<compile_context>
chip_gen: v5e
topology: v5e:2x2
jax: 0.10.0
libtpu: 0.0.40
codegen_flags: <defaults>
</compile_context>

<pallas_src>
import functools
import math

import jax
import jax.numpy as jnp
import numpy as np
from jax.experimental import pallas as pl
from jax.experimental.pallas import tpu as pltpu

BN_EPS = 1e-5
COMPUTE_DTYPE = jnp.bfloat16        # MXU operand dtype (accumulate in f32)
ACT_DTYPE = jnp.bfloat16            # dtype of activations between layers
# Conservative VMEM budget for tile sizing: v7x has 64 MiB physical
# (32 MiB default scoped) per TensorCore; v5e/v6e have 128 MiB.
VMEM_BUDGET_BYTES = 24 * 1024 * 1024


# ---------------------------- Pallas kernels ----------------------------

def _gemm_shift_kernel(x_ref, w_ref, b_ref, o_ref, *, relu):
    """out = relu?(x @ w + shift); BN scale already folded into w."""
    acc = jnp.dot(x_ref[...], w_ref[...], preferred_element_type=jnp.float32)
    acc = acc + b_ref[...]
    if relu:
        acc = jnp.maximum(acc, 0.0)
    o_ref[...] = acc.astype(o_ref.dtype)


def _conv3x3_kernel(*refs, taps, oh, ow, cout, stride, relu,
                    num_planes, has_residual):
    """Fused 3x3 conv: in-kernel im2col (tap loop) + shift + residual + ReLU.

    refs = (*plane_refs, w_ref, b_ref, [r_ref], o_ref)
      plane_refs[p]: (1, Hp, Wp_p, Cin)  column-parity planes of the padded
                     image (1 plane for stride 1, 2 planes for stride 2), bf16
      w_ref:         (KH*KW, Cin, Cout)  per-tap weights, BN scale folded, bf16
      b_ref:         (1, Cout)           f32 shift (BN beta / conv bias)
      r_ref:         (1, OH, OW, Cout)   optional residual
      o_ref:         (1, OH, OW, Cout)
    """
    plane_refs = refs[:num_planes]
    w_ref = refs[num_planes]
    b_ref = refs[num_planes + 1]
    r_ref = refs[num_planes + 2] if has_residual else None
    o_ref = refs[-1]

    shift = b_ref[...]                                  # (1, cout) f32
    w_taps = [w_ref[t] for t in range(len(taps))]       # hoisted (cin, cout)

    def row_body(y, carry):
        acc = jnp.zeros((ow, cout), jnp.float32)
        for t, (di, p, cj) in enumerate(taps):
            # One output row's worth of inputs for this tap: (ow, cin).
            row = plane_refs[p][0, stride * y + di, pl.ds(cj, ow), :]
            acc = acc + jnp.dot(row, w_taps[t],
                                preferred_element_type=jnp.float32)
        acc = acc + shift
        if has_residual:
            acc = acc + r_ref[0, y].astype(jnp.float32)
        if relu:
            acc = jnp.maximum(acc, 0.0)
        o_ref[0, y] = acc.astype(o_ref.dtype)
        return carry

    jax.lax.fori_loop(0, oh, row_body, 0)


# ------------------------------ wrappers ------------------------------

def _pick_tile_m(m, k, o):
    """Largest M tile that divides m (no pad copy), fits the VMEM budget
    (double-buffered bf16 LHS + f32-worst-case output), and keeps >=2 grid
    steps when possible (v7x has 2 TensorCores)."""
    best = None
    for tm in (2048, 1024, 512, 256, 128, 64, 32, 16, 8):
        if tm > m or m % tm:
            continue
        vmem = 2 * tm * k * 2 + 2 * tm * o * 4 + k * o * 2
        if vmem > VMEM_BUDGET_BYTES:
            continue
        if best is None:
            best = tm
        if m // tm >= 2:
            return tm
    return best if best is not None else m


def pallas_conv1x1(x, w, scale, shift, stride, relu, out_dtype):
    """1x1 conv (+ folded BN scale) + shift + optional ReLU as a flat GEMM."""
    if stride > 1:
        x = x[:, ::stride, ::stride, :]
    n, h, wd, cin = x.shape
    o = w.shape[0]
    m = n * h * wd
    lhs = x.reshape(m, cin).astype(COMPUTE_DTYPE)
    w2d = (w[:, :, 0, 0].T * scale[None, :]).astype(COMPUTE_DTYPE)  # (cin, o)
    shift2 = shift.reshape(1, o).astype(jnp.float32)
    tm = _pick_tile_m(m, cin, o)

    out = pl.pallas_call(
        functools.partial(_gemm_shift_kernel, relu=relu),
        out_shape=jax.ShapeDtypeStruct((m, o), out_dtype),
        grid=(m // tm,),
        in_specs=[
            pl.BlockSpec((tm, cin), lambda i: (i, 0)),
            pl.BlockSpec((cin, o), lambda i: (0, 0)),
            pl.BlockSpec((1, o), lambda i: (0, 0)),
        ],
        out_specs=pl.BlockSpec((tm, o), lambda i: (i, 0)),
        compiler_params=pltpu.CompilerParams(
            dimension_semantics=("parallel",)),
    )(lhs, w2d, shift2)
    return out.reshape(n, h, wd, o)


def pallas_conv3x3(x, w, scale, shift, stride, relu, residual, out_dtype):
    """3x3 conv (pad=1) + folded BN + optional residual + optional ReLU.

    Grid is over the batch: each grid step keeps one halo-padded image in VMEM
    and runs the im2col tap loop in-kernel (no HBM patch tensor)."""
    n, h, wd, cin = x.shape
    o, _, kh, kw = w.shape
    pad = kh // 2
    oh = (h + 2 * pad - kh) // stride + 1
    ow = (wd + 2 * pad - kw) // stride + 1

    # Halo pad is a cheap (~1.1x activation) wrapper op; the 9x patch tensor
    # and the pad-to-tile copies of the previous version are gone.
    xp = jnp.pad(x, ((0, 0), (pad, pad), (pad, pad), (0, 0))).astype(COMPUTE_DTYPE)
    if stride == 1:
        planes = [xp]
        taps = tuple((di, 0, dj) for di in range(kh) for dj in range(kw))
    else:  # stride == 2: split by column parity -> no strided loads in-kernel
        planes = [xp[:, :, 0::2, :], xp[:, :, 1::2, :]]
        taps = tuple((di, dj % 2, dj // 2)
                     for di in range(kh) for dj in range(kw))

    # Per-tap weights with the BN scale folded in, (KH*KW, Cin, Cout) bf16.
    w_taps = jnp.stack(
        [w[:, :, di, dj].T * scale[None, :]
         for di in range(kh) for dj in range(kw)],
        axis=0).astype(COMPUTE_DTYPE)
    shift2 = shift.reshape(1, o).astype(jnp.float32)

    args, in_specs = [], []
    for pln in planes:
        args.append(pln)
        in_specs.append(
            pl.BlockSpec((1,) + pln.shape[1:], lambda b: (b, 0, 0, 0)))
    args.append(w_taps)
    in_specs.append(pl.BlockSpec(w_taps.shape, lambda b: (0, 0, 0)))
    args.append(shift2)
    in_specs.append(pl.BlockSpec((1, o), lambda b: (0, 0)))
    has_res = residual is not None
    if has_res:
        args.append(residual)
        in_specs.append(pl.BlockSpec((1, oh, ow, o), lambda b: (b, 0, 0, 0)))

    kernel = functools.partial(
        _conv3x3_kernel, taps=taps, oh=oh, ow=ow, cout=o, stride=stride,
        relu=relu, num_planes=len(planes), has_residual=has_res)

    return pl.pallas_call(
        kernel,
        out_shape=jax.ShapeDtypeStruct((n, oh, ow, o), out_dtype),
        grid=(n,),
        in_specs=in_specs,
        out_specs=pl.BlockSpec((1, oh, ow, o), lambda b: (b, 0, 0, 0)),
        compiler_params=pltpu.CompilerParams(
            dimension_semantics=("parallel",)),
    )(*args)


# ---------------------- pure-JAX reference (for check) ----------------------

def ref_conv1x1(x, w, scale, shift, stride, relu, out_dtype):
    if stride > 1:
        x = x[:, ::stride, ::stride, :]
    n, h, wd, cin = x.shape
    o = w.shape[0]
    w2d = (w[:, :, 0, 0].T * scale[None, :]).astype(COMPUTE_DTYPE)
    y = jnp.dot(x.reshape(-1, cin).astype(COMPUTE_DTYPE), w2d,
                preferred_element_type=jnp.float32)
    y = y + shift.astype(jnp.float32)
    if relu:
        y = jnp.maximum(y, 0.0)
    return y.reshape(n, h, wd, o).astype(out_dtype)


def ref_conv3x3(x, w, scale, shift, stride, relu, residual, out_dtype):
    w_hwio = (jnp.transpose(w, (2, 3, 1, 0)) * scale).astype(COMPUTE_DTYPE)
    y = jax.lax.conv_general_dilated(
        x.astype(COMPUTE_DTYPE), w_hwio, (stride, stride), [(1, 1), (1, 1)],
        dimension_numbers=('NHWC', 'HWIO', 'NHWC'),
        preferred_element_type=jnp.float32)
    y = y + shift.astype(jnp.float32)
    if residual is not None:
        y = y + residual.astype(jnp.float32)
    if relu:
        y = jnp.maximum(y, 0.0)
    return y.astype(out_dtype)


# ------------------------------ model logic ------------------------------

def _kaiming(key, o, i, kh, kw):
    # nn.init.kaiming_normal_(mode='fan_out', nonlinearity='relu')
    std = math.sqrt(2.0 / (o * kh * kw))
    return jax.random.normal(key, (o, i, kh, kw), jnp.float32) * std


def init_backbone_params(key, in_channels=1, base_channels=8,
                         output_channels=32, num_blocks=(2, 2, 2)):
    # BN init: weight=1, bias=0, running_mean=0, running_var=1 (eval mode),
    # folded into per-channel scale / shift.
    bn_scale = lambda c: jnp.full((c,), 1.0 / math.sqrt(1.0 + BN_EPS), jnp.float32)
    bn_shift = lambda c: jnp.zeros((c,), jnp.float32)
    keys = iter(jax.random.split(key, 64))

    params = {'init': dict(w=_kaiming(next(keys), base_channels, in_channels, 3, 3),
                           s=bn_scale(base_channels), b=bn_shift(base_channels))}
    stages = []
    cin = base_channels
    for si, nb in enumerate(num_blocks):
        cout = base_channels * (2 ** (si + 1))
        blocks = []
        for bi in range(nb):
            stride = 2 if bi == 0 else 1
            blk = dict(stride=stride,
                       w1=_kaiming(next(keys), cout, cin, 3, 3),
                       s1=bn_scale(cout), b1=bn_shift(cout),
                       w2=_kaiming(next(keys), cout, cout, 3, 3),
                       s2=bn_scale(cout), b2=bn_shift(cout))
            if stride != 1 or cin != cout:
                blk['ws'] = _kaiming(next(keys), cout, cin, 1, 1)
                blk['ss'] = bn_scale(cout)
                blk['bs'] = bn_shift(cout)
            blocks.append(blk)
            cin = cout
        stages.append(blocks)
    params['stages'] = stages
    # proj: Conv2d(base*8, output_channels, 1) with bias (bias init to zeros).
    params['proj'] = dict(w=_kaiming(next(keys), output_channels, cin, 1, 1),
                          s=jnp.ones((output_channels,), jnp.float32),
                          b=jnp.zeros((output_channels,), jnp.float32))
    return params


def backbone_forward(params, x_nchw, conv3x3, conv1x1):
    x = jnp.transpose(x_nchw, (0, 2, 3, 1)).astype(jnp.float32)   # NCHW -> NHWC
    p = params['init']
    x = conv3x3(x, p['w'], p['s'], p['b'], 1, True, None, ACT_DTYPE)
    for stage in params['stages']:
        for blk in stage:
            y = conv3x3(x, blk['w1'], blk['s1'], blk['b1'],
                        blk['stride'], True, None, ACT_DTYPE)
            if 'ws' in blk:
                identity = conv1x1(x, blk['ws'], blk['ss'], blk['bs'],
                                   blk['stride'], False, ACT_DTYPE)
            else:
                identity = x
            x = conv3x3(y, blk['w2'], blk['s2'], blk['b2'],
                        1, True, identity, ACT_DTYPE)
    p = params['proj']
    x = conv1x1(x, p['w'], p['s'], p['b'], 1, False, jnp.float32)
    return jnp.transpose(x, (0, 3, 1, 2))                          # NHWC -> NCHW


if __name__ == "__main__":
    key = jax.random.PRNGKey(0)
    pkey, xkey = jax.random.split(key)

    # Small, module-consistent configuration: in_channels=1, base_channels=8,
    # output_channels=32, num_blocks=(2, 2, 2); input NCHW (2, 1, 16, 16).
    params = init_backbone_params(pkey, in_channels=1, base_channels=8,
                                  output_channels=32, num_blocks=(2, 2, 2))
    x = jax.random.normal(xkey, (2, 1, 16, 16), jnp.float32)

    pallas_fwd = jax.jit(lambda inp: backbone_forward(
        params, inp, pallas_conv3x3, pallas_conv1x1))
    ref_fwd = jax.jit(lambda inp: backbone_forward(
        params, inp, ref_conv3x3, ref_conv1x1))

    out = jax.block_until_ready(pallas_fwd(x))
    assert out.shape == (2, 32, 2, 2), out.shape

    ref = jax.block_until_ready(ref_fwd(x))
    # Both paths use identical bf16 operand quantization with f32 accumulation;
    # tolerance covers rare 1-ulp bf16 re-rounding differences.
    np.testing.assert_allclose(np.asarray(out), np.asarray(ref),
                               rtol=2e-2, atol=2e-2)
    print("KERNEL_OK")
</pallas_src>

<mosaic_0001>
module attributes {stable_mosaic.version = 11 : i64} {
  func.func @_conv3x3_kernel(%arg0: i32, %arg1: memref<1x18x18x1xbf16, #tpu.memory_space<vmem>>, %arg2: memref<9x1x8xbf16, #tpu.memory_space<vmem>>, %arg3: memref<1x8xf32, #tpu.memory_space<vmem>>, %arg4: memref<1x16x16x8xbf16, #tpu.memory_space<vmem>>) attributes {dimension_semantics = [#tpu.dimension_semantics<parallel>], iteration_bounds = array<i64: 2>, scalar_prefetch = 0 : i64, scratch_operands = 0 : i64, tpu.core_type = #tpu.core_type<tc>, window_params = [{transform_indices = @transform_0, window_bounds = array<i64: 1, 18, 18, 1>}, {pipeline_mode = #tpu.pipeline_mode<synchronous>, transform_indices = @transform_1, window_bounds = array<i64: 9, 1, 8>}, {pipeline_mode = #tpu.pipeline_mode<synchronous>, transform_indices = @transform_2, window_bounds = array<i64: 1, 8>}, {transform_indices = @transform_3, window_bounds = array<i64: 1, 16, 16, 8>}]} {
    %c0 = arith.constant 0 : index
    %c0_0 = arith.constant 0 : index
    %0 = vector.load %arg3[%c0, %c0_0] : memref<1x8xf32, #tpu.memory_space<vmem>>, vector<1x8xf32>
    %c0_1 = arith.constant 0 : index
    %c0_2 = arith.constant 0 : index
    %c0_3 = arith.constant 0 : index
    %1 = vector.load %arg2[%c0_1, %c0_2, %c0_3] : memref<9x1x8xbf16, #tpu.memory_space<vmem>>, vector<1x1x8xbf16>
    %2 = vector.shape_cast %1 : vector<1x1x8xbf16> to vector<1x8xbf16>
    %c1 = arith.constant 1 : index
    %c0_4 = arith.constant 0 : index
    %c0_5 = arith.constant 0 : index
    %3 = vector.load %arg2[%c1, %c0_4, %c0_5] : memref<9x1x8xbf16, #tpu.memory_space<vmem>>, vector<1x1x8xbf16>
    %4 = vector.shape_cast %3 : vector<1x1x8xbf16> to vector<1x8xbf16>
    %c2 = arith.constant 2 : index
    %c0_6 = arith.constant 0 : index
    %c0_7 = arith.constant 0 : index
    %5 = vector.load %arg2[%c2, %c0_6, %c0_7] : memref<9x1x8xbf16, #tpu.memory_space<vmem>>, vector<1x1x8xbf16>
    %6 = vector.shape_cast %5 : vector<1x1x8xbf16> to vector<1x8xbf16>
    %c3 = arith.constant 3 : index
    %c0_8 = arith.constant 0 : index
    %c0_9 = arith.constant 0 : index
    %7 = vector.load %arg2[%c3, %c0_8, %c0_9] : memref<9x1x8xbf16, #tpu.memory_space<vmem>>, vector<1x1x8xbf16>
    %8 = vector.shape_cast %7 : vector<1x1x8xbf16> to vector<1x8xbf16>
    %c4 = arith.constant 4 : index
    %c0_10 = arith.constant 0 : index
    %c0_11 = arith.constant 0 : index
    %9 = vector.load %arg2[%c4, %c0_10, %c0_11] : memref<9x1x8xbf16, #tpu.memory_space<vmem>>, vector<1x1x8xbf16>
    %10 = vector.shape_cast %9 : vector<1x1x8xbf16> to vector<1x8xbf16>
    %c5 = arith.constant 5 : index
    %c0_12 = arith.constant 0 : index
    %c0_13 = arith.constant 0 : index
    %11 = vector.load %arg2[%c5, %c0_12, %c0_13] : memref<9x1x8xbf16, #tpu.memory_space<vmem>>, vector<1x1x8xbf16>
    %12 = vector.shape_cast %11 : vector<1x1x8xbf16> to vector<1x8xbf16>
    %c6 = arith.constant 6 : index
    %c0_14 = arith.constant 0 : index
    %c0_15 = arith.constant 0 : index
    %13 = vector.load %arg2[%c6, %c0_14, %c0_15] : memref<9x1x8xbf16, #tpu.memory_space<vmem>>, vector<1x1x8xbf16>
    %14 = vector.shape_cast %13 : vector<1x1x8xbf16> to vector<1x8xbf16>
    %c7 = arith.constant 7 : index
    %c0_16 = arith.constant 0 : index
    %c0_17 = arith.constant 0 : index
    %15 = vector.load %arg2[%c7, %c0_16, %c0_17] : memref<9x1x8xbf16, #tpu.memory_space<vmem>>, vector<1x1x8xbf16>
    %16 = vector.shape_cast %15 : vector<1x1x8xbf16> to vector<1x8xbf16>
    %c8 = arith.constant 8 : index
    %c0_18 = arith.constant 0 : index
    %c0_19 = arith.constant 0 : index
    %17 = vector.load %arg2[%c8, %c0_18, %c0_19] : memref<9x1x8xbf16, #tpu.memory_space<vmem>>, vector<1x1x8xbf16>
    %18 = vector.shape_cast %17 : vector<1x1x8xbf16> to vector<1x8xbf16>
    %c0_i32 = arith.constant 0 : i32
    %c16_i32 = arith.constant 16 : i32
    %19 = arith.addi %c0_i32, %c16_i32 : i32
    %c1_i32 = arith.constant 1 : i32
    scf.for %arg5 = %c0_i32 to %19 step %c1_i32  : i32 {
      %cst = arith.constant 0.000000e+00 : f32
      %20 = vector.broadcast %cst : f32 to vector<16x8xf32>
      %c1_i32_21 = arith.constant 1 : i32
      %21 = arith.muli %c1_i32_21, %arg5 : i32
      %c0_i32_22 = arith.constant 0 : i32
      %22 = arith.addi %21, %c0_i32_22 : i32
      %c0_23 = arith.constant 0 : index
      %23 = arith.index_cast %22 : i32 to index
      %c0_24 = arith.constant 0 : index
      %c0_25 = arith.constant 0 : index
      %24 = vector.load %arg1[%c0_23, %23, %c0_24, %c0_25] : memref<1x18x18x1xbf16, #tpu.memory_space<vmem>>, vector<1x1x16x1xbf16>
      %25 = vector.shape_cast %24 : vector<1x1x16x1xbf16> to vector<16x1xbf16>
      %cst_26 = arith.constant dense<0.000000e+00> : vector<16x8xf32>
      %26 = tpu.matmul %25, %2, %cst_26 {dimension_numbers = #tpu.dot_dimension_numbers<[1], [0], [0], [1], [0, 0, 1, 1], [], []>} : vector<16x1xbf16>, vector<1x8xbf16>, vector<16x8xf32> -> vector<16x8xf32>
      %27 = arith.addf %20, %26 : vector<16x8xf32>
      %c1_i32_27 = arith.constant 1 : i32
      %28 = arith.muli %c1_i32_27, %arg5 : i32
      %c0_i32_28 = arith.constant 0 : i32
      %29 = arith.addi %28, %c0_i32_28 : i32
      %c0_29 = arith.constant 0 : index
      %30 = arith.index_cast %29 : i32 to index
      %c1_30 = arith.constant 1 : index
      %c0_31 = arith.constant 0 : index
      %31 = vector.load %arg1[%c0_29, %30, %c1_30, %c0_31] : memref<1x18x18x1xbf16, #tpu.memory_space<vmem>>, vector<1x1x16x1xbf16>
      %32 = vector.shape_cast %31 : vector<1x1x16x1xbf16> to vector<16x1xbf16>
      %cst_32 = arith.constant dense<0.000000e+00> : vector<16x8xf32>
      %33 = tpu.matmul %32, %4, %cst_32 {dimension_numbers = #tpu.dot_dimension_numbers<[1], [0], [0], [1], [0, 0, 1, 1], [], []>} : vector<16x1xbf16>, vector<1x8xbf16>, vector<16x8xf32> -> vector<16x8xf32>
      %34 = arith.addf %27, %33 : vector<16x8xf32>
      %c1_i32_33 = arith.constant 1 : i32
      %35 = arith.muli %c1_i32_33, %arg5 : i32
      %c0_i32_34 = arith.constant 0 : i32
      %36 = arith.addi %35, %c0_i32_34 : i32
      %c0_35 = arith.constant 0 : index
      %37 = arith.index_cast %36 : i32 to index
      %c2_36 = arith.constant 2 : index
      %c0_37 = arith.constant 0 : index
      %38 = vector.load %arg1[%c0_35, %37, %c2_36, %c0_37] : memref<1x18x18x1xbf16, #tpu.memory_space<vmem>>, vector<1x1x16x1xbf16>
      %39 = vector.shape_cast %38 : vector<1x1x16x1xbf16> to vector<16x1xbf16>
      %cst_38 = arith.constant dense<0.000000e+00> : vector<16x8xf32>
      %40 = tpu.matmul %39, %6, %cst_38 {dimension_numbers = #tpu.dot_dimension_numbers<[1], [0], [0], [1], [0, 0, 1, 1], [], []>} : vector<16x1xbf16>, vector<1x8xbf16>, vector<16x8xf32> -> vector<16x8xf32>
      %41 = arith.addf %34, %40 : vector<16x8xf32>
      %c1_i32_39 = arith.constant 1 : i32
      %42 = arith.muli %c1_i32_39, %arg5 : i32
      %c1_i32_40 = arith.constant 1 : i32
      %43 = arith.addi %42, %c1_i32_40 : i32
      %c0_41 = arith.constant 0 : index
      %44 = arith.index_cast %43 : i32 to index
      %c0_42 = arith.constant 0 : index
      %c0_43 = arith.constant 0 : index
      %45 = vector.load %arg1[%c0_41, %44, %c0_42, %c0_43] : memref<1x18x18x1xbf16, #tpu.memory_space<vmem>>, vector<1x1x16x1xbf16>
      %46 = vector.shape_cast %45 : vector<1x1x16x1xbf16> to vector<16x1xbf16>
      %cst_44 = arith.constant dense<0.000000e+00> : vector<16x8xf32>
      %47 = tpu.matmul %46, %8, %cst_44 {dimension_numbers = #tpu.dot_dimension_numbers<[1], [0], [0], [1], [0, 0, 1, 1], [], []>} : vector<16x1xbf16>, vector<1x8xbf16>, vector<16x8xf32> -> vector<16x8xf32>
      %48 = arith.addf %41, %47 : vector<16x8xf32>
      %c1_i32_45 = arith.constant 1 : i32
      %49 = arith.muli %c1_i32_45, %arg5 : i32
      %c1_i32_46 = arith.constant 1 : i32
      %50 = arith.addi %49, %c1_i32_46 : i32
      %c0_47 = arith.constant 0 : index
      %51 = arith.index_cast %50 : i32 to index
      %c1_48 = arith.constant 1 : index
      %c0_49 = arith.constant 0 : index
      %52 = vector.load %arg1[%c0_47, %51, %c1_48, %c0_49] : memref<1x18x18x1xbf16, #tpu.memory_space<vmem>>, vector<1x1x16x1xbf16>
      %53 = vector.shape_cast %52 : vector<1x1x16x1xbf16> to vector<16x1xbf16>
      %cst_50 = arith.constant dense<0.000000e+00> : vector<16x8xf32>
      %54 = tpu.matmul %53, %10, %cst_50 {dimension_numbers = #tpu.dot_dimension_numbers<[1], [0], [0], [1], [0, 0, 1, 1], [], []>} : vector<16x1xbf16>, vector<1x8xbf16>, vector<16x8xf32> -> vector<16x8xf32>
      %55 = arith.addf %48, %54 : vector<16x8xf32>
      %c1_i32_51 = arith.constant 1 : i32
      %56 = arith.muli %c1_i32_51, %arg5 : i32
      %c1_i32_52 = arith.constant 1 : i32
      %57 = arith.addi %56, %c1_i32_52 : i32
      %c0_53 = arith.constant 0 : index
      %58 = arith.index_cast %57 : i32 to index
      %c2_54 = arith.constant 2 : index
      %c0_55 = arith.constant 0 : index
      %59 = vector.load %arg1[%c0_53, %58, %c2_54, %c0_55] : memref<1x18x18x1xbf16, #tpu.memory_space<vmem>>, vector<1x1x16x1xbf16>
      %60 = vector.shape_cast %59 : vector<1x1x16x1xbf16> to vector<16x1xbf16>
      %cst_56 = arith.constant dense<0.000000e+00> : vector<16x8xf32>
      %61 = tpu.matmul %60, %12, %cst_56 {dimension_numbers = #tpu.dot_dimension_numbers<[1], [0], [0], [1], [0, 0, 1, 1], [], []>} : vector<16x1xbf16>, vector<1x8xbf16>, vector<16x8xf32> -> vector<16x8xf32>
      %62 = arith.addf %55, %61 : vector<16x8xf32>
      %c1_i32_57 = arith.constant 1 : i32
      %63 = arith.muli %c1_i32_57, %arg5 : i32
      %c2_i32 = arith.constant 2 : i32
      %64 = arith.addi %63, %c2_i32 : i32
      %c0_58 = arith.constant 0 : index
      %65 = arith.index_cast %64 : i32 to index
      %c0_59 = arith.constant 0 : index
      %c0_60 = arith.constant 0 : index
      %66 = vector.load %arg1[%c0_58, %65, %c0_59, %c0_60] : memref<1x18x18x1xbf16, #tpu.memory_space<vmem>>, vector<1x1x16x1xbf16>
      %67 = vector.shape_cast %66 : vector<1x1x16x1xbf16> to vector<16x1xbf16>
      %cst_61 = arith.constant dense<0.000000e+00> : vector<16x8xf32>
      %68 = tpu.matmul %67, %14, %cst_61 {dimension_numbers = #tpu.dot_dimension_numbers<[1], [0], [0], [1], [0, 0, 1, 1], [], []>} : vector<16x1xbf16>, vector<1x8xbf16>, vector<16x8xf32> -> vector<16x8xf32>
      %69 = arith.addf %62, %68 : vector<16x8xf32>
      %c1_i32_62 = arith.constant 1 : i32
      %70 = arith.muli %c1_i32_62, %arg5 : i32
      %c2_i32_63 = arith.constant 2 : i32
      %71 = arith.addi %70, %c2_i32_63 : i32
      %c0_64 = arith.constant 0 : index
      %72 = arith.index_cast %71 : i32 to index
      %c1_65 = arith.constant 1 : index
      %c0_66 = arith.constant 0 : index
      %73 = vector.load %arg1[%c0_64, %72, %c1_65, %c0_66] : memref<1x18x18x1xbf16, #tpu.memory_space<vmem>>, vector<1x1x16x1xbf16>
      %74 = vector.shape_cast %73 : vector<1x1x16x1xbf16> to vector<16x1xbf16>
      %cst_67 = arith.constant dense<0.000000e+00> : vector<16x8xf32>
      %75 = tpu.matmul %74, %16, %cst_67 {dimension_numbers = #tpu.dot_dimension_numbers<[1], [0], [0], [1], [0, 0, 1, 1], [], []>} : vector<16x1xbf16>, vector<1x8xbf16>, vector<16x8xf32> -> vector<16x8xf32>
      %76 = arith.addf %69, %75 : vector<16x8xf32>
      %c1_i32_68 = arith.constant 1 : i32
      %77 = arith.muli %c1_i32_68, %arg5 : i32
      %c2_i32_69 = arith.constant 2 : i32
      %78 = arith.addi %77, %c2_i32_69 : i32
      %c0_70 = arith.constant 0 : index
      %79 = arith.index_cast %78 : i32 to index
      %c2_71 = arith.constant 2 : index
      %c0_72 = arith.constant 0 : index
      %80 = vector.load %arg1[%c0_70, %79, %c2_71, %c0_72] : memref<1x18x18x1xbf16, #tpu.memory_space<vmem>>, vector<1x1x16x1xbf16>
      %81 = vector.shape_cast %80 : vector<1x1x16x1xbf16> to vector<16x1xbf16>
      %cst_73 = arith.constant dense<0.000000e+00> : vector<16x8xf32>
      %82 = tpu.matmul %81, %18, %cst_73 {dimension_numbers = #tpu.dot_dimension_numbers<[1], [0], [0], [1], [0, 0, 1, 1], [], []>} : vector<16x1xbf16>, vector<1x8xbf16>, vector<16x8xf32> -> vector<16x8xf32>
      %83 = arith.addf %76, %82 : vector<16x8xf32>
      %84 = vector.broadcast %0 : vector<1x8xf32> to vector<16x8xf32>
      %85 = arith.addf %83, %84 : vector<16x8xf32>
      %cst_74 = arith.constant 0.000000e+00 : f32
      %86 = vector.broadcast %cst_74 : f32 to vector<16x8xf32>
      %87 = arith.maximumf %85, %86 : vector<16x8xf32>
      %88 = arith.truncf %87 : vector<16x8xf32> to vector<16x8xbf16>
      %c0_75 = arith.constant 0 : index
      %89 = arith.index_cast %arg5 : i32 to index
      %c0_76 = arith.constant 0 : index
      %c0_77 = arith.constant 0 : index
      %90 = vector.load %arg4[%c0_75, %89, %c0_76, %c0_77] : memref<1x16x16x8xbf16, #tpu.memory_space<vmem>>, vector<1x1x16x8xbf16>
      %91 = vector.shape_cast %90 : vector<1x1x16x8xbf16> to vector<16x8xbf16>
      %92 = vector.shape_cast %88 : vector<16x8xbf16> to vector<1x1x16x8xbf16>
      tpu.vector_store %arg4[%c0_75, %89, %c0_76, %c0_77], %92 {strides = array<i32>} : memref<1x16x16x8xbf16, #tpu.memory_space<vmem>>, vector<1x1x16x8xbf16>,
    }
    %c16_i32_20 = arith.constant 16 : i32
    return
  }
  func.func @transform_0(%arg0: i32) -> (i32, i32, i32, i32) {
    %c0_i32 = arith.constant 0 : i32
    %c0_i32_0 = arith.constant 0 : i32
    %c0_i32_1 = arith.constant 0 : i32
    %c0_i32_2 = arith.constant 0 : i32
    return %arg0, %c0_i32, %c0_i32_0, %c0_i32_1 : i32, i32, i32, i32
  }
  func.func @transform_1(%arg0: i32) -> (i32, i32, i32) {
    %c0_i32 = arith.constant 0 : i32
    %c0_i32_0 = arith.constant 0 : i32
    %c0_i32_1 = arith.constant 0 : i32
    %c0_i32_2 = arith.constant 0 : i32
    return %c0_i32, %c0_i32_0, %c0_i32_1 : i32, i32, i32
  }
  func.func @transform_2(%arg0: i32) -> (i32, i32) {
    %c0_i32 = arith.constant 0 : i32
    %c0_i32_0 = arith.constant 0 : i32
    %c0_i32_1 = arith.constant 0 : i32
    return %c0_i32, %c0_i32_0 : i32, i32
  }
  func.func @transform_3(%arg0: i32) -> (i32, i32, i32, i32) {
    %c0_i32 = arith.constant 0 : i32
    %c0_i32_0 = arith.constant 0 : i32
    %c0_i32_1 = arith.constant 0 : i32
    %c0_i32_2 = arith.constant 0 : i32
    return %arg0, %c0_i32, %c0_i32_0, %c0_i32_1 : i32, i32, i32, i32
  }
}

module attributes {stable_mosaic.version = 11 : i64} {
  func.func @_gemm_shift_kernel(%arg0: i32, %arg1: memref<64x8xbf16, #tpu.memory_space<vmem>>, %arg2: memref<8x16xbf16, #tpu.memory_space<vmem>>, %arg3: memref<1x16xf32, #tpu.memory_space<vmem>>, %arg4: memref<64x16xbf16, #tpu.memory_space<vmem>>) attributes {dimension_semantics = [#tpu.dimension_semantics<parallel>], iteration_bounds = array<i64: 2>, scalar_prefetch = 0 : i64, scratch_operands = 0 : i64, tpu.core_type = #tpu.core_type<tc>, window_params = [{transform_indices = @transform_0, window_bounds = array<i64: 64, 8>}, {pipeline_mode = #tpu.pipeline_mode<synchronous>, transform_indices = @transform_1, window_bounds = array<i64: 8, 16>}, {pipeline_mode = #tpu.pipeline_mode<synchronous>, transform_indices = @transform_2, window_bounds = array<i64: 1, 16>}, {transform_indices = @transform_3, window_bounds = array<i64: 64, 16>}]} {
    %c0 = arith.constant 0 : index
    %c0_0 = arith.constant 0 : index
    %0 = vector.load %arg1[%c0, %c0_0] : memref<64x8xbf16, #tpu.memory_space<vmem>>, vector<64x8xbf16>
    %c0_1 = arith.constant 0 : index
    %c0_2 = arith.constant 0 : index
    %1 = vector.load %arg2[%c0_1, %c0_2] : memref<8x16xbf16, #tpu.memory_space<vmem>>, vector<8x16xbf16>
    %cst = arith.constant dense<0.000000e+00> : vector<64x16xf32>
    %2 = tpu.matmul %0, %1, %cst {dimension_numbers = #tpu.dot_dimension_numbers<[1], [0], [0], [1], [0, 0, 1, 1], [], []>} : vector<64x8xbf16>, vector<8x16xbf16>, vector<64x16xf32> -> vector<64x16xf32>
    %c0_3 = arith.constant 0 : index
    %c0_4 = arith.constant 0 : index
    %3 = vector.load %arg3[%c0_3, %c0_4] : memref<1x16xf32, #tpu.memory_space<vmem>>, vector<1x16xf32>
    %4 = vector.broadcast %3 : vector<1x16xf32> to vector<64x16xf32>
    %5 = arith.addf %2, %4 : vector<64x16xf32>
    %6 = arith.truncf %5 : vector<64x16xf32> to vector<64x16xbf16>
    %c0_5 = arith.constant 0 : index
    %c0_6 = arith.constant 0 : index
    %7 = vector.load %arg4[%c0_5, %c0_6] : memref<64x16xbf16, #tpu.memory_space<vmem>>, vector<64x16xbf16>
    tpu.vector_store %arg4[%c0_5, %c0_6], %6 {strides = array<i32>} : memref<64x16xbf16, #tpu.memory_space<vmem>>, vector<64x16xbf16>,
    return
  }
  func.func @transform_0(%arg0: i32) -> (i32, i32) {
    %c0_i32 = arith.constant 0 : i32
    %c0_i32_0 = arith.constant 0 : i32
    return %arg0, %c0_i32 : i32, i32
  }
  func.func @transform_1(%arg0: i32) -> (i32, i32) {
    %c0_i32 = arith.constant 0 : i32
    %c0_i32_0 = arith.constant 0 : i32
    %c0_i32_1 = arith.constant 0 : i32
    return %c0_i32, %c0_i32_0 : i32, i32
  }
  func.func @transform_2(%arg0: i32) -> (i32, i32) {
    %c0_i32 = arith.constant 0 : i32
    %c0_i32_0 = arith.constant 0 : i32
    %c0_i32_1 = arith.constant 0 : i32
    return %c0_i32, %c0_i32_0 : i32, i32
  }
  func.func @transform_3(%arg0: i32) -> (i32, i32) {
    %c0_i32 = arith.constant 0 : i32
    %c0_i32_0 = arith.constant 0 : i32
    return %arg0, %c0_i32 : i32, i32
  }
}

module attributes {stable_mosaic.version = 11 : i64} {
  func.func @_conv3x3_kernel(%arg0: i32, %arg1: memref<1x10x10x16xbf16, #tpu.memory_space<vmem>>, %arg2: memref<9x16x16xbf16, #tpu.memory_space<vmem>>, %arg3: memref<1x16xf32, #tpu.memory_space<vmem>>, %arg4: memref<1x8x8x16xbf16, #tpu.memory_space<vmem>>) attributes {dimension_semantics = [#tpu.dimension_semantics<parallel>], iteration_bounds = array<i64: 2>, scalar_prefetch = 0 : i64, scratch_operands = 0 : i64, tpu.core_type = #tpu.core_type<tc>, window_params = [{transform_indices = @transform_0, window_bounds = array<i64: 1, 10, 10, 16>}, {pipeline_mode = #tpu.pipeline_mode<synchronous>, transform_indices = @transform_1, window_bounds = array<i64: 9, 16, 16>}, {pipeline_mode = #tpu.pipeline_mode<synchronous>, transform_indices = @transform_2, window_bounds = array<i64: 1, 16>}, {transform_indices = @transform_3, window_bounds = array<i64: 1, 8, 8, 16>}]} {
    %c0 = arith.constant 0 : index
    %c0_0 = arith.constant 0 : index
    %0 = vector.load %arg3[%c0, %c0_0] : memref<1x16xf32, #tpu.memory_space<vmem>>, vector<1x16xf32>
    %c0_1 = arith.constant 0 : index
    %c0_2 = arith.constant 0 : index
    %c0_3 = arith.constant 0 : index
    %1 = vector.load %arg2[%c0_1, %c0_2, %c0_3] : memref<9x16x16xbf16, #tpu.memory_space<vmem>>, vector<1x16x16xbf16>
    %2 = vector.shape_cast %1 : vector<1x16x16xbf16> to vector<16x16xbf16>
    %c1 = arith.constant 1 : index
    %c0_4 = arith.constant 0 : index
    %c0_5 = arith.constant 0 : index
    %3 = vector.load %arg2[%c1, %c0_4, %c0_5] : memref<9x16x16xbf16, #tpu.memory_space<vmem>>, vector<1x16x16xbf16>
    %4 = vector.shape_cast %3 : vector<1x16x16xbf16> to vector<16x16xbf16>
    %c2 = arith.constant 2 : index
    %c0_6 = arith.constant 0 : index
    %c0_7 = arith.constant 0 : index
    %5 = vector.load %arg2[%c2, %c0_6, %c0_7] : memref<9x16x16xbf16, #tpu.memory_space<vmem>>, vector<1x16x16xbf16>
    %6 = vector.shape_cast %5 : vector<1x16x16xbf16> to vector<16x16xbf16>
    %c3 = arith.constant 3 : index
    %c0_8 = arith.constant 0 : index
    %c0_9 = arith.constant 0 : index
    %7 = vector.load %arg2[%c3, %c0_8, %c0_9] : memref<9x16x16xbf16, #tpu.memory_space<vmem>>, vector<1x16x16xbf16>
    %8 = vector.shape_cast %7 : vector<1x16x16xbf16> to vector<16x16xbf16>
    %c4 = arith.constant 4 : index
    %c0_10 = arith.constant 0 : index
    %c0_11 = arith.constant 0 : index
    %9 = vector.load %arg2[%c4, %c0_10, %c0_11] : memref<9x16x16xbf16, #tpu.memory_space<vmem>>, vector<1x16x16xbf16>
    %10 = vector.shape_cast %9 : vector<1x16x16xbf16> to vector<16x16xbf16>
    %c5 = arith.constant 5 : index
    %c0_12 = arith.constant 0 : index
    %c0_13 = arith.constant 0 : index
    %11 = vector.load %arg2[%c5, %c0_12, %c0_13] : memref<9x16x16xbf16, #tpu.memory_space<vmem>>, vector<1x16x16xbf16>
    %12 = vector.shape_cast %11 : vector<1x16x16xbf16> to vector<16x16xbf16>
    %c6 = arith.constant 6 : index
    %c0_14 = arith.constant 0 : index
    %c0_15 = arith.constant 0 : index
    %13 = vector.load %arg2[%c6, %c0_14, %c0_15] : memref<9x16x16xbf16, #tpu.memory_space<vmem>>, vector<1x16x16xbf16>
    %14 = vector.shape_cast %13 : vector<1x16x16xbf16> to vector<16x16xbf16>
    %c7 = arith.constant 7 : index
    %c0_16 = arith.constant 0 : index
    %c0_17 = arith.constant 0 : index
    %15 = vector.load %arg2[%c7, %c0_16, %c0_17] : memref<9x16x16xbf16, #tpu.memory_space<vmem>>, vector<1x16x16xbf16>
    %16 = vector.shape_cast %15 : vector<1x16x16xbf16> to vector<16x16xbf16>
    %c8 = arith.constant 8 : index
    %c0_18 = arith.constant 0 : index
    %c0_19 = arith.constant 0 : index
    %17 = vector.load %arg2[%c8, %c0_18, %c0_19] : memref<9x16x16xbf16, #tpu.memory_space<vmem>>, vector<1x16x16xbf16>
    %18 = vector.shape_cast %17 : vector<1x16x16xbf16> to vector<16x16xbf16>
    %c0_i32 = arith.constant 0 : i32
    %c8_i32 = arith.constant 8 : i32
    %19 = arith.addi %c0_i32, %c8_i32 : i32
    %c1_i32 = arith.constant 1 : i32
    scf.for %arg5 = %c0_i32 to %19 step %c1_i32  : i32 {
      %cst = arith.constant 0.000000e+00 : f32
      %20 = vector.broadcast %cst : f32 to vector<8x16xf32>
      %c1_i32_21 = arith.constant 1 : i32
      %21 = arith.muli %c1_i32_21, %arg5 : i32
      %c0_i32_22 = arith.constant 0 : i32
      %22 = arith.addi %21, %c0_i32_22 : i32
      %c0_23 = arith.constant 0 : index
      %23 = arith.index_cast %22 : i32 to index
      %c0_24 = arith.constant 0 : index
      %c0_25 = arith.constant 0 : index
      %24 = vector.load %arg1[%c0_23, %23, %c0_24, %c0_25] : memref<1x10x10x16xbf16, #tpu.memory_space<vmem>>, vector<1x1x8x16xbf16>
      %25 = vector.shape_cast %24 : vector<1x1x8x16xbf16> to vector<8x16xbf16>
      %cst_26 = arith.constant dense<0.000000e+00> : vector<8x16xf32>
      %26 = tpu.matmul %25, %2, %cst_26 {dimension_numbers = #tpu.dot_dimension_numbers<[1], [0], [0], [1], [0, 0, 1, 1], [], []>} : vector<8x16xbf16>, vector<16x16xbf16>, vector<8x16xf32> -> vector<8x16xf32>
      %27 = arith.addf %20, %26 : vector<8x16xf32>
      %c1_i32_27 = arith.constant 1 : i32
      %28 = arith.muli %c1_i32_27, %arg5 : i32
      %c0_i32_28 = arith.constant 0 : i32
      %29 = arith.addi %28, %c0_i32_28 : i32
      %c0_29 = arith.constant 0 : index
      %30 = arith.index_cast %29 : i32 to index
      %c1_30 = arith.constant 1 : index
      %c0_31 = arith.constant 0 : index
      %31 = vector.load %arg1[%c0_29, %30, %c1_30, %c0_31] : memref<1x10x10x16xbf16, #tpu.memory_space<vmem>>, vector<1x1x8x16xbf16>
      %32 = vector.shape_cast %31 : vector<1x1x8x16xbf16> to vector<8x16xbf16>
      %cst_32 = arith.constant dense<0.000000e+00> : vector<8x16xf32>
      %33 = tpu.matmul %32, %4, %cst_32 {dimension_numbers = #tpu.dot_dimension_numbers<[1], [0], [0], [1], [0, 0, 1, 1], [], []>} : vector<8x16xbf16>, vector<16x16xbf16>, vector<8x16xf32> -> vector<8x16xf32>
      %34 = arith.addf %27, %33 : vector<8x16xf32>
      %c1_i32_33 = arith.constant 1 : i32
      %35 = arith.muli %c1_i32_33, %arg5 : i32
      %c0_i32_34 = arith.constant 0 : i32
      %36 = arith.addi %35, %c0_i32_34 : i32
      %c0_35 = arith.constant 0 : index
      %37 = arith.index_cast %36 : i32 to index
      %c2_36 = arith.constant 2 : index
      %c0_37 = arith.constant 0 : index
      %38 = vector.load %arg1[%c0_35, %37, %c2_36, %c0_37] : memref<1x10x10x16xbf16, #tpu.memory_space<vmem>>, vector<1x1x8x16xbf16>
      %39 = vector.shape_cast %38 : vector<1x1x8x16xbf16> to vector<8x16xbf16>
      %cst_38 = arith.constant dense<0.000000e+00> : vector<8x16xf32>
      %40 = tpu.matmul %39, %6, %cst_38 {dimension_numbers = #tpu.dot_dimension_numbers<[1], [0], [0], [1], [0, 0, 1, 1], [], []>} : vector<8x16xbf16>, vector<16x16xbf16>, vector<8x16xf32> -> vector<8x16xf32>
      %41 = arith.addf %34, %40 : vector<8x16xf32>
      %c1_i32_39 = arith.constant 1 : i32
      %42 = arith.muli %c1_i32_39, %arg5 : i32
      %c1_i32_40 = arith.constant 1 : i32
      %43 = arith.addi %42, %c1_i32_40 : i32
      %c0_41 = arith.constant 0 : index
      %44 = arith.index_cast %43 : i32 to index
      %c0_42 = arith.constant 0 : index
      %c0_43 = arith.constant 0 : index
      %45 = vector.load %arg1[%c0_41, %44, %c0_42, %c0_43] : memref<1x10x10x16xbf16, #tpu.memory_space<vmem>>, vector<1x1x8x16xbf16>
      %46 = vector.shape_cast %45 : vector<1x1x8x16xbf16> to vector<8x16xbf16>
      %cst_44 = arith.constant dense<0.000000e+00> : vector<8x16xf32>
      %47 = tpu.matmul %46, %8, %cst_44 {dimension_numbers = #tpu.dot_dimension_numbers<[1], [0], [0], [1], [0, 0, 1, 1], [], []>} : vector<8x16xbf16>, vector<16x16xbf16>, vector<8x16xf32> -> vector<8x16xf32>
      %48 = arith.addf %41, %47 : vector<8x16xf32>
      %c1_i32_45 = arith.constant 1 : i32
      %49 = arith.muli %c1_i32_45, %arg5 : i32
      %c1_i32_46 = arith.constant 1 : i32
      %50 = arith.addi %49, %c1_i32_46 : i32
      %c0_47 = arith.constant 0 : index
      %51 = arith.index_cast %50 : i32 to index
      %c1_48 = arith.constant 1 : index
      %c0_49 = arith.constant 0 : index
      %52 = vector.load %arg1[%c0_47, %51, %c1_48, %c0_49] : memref<1x10x10x16xbf16, #tpu.memory_space<vmem>>, vector<1x1x8x16xbf16>
      %53 = vector.shape_cast %52 : vector<1x1x8x16xbf16> to vector<8x16xbf16>
      %cst_50 = arith.constant dense<0.000000e+00> : vector<8x16xf32>
      %54 = tpu.matmul %53, %10, %cst_50 {dimension_numbers = #tpu.dot_dimension_numbers<[1], [0], [0], [1], [0, 0, 1, 1], [], []>} : vector<8x16xbf16>, vector<16x16xbf16>, vector<8x16xf32> -> vector<8x16xf32>
      %55 = arith.addf %48, %54 : vector<8x16xf32>
      %c1_i32_51 = arith.constant 1 : i32
      %56 = arith.muli %c1_i32_51, %arg5 : i32
      %c1_i32_52 = arith.constant 1 : i32
      %57 = arith.addi %56, %c1_i32_52 : i32
      %c0_53 = arith.constant 0 : index
      %58 = arith.index_cast %57 : i32 to index
      %c2_54 = arith.constant 2 : index
      %c0_55 = arith.constant 0 : index
      %59 = vector.load %arg1[%c0_53, %58, %c2_54, %c0_55] : memref<1x10x10x16xbf16, #tpu.memory_space<vmem>>, vector<1x1x8x16xbf16>
      %60 = vector.shape_cast %59 : vector<1x1x8x16xbf16> to vector<8x16xbf16>
      %cst_56 = arith.constant dense<0.000000e+00> : vector<8x16xf32>
      %61 = tpu.matmul %60, %12, %cst_56 {dimension_numbers = #tpu.dot_dimension_numbers<[1], [0], [0], [1], [0, 0, 1, 1], [], []>} : vector<8x16xbf16>, vector<16x16xbf16>, vector<8x16xf32> -> vector<8x16xf32>
      %62 = arith.addf %55, %61 : vector<8x16xf32>
      %c1_i32_57 = arith.constant 1 : i32
      %63 = arith.muli %c1_i32_57, %arg5 : i32
      %c2_i32 = arith.constant 2 : i32
      %64 = arith.addi %63, %c2_i32 : i32
      %c0_58 = arith.constant 0 : index
      %65 = arith.index_cast %64 : i32 to index
      %c0_59 = arith.constant 0 : index
      %c0_60 = arith.constant 0 : index
      %66 = vector.load %arg1[%c0_58, %65, %c0_59, %c0_60] : memref<1x10x10x16xbf16, #tpu.memory_space<vmem>>, vector<1x1x8x16xbf16>
      %67 = vector.shape_cast %66 : vector<1x1x8x16xbf16> to vector<8x16xbf16>
      %cst_61 = arith.constant dense<0.000000e+00> : vector<8x16xf32>
      %68 = tpu.matmul %67, %14, %cst_61 {dimension_numbers = #tpu.dot_dimension_numbers<[1], [0], [0], [1], [0, 0, 1, 1], [], []>} : vector<8x16xbf16>, vector<16x16xbf16>, vector<8x16xf32> -> vector<8x16xf32>
      %69 = arith.addf %62, %68 : vector<8x16xf32>
      %c1_i32_62 = arith.constant 1 : i32
      %70 = arith.muli %c1_i32_62, %arg5 : i32
      %c2_i32_63 = arith.constant 2 : i32
      %71 = arith.addi %70, %c2_i32_63 : i32
      %c0_64 = arith.constant 0 : index
      %72 = arith.index_cast %71 : i32 to index
      %c1_65 = arith.constant 1 : index
      %c0_66 = arith.constant 0 : index
      %73 = vector.load %arg1[%c0_64, %72, %c1_65, %c0_66] : memref<1x10x10x16xbf16, #tpu.memory_space<vmem>>, vector<1x1x8x16xbf16>
      %74 = vector.shape_cast %73 : vector<1x1x8x16xbf16> to vector<8x16xbf16>
      %cst_67 = arith.constant dense<0.000000e+00> : vector<8x16xf32>
      %75 = tpu.matmul %74, %16, %cst_67 {dimension_numbers = #tpu.dot_dimension_numbers<[1], [0], [0], [1], [0, 0, 1, 1], [], []>} : vector<8x16xbf16>, vector<16x16xbf16>, vector<8x16xf32> -> vector<8x16xf32>
      %76 = arith.addf %69, %75 : vector<8x16xf32>
      %c1_i32_68 = arith.constant 1 : i32
      %77 = arith.muli %c1_i32_68, %arg5 : i32
      %c2_i32_69 = arith.constant 2 : i32
      %78 = arith.addi %77, %c2_i32_69 : i32
      %c0_70 = arith.constant 0 : index
      %79 = arith.index_cast %78 : i32 to index
      %c2_71 = arith.constant 2 : index
      %c0_72 = arith.constant 0 : index
      %80 = vector.load %arg1[%c0_70, %79, %c2_71, %c0_72] : memref<1x10x10x16xbf16, #tpu.memory_space<vmem>>, vector<1x1x8x16xbf16>
      %81 = vector.shape_cast %80 : vector<1x1x8x16xbf16> to vector<8x16xbf16>
      %cst_73 = arith.constant dense<0.000000e+00> : vector<8x16xf32>
      %82 = tpu.matmul %81, %18, %cst_73 {dimension_numbers = #tpu.dot_dimension_numbers<[1], [0], [0], [1], [0, 0, 1, 1], [], []>} : vector<8x16xbf16>, vector<16x16xbf16>, vector<8x16xf32> -> vector<8x16xf32>
      %83 = arith.addf %76, %82 : vector<8x16xf32>
      %84 = vector.broadcast %0 : vector<1x16xf32> to vector<8x16xf32>
      %85 = arith.addf %83, %84 : vector<8x16xf32>
      %cst_74 = arith.constant 0.000000e+00 : f32
      %86 = vector.broadcast %cst_74 : f32 to vector<8x16xf32>
      %87 = arith.maximumf %85, %86 : vector<8x16xf32>
      %88 = arith.truncf %87 : vector<8x16xf32> to vector<8x16xbf16>
      %c0_75 = arith.constant 0 : index
      %89 = arith.index_cast %arg5 : i32 to index
      %c0_76 = arith.constant 0 : index
      %c0_77 = arith.constant 0 : index
      %90 = vector.load %arg4[%c0_75, %89, %c0_76, %c0_77] : memref<1x8x8x16xbf16, #tpu.memory_space<vmem>>, vector<1x1x8x16xbf16>
      %91 = vector.shape_cast %90 : vector<1x1x8x16xbf16> to vector<8x16xbf16>
      %92 = vector.shape_cast %88 : vector<8x16xbf16> to vector<1x1x8x16xbf16>
      tpu.vector_store %arg4[%c0_75, %89, %c0_76, %c0_77], %92 {strides = array<i32>} : memref<1x8x8x16xbf16, #tpu.memory_space<vmem>>, vector<1x1x8x16xbf16>,
    }
    %c8_i32_20 = arith.constant 8 : i32
    return
  }
  func.func @transform_0(%arg0: i32) -> (i32, i32, i32, i32) {
    %c0_i32 = arith.constant 0 : i32
    %c0_i32_0 = arith.constant 0 : i32
    %c0_i32_1 = arith.constant 0 : i32
    %c0_i32_2 = arith.constant 0 : i32
    return %arg0, %c0_i32, %c0_i32_0, %c0_i32_1 : i32, i32, i32, i32
  }
  func.func @transform_1(%arg0: i32) -> (i32, i32, i32) {
    %c0_i32 = arith.constant 0 : i32
    %c0_i32_0 = arith.constant 0 : i32
    %c0_i32_1 = arith.constant 0 : i32
    %c0_i32_2 = arith.constant 0 : i32
    return %c0_i32, %c0_i32_0, %c0_i32_1 : i32, i32, i32
  }
  func.func @transform_2(%arg0: i32) -> (i32, i32) {
    %c0_i32 = arith.constant 0 : i32
    %c0_i32_0 = arith.constant 0 : i32
    %c0_i32_1 = arith.constant 0 : i32
    return %c0_i32, %c0_i32_0 : i32, i32
  }
  func.func @transform_3(%arg0: i32) -> (i32, i32, i32, i32) {
    %c0_i32 = arith.constant 0 : i32
    %c0_i32_0 = arith.constant 0 : i32
    %c0_i32_1 = arith.constant 0 : i32
    %c0_i32_2 = arith.constant 0 : i32
    return %arg0, %c0_i32, %c0_i32_0, %c0_i32_1 : i32, i32, i32, i32
  }
}

module attributes {stable_mosaic.version = 11 : i64} {
  func.func @_conv3x3_kernel(%arg0: i32, %arg1: memref<1x18x9x8xbf16, #tpu.memory_space<vmem>>, %arg2: memref<1x18x9x8xbf16, #tpu.memory_space<vmem>>, %arg3: memref<9x8x16xbf16, #tpu.memory_space<vmem>>, %arg4: memref<1x16xf32, #tpu.memory_space<vmem>>, %arg5: memref<1x8x8x16xbf16, #tpu.memory_space<vmem>>) attributes {dimension_semantics = [#tpu.dimension_semantics<parallel>], iteration_bounds = array<i64: 2>, scalar_prefetch = 0 : i64, scratch_operands = 0 : i64, tpu.core_type = #tpu.core_type<tc>, window_params = [{transform_indices = @transform_0, window_bounds = array<i64: 1, 18, 9, 8>}, {transform_indices = @transform_1, window_bounds = array<i64: 1, 18, 9, 8>}, {pipeline_mode = #tpu.pipeline_mode<synchronous>, transform_indices = @transform_2, window_bounds = array<i64: 9, 8, 16>}, {pipeline_mode = #tpu.pipeline_mode<synchronous>, transform_indices = @transform_3, window_bounds = array<i64: 1, 16>}, {transform_indices = @transform_4, window_bounds = array<i64: 1, 8, 8, 16>}]} {
    %c0 = arith.constant 0 : index
    %c0_0 = arith.constant 0 : index
    %0 = vector.load %arg4[%c0, %c0_0] : memref<1x16xf32, #tpu.memory_space<vmem>>, vector<1x16xf32>
    %c0_1 = arith.constant 0 : index
    %c0_2 = arith.constant 0 : index
    %c0_3 = arith.constant 0 : index
    %1 = vector.load %arg3[%c0_1, %c0_2, %c0_3] : memref<9x8x16xbf16, #tpu.memory_space<vmem>>, vector<1x8x16xbf16>
    %2 = vector.shape_cast %1 : vector<1x8x16xbf16> to vector<8x16xbf16>
    %c1 = arith.constant 1 : index
    %c0_4 = arith.constant 0 : index
    %c0_5 = arith.constant 0 : index
    %3 = vector.load %arg3[%c1, %c0_4, %c0_5] : memref<9x8x16xbf16, #tpu.memory_space<vmem>>, vector<1x8x16xbf16>
    %4 = vector.shape_cast %3 : vector<1x8x16xbf16> to vector<8x16xbf16>
    %c2 = arith.constant 2 : index
    %c0_6 = arith.constant 0 : index
    %c0_7 = arith.constant 0 : index
    %5 = vector.load %arg3[%c2, %c0_6, %c0_7] : memref<9x8x16xbf16, #tpu.memory_space<vmem>>, vector<1x8x16xbf16>
    %6 = vector.shape_cast %5 : vector<1x8x16xbf16> to vector<8x16xbf16>
    %c3 = arith.constant 3 : index
    %c0_8 = arith.constant 0 : index
    %c0_9 = arith.constant 0 : index
    %7 = vector.load %arg3[%c3, %c0_8, %c0_9] : memref<9x8x16xbf16, #tpu.memory_space<vmem>>, vector<1x8x16xbf16>
    %8 = vector.shape_cast %7 : vector<1x8x16xbf16> to vector<8x16xbf16>
    %c4 = arith.constant 4 : index
    %c0_10 = arith.constant 0 : index
    %c0_11 = arith.constant 0 : index
    %9 = vector.load %arg3[%c4, %c0_10, %c0_11] : memref<9x8x16xbf16, #tpu.memory_space<vmem>>, vector<1x8x16xbf16>
    %10 = vector.shape_cast %9 : vector<1x8x16xbf16> to vector<8x16xbf16>
    %c5 = arith.constant 5 : index
    %c0_12 = arith.constant 0 : index
    %c0_13 = arith.constant 0 : index
    %11 = vector.load %arg3[%c5, %c0_12, %c0_13] : memref<9x8x16xbf16, #tpu.memory_space<vmem>>, vector<1x8x16xbf16>
    %12 = vector.shape_cast %11 : vector<1x8x16xbf16> to vector<8x16xbf16>
    %c6 = arith.constant 6 : index
    %c0_14 = arith.constant 0 : index
    %c0_15 = arith.constant 0 : index
    %13 = vector.load %arg3[%c6, %c0_14, %c0_15] : memref<9x8x16xbf16, #tpu.memory_space<vmem>>, vector<1x8x16xbf16>
    %14 = vector.shape_cast %13 : vector<1x8x16xbf16> to vector<8x16xbf16>
    %c7 = arith.constant 7 : index
    %c0_16 = arith.constant 0 : index
    %c0_17 = arith.constant 0 : index
    %15 = vector.load %arg3[%c7, %c0_16, %c0_17] : memref<9x8x16xbf16, #tpu.memory_space<vmem>>, vector<1x8x16xbf16>
    %16 = vector.shape_cast %15 : vector<1x8x16xbf16> to vector<8x16xbf16>
    %c8 = arith.constant 8 : index
    %c0_18 = arith.constant 0 : index
    %c0_19 = arith.constant 0 : index
    %17 = vector.load %arg3[%c8, %c0_18, %c0_19] : memref<9x8x16xbf16, #tpu.memory_space<vmem>>, vector<1x8x16xbf16>
    %18 = vector.shape_cast %17 : vector<1x8x16xbf16> to vector<8x16xbf16>
    %c0_i32 = arith.constant 0 : i32
    %c8_i32 = arith.constant 8 : i32
    %19 = arith.addi %c0_i32, %c8_i32 : i32
    %c1_i32 = arith.constant 1 : i32
    scf.for %arg6 = %c0_i32 to %19 step %c1_i32  : i32 {
      %cst = arith.constant 0.000000e+00 : f32
      %20 = vector.broadcast %cst : f32 to vector<8x16xf32>
      %c2_i32 = arith.constant 2 : i32
      %21 = arith.muli %c2_i32, %arg6 : i32
      %c0_i32_21 = arith.constant 0 : i32
      %22 = arith.addi %21, %c0_i32_21 : i32
      %c0_22 = arith.constant 0 : index
      %23 = arith.index_cast %22 : i32 to index
      %c0_23 = arith.constant 0 : index
      %c0_24 = arith.constant 0 : index
      %24 = vector.load %arg1[%c0_22, %23, %c0_23, %c0_24] : memref<1x18x9x8xbf16, #tpu.memory_space<vmem>>, vector<1x1x8x8xbf16>
      %25 = vector.shape_cast %24 : vector<1x1x8x8xbf16> to vector<8x8xbf16>
      %cst_25 = arith.constant dense<0.000000e+00> : vector<8x16xf32>
      %26 = tpu.matmul %25, %2, %cst_25 {dimension_numbers = #tpu.dot_dimension_numbers<[1], [0], [0], [1], [0, 0, 1, 1], [], []>} : vector<8x8xbf16>, vector<8x16xbf16>, vector<8x16xf32> -> vector<8x16xf32>
      %27 = arith.addf %20, %26 : vector<8x16xf32>
      %c2_i32_26 = arith.constant 2 : i32
      %28 = arith.muli %c2_i32_26, %arg6 : i32
      %c0_i32_27 = arith.constant 0 : i32
      %29 = arith.addi %28, %c0_i32_27 : i32
      %c0_28 = arith.constant 0 : index
      %30 = arith.index_cast %29 : i32 to index
      %c0_29 = arith.constant 0 : index
      %c0_30 = arith.constant 0 : index
      %31 = vector.load %arg2[%c0_28, %30, %c0_29, %c0_30] : memref<1x18x9x8xbf16, #tpu.memory_space<vmem>>, vector<1x1x8x8xbf16>
      %32 = vector.shape_cast %31 : vector<1x1x8x8xbf16> to vector<8x8xbf16>
      %cst_31 = arith.constant dense<0.000000e+00> : vector<8x16xf32>
      %33 = tpu.matmul %32, %4, %cst_31 {dimension_numbers = #tpu.dot_dimension_numbers<[1], [0], [0], [1], [0, 0, 1, 1], [], []>} : vector<8x8xbf16>, vector<8x16xbf16>, vector<8x16xf32> -> vector<8x16xf32>
      %34 = arith.addf %27, %33 : vector<8x16xf32>
      %c2_i32_32 = arith.constant 2 : i32
      %35 = arith.muli %c2_i32_32, %arg6 : i32
      %c0_i32_33 = arith.constant 0 : i32
      %36 = arith.addi %35, %c0_i32_33 : i32
      %c0_34 = arith.constant 0 : index
      %37 = arith.index_cast %36 : i32 to index
      %c1_35 = arith.constant 1 : index
      %c0_36 = arith.constant 0 : index
      %38 = vector.load %arg1[%c0_34, %37, %c1_35, %c0_36] : memref<1x18x9x8xbf16, #tpu.memory_space<vmem>>, vector<1x1x8x8xbf16>
      %39 = vector.shape_cast %38 : vector<1x1x8x8xbf16> to vector<8x8xbf16>
      %cst_37 = arith.constant dense<0.000000e+00> : vector<8x16xf32>
      %40 = tpu.matmul %39, %6, %cst_37 {dimension_numbers = #tpu.dot_dimension_numbers<[1], [0], [0], [1], [0, 0, 1, 1], [], []>} : vector<8x8xbf16>, vector<8x16xbf16>, vector<8x16xf32> -> vector<8x16xf32>
      %41 = arith.addf %34, %40 : vector<8x16xf32>
      %c2_i32_38 = arith.constant 2 : i32
      %42 = arith.muli %c2_i32_38, %arg6 : i32
      %c1_i32_39 = arith.constant 1 : i32
      %43 = arith.addi %42, %c1_i32_39 : i32
      %c0_40 = arith.constant 0 : index
      %44 = arith.index_cast %43 : i32 to index
      %c0_41 = arith.constant 0 : index
      %c0_42 = arith.constant 0 : index
      %45 = vector.load %arg1[%c0_40, %44, %c0_41, %c0_42] : memref<1x18x9x8xbf16, #tpu.memory_space<vmem>>, vector<1x1x8x8xbf16>
      %46 = vector.shape_cast %45 : vector<1x1x8x8xbf16> to vector<8x8xbf16>
      %cst_43 = arith.constant dense<0.000000e+00> : vector<8x16xf32>
      %47 = tpu.matmul %46, %8, %cst_43 {dimension_numbers = #tpu.dot_dimension_numbers<[1], [0], [0], [1], [0, 0, 1, 1], [], []>} : vector<8x8xbf16>, vector<8x16xbf16>, vector<8x16xf32> -> vector<8x16xf32>
      %48 = arith.addf %41, %47 : vector<8x16xf32>
      %c2_i32_44 = arith.constant 2 : i32
      %49 = arith.muli %c2_i32_44, %arg6 : i32
      %c1_i32_45 = arith.constant 1 : i32
      %50 = arith.addi %49, %c1_i32_45 : i32
      %c0_46 = arith.constant 0 : index
      %51 = arith.index_cast %50 : i32 to index
      %c0_47 = arith.constant 0 : index
      %c0_48 = arith.constant 0 : index
      %52 = vector.load %arg2[%c0_46, %51, %c0_47, %c0_48] : memref<1x18x9x8xbf16, #tpu.memory_space<vmem>>, vector<1x1x8x8xbf16>
      %53 = vector.shape_cast %52 : vector<1x1x8x8xbf16> to vector<8x8xbf16>
      %cst_49 = arith.constant dense<0.000000e+00> : vector<8x16xf32>
      %54 = tpu.matmul %53, %10, %cst_49 {dimension_numbers = #tpu.dot_dimension_numbers<[1], [0], [0], [1], [0, 0, 1, 1], [], []>} : vector<8x8xbf16>, vector<8x16xbf16>, vector<8x16xf32> -> vector<8x16xf32>
      %55 = arith.addf %48, %54 : vector<8x16xf32>
      %c2_i32_50 = arith.constant 2 : i32
      %56 = arith.muli %c2_i32_50, %arg6 : i32
      %c1_i32_51 = arith.constant 1 : i32
      %57 = arith.addi %56, %c1_i32_51 : i32
      %c0_52 = arith.constant 0 : index
      %58 = arith.index_cast %57 : i32 to index
      %c1_53 = arith.constant 1 : index
      %c0_54 = arith.constant 0 : index
      %59 = vector.load %arg1[%c0_52, %58, %c1_53, %c0_54] : memref<1x18x9x8xbf16, #tpu.memory_space<vmem>>, vector<1x1x8x8xbf16>
      %60 = vector.shape_cast %59 : vector<1x1x8x8xbf16> to vector<8x8xbf16>
      %cst_55 = arith.constant dense<0.000000e+00> : vector<8x16xf32>
      %61 = tpu.matmul %60, %12, %cst_55 {dimension_numbers = #tpu.dot_dimension_numbers<[1], [0], [0], [1], [0, 0, 1, 1], [], []>} : vector<8x8xbf16>, vector<8x16xbf16>, vector<8x16xf32> -> vector<8x16xf32>
      %62 = arith.addf %55, %61 : vector<8x16xf32>
      %c2_i32_56 = arith.constant 2 : i32
      %63 = arith.muli %c2_i32_56, %arg6 : i32
      %c2_i32_57 = arith.constant 2 : i32
      %64 = arith.addi %63, %c2_i32_57 : i32
      %c0_58 = arith.constant 0 : index
      %65 = arith.index_cast %64 : i32 to index
      %c0_59 = arith.constant 0 : index
      %c0_60 = arith.constant 0 : index
      %66 = vector.load %arg1[%c0_58, %65, %c0_59, %c0_60] : memref<1x18x9x8xbf16, #tpu.memory_space<vmem>>, vector<1x1x8x8xbf16>
      %67 = vector.shape_cast %66 : vector<1x1x8x8xbf16> to vector<8x8xbf16>
      %cst_61 = arith.constant dense<0.000000e+00> : vector<8x16xf32>
      %68 = tpu.matmul %67, %14, %cst_61 {dimension_numbers = #tpu.dot_dimension_numbers<[1], [0], [0], [1], [0, 0, 1, 1], [], []>} : vector<8x8xbf16>, vector<8x16xbf16>, vector<8x16xf32> -> vector<8x16xf32>
      %69 = arith.addf %62, %68 : vector<8x16xf32>
      %c2_i32_62 = arith.constant 2 : i32
      %70 = arith.muli %c2_i32_62, %arg6 : i32
      %c2_i32_63 = arith.constant 2 : i32
      %71 = arith.addi %70, %c2_i32_63 : i32
      %c0_64 = arith.constant 0 : index
      %72 = arith.index_cast %71 : i32 to index
      %c0_65 = arith.constant 0 : index
      %c0_66 = arith.constant 0 : index
      %73 = vector.load %arg2[%c0_64, %72, %c0_65, %c0_66] : memref<1x18x9x8xbf16, #tpu.memory_space<vmem>>, vector<1x1x8x8xbf16>
      %74 = vector.shape_cast %73 : vector<1x1x8x8xbf16> to vector<8x8xbf16>
      %cst_67 = arith.constant dense<0.000000e+00> : vector<8x16xf32>
      %75 = tpu.matmul %74, %16, %cst_67 {dimension_numbers = #tpu.dot_dimension_numbers<[1], [0], [0], [1], [0, 0, 1, 1], [], []>} : vector<8x8xbf16>, vector<8x16xbf16>, vector<8x16xf32> -> vector<8x16xf32>
      %76 = arith.addf %69, %75 : vector<8x16xf32>
      %c2_i32_68 = arith.constant 2 : i32
      %77 = arith.muli %c2_i32_68, %arg6 : i32
      %c2_i32_69 = arith.constant 2 : i32
      %78 = arith.addi %77, %c2_i32_69 : i32
      %c0_70 = arith.constant 0 : index
      %79 = arith.index_cast %78 : i32 to index
      %c1_71 = arith.constant 1 : index
      %c0_72 = arith.constant 0 : index
      %80 = vector.load %arg1[%c0_70, %79, %c1_71, %c0_72] : memref<1x18x9x8xbf16, #tpu.memory_space<vmem>>, vector<1x1x8x8xbf16>
      %81 = vector.shape_cast %80 : vector<1x1x8x8xbf16> to vector<8x8xbf16>
      %cst_73 = arith.constant dense<0.000000e+00> : vector<8x16xf32>
      %82 = tpu.matmul %81, %18, %cst_73 {dimension_numbers = #tpu.dot_dimension_numbers<[1], [0], [0], [1], [0, 0, 1, 1], [], []>} : vector<8x8xbf16>, vector<8x16xbf16>, vector<8x16xf32> -> vector<8x16xf32>
      %83 = arith.addf %76, %82 : vector<8x16xf32>
      %84 = vector.broadcast %0 : vector<1x16xf32> to vector<8x16xf32>
      %85 = arith.addf %83, %84 : vector<8x16xf32>
      %cst_74 = arith.constant 0.000000e+00 : f32
      %86 = vector.broadcast %cst_74 : f32 to vector<8x16xf32>
      %87 = arith.maximumf %85, %86 : vector<8x16xf32>
      %88 = arith.truncf %87 : vector<8x16xf32> to vector<8x16xbf16>
      %c0_75 = arith.constant 0 : index
      %89 = arith.index_cast %arg6 : i32 to index
      %c0_76 = arith.constant 0 : index
      %c0_77 = arith.constant 0 : index
      %90 = vector.load %arg5[%c0_75, %89, %c0_76, %c0_77] : memref<1x8x8x16xbf16, #tpu.memory_space<vmem>>, vector<1x1x8x16xbf16>
      %91 = vector.shape_cast %90 : vector<1x1x8x16xbf16> to vector<8x16xbf16>
      %92 = vector.shape_cast %88 : vector<8x16xbf16> to vector<1x1x8x16xbf16>
      tpu.vector_store %arg5[%c0_75, %89, %c0_76, %c0_77], %92 {strides = array<i32>} : memref<1x8x8x16xbf16, #tpu.memory_space<vmem>>, vector<1x1x8x16xbf16>,
    }
    %c8_i32_20 = arith.constant 8 : i32
    return
  }
  func.func @transform_0(%arg0: i32) -> (i32, i32, i32, i32) {
    %c0_i32 = arith.constant 0 : i32
    %c0_i32_0 = arith.constant 0 : i32
    %c0_i32_1 = arith.constant 0 : i32
    %c0_i32_2 = arith.constant 0 : i32
    return %arg0, %c0_i32, %c0_i32_0, %c0_i32_1 : i32, i32, i32, i32
  }
  func.func @transform_1(%arg0: i32) -> (i32, i32, i32, i32) {
    %c0_i32 = arith.constant 0 : i32
    %c0_i32_0 = arith.constant 0 : i32
    %c0_i32_1 = arith.constant 0 : i32
    %c0_i32_2 = arith.constant 0 : i32
    return %arg0, %c0_i32, %c0_i32_0, %c0_i32_1 : i32, i32, i32, i32
  }
  func.func @transform_2(%arg0: i32) -> (i32, i32, i32) {
    %c0_i32 = arith.constant 0 : i32
    %c0_i32_0 = arith.constant 0 : i32
    %c0_i32_1 = arith.constant 0 : i32
    %c0_i32_2 = arith.constant 0 : i32
    return %c0_i32, %c0_i32_0, %c0_i32_1 : i32, i32, i32
  }
  func.func @transform_3(%arg0: i32) -> (i32, i32) {
    %c0_i32 = arith.constant 0 : i32
    %c0_i32_0 = arith.constant 0 : i32
    %c0_i32_1 = arith.constant 0 : i32
    return %c0_i32, %c0_i32_0 : i32, i32
  }
  func.func @transform_4(%arg0: i32) -> (i32, i32, i32, i32) {
    %c0_i32 = arith.constant 0 : i32
    %c0_i32_0 = arith.constant 0 : i32
    %c0_i32_1 = arith.constant 0 : i32
    %c0_i32_2 = arith.constant 0 : i32
    return %arg0, %c0_i32, %c0_i32_0, %c0_i32_1 : i32, i32, i32, i32
  }
}

module attributes {stable_mosaic.version = 11 : i64} {
  func.func @_conv3x3_kernel(%arg0: i32, %arg1: memref<1x10x10x16xbf16, #tpu.memory_space<vmem>>, %arg2: memref<9x16x16xbf16, #tpu.memory_space<vmem>>, %arg3: memref<1x16xf32, #tpu.memory_space<vmem>>, %arg4: memref<1x8x8x16xbf16, #tpu.memory_space<vmem>>, %arg5: memref<1x8x8x16xbf16, #tpu.memory_space<vmem>>) attributes {dimension_semantics = [#tpu.dimension_semantics<parallel>], iteration_bounds = array<i64: 2>, scalar_prefetch = 0 : i64, scratch_operands = 0 : i64, tpu.core_type = #tpu.core_type<tc>, window_params = [{transform_indices = @transform_0, window_bounds = array<i64: 1, 10, 10, 16>}, {pipeline_mode = #tpu.pipeline_mode<synchronous>, transform_indices = @transform_1, window_bounds = array<i64: 9, 16, 16>}, {pipeline_mode = #tpu.pipeline_mode<synchronous>, transform_indices = @transform_2, window_bounds = array<i64: 1, 16>}, {transform_indices = @transform_3, window_bounds = array<i64: 1, 8, 8, 16>}, {transform_indices = @transform_4, window_bounds = array<i64: 1, 8, 8, 16>}]} {
    %c0 = arith.constant 0 : index
    %c0_0 = arith.constant 0 : index
    %0 = vector.load %arg3[%c0, %c0_0] : memref<1x16xf32, #tpu.memory_space<vmem>>, vector<1x16xf32>
    %c0_1 = arith.constant 0 : index
    %c0_2 = arith.constant 0 : index
    %c0_3 = arith.constant 0 : index
    %1 = vector.load %arg2[%c0_1, %c0_2, %c0_3] : memref<9x16x16xbf16, #tpu.memory_space<vmem>>, vector<1x16x16xbf16>
    %2 = vector.shape_cast %1 : vector<1x16x16xbf16> to vector<16x16xbf16>
    %c1 = arith.constant 1 : index
    %c0_4 = arith.constant 0 : index
    %c0_5 = arith.constant 0 : index
    %3 = vector.load %arg2[%c1, %c0_4, %c0_5] : memref<9x16x16xbf16, #tpu.memory_space<vmem>>, vector<1x16x16xbf16>
    %4 = vector.shape_cast %3 : vector<1x16x16xbf16> to vector<16x16xbf16>
    %c2 = arith.constant 2 : index
    %c0_6 = arith.constant 0 : index
    %c0_7 = arith.constant 0 : index
    %5 = vector.load %arg2[%c2, %c0_6, %c0_7] : memref<9x16x16xbf16, #tpu.memory_space<vmem>>, vector<1x16x16xbf16>
    %6 = vector.shape_cast %5 : vector<1x16x16xbf16> to vector<16x16xbf16>
    %c3 = arith.constant 3 : index
    %c0_8 = arith.constant 0 : index
    %c0_9 = arith.constant 0 : index
    %7 = vector.load %arg2[%c3, %c0_8, %c0_9] : memref<9x16x16xbf16, #tpu.memory_space<vmem>>, vector<1x16x16xbf16>
    %8 = vector.shape_cast %7 : vector<1x16x16xbf16> to vector<16x16xbf16>
    %c4 = arith.constant 4 : index
    %c0_10 = arith.constant 0 : index
    %c0_11 = arith.constant 0 : index
    %9 = vector.load %arg2[%c4, %c0_10, %c0_11] : memref<9x16x16xbf16, #tpu.memory_space<vmem>>, vector<1x16x16xbf16>
    %10 = vector.shape_cast %9 : vector<1x16x16xbf16> to vector<16x16xbf16>
    %c5 = arith.constant 5 : index
    %c0_12 = arith.constant 0 : index
    %c0_13 = arith.constant 0 : index
    %11 = vector.load %arg2[%c5, %c0_12, %c0_13] : memref<9x16x16xbf16, #tpu.memory_space<vmem>>, vector<1x16x16xbf16>
    %12 = vector.shape_cast %11 : vector<1x16x16xbf16> to vector<16x16xbf16>
    %c6 = arith.constant 6 : index
    %c0_14 = arith.constant 0 : index
    %c0_15 = arith.constant 0 : index
    %13 = vector.load %arg2[%c6, %c0_14, %c0_15] : memref<9x16x16xbf16, #tpu.memory_space<vmem>>, vector<1x16x16xbf16>
    %14 = vector.shape_cast %13 : vector<1x16x16xbf16> to vector<16x16xbf16>
    %c7 = arith.constant 7 : index
    %c0_16 = arith.constant 0 : index
    %c0_17 = arith.constant 0 : index
    %15 = vector.load %arg2[%c7, %c0_16, %c0_17] : memref<9x16x16xbf16, #tpu.memory_space<vmem>>, vector<1x16x16xbf16>
    %16 = vector.shape_cast %15 : vector<1x16x16xbf16> to vector<16x16xbf16>
    %c8 = arith.constant 8 : index
    %c0_18 = arith.constant 0 : index
    %c0_19 = arith.constant 0 : index
    %17 = vector.load %arg2[%c8, %c0_18, %c0_19] : memref<9x16x16xbf16, #tpu.memory_space<vmem>>, vector<1x16x16xbf16>
    %18 = vector.shape_cast %17 : vector<1x16x16xbf16> to vector<16x16xbf16>
    %c0_i32 = arith.constant 0 : i32
    %c8_i32 = arith.constant 8 : i32
    %19 = arith.addi %c0_i32, %c8_i32 : i32
    %c1_i32 = arith.constant 1 : i32
    scf.for %arg6 = %c0_i32 to %19 step %c1_i32  : i32 {
      %cst = arith.constant 0.000000e+00 : f32
      %20 = vector.broadcast %cst : f32 to vector<8x16xf32>
      %c1_i32_21 = arith.constant 1 : i32
      %21 = arith.muli %c1_i32_21, %arg6 : i32
      %c0_i32_22 = arith.constant 0 : i32
      %22 = arith.addi %21, %c0_i32_22 : i32
      %c0_23 = arith.constant 0 : index
      %23 = arith.index_cast %22 : i32 to index
      %c0_24 = arith.constant 0 : index
      %c0_25 = arith.constant 0 : index
      %24 = vector.load %arg1[%c0_23, %23, %c0_24, %c0_25] : memref<1x10x10x16xbf16, #tpu.memory_space<vmem>>, vector<1x1x8x16xbf16>
      %25 = vector.shape_cast %24 : vector<1x1x8x16xbf16> to vector<8x16xbf16>
      %cst_26 = arith.constant dense<0.000000e+00> : vector<8x16xf32>
      %26 = tpu.matmul %25, %2, %cst_26 {dimension_numbers = #tpu.dot_dimension_numbers<[1], [0], [0], [1], [0, 0, 1, 1], [], []>} : vector<8x16xbf16>, vector<16x16xbf16>, vector<8x16xf32> -> vector<8x16xf32>
      %27 = arith.addf %20, %26 : vector<8x16xf32>
      %c1_i32_27 = arith.constant 1 : i32
      %28 = arith.muli %c1_i32_27, %arg6 : i32
      %c0_i32_28 = arith.constant 0 : i32
      %29 = arith.addi %28, %c0_i32_28 : i32
      %c0_29 = arith.constant 0 : index
      %30 = arith.index_cast %29 : i32 to index
      %c1_30 = arith.constant 1 : index
      %c0_31 = arith.constant 0 : index
      %31 = vector.load %arg1[%c0_29, %30, %c1_30, %c0_31] : memref<1x10x10x16xbf16, #tpu.memory_space<vmem>>, vector<1x1x8x16xbf16>
      %32 = vector.shape_cast %31 : vector<1x1x8x16xbf16> to vector<8x16xbf16>
      %cst_32 = arith.constant dense<0.000000e+00> : vector<8x16xf32>
      %33 = tpu.matmul %32, %4, %cst_32 {dimension_numbers = #tpu.dot_dimension_numbers<[1], [0], [0], [1], [0, 0, 1, 1], [], []>} : vector<8x16xbf16>, vector<16x16xbf16>, vector<8x16xf32> -> vector<8x16xf32>
      %34 = arith.addf %27, %33 : vector<8x16xf32>
      %c1_i32_33 = arith.constant 1 : i32
      %35 = arith.muli %c1_i32_33, %arg6 : i32
      %c0_i32_34 = arith.constant 0 : i32
      %36 = arith.addi %35, %c0_i32_34 : i32
      %c0_35 = arith.constant 0 : index
      %37 = arith.index_cast %36 : i32 to index
      %c2_36 = arith.constant 2 : index
      %c0_37 = arith.constant 0 : index
      %38 = vector.load %arg1[%c0_35, %37, %c2_36, %c0_37] : memref<1x10x10x16xbf16, #tpu.memory_space<vmem>>, vector<1x1x8x16xbf16>
      %39 = vector.shape_cast %38 : vector<1x1x8x16xbf16> to vector<8x16xbf16>
      %cst_38 = arith.constant dense<0.000000e+00> : vector<8x16xf32>
      %40 = tpu.matmul %39, %6, %cst_38 {dimension_numbers = #tpu.dot_dimension_numbers<[1], [0], [0], [1], [0, 0, 1, 1], [], []>} : vector<8x16xbf16>, vector<16x16xbf16>, vector<8x16xf32> -> vector<8x16xf32>
      %41 = arith.addf %34, %40 : vector<8x16xf32>
      %c1_i32_39 = arith.constant 1 : i32
      %42 = arith.muli %c1_i32_39, %arg6 : i32
      %c1_i32_40 = arith.constant 1 : i32
      %43 = arith.addi %42, %c1_i32_40 : i32
      %c0_41 = arith.constant 0 : index
      %44 = arith.index_cast %43 : i32 to index
      %c0_42 = arith.constant 0 : index
      %c0_43 = arith.constant 0 : index
      %45 = vector.load %arg1[%c0_41, %44, %c0_42, %c0_43] : memref<1x10x10x16xbf16, #tpu.memory_space<vmem>>, vector<1x1x8x16xbf16>
      %46 = vector.shape_cast %45 : vector<1x1x8x16xbf16> to vector<8x16xbf16>
      %cst_44 = arith.constant dense<0.000000e+00> : vector<8x16xf32>
      %47 = tpu.matmul %46, %8, %cst_44 {dimension_numbers = #tpu.dot_dimension_numbers<[1], [0], [0], [1], [0, 0, 1, 1], [], []>} : vector<8x16xbf16>, vector<16x16xbf16>, vector<8x16xf32> -> vector<8x16xf32>
      %48 = arith.addf %41, %47 : vector<8x16xf32>
      %c1_i32_45 = arith.constant 1 : i32
      %49 = arith.muli %c1_i32_45, %arg6 : i32
      %c1_i32_46 = arith.constant 1 : i32
      %50 = arith.addi %49, %c1_i32_46 : i32
      %c0_47 = arith.constant 0 : index
      %51 = arith.index_cast %50 : i32 to index
      %c1_48 = arith.constant 1 : index
      %c0_49 = arith.constant 0 : index
      %52 = vector.load %arg1[%c0_47, %51, %c1_48, %c0_49] : memref<1x10x10x16xbf16, #tpu.memory_space<vmem>>, vector<1x1x8x16xbf16>
      %53 = vector.shape_cast %52 : vector<1x1x8x16xbf16> to vector<8x16xbf16>
      %cst_50 = arith.constant dense<0.000000e+00> : vector<8x16xf32>
      %54 = tpu.matmul %53, %10, %cst_50 {dimension_numbers = #tpu.dot_dimension_numbers<[1], [0], [0], [1], [0, 0, 1, 1], [], []>} : vector<8x16xbf16>, vector<16x16xbf16>, vector<8x16xf32> -> vector<8x16xf32>
      %55 = arith.addf %48, %54 : vector<8x16xf32>
      %c1_i32_51 = arith.constant 1 : i32
      %56 = arith.muli %c1_i32_51, %arg6 : i32
      %c1_i32_52 = arith.constant 1 : i32
      %57 = arith.addi %56, %c1_i32_52 : i32
      %c0_53 = arith.constant 0 : index
      %58 = arith.index_cast %57 : i32 to index
      %c2_54 = arith.constant 2 : index
      %c0_55 = arith.constant 0 : index
      %59 = vector.load %arg1[%c0_53, %58, %c2_54, %c0_55] : memref<1x10x10x16xbf16, #tpu.memory_space<vmem>>, vector<1x1x8x16xbf16>
      %60 = vector.shape_cast %59 : vector<1x1x8x16xbf16> to vector<8x16xbf16>
      %cst_56 = arith.constant dense<0.000000e+00> : vector<8x16xf32>
      %61 = tpu.matmul %60, %12, %cst_56 {dimension_numbers = #tpu.dot_dimension_numbers<[1], [0], [0], [1], [0, 0, 1, 1], [], []>} : vector<8x16xbf16>, vector<16x16xbf16>, vector<8x16xf32> -> vector<8x16xf32>
      %62 = arith.addf %55, %61 : vector<8x16xf32>
      %c1_i32_57 = arith.constant 1 : i32
      %63 = arith.muli %c1_i32_57, %arg6 : i32
      %c2_i32 = arith.constant 2 : i32
      %64 = arith.addi %63, %c2_i32 : i32
      %c0_58 = arith.constant 0 : index
      %65 = arith.index_cast %64 : i32 to index
      %c0_59 = arith.constant 0 : index
      %c0_60 = arith.constant 0 : index
      %66 = vector.load %arg1[%c0_58, %65, %c0_59, %c0_60] : memref<1x10x10x16xbf16, #tpu.memory_space<vmem>>, vector<1x1x8x16xbf16>
      %67 = vector.shape_cast %66 : vector<1x1x8x16xbf16> to vector<8x16xbf16>
      %cst_61 = arith.constant dense<0.000000e+00> : vector<8x16xf32>
      %68 = tpu.matmul %67, %14, %cst_61 {dimension_numbers = #tpu.dot_dimension_numbers<[1], [0], [0], [1], [0, 0, 1, 1], [], []>} : vector<8x16xbf16>, vector<16x16xbf16>, vector<8x16xf32> -> vector<8x16xf32>
      %69 = arith.addf %62, %68 : vector<8x16xf32>
      %c1_i32_62 = arith.constant 1 : i32
      %70 = arith.muli %c1_i32_62, %arg6 : i32
      %c2_i32_63 = arith.constant 2 : i32
      %71 = arith.addi %70, %c2_i32_63 : i32
      %c0_64 = arith.constant 0 : index
      %72 = arith.index_cast %71 : i32 to index
      %c1_65 = arith.constant 1 : index
      %c0_66 = arith.constant 0 : index
      %73 = vector.load %arg1[%c0_64, %72, %c1_65, %c0_66] : memref<1x10x10x16xbf16, #tpu.memory_space<vmem>>, vector<1x1x8x16xbf16>
      %74 = vector.shape_cast %73 : vector<1x1x8x16xbf16> to vector<8x16xbf16>
      %cst_67 = arith.constant dense<0.000000e+00> : vector<8x16xf32>
      %75 = tpu.matmul %74, %16, %cst_67 {dimension_numbers = #tpu.dot_dimension_numbers<[1], [0], [0], [1], [0, 0, 1, 1], [], []>} : vector<8x16xbf16>, vector<16x16xbf16>, vector<8x16xf32> -> vector<8x16xf32>
      %76 = arith.addf %69, %75 : vector<8x16xf32>
      %c1_i32_68 = arith.constant 1 : i32
      %77 = arith.muli %c1_i32_68, %arg6 : i32
      %c2_i32_69 = arith.constant 2 : i32
      %78 = arith.addi %77, %c2_i32_69 : i32
      %c0_70 = arith.constant 0 : index
      %79 = arith.index_cast %78 : i32 to index
      %c2_71 = arith.constant 2 : index
      %c0_72 = arith.constant 0 : index
      %80 = vector.load %arg1[%c0_70, %79, %c2_71, %c0_72] : memref<1x10x10x16xbf16, #tpu.memory_space<vmem>>, vector<1x1x8x16xbf16>
      %81 = vector.shape_cast %80 : vector<1x1x8x16xbf16> to vector<8x16xbf16>
      %cst_73 = arith.constant dense<0.000000e+00> : vector<8x16xf32>
      %82 = tpu.matmul %81, %18, %cst_73 {dimension_numbers = #tpu.dot_dimension_numbers<[1], [0], [0], [1], [0, 0, 1, 1], [], []>} : vector<8x16xbf16>, vector<16x16xbf16>, vector<8x16xf32> -> vector<8x16xf32>
      %83 = arith.addf %76, %82 : vector<8x16xf32>
      %84 = vector.broadcast %0 : vector<1x16xf32> to vector<8x16xf32>
      %85 = arith.addf %83, %84 : vector<8x16xf32>
      %c0_74 = arith.constant 0 : index
      %86 = arith.index_cast %arg6 : i32 to index
      %c0_75 = arith.constant 0 : index
      %c0_76 = arith.constant 0 : index
      %87 = vector.load %arg4[%c0_74, %86, %c0_75, %c0_76] : memref<1x8x8x16xbf16, #tpu.memory_space<vmem>>, vector<1x1x8x16xbf16>
      %88 = vector.shape_cast %87 : vector<1x1x8x16xbf16> to vector<8x16xbf16>
      %89 = arith.extf %88 : vector<8x16xbf16> to vector<8x16xf32>
      %90 = arith.addf %85, %89 : vector<8x16xf32>
      %cst_77 = arith.constant 0.000000e+00 : f32
      %91 = vector.broadcast %cst_77 : f32 to vector<8x16xf32>
      %92 = arith.maximumf %90, %91 : vector<8x16xf32>
      %93 = arith.truncf %92 : vector<8x16xf32> to vector<8x16xbf16>
      %c0_78 = arith.constant 0 : index
      %94 = arith.index_cast %arg6 : i32 to index
      %c0_79 = arith.constant 0 : index
      %c0_80 = arith.constant 0 : index
      %95 = vector.load %arg5[%c0_78, %94, %c0_79, %c0_80] : memref<1x8x8x16xbf16, #tpu.memory_space<vmem>>, vector<1x1x8x16xbf16>
      %96 = vector.shape_cast %95 : vector<1x1x8x16xbf16> to vector<8x16xbf16>
      %97 = vector.shape_cast %93 : vector<8x16xbf16> to vector<1x1x8x16xbf16>
      tpu.vector_store %arg5[%c0_78, %94, %c0_79, %c0_80], %97 {strides = array<i32>} : memref<1x8x8x16xbf16, #tpu.memory_space<vmem>>, vector<1x1x8x16xbf16>,
    }
    %c8_i32_20 = arith.constant 8 : i32
    return
  }
  func.func @transform_0(%arg0: i32) -> (i32, i32, i32, i32) {
    %c0_i32 = arith.constant 0 : i32
    %c0_i32_0 = arith.constant 0 : i32
    %c0_i32_1 = arith.constant 0 : i32
    %c0_i32_2 = arith.constant 0 : i32
    return %arg0, %c0_i32, %c0_i32_0, %c0_i32_1 : i32, i32, i32, i32
  }
  func.func @transform_1(%arg0: i32) -> (i32, i32, i32) {
    %c0_i32 = arith.constant 0 : i32
    %c0_i32_0 = arith.constant 0 : i32
    %c0_i32_1 = arith.constant 0 : i32
    %c0_i32_2 = arith.constant 0 : i32
    return %c0_i32, %c0_i32_0, %c0_i32_1 : i32, i32, i32
  }
  func.func @transform_2(%arg0: i32) -> (i32, i32) {
    %c0_i32 = arith.constant 0 : i32
    %c0_i32_0 = arith.constant 0 : i32
    %c0_i32_1 = arith.constant 0 : i32
    return %c0_i32, %c0_i32_0 : i32, i32
  }
  func.func @transform_3(%arg0: i32) -> (i32, i32, i32, i32) {
    %c0_i32 = arith.constant 0 : i32
    %c0_i32_0 = arith.constant 0 : i32
    %c0_i32_1 = arith.constant 0 : i32
    %c0_i32_2 = arith.constant 0 : i32
    return %arg0, %c0_i32, %c0_i32_0, %c0_i32_1 : i32, i32, i32, i32
  }
  func.func @transform_4(%arg0: i32) -> (i32, i32, i32, i32) {
    %c0_i32 = arith.constant 0 : i32
    %c0_i32_0 = arith.constant 0 : i32
    %c0_i32_1 = arith.constant 0 : i32
    %c0_i32_2 = arith.constant 0 : i32
    return %arg0, %c0_i32, %c0_i32_0, %c0_i32_1 : i32, i32, i32, i32
  }
}

module attributes {stable_mosaic.version = 11 : i64} {
  func.func @_gemm_shift_kernel(%arg0: i32, %arg1: memref<16x16xbf16, #tpu.memory_space<vmem>>, %arg2: memref<16x32xbf16, #tpu.memory_space<vmem>>, %arg3: memref<1x32xf32, #tpu.memory_space<vmem>>, %arg4: memref<16x32xbf16, #tpu.memory_space<vmem>>) attributes {dimension_semantics = [#tpu.dimension_semantics<parallel>], iteration_bounds = array<i64: 2>, scalar_prefetch = 0 : i64, scratch_operands = 0 : i64, tpu.core_type = #tpu.core_type<tc>, window_params = [{transform_indices = @transform_0, window_bounds = array<i64: 16, 16>}, {pipeline_mode = #tpu.pipeline_mode<synchronous>, transform_indices = @transform_1, window_bounds = array<i64: 16, 32>}, {pipeline_mode = #tpu.pipeline_mode<synchronous>, transform_indices = @transform_2, window_bounds = array<i64: 1, 32>}, {transform_indices = @transform_3, window_bounds = array<i64: 16, 32>}]} {
    %c0 = arith.constant 0 : index
    %c0_0 = arith.constant 0 : index
    %0 = vector.load %arg1[%c0, %c0_0] : memref<16x16xbf16, #tpu.memory_space<vmem>>, vector<16x16xbf16>
    %c0_1 = arith.constant 0 : index
    %c0_2 = arith.constant 0 : index
    %1 = vector.load %arg2[%c0_1, %c0_2] : memref<16x32xbf16, #tpu.memory_space<vmem>>, vector<16x32xbf16>
    %cst = arith.constant dense<0.000000e+00> : vector<16x32xf32>
    %2 = tpu.matmul %0, %1, %cst {dimension_numbers = #tpu.dot_dimension_numbers<[1], [0], [0], [1], [0, 0, 1, 1], [], []>} : vector<16x16xbf16>, vector<16x32xbf16>, vector<16x32xf32> -> vector<16x32xf32>
    %c0_3 = arith.constant 0 : index
    %c0_4 = arith.constant 0 : index
    %3 = vector.load %arg3[%c0_3, %c0_4] : memref<1x32xf32, #tpu.memory_space<vmem>>, vector<1x32xf32>
    %4 = vector.broadcast %3 : vector<1x32xf32> to vector<16x32xf32>
    %5 = arith.addf %2, %4 : vector<16x32xf32>
    %6 = arith.truncf %5 : vector<16x32xf32> to vector<16x32xbf16>
    %c0_5 = arith.constant 0 : index
    %c0_6 = arith.constant 0 : index
    %7 = vector.load %arg4[%c0_5, %c0_6] : memref<16x32xbf16, #tpu.memory_space<vmem>>, vector<16x32xbf16>
    tpu.vector_store %arg4[%c0_5, %c0_6], %6 {strides = array<i32>} : memref<16x32xbf16, #tpu.memory_space<vmem>>, vector<16x32xbf16>,
    return
  }
  func.func @transform_0(%arg0: i32) -> (i32, i32) {
    %c0_i32 = arith.constant 0 : i32
    %c0_i32_0 = arith.constant 0 : i32
    return %arg0, %c0_i32 : i32, i32
  }
  func.func @transform_1(%arg0: i32) -> (i32, i32) {
    %c0_i32 = arith.constant 0 : i32
    %c0_i32_0 = arith.constant 0 : i32
    %c0_i32_1 = arith.constant 0 : i32
    return %c0_i32, %c0_i32_0 : i32, i32
  }
  func.func @transform_2(%arg0: i32) -> (i32, i32) {
    %c0_i32 = arith.constant 0 : i32
    %c0_i32_0 = arith.constant 0 : i32
    %c0_i32_1 = arith.constant 0 : i32
    return %c0_i32, %c0_i32_0 : i32, i32
  }
  func.func @transform_3(%arg0: i32) -> (i32, i32) {
    %c0_i32 = arith.constant 0 : i32
    %c0_i32_0 = arith.constant 0 : i32
    return %arg0, %c0_i32 : i32, i32
  }
}

module attributes {stable_mosaic.version = 11 : i64} {
  func.func @_conv3x3_kernel(%arg0: i32, %arg1: memref<1x10x5x16xbf16, #tpu.memory_space<vmem>>, %arg2: memref<1x10x5x16xbf16, #tpu.memory_space<vmem>>, %arg3: memref<9x16x32xbf16, #tpu.memory_space<vmem>>, %arg4: memref<1x32xf32, #tpu.memory_space<vmem>>, %arg5: memref<1x4x4x32xbf16, #tpu.memory_space<vmem>>) attributes {dimension_semantics = [#tpu.dimension_semantics<parallel>], iteration_bounds = array<i64: 2>, scalar_prefetch = 0 : i64, scratch_operands = 0 : i64, tpu.core_type = #tpu.core_type<tc>, window_params = [{transform_indices = @transform_0, window_bounds = array<i64: 1, 10, 5, 16>}, {transform_indices = @transform_1, window_bounds = array<i64: 1, 10, 5, 16>}, {pipeline_mode = #tpu.pipeline_mode<synchronous>, transform_indices = @transform_2, window_bounds = array<i64: 9, 16, 32>}, {pipeline_mode = #tpu.pipeline_mode<synchronous>, transform_indices = @transform_3, window_bounds = array<i64: 1, 32>}, {transform_indices = @transform_4, window_bounds = array<i64: 1, 4, 4, 32>}]} {
    %c0 = arith.constant 0 : index
    %c0_0 = arith.constant 0 : index
    %0 = vector.load %arg4[%c0, %c0_0] : memref<1x32xf32, #tpu.memory_space<vmem>>, vector<1x32xf32>
    %c0_1 = arith.constant 0 : index
    %c0_2 = arith.constant 0 : index
    %c0_3 = arith.constant 0 : index
    %1 = vector.load %arg3[%c0_1, %c0_2, %c0_3] : memref<9x16x32xbf16, #tpu.memory_space<vmem>>, vector<1x16x32xbf16>
    %2 = vector.shape_cast %1 : vector<1x16x32xbf16> to vector<16x32xbf16>
    %c1 = arith.constant 1 : index
    %c0_4 = arith.constant 0 : index
    %c0_5 = arith.constant 0 : index
    %3 = vector.load %arg3[%c1, %c0_4, %c0_5] : memref<9x16x32xbf16, #tpu.memory_space<vmem>>, vector<1x16x32xbf16>
    %4 = vector.shape_cast %3 : vector<1x16x32xbf16> to vector<16x32xbf16>
    %c2 = arith.constant 2 : index
    %c0_6 = arith.constant 0 : index
    %c0_7 = arith.constant 0 : index
    %5 = vector.load %arg3[%c2, %c0_6, %c0_7] : memref<9x16x32xbf16, #tpu.memory_space<vmem>>, vector<1x16x32xbf16>
    %6 = vector.shape_cast %5 : vector<1x16x32xbf16> to vector<16x32xbf16>
    %c3 = arith.constant 3 : index
    %c0_8 = arith.constant 0 : index
    %c0_9 = arith.constant 0 : index
    %7 = vector.load %arg3[%c3, %c0_8, %c0_9] : memref<9x16x32xbf16, #tpu.memory_space<vmem>>, vector<1x16x32xbf16>
    %8 = vector.shape_cast %7 : vector<1x16x32xbf16> to vector<16x32xbf16>
    %c4 = arith.constant 4 : index
    %c0_10 = arith.constant 0 : index
    %c0_11 = arith.constant 0 : index
    %9 = vector.load %arg3[%c4, %c0_10, %c0_11] : memref<9x16x32xbf16, #tpu.memory_space<vmem>>, vector<1x16x32xbf16>
    %10 = vector.shape_cast %9 : vector<1x16x32xbf16> to vector<16x32xbf16>
    %c5 = arith.constant 5 : index
    %c0_12 = arith.constant 0 : index
    %c0_13 = arith.constant 0 : index
    %11 = vector.load %arg3[%c5, %c0_12, %c0_13] : memref<9x16x32xbf16, #tpu.memory_space<vmem>>, vector<1x16x32xbf16>
    %12 = vector.shape_cast %11 : vector<1x16x32xbf16> to vector<16x32xbf16>
    %c6 = arith.constant 6 : index
    %c0_14 = arith.constant 0 : index
    %c0_15 = arith.constant 0 : index
    %13 = vector.load %arg3[%c6, %c0_14, %c0_15] : memref<9x16x32xbf16, #tpu.memory_space<vmem>>, vector<1x16x32xbf16>
    %14 = vector.shape_cast %13 : vector<1x16x32xbf16> to vector<16x32xbf16>
    %c7 = arith.constant 7 : index
    %c0_16 = arith.constant 0 : index
    %c0_17 = arith.constant 0 : index
    %15 = vector.load %arg3[%c7, %c0_16, %c0_17] : memref<9x16x32xbf16, #tpu.memory_space<vmem>>, vector<1x16x32xbf16>
    %16 = vector.shape_cast %15 : vector<1x16x32xbf16> to vector<16x32xbf16>
    %c8 = arith.constant 8 : index
    %c0_18 = arith.constant 0 : index
    %c0_19 = arith.constant 0 : index
    %17 = vector.load %arg3[%c8, %c0_18, %c0_19] : memref<9x16x32xbf16, #tpu.memory_space<vmem>>, vector<1x16x32xbf16>
    %18 = vector.shape_cast %17 : vector<1x16x32xbf16> to vector<16x32xbf16>
    %c0_i32 = arith.constant 0 : i32
    %c4_i32 = arith.constant 4 : i32
    %19 = arith.addi %c0_i32, %c4_i32 : i32
    %c1_i32 = arith.constant 1 : i32
    scf.for %arg6 = %c0_i32 to %19 step %c1_i32  : i32 {
      %cst = arith.constant 0.000000e+00 : f32
      %20 = vector.broadcast %cst : f32 to vector<4x32xf32>
      %c2_i32 = arith.constant 2 : i32
      %21 = arith.muli %c2_i32, %arg6 : i32
      %c0_i32_21 = arith.constant 0 : i32
      %22 = arith.addi %21, %c0_i32_21 : i32
      %c0_22 = arith.constant 0 : index
      %23 = arith.index_cast %22 : i32 to index
      %c0_23 = arith.constant 0 : index
      %c0_24 = arith.constant 0 : index
      %24 = vector.load %arg1[%c0_22, %23, %c0_23, %c0_24] : memref<1x10x5x16xbf16, #tpu.memory_space<vmem>>, vector<1x1x4x16xbf16>
      %25 = vector.shape_cast %24 : vector<1x1x4x16xbf16> to vector<4x16xbf16>
      %cst_25 = arith.constant dense<0.000000e+00> : vector<4x32xf32>
      %26 = tpu.matmul %25, %2, %cst_25 {dimension_numbers = #tpu.dot_dimension_numbers<[1], [0], [0], [1], [0, 0, 1, 1], [], []>} : vector<4x16xbf16>, vector<16x32xbf16>, vector<4x32xf32> -> vector<4x32xf32>
      %27 = arith.addf %20, %26 : vector<4x32xf32>
      %c2_i32_26 = arith.constant 2 : i32
      %28 = arith.muli %c2_i32_26, %arg6 : i32
      %c0_i32_27 = arith.constant 0 : i32
      %29 = arith.addi %28, %c0_i32_27 : i32
      %c0_28 = arith.constant 0 : index
      %30 = arith.index_cast %29 : i32 to index
      %c0_29 = arith.constant 0 : index
      %c0_30 = arith.constant 0 : index
      %31 = vector.load %arg2[%c0_28, %30, %c0_29, %c0_30] : memref<1x10x5x16xbf16, #tpu.memory_space<vmem>>, vector<1x1x4x16xbf16>
      %32 = vector.shape_cast %31 : vector<1x1x4x16xbf16> to vector<4x16xbf16>
      %cst_31 = arith.constant dense<0.000000e+00> : vector<4x32xf32>
      %33 = tpu.matmul %32, %4, %cst_31 {dimension_numbers = #tpu.dot_dimension_numbers<[1], [0], [0], [1], [0, 0, 1, 1], [], []>} : vector<4x16xbf16>, vector<16x32xbf16>, vector<4x32xf32> -> vector<4x32xf32>
      %34 = arith.addf %27, %33 : vector<4x32xf32>
      %c2_i32_32 = arith.constant 2 : i32
      %35 = arith.muli %c2_i32_32, %arg6 : i32
      %c0_i32_33 = arith.constant 0 : i32
      %36 = arith.addi %35, %c0_i32_33 : i32
      %c0_34 = arith.constant 0 : index
      %37 = arith.index_cast %36 : i32 to index
      %c1_35 = arith.constant 1 : index
      %c0_36 = arith.constant 0 : index
      %38 = vector.load %arg1[%c0_34, %37, %c1_35, %c0_36] : memref<1x10x5x16xbf16, #tpu.memory_space<vmem>>, vector<1x1x4x16xbf16>
      %39 = vector.shape_cast %38 : vector<1x1x4x16xbf16> to vector<4x16xbf16>
      %cst_37 = arith.constant dense<0.000000e+00> : vector<4x32xf32>
      %40 = tpu.matmul %39, %6, %cst_37 {dimension_numbers = #tpu.dot_dimension_numbers<[1], [0], [0], [1], [0, 0, 1, 1], [], []>} : vector<4x16xbf16>, vector<16x32xbf16>, vector<4x32xf32> -> vector<4x32xf32>
      %41 = arith.addf %34, %40 : vector<4x32xf32>
      %c2_i32_38 = arith.constant 2 : i32
      %42 = arith.muli %c2_i32_38, %arg6 : i32
      %c1_i32_39 = arith.constant 1 : i32
      %43 = arith.addi %42, %c1_i32_39 : i32
      %c0_40 = arith.constant 0 : index
      %44 = arith.index_cast %43 : i32 to index
      %c0_41 = arith.constant 0 : index
      %c0_42 = arith.constant 0 : index
      %45 = vector.load %arg1[%c0_40, %44, %c0_41, %c0_42] : memref<1x10x5x16xbf16, #tpu.memory_space<vmem>>, vector<1x1x4x16xbf16>
      %46 = vector.shape_cast %45 : vector<1x1x4x16xbf16> to vector<4x16xbf16>
      %cst_43 = arith.constant dense<0.000000e+00> : vector<4x32xf32>
      %47 = tpu.matmul %46, %8, %cst_43 {dimension_numbers = #tpu.dot_dimension_numbers<[1], [0], [0], [1], [0, 0, 1, 1], [], []>} : vector<4x16xbf16>, vector<16x32xbf16>, vector<4x32xf32> -> vector<4x32xf32>
      %48 = arith.addf %41, %47 : vector<4x32xf32>
      %c2_i32_44 = arith.constant 2 : i32
      %49 = arith.muli %c2_i32_44, %arg6 : i32
      %c1_i32_45 = arith.constant 1 : i32
      %50 = arith.addi %49, %c1_i32_45 : i32
      %c0_46 = arith.constant 0 : index
      %51 = arith.index_cast %50 : i32 to index
      %c0_47 = arith.constant 0 : index
      %c0_48 = arith.constant 0 : index
      %52 = vector.load %arg2[%c0_46, %51, %c0_47, %c0_48] : memref<1x10x5x16xbf16, #tpu.memory_space<vmem>>, vector<1x1x4x16xbf16>
      %53 = vector.shape_cast %52 : vector<1x1x4x16xbf16> to vector<4x16xbf16>
      %cst_49 = arith.constant dense<0.000000e+00> : vector<4x32xf32>
      %54 = tpu.matmul %53, %10, %cst_49 {dimension_numbers = #tpu.dot_dimension_numbers<[1], [0], [0], [1], [0, 0, 1, 1], [], []>} : vector<4x16xbf16>, vector<16x32xbf16>, vector<4x32xf32> -> vector<4x32xf32>
      %55 = arith.addf %48, %54 : vector<4x32xf32>
      %c2_i32_50 = arith.constant 2 : i32
      %56 = arith.muli %c2_i32_50, %arg6 : i32
      %c1_i32_51 = arith.constant 1 : i32
      %57 = arith.addi %56, %c1_i32_51 : i32
      %c0_52 = arith.constant 0 : index
      %58 = arith.index_cast %57 : i32 to index
      %c1_53 = arith.constant 1 : index
      %c0_54 = arith.constant 0 : index
      %59 = vector.load %arg1[%c0_52, %58, %c1_53, %c0_54] : memref<1x10x5x16xbf16, #tpu.memory_space<vmem>>, vector<1x1x4x16xbf16>
      %60 = vector.shape_cast %59 : vector<1x1x4x16xbf16> to vector<4x16xbf16>
      %cst_55 = arith.constant dense<0.000000e+00> : vector<4x32xf32>
      %61 = tpu.matmul %60, %12, %cst_55 {dimension_numbers = #tpu.dot_dimension_numbers<[1], [0], [0], [1], [0, 0, 1, 1], [], []>} : vector<4x16xbf16>, vector<16x32xbf16>, vector<4x32xf32> -> vector<4x32xf32>
      %62 = arith.addf %55, %61 : vector<4x32xf32>
      %c2_i32_56 = arith.constant 2 : i32
      %63 = arith.muli %c2_i32_56, %arg6 : i32
      %c2_i32_57 = arith.constant 2 : i32
      %64 = arith.addi %63, %c2_i32_57 : i32
      %c0_58 = arith.constant 0 : index
      %65 = arith.index_cast %64 : i32 to index
      %c0_59 = arith.constant 0 : index
      %c0_60 = arith.constant 0 : index
      %66 = vector.load %arg1[%c0_58, %65, %c0_59, %c0_60] : memref<1x10x5x16xbf16, #tpu.memory_space<vmem>>, vector<1x1x4x16xbf16>
      %67 = vector.shape_cast %66 : vector<1x1x4x16xbf16> to vector<4x16xbf16>
      %cst_61 = arith.constant dense<0.000000e+00> : vector<4x32xf32>
      %68 = tpu.matmul %67, %14, %cst_61 {dimension_numbers = #tpu.dot_dimension_numbers<[1], [0], [0], [1], [0, 0, 1, 1], [], []>} : vector<4x16xbf16>, vector<16x32xbf16>, vector<4x32xf32> -> vector<4x32xf32>
      %69 = arith.addf %62, %68 : vector<4x32xf32>
      %c2_i32_62 = arith.constant 2 : i32
      %70 = arith.muli %c2_i32_62, %arg6 : i32
      %c2_i32_63 = arith.constant 2 : i32
      %71 = arith.addi %70, %c2_i32_63 : i32
      %c0_64 = arith.constant 0 : index
      %72 = arith.index_cast %71 : i32 to index
      %c0_65 = arith.constant 0 : index
      %c0_66 = arith.constant 0 : index
      %73 = vector.load %arg2[%c0_64, %72, %c0_65, %c0_66] : memref<1x10x5x16xbf16, #tpu.memory_space<vmem>>, vector<1x1x4x16xbf16>
      %74 = vector.shape_cast %73 : vector<1x1x4x16xbf16> to vector<4x16xbf16>
      %cst_67 = arith.constant dense<0.000000e+00> : vector<4x32xf32>
      %75 = tpu.matmul %74, %16, %cst_67 {dimension_numbers = #tpu.dot_dimension_numbers<[1], [0], [0], [1], [0, 0, 1, 1], [], []>} : vector<4x16xbf16>, vector<16x32xbf16>, vector<4x32xf32> -> vector<4x32xf32>
      %76 = arith.addf %69, %75 : vector<4x32xf32>
      %c2_i32_68 = arith.constant 2 : i32
      %77 = arith.muli %c2_i32_68, %arg6 : i32
      %c2_i32_69 = arith.constant 2 : i32
      %78 = arith.addi %77, %c2_i32_69 : i32
      %c0_70 = arith.constant 0 : index
      %79 = arith.index_cast %78 : i32 to index
      %c1_71 = arith.constant 1 : index
      %c0_72 = arith.constant 0 : index
      %80 = vector.load %arg1[%c0_70, %79, %c1_71, %c0_72] : memref<1x10x5x16xbf16, #tpu.memory_space<vmem>>, vector<1x1x4x16xbf16>
      %81 = vector.shape_cast %80 : vector<1x1x4x16xbf16> to vector<4x16xbf16>
      %cst_73 = arith.constant dense<0.000000e+00> : vector<4x32xf32>
      %82 = tpu.matmul %81, %18, %cst_73 {dimension_numbers = #tpu.dot_dimension_numbers<[1], [0], [0], [1], [0, 0, 1, 1], [], []>} : vector<4x16xbf16>, vector<16x32xbf16>, vector<4x32xf32> -> vector<4x32xf32>
      %83 = arith.addf %76, %82 : vector<4x32xf32>
      %84 = vector.broadcast %0 : vector<1x32xf32> to vector<4x32xf32>
      %85 = arith.addf %83, %84 : vector<4x32xf32>
      %cst_74 = arith.constant 0.000000e+00 : f32
      %86 = vector.broadcast %cst_74 : f32 to vector<4x32xf32>
      %87 = arith.maximumf %85, %86 : vector<4x32xf32>
      %88 = arith.truncf %87 : vector<4x32xf32> to vector<4x32xbf16>
      %c0_75 = arith.constant 0 : index
      %89 = arith.index_cast %arg6 : i32 to index
      %c0_76 = arith.constant 0 : index
      %c0_77 = arith.constant 0 : index
      %90 = vector.load %arg5[%c0_75, %89, %c0_76, %c0_77] : memref<1x4x4x32xbf16, #tpu.memory_space<vmem>>, vector<1x1x4x32xbf16>
      %91 = vector.shape_cast %90 : vector<1x1x4x32xbf16> to vector<4x32xbf16>
      %92 = vector.shape_cast %88 : vector<4x32xbf16> to vector<1x1x4x32xbf16>
      tpu.vector_store %arg5[%c0_75, %89, %c0_76, %c0_77], %92 {strides = array<i32>} : memref<1x4x4x32xbf16, #tpu.memory_space<vmem>>, vector<1x1x4x32xbf16>,
    }
    %c4_i32_20 = arith.constant 4 : i32
    return
  }
  func.func @transform_0(%arg0: i32) -> (i32, i32, i32, i32) {
    %c0_i32 = arith.constant 0 : i32
    %c0_i32_0 = arith.constant 0 : i32
    %c0_i32_1 = arith.constant 0 : i32
    %c0_i32_2 = arith.constant 0 : i32
    return %arg0, %c0_i32, %c0_i32_0, %c0_i32_1 : i32, i32, i32, i32
  }
  func.func @transform_1(%arg0: i32) -> (i32, i32, i32, i32) {
    %c0_i32 = arith.constant 0 : i32
    %c0_i32_0 = arith.constant 0 : i32
    %c0_i32_1 = arith.constant 0 : i32
    %c0_i32_2 = arith.constant 0 : i32
    return %arg0, %c0_i32, %c0_i32_0, %c0_i32_1 : i32, i32, i32, i32
  }
  func.func @transform_2(%arg0: i32) -> (i32, i32, i32) {
    %c0_i32 = arith.constant 0 : i32
    %c0_i32_0 = arith.constant 0 : i32
    %c0_i32_1 = arith.constant 0 : i32
    %c0_i32_2 = arith.constant 0 : i32
    return %c0_i32, %c0_i32_0, %c0_i32_1 : i32, i32, i32
  }
  func.func @transform_3(%arg0: i32) -> (i32, i32) {
    %c0_i32 = arith.constant 0 : i32
    %c0_i32_0 = arith.constant 0 : i32
    %c0_i32_1 = arith.constant 0 : i32
    return %c0_i32, %c0_i32_0 : i32, i32
  }
  func.func @transform_4(%arg0: i32) -> (i32, i32, i32, i32) {
    %c0_i32 = arith.constant 0 : i32
    %c0_i32_0 = arith.constant 0 : i32
    %c0_i32_1 = arith.constant 0 : i32
    %c0_i32_2 = arith.constant 0 : i32
    return %arg0, %c0_i32, %c0_i32_0, %c0_i32_1 : i32, i32, i32, i32
  }
}

module attributes {stable_mosaic.version = 11 : i64} {
  func.func @_conv3x3_kernel(%arg0: i32, %arg1: memref<1x6x6x32xbf16, #tpu.memory_space<vmem>>, %arg2: memref<9x32x32xbf16, #tpu.memory_space<vmem>>, %arg3: memref<1x32xf32, #tpu.memory_space<vmem>>, %arg4: memref<1x4x4x32xbf16, #tpu.memory_space<vmem>>, %arg5: memref<1x4x4x32xbf16, #tpu.memory_space<vmem>>) attributes {dimension_semantics = [#tpu.dimension_semantics<parallel>], iteration_bounds = array<i64: 2>, scalar_prefetch = 0 : i64, scratch_operands = 0 : i64, tpu.core_type = #tpu.core_type<tc>, window_params = [{transform_indices = @transform_0, window_bounds = array<i64: 1, 6, 6, 32>}, {pipeline_mode = #tpu.pipeline_mode<synchronous>, transform_indices = @transform_1, window_bounds = array<i64: 9, 32, 32>}, {pipeline_mode = #tpu.pipeline_mode<synchronous>, transform_indices = @transform_2, window_bounds = array<i64: 1, 32>}, {transform_indices = @transform_3, window_bounds = array<i64: 1, 4, 4, 32>}, {transform_indices = @transform_4, window_bounds = array<i64: 1, 4, 4, 32>}]} {
    %c0 = arith.constant 0 : index
    %c0_0 = arith.constant 0 : index
    %0 = vector.load %arg3[%c0, %c0_0] : memref<1x32xf32, #tpu.memory_space<vmem>>, vector<1x32xf32>
    %c0_1 = arith.constant 0 : index
    %c0_2 = arith.constant 0 : index
    %c0_3 = arith.constant 0 : index
    %1 = vector.load %arg2[%c0_1, %c0_2, %c0_3] : memref<9x32x32xbf16, #tpu.memory_space<vmem>>, vector<1x32x32xbf16>
    %2 = vector.shape_cast %1 : vector<1x32x32xbf16> to vector<32x32xbf16>
    %c1 = arith.constant 1 : index
    %c0_4 = arith.constant 0 : index
    %c0_5 = arith.constant 0 : index
    %3 = vector.load %arg2[%c1, %c0_4, %c0_5] : memref<9x32x32xbf16, #tpu.memory_space<vmem>>, vector<1x32x32xbf16>
    %4 = vector.shape_cast %3 : vector<1x32x32xbf16> to vector<32x32xbf16>
    %c2 = arith.constant 2 : index
    %c0_6 = arith.constant 0 : index
    %c0_7 = arith.constant 0 : index
    %5 = vector.load %arg2[%c2, %c0_6, %c0_7] : memref<9x32x32xbf16, #tpu.memory_space<vmem>>, vector<1x32x32xbf16>
    %6 = vector.shape_cast %5 : vector<1x32x32xbf16> to vector<32x32xbf16>
    %c3 = arith.constant 3 : index
    %c0_8 = arith.constant 0 : index
    %c0_9 = arith.constant 0 : index
    %7 = vector.load %arg2[%c3, %c0_8, %c0_9] : memref<9x32x32xbf16, #tpu.memory_space<vmem>>, vector<1x32x32xbf16>
    %8 = vector.shape_cast %7 : vector<1x32x32xbf16> to vector<32x32xbf16>
    %c4 = arith.constant 4 : index
    %c0_10 = arith.constant 0 : index
    %c0_11 = arith.constant 0 : index
    %9 = vector.load %arg2[%c4, %c0_10, %c0_11] : memref<9x32x32xbf16, #tpu.memory_space<vmem>>, vector<1x32x32xbf16>
    %10 = vector.shape_cast %9 : vector<1x32x32xbf16> to vector<32x32xbf16>
    %c5 = arith.constant 5 : index
    %c0_12 = arith.constant 0 : index
    %c0_13 = arith.constant 0 : index
    %11 = vector.load %arg2[%c5, %c0_12, %c0_13] : memref<9x32x32xbf16, #tpu.memory_space<vmem>>, vector<1x32x32xbf16>
    %12 = vector.shape_cast %11 : vector<1x32x32xbf16> to vector<32x32xbf16>
    %c6 = arith.constant 6 : index
    %c0_14 = arith.constant 0 : index
    %c0_15 = arith.constant 0 : index
    %13 = vector.load %arg2[%c6, %c0_14, %c0_15] : memref<9x32x32xbf16, #tpu.memory_space<vmem>>, vector<1x32x32xbf16>
    %14 = vector.shape_cast %13 : vector<1x32x32xbf16> to vector<32x32xbf16>
    %c7 = arith.constant 7 : index
    %c0_16 = arith.constant 0 : index
    %c0_17 = arith.constant 0 : index
    %15 = vector.load %arg2[%c7, %c0_16, %c0_17] : memref<9x32x32xbf16, #tpu.memory_space<vmem>>, vector<1x32x32xbf16>
    %16 = vector.shape_cast %15 : vector<1x32x32xbf16> to vector<32x32xbf16>
    %c8 = arith.constant 8 : index
    %c0_18 = arith.constant 0 : index
    %c0_19 = arith.constant 0 : index
    %17 = vector.load %arg2[%c8, %c0_18, %c0_19] : memref<9x32x32xbf16, #tpu.memory_space<vmem>>, vector<1x32x32xbf16>
    %18 = vector.shape_cast %17 : vector<1x32x32xbf16> to vector<32x32xbf16>
    %c0_i32 = arith.constant 0 : i32
    %c4_i32 = arith.constant 4 : i32
    %19 = arith.addi %c0_i32, %c4_i32 : i32
    %c1_i32 = arith.constant 1 : i32
    scf.for %arg6 = %c0_i32 to %19 step %c1_i32  : i32 {
      %cst = arith.constant 0.000000e+00 : f32
      %20 = vector.broadcast %cst : f32 to vector<4x32xf32>
      %c1_i32_21 = arith.constant 1 : i32
      %21 = arith.muli %c1_i32_21, %arg6 : i32
      %c0_i32_22 = arith.constant 0 : i32
      %22 = arith.addi %21, %c0_i32_22 : i32
      %c0_23 = arith.constant 0 : index
      %23 = arith.index_cast %22 : i32 to index
      %c0_24 = arith.constant 0 : index
      %c0_25 = arith.constant 0 : index
      %24 = vector.load %arg1[%c0_23, %23, %c0_24, %c0_25] : memref<1x6x6x32xbf16, #tpu.memory_space<vmem>>, vector<1x1x4x32xbf16>
      %25 = vector.shape_cast %24 : vector<1x1x4x32xbf16> to vector<4x32xbf16>
      %cst_26 = arith.constant dense<0.000000e+00> : vector<4x32xf32>
      %26 = tpu.matmul %25, %2, %cst_26 {dimension_numbers = #tpu.dot_dimension_numbers<[1], [0], [0], [1], [0, 0, 1, 1], [], []>} : vector<4x32xbf16>, vector<32x32xbf16>, vector<4x32xf32> -> vector<4x32xf32>
      %27 = arith.addf %20, %26 : vector<4x32xf32>
      %c1_i32_27 = arith.constant 1 : i32
      %28 = arith.muli %c1_i32_27, %arg6 : i32
      %c0_i32_28 = arith.constant 0 : i32
      %29 = arith.addi %28, %c0_i32_28 : i32
      %c0_29 = arith.constant 0 : index
      %30 = arith.index_cast %29 : i32 to index
      %c1_30 = arith.constant 1 : index
      %c0_31 = arith.constant 0 : index
      %31 = vector.load %arg1[%c0_29, %30, %c1_30, %c0_31] : memref<1x6x6x32xbf16, #tpu.memory_space<vmem>>, vector<1x1x4x32xbf16>
      %32 = vector.shape_cast %31 : vector<1x1x4x32xbf16> to vector<4x32xbf16>
      %cst_32 = arith.constant dense<0.000000e+00> : vector<4x32xf32>
      %33 = tpu.matmul %32, %4, %cst_32 {dimension_numbers = #tpu.dot_dimension_numbers<[1], [0], [0], [1], [0, 0, 1, 1], [], []>} : vector<4x32xbf16>, vector<32x32xbf16>, vector<4x32xf32> -> vector<4x32xf32>
      %34 = arith.addf %27, %33 : vector<4x32xf32>
      %c1_i32_33 = arith.constant 1 : i32
      %35 = arith.muli %c1_i32_33, %arg6 : i32
      %c0_i32_34 = arith.constant 0 : i32
      %36 = arith.addi %35, %c0_i32_34 : i32
      %c0_35 = arith.constant 0 : index
      %37 = arith.index_cast %36 : i32 to index
      %c2_36 = arith.constant 2 : index
      %c0_37 = arith.constant 0 : index
      %38 = vector.load %arg1[%c0_35, %37, %c2_36, %c0_37] : memref<1x6x6x32xbf16, #tpu.memory_space<vmem>>, vector<1x1x4x32xbf16>
      %39 = vector.shape_cast %38 : vector<1x1x4x32xbf16> to vector<4x32xbf16>
      %cst_38 = arith.constant dense<0.000000e+00> : vector<4x32xf32>
      %40 = tpu.matmul %39, %6, %cst_38 {dimension_numbers = #tpu.dot_dimension_numbers<[1], [0], [0], [1], [0, 0, 1, 1], [], []>} : vector<4x32xbf16>, vector<32x32xbf16>, vector<4x32xf32> -> vector<4x32xf32>
      %41 = arith.addf %34, %40 : vector<4x32xf32>
      %c1_i32_39 = arith.constant 1 : i32
      %42 = arith.muli %c1_i32_39, %arg6 : i32
      %c1_i32_40 = arith.constant 1 : i32
      %43 = arith.addi %42, %c1_i32_40 : i32
      %c0_41 = arith.constant 0 : index
      %44 = arith.index_cast %43 : i32 to index
      %c0_42 = arith.constant 0 : index
      %c0_43 = arith.constant 0 : index
      %45 = vector.load %arg1[%c0_41, %44, %c0_42, %c0_43] : memref<1x6x6x32xbf16, #tpu.memory_space<vmem>>, vector<1x1x4x32xbf16>
      %46 = vector.shape_cast %45 : vector<1x1x4x32xbf16> to vector<4x32xbf16>
      %cst_44 = arith.constant dense<0.000000e+00> : vector<4x32xf32>
      %47 = tpu.matmul %46, %8, %cst_44 {dimension_numbers = #tpu.dot_dimension_numbers<[1], [0], [0], [1], [0, 0, 1, 1], [], []>} : vector<4x32xbf16>, vector<32x32xbf16>, vector<4x32xf32> -> vector<4x32xf32>
      %48 = arith.addf %41, %47 : vector<4x32xf32>
      %c1_i32_45 = arith.constant 1 : i32
      %49 = arith.muli %c1_i32_45, %arg6 : i32
      %c1_i32_46 = arith.constant 1 : i32
      %50 = arith.addi %49, %c1_i32_46 : i32
      %c0_47 = arith.constant 0 : index
      %51 = arith.index_cast %50 : i32 to index
      %c1_48 = arith.constant 1 : index
      %c0_49 = arith.constant 0 : index
      %52 = vector.load %arg1[%c0_47, %51, %c1_48, %c0_49] : memref<1x6x6x32xbf16, #tpu.memory_space<vmem>>, vector<1x1x4x32xbf16>
      %53 = vector.shape_cast %52 : vector<1x1x4x32xbf16> to vector<4x32xbf16>
      %cst_50 = arith.constant dense<0.000000e+00> : vector<4x32xf32>
      %54 = tpu.matmul %53, %10, %cst_50 {dimension_numbers = #tpu.dot_dimension_numbers<[1], [0], [0], [1], [0, 0, 1, 1], [], []>} : vector<4x32xbf16>, vector<32x32xbf16>, vector<4x32xf32> -> vector<4x32xf32>
      %55 = arith.addf %48, %54 : vector<4x32xf32>
      %c1_i32_51 = arith.constant 1 : i32
      %56 = arith.muli %c1_i32_51, %arg6 : i32
      %c1_i32_52 = arith.constant 1 : i32
      %57 = arith.addi %56, %c1_i32_52 : i32
      %c0_53 = arith.constant 0 : index
      %58 = arith.index_cast %57 : i32 to index
      %c2_54 = arith.constant 2 : index
      %c0_55 = arith.constant 0 : index
      %59 = vector.load %arg1[%c0_53, %58, %c2_54, %c0_55] : memref<1x6x6x32xbf16, #tpu.memory_space<vmem>>, vector<1x1x4x32xbf16>
      %60 = vector.shape_cast %59 : vector<1x1x4x32xbf16> to vector<4x32xbf16>
      %cst_56 = arith.constant dense<0.000000e+00> : vector<4x32xf32>
      %61 = tpu.matmul %60, %12, %cst_56 {dimension_numbers = #tpu.dot_dimension_numbers<[1], [0], [0], [1], [0, 0, 1, 1], [], []>} : vector<4x32xbf16>, vector<32x32xbf16>, vector<4x32xf32> -> vector<4x32xf32>
      %62 = arith.addf %55, %61 : vector<4x32xf32>
      %c1_i32_57 = arith.constant 1 : i32
      %63 = arith.muli %c1_i32_57, %arg6 : i32
      %c2_i32 = arith.constant 2 : i32
      %64 = arith.addi %63, %c2_i32 : i32
      %c0_58 = arith.constant 0 : index
      %65 = arith.index_cast %64 : i32 to index
      %c0_59 = arith.constant 0 : index
      %c0_60 = arith.constant 0 : index
      %66 = vector.load %arg1[%c0_58, %65, %c0_59, %c0_60] : memref<1x6x6x32xbf16, #tpu.memory_space<vmem>>, vector<1x1x4x32xbf16>
      %67 = vector.shape_cast %66 : vector<1x1x4x32xbf16> to vector<4x32xbf16>
      %cst_61 = arith.constant dense<0.000000e+00> : vector<4x32xf32>
      %68 = tpu.matmul %67, %14, %cst_61 {dimension_numbers = #tpu.dot_dimension_numbers<[1], [0], [0], [1], [0, 0, 1, 1], [], []>} : vector<4x32xbf16>, vector<32x32xbf16>, vector<4x32xf32> -> vector<4x32xf32>
      %69 = arith.addf %62, %68 : vector<4x32xf32>
      %c1_i32_62 = arith.constant 1 : i32
      %70 = arith.muli %c1_i32_62, %arg6 : i32
      %c2_i32_63 = arith.constant 2 : i32
      %71 = arith.addi %70, %c2_i32_63 : i32
      %c0_64 = arith.constant 0 : index
      %72 = arith.index_cast %71 : i32 to index
      %c1_65 = arith.constant 1 : index
      %c0_66 = arith.constant 0 : index
      %73 = vector.load %arg1[%c0_64, %72, %c1_65, %c0_66] : memref<1x6x6x32xbf16, #tpu.memory_space<vmem>>, vector<1x1x4x32xbf16>
      %74 = vector.shape_cast %73 : vector<1x1x4x32xbf16> to vector<4x32xbf16>
      %cst_67 = arith.constant dense<0.000000e+00> : vector<4x32xf32>
      %75 = tpu.matmul %74, %16, %cst_67 {dimension_numbers = #tpu.dot_dimension_numbers<[1], [0], [0], [1], [0, 0, 1, 1], [], []>} : vector<4x32xbf16>, vector<32x32xbf16>, vector<4x32xf32> -> vector<4x32xf32>
      %76 = arith.addf %69, %75 : vector<4x32xf32>
      %c1_i32_68 = arith.constant 1 : i32
      %77 = arith.muli %c1_i32_68, %arg6 : i32
      %c2_i32_69 = arith.constant 2 : i32
      %78 = arith.addi %77, %c2_i32_69 : i32
      %c0_70 = arith.constant 0 : index
      %79 = arith.index_cast %78 : i32 to index
      %c2_71 = arith.constant 2 : index
      %c0_72 = arith.constant 0 : index
      %80 = vector.load %arg1[%c0_70, %79, %c2_71, %c0_72] : memref<1x6x6x32xbf16, #tpu.memory_space<vmem>>, vector<1x1x4x32xbf16>
      %81 = vector.shape_cast %80 : vector<1x1x4x32xbf16> to vector<4x32xbf16>
      %cst_73 = arith.constant dense<0.000000e+00> : vector<4x32xf32>
      %82 = tpu.matmul %81, %18, %cst_73 {dimension_numbers = #tpu.dot_dimension_numbers<[1], [0], [0], [1], [0, 0, 1, 1], [], []>} : vector<4x32xbf16>, vector<32x32xbf16>, vector<4x32xf32> -> vector<4x32xf32>
      %83 = arith.addf %76, %82 : vector<4x32xf32>
      %84 = vector.broadcast %0 : vector<1x32xf32> to vector<4x32xf32>
      %85 = arith.addf %83, %84 : vector<4x32xf32>
      %c0_74 = arith.constant 0 : index
      %86 = arith.index_cast %arg6 : i32 to index
      %c0_75 = arith.constant 0 : index
      %c0_76 = arith.constant 0 : index
      %87 = vector.load %arg4[%c0_74, %86, %c0_75, %c0_76] : memref<1x4x4x32xbf16, #tpu.memory_space<vmem>>, vector<1x1x4x32xbf16>
      %88 = vector.shape_cast %87 : vector<1x1x4x32xbf16> to vector<4x32xbf16>
      %89 = arith.extf %88 : vector<4x32xbf16> to vector<4x32xf32>
      %90 = arith.addf %85, %89 : vector<4x32xf32>
      %cst_77 = arith.constant 0.000000e+00 : f32
      %91 = vector.broadcast %cst_77 : f32 to vector<4x32xf32>
      %92 = arith.maximumf %90, %91 : vector<4x32xf32>
      %93 = arith.truncf %92 : vector<4x32xf32> to vector<4x32xbf16>
      %c0_78 = arith.constant 0 : index
      %94 = arith.index_cast %arg6 : i32 to index
      %c0_79 = arith.constant 0 : index
      %c0_80 = arith.constant 0 : index
      %95 = vector.load %arg5[%c0_78, %94, %c0_79, %c0_80] : memref<1x4x4x32xbf16, #tpu.memory_space<vmem>>, vector<1x1x4x32xbf16>
      %96 = vector.shape_cast %95 : vector<1x1x4x32xbf16> to vector<4x32xbf16>
      %97 = vector.shape_cast %93 : vector<4x32xbf16> to vector<1x1x4x32xbf16>
      tpu.vector_store %arg5[%c0_78, %94, %c0_79, %c0_80], %97 {strides = array<i32>} : memref<1x4x4x32xbf16, #tpu.memory_space<vmem>>, vector<1x1x4x32xbf16>,
    }
    %c4_i32_20 = arith.constant 4 : i32
    return
  }
  func.func @transform_0(%arg0: i32) -> (i32, i32, i32, i32) {
    %c0_i32 = arith.constant 0 : i32
    %c0_i32_0 = arith.constant 0 : i32
    %c0_i32_1 = arith.constant 0 : i32
    %c0_i32_2 = arith.constant 0 : i32
    return %arg0, %c0_i32, %c0_i32_0, %c0_i32_1 : i32, i32, i32, i32
  }
  func.func @transform_1(%arg0: i32) -> (i32, i32, i32) {
    %c0_i32 = arith.constant 0 : i32
    %c0_i32_0 = arith.constant 0 : i32
    %c0_i32_1 = arith.constant 0 : i32
    %c0_i32_2 = arith.constant 0 : i32
    return %c0_i32, %c0_i32_0, %c0_i32_1 : i32, i32, i32
  }
  func.func @transform_2(%arg0: i32) -> (i32, i32) {
    %c0_i32 = arith.constant 0 : i32
    %c0_i32_0 = arith.constant 0 : i32
    %c0_i32_1 = arith.constant 0 : i32
    return %c0_i32, %c0_i32_0 : i32, i32
  }
  func.func @transform_3(%arg0: i32) -> (i32, i32, i32, i32) {
    %c0_i32 = arith.constant 0 : i32
    %c0_i32_0 = arith.constant 0 : i32
    %c0_i32_1 = arith.constant 0 : i32
    %c0_i32_2 = arith.constant 0 : i32
    return %arg0, %c0_i32, %c0_i32_0, %c0_i32_1 : i32, i32, i32, i32
  }
  func.func @transform_4(%arg0: i32) -> (i32, i32, i32, i32) {
    %c0_i32 = arith.constant 0 : i32
    %c0_i32_0 = arith.constant 0 : i32
    %c0_i32_1 = arith.constant 0 : i32
    %c0_i32_2 = arith.constant 0 : i32
    return %arg0, %c0_i32, %c0_i32_0, %c0_i32_1 : i32, i32, i32, i32
  }
}

module attributes {stable_mosaic.version = 11 : i64} {
  func.func @_conv3x3_kernel(%arg0: i32, %arg1: memref<1x6x6x32xbf16, #tpu.memory_space<vmem>>, %arg2: memref<9x32x32xbf16, #tpu.memory_space<vmem>>, %arg3: memref<1x32xf32, #tpu.memory_space<vmem>>, %arg4: memref<1x4x4x32xbf16, #tpu.memory_space<vmem>>) attributes {dimension_semantics = [#tpu.dimension_semantics<parallel>], iteration_bounds = array<i64: 2>, scalar_prefetch = 0 : i64, scratch_operands = 0 : i64, tpu.core_type = #tpu.core_type<tc>, window_params = [{transform_indices = @transform_0, window_bounds = array<i64: 1, 6, 6, 32>}, {pipeline_mode = #tpu.pipeline_mode<synchronous>, transform_indices = @transform_1, window_bounds = array<i64: 9, 32, 32>}, {pipeline_mode = #tpu.pipeline_mode<synchronous>, transform_indices = @transform_2, window_bounds = array<i64: 1, 32>}, {transform_indices = @transform_3, window_bounds = array<i64: 1, 4, 4, 32>}]} {
    %c0 = arith.constant 0 : index
    %c0_0 = arith.constant 0 : index
    %0 = vector.load %arg3[%c0, %c0_0] : memref<1x32xf32, #tpu.memory_space<vmem>>, vector<1x32xf32>
    %c0_1 = arith.constant 0 : index
    %c0_2 = arith.constant 0 : index
    %c0_3 = arith.constant 0 : index
    %1 = vector.load %arg2[%c0_1, %c0_2, %c0_3] : memref<9x32x32xbf16, #tpu.memory_space<vmem>>, vector<1x32x32xbf16>
    %2 = vector.shape_cast %1 : vector<1x32x32xbf16> to vector<32x32xbf16>
    %c1 = arith.constant 1 : index
    %c0_4 = arith.constant 0 : index
    %c0_5 = arith.constant 0 : index
    %3 = vector.load %arg2[%c1, %c0_4, %c0_5] : memref<9x32x32xbf16, #tpu.memory_space<vmem>>, vector<1x32x32xbf16>
    %4 = vector.shape_cast %3 : vector<1x32x32xbf16> to vector<32x32xbf16>
    %c2 = arith.constant 2 : index
    %c0_6 = arith.constant 0 : index
    %c0_7 = arith.constant 0 : index
    %5 = vector.load %arg2[%c2, %c0_6, %c0_7] : memref<9x32x32xbf16, #tpu.memory_space<vmem>>, vector<1x32x32xbf16>
    %6 = vector.shape_cast %5 : vector<1x32x32xbf16> to vector<32x32xbf16>
    %c3 = arith.constant 3 : index
    %c0_8 = arith.constant 0 : index
    %c0_9 = arith.constant 0 : index
    %7 = vector.load %arg2[%c3, %c0_8, %c0_9] : memref<9x32x32xbf16, #tpu.memory_space<vmem>>, vector<1x32x32xbf16>
    %8 = vector.shape_cast %7 : vector<1x32x32xbf16> to vector<32x32xbf16>
    %c4 = arith.constant 4 : index
    %c0_10 = arith.constant 0 : index
    %c0_11 = arith.constant 0 : index
    %9 = vector.load %arg2[%c4, %c0_10, %c0_11] : memref<9x32x32xbf16, #tpu.memory_space<vmem>>, vector<1x32x32xbf16>
    %10 = vector.shape_cast %9 : vector<1x32x32xbf16> to vector<32x32xbf16>
    %c5 = arith.constant 5 : index
    %c0_12 = arith.constant 0 : index
    %c0_13 = arith.constant 0 : index
    %11 = vector.load %arg2[%c5, %c0_12, %c0_13] : memref<9x32x32xbf16, #tpu.memory_space<vmem>>, vector<1x32x32xbf16>
    %12 = vector.shape_cast %11 : vector<1x32x32xbf16> to vector<32x32xbf16>
    %c6 = arith.constant 6 : index
    %c0_14 = arith.constant 0 : index
    %c0_15 = arith.constant 0 : index
    %13 = vector.load %arg2[%c6, %c0_14, %c0_15] : memref<9x32x32xbf16, #tpu.memory_space<vmem>>, vector<1x32x32xbf16>
    %14 = vector.shape_cast %13 : vector<1x32x32xbf16> to vector<32x32xbf16>
    %c7 = arith.constant 7 : index
    %c0_16 = arith.constant 0 : index
    %c0_17 = arith.constant 0 : index
    %15 = vector.load %arg2[%c7, %c0_16, %c0_17] : memref<9x32x32xbf16, #tpu.memory_space<vmem>>, vector<1x32x32xbf16>
    %16 = vector.shape_cast %15 : vector<1x32x32xbf16> to vector<32x32xbf16>
    %c8 = arith.constant 8 : index
    %c0_18 = arith.constant 0 : index
    %c0_19 = arith.constant 0 : index
    %17 = vector.load %arg2[%c8, %c0_18, %c0_19] : memref<9x32x32xbf16, #tpu.memory_space<vmem>>, vector<1x32x32xbf16>
    %18 = vector.shape_cast %17 : vector<1x32x32xbf16> to vector<32x32xbf16>
    %c0_i32 = arith.constant 0 : i32
    %c4_i32 = arith.constant 4 : i32
    %19 = arith.addi %c0_i32, %c4_i32 : i32
    %c1_i32 = arith.constant 1 : i32
    scf.for %arg5 = %c0_i32 to %19 step %c1_i32  : i32 {
      %cst = arith.constant 0.000000e+00 : f32
      %20 = vector.broadcast %cst : f32 to vector<4x32xf32>
      %c1_i32_21 = arith.constant 1 : i32
      %21 = arith.muli %c1_i32_21, %arg5 : i32
      %c0_i32_22 = arith.constant 0 : i32
      %22 = arith.addi %21, %c0_i32_22 : i32
      %c0_23 = arith.constant 0 : index
      %23 = arith.index_cast %22 : i32 to index
      %c0_24 = arith.constant 0 : index
      %c0_25 = arith.constant 0 : index
      %24 = vector.load %arg1[%c0_23, %23, %c0_24, %c0_25] : memref<1x6x6x32xbf16, #tpu.memory_space<vmem>>, vector<1x1x4x32xbf16>
      %25 = vector.shape_cast %24 : vector<1x1x4x32xbf16> to vector<4x32xbf16>
      %cst_26 = arith.constant dense<0.000000e+00> : vector<4x32xf32>
      %26 = tpu.matmul %25, %2, %cst_26 {dimension_numbers = #tpu.dot_dimension_numbers<[1], [0], [0], [1], [0, 0, 1, 1], [], []>} : vector<4x32xbf16>, vector<32x32xbf16>, vector<4x32xf32> -> vector<4x32xf32>
      %27 = arith.addf %20, %26 : vector<4x32xf32>
      %c1_i32_27 = arith.constant 1 : i32
      %28 = arith.muli %c1_i32_27, %arg5 : i32
      %c0_i32_28 = arith.constant 0 : i32
      %29 = arith.addi %28, %c0_i32_28 : i32
      %c0_29 = arith.constant 0 : index
      %30 = arith.index_cast %29 : i32 to index
      %c1_30 = arith.constant 1 : index
      %c0_31 = arith.constant 0 : index
      %31 = vector.load %arg1[%c0_29, %30, %c1_30, %c0_31] : memref<1x6x6x32xbf16, #tpu.memory_space<vmem>>, vector<1x1x4x32xbf16>
      %32 = vector.shape_cast %31 : vector<1x1x4x32xbf16> to vector<4x32xbf16>
      %cst_32 = arith.constant dense<0.000000e+00> : vector<4x32xf32>
      %33 = tpu.matmul %32, %4, %cst_32 {dimension_numbers = #tpu.dot_dimension_numbers<[1], [0], [0], [1], [0, 0, 1, 1], [], []>} : vector<4x32xbf16>, vector<32x32xbf16>, vector<4x32xf32> -> vector<4x32xf32>
      %34 = arith.addf %27, %33 : vector<4x32xf32>
      %c1_i32_33 = arith.constant 1 : i32
      %35 = arith.muli %c1_i32_33, %arg5 : i32
      %c0_i32_34 = arith.constant 0 : i32
      %36 = arith.addi %35, %c0_i32_34 : i32
      %c0_35 = arith.constant 0 : index
      %37 = arith.index_cast %36 : i32 to index
      %c2_36 = arith.constant 2 : index
      %c0_37 = arith.constant 0 : index
      %38 = vector.load %arg1[%c0_35, %37, %c2_36, %c0_37] : memref<1x6x6x32xbf16, #tpu.memory_space<vmem>>, vector<1x1x4x32xbf16>
      %39 = vector.shape_cast %38 : vector<1x1x4x32xbf16> to vector<4x32xbf16>
      %cst_38 = arith.constant dense<0.000000e+00> : vector<4x32xf32>
      %40 = tpu.matmul %39, %6, %cst_38 {dimension_numbers = #tpu.dot_dimension_numbers<[1], [0], [0], [1], [0, 0, 1, 1], [], []>} : vector<4x32xbf16>, vector<32x32xbf16>, vector<4x32xf32> -> vector<4x32xf32>
      %41 = arith.addf %34, %40 : vector<4x32xf32>
      %c1_i32_39 = arith.constant 1 : i32
      %42 = arith.muli %c1_i32_39, %arg5 : i32
      %c1_i32_40 = arith.constant 1 : i32
      %43 = arith.addi %42, %c1_i32_40 : i32
      %c0_41 = arith.constant 0 : index
      %44 = arith.index_cast %43 : i32 to index
      %c0_42 = arith.constant 0 : index
      %c0_43 = arith.constant 0 : index
      %45 = vector.load %arg1[%c0_41, %44, %c0_42, %c0_43] : memref<1x6x6x32xbf16, #tpu.memory_space<vmem>>, vector<1x1x4x32xbf16>
      %46 = vector.shape_cast %45 : vector<1x1x4x32xbf16> to vector<4x32xbf16>
      %cst_44 = arith.constant dense<0.000000e+00> : vector<4x32xf32>
      %47 = tpu.matmul %46, %8, %cst_44 {dimension_numbers = #tpu.dot_dimension_numbers<[1], [0], [0], [1], [0, 0, 1, 1], [], []>} : vector<4x32xbf16>, vector<32x32xbf16>, vector<4x32xf32> -> vector<4x32xf32>
      %48 = arith.addf %41, %47 : vector<4x32xf32>
      %c1_i32_45 = arith.constant 1 : i32
      %49 = arith.muli %c1_i32_45, %arg5 : i32
      %c1_i32_46 = arith.constant 1 : i32
      %50 = arith.addi %49, %c1_i32_46 : i32
      %c0_47 = arith.constant 0 : index
      %51 = arith.index_cast %50 : i32 to index
      %c1_48 = arith.constant 1 : index
      %c0_49 = arith.constant 0 : index
      %52 = vector.load %arg1[%c0_47, %51, %c1_48, %c0_49] : memref<1x6x6x32xbf16, #tpu.memory_space<vmem>>, vector<1x1x4x32xbf16>
      %53 = vector.shape_cast %52 : vector<1x1x4x32xbf16> to vector<4x32xbf16>
      %cst_50 = arith.constant dense<0.000000e+00> : vector<4x32xf32>
      %54 = tpu.matmul %53, %10, %cst_50 {dimension_numbers = #tpu.dot_dimension_numbers<[1], [0], [0], [1], [0, 0, 1, 1], [], []>} : vector<4x32xbf16>, vector<32x32xbf16>, vector<4x32xf32> -> vector<4x32xf32>
      %55 = arith.addf %48, %54 : vector<4x32xf32>
      %c1_i32_51 = arith.constant 1 : i32
      %56 = arith.muli %c1_i32_51, %arg5 : i32
      %c1_i32_52 = arith.constant 1 : i32
      %57 = arith.addi %56, %c1_i32_52 : i32
      %c0_53 = arith.constant 0 : index
      %58 = arith.index_cast %57 : i32 to index
      %c2_54 = arith.constant 2 : index
      %c0_55 = arith.constant 0 : index
      %59 = vector.load %arg1[%c0_53, %58, %c2_54, %c0_55] : memref<1x6x6x32xbf16, #tpu.memory_space<vmem>>, vector<1x1x4x32xbf16>
      %60 = vector.shape_cast %59 : vector<1x1x4x32xbf16> to vector<4x32xbf16>
      %cst_56 = arith.constant dense<0.000000e+00> : vector<4x32xf32>
      %61 = tpu.matmul %60, %12, %cst_56 {dimension_numbers = #tpu.dot_dimension_numbers<[1], [0], [0], [1], [0, 0, 1, 1], [], []>} : vector<4x32xbf16>, vector<32x32xbf16>, vector<4x32xf32> -> vector<4x32xf32>
      %62 = arith.addf %55, %61 : vector<4x32xf32>
      %c1_i32_57 = arith.constant 1 : i32
      %63 = arith.muli %c1_i32_57, %arg5 : i32
      %c2_i32 = arith.constant 2 : i32
      %64 = arith.addi %63, %c2_i32 : i32
      %c0_58 = arith.constant 0 : index
      %65 = arith.index_cast %64 : i32 to index
      %c0_59 = arith.constant 0 : index
      %c0_60 = arith.constant 0 : index
      %66 = vector.load %arg1[%c0_58, %65, %c0_59, %c0_60] : memref<1x6x6x32xbf16, #tpu.memory_space<vmem>>, vector<1x1x4x32xbf16>
      %67 = vector.shape_cast %66 : vector<1x1x4x32xbf16> to vector<4x32xbf16>
      %cst_61 = arith.constant dense<0.000000e+00> : vector<4x32xf32>
      %68 = tpu.matmul %67, %14, %cst_61 {dimension_numbers = #tpu.dot_dimension_numbers<[1], [0], [0], [1], [0, 0, 1, 1], [], []>} : vector<4x32xbf16>, vector<32x32xbf16>, vector<4x32xf32> -> vector<4x32xf32>
      %69 = arith.addf %62, %68 : vector<4x32xf32>
      %c1_i32_62 = arith.constant 1 : i32
      %70 = arith.muli %c1_i32_62, %arg5 : i32
      %c2_i32_63 = arith.constant 2 : i32
      %71 = arith.addi %70, %c2_i32_63 : i32
      %c0_64 = arith.constant 0 : index
      %72 = arith.index_cast %71 : i32 to index
      %c1_65 = arith.constant 1 : index
      %c0_66 = arith.constant 0 : index
      %73 = vector.load %arg1[%c0_64, %72, %c1_65, %c0_66] : memref<1x6x6x32xbf16, #tpu.memory_space<vmem>>, vector<1x1x4x32xbf16>
      %74 = vector.shape_cast %73 : vector<1x1x4x32xbf16> to vector<4x32xbf16>
      %cst_67 = arith.constant dense<0.000000e+00> : vector<4x32xf32>
      %75 = tpu.matmul %74, %16, %cst_67 {dimension_numbers = #tpu.dot_dimension_numbers<[1], [0], [0], [1], [0, 0, 1, 1], [], []>} : vector<4x32xbf16>, vector<32x32xbf16>, vector<4x32xf32> -> vector<4x32xf32>
      %76 = arith.addf %69, %75 : vector<4x32xf32>
      %c1_i32_68 = arith.constant 1 : i32
      %77 = arith.muli %c1_i32_68, %arg5 : i32
      %c2_i32_69 = arith.constant 2 : i32
      %78 = arith.addi %77, %c2_i32_69 : i32
      %c0_70 = arith.constant 0 : index
      %79 = arith.index_cast %78 : i32 to index
      %c2_71 = arith.constant 2 : index
      %c0_72 = arith.constant 0 : index
      %80 = vector.load %arg1[%c0_70, %79, %c2_71, %c0_72] : memref<1x6x6x32xbf16, #tpu.memory_space<vmem>>, vector<1x1x4x32xbf16>
      %81 = vector.shape_cast %80 : vector<1x1x4x32xbf16> to vector<4x32xbf16>
      %cst_73 = arith.constant dense<0.000000e+00> : vector<4x32xf32>
      %82 = tpu.matmul %81, %18, %cst_73 {dimension_numbers = #tpu.dot_dimension_numbers<[1], [0], [0], [1], [0, 0, 1, 1], [], []>} : vector<4x32xbf16>, vector<32x32xbf16>, vector<4x32xf32> -> vector<4x32xf32>
      %83 = arith.addf %76, %82 : vector<4x32xf32>
      %84 = vector.broadcast %0 : vector<1x32xf32> to vector<4x32xf32>
      %85 = arith.addf %83, %84 : vector<4x32xf32>
      %cst_74 = arith.constant 0.000000e+00 : f32
      %86 = vector.broadcast %cst_74 : f32 to vector<4x32xf32>
      %87 = arith.maximumf %85, %86 : vector<4x32xf32>
      %88 = arith.truncf %87 : vector<4x32xf32> to vector<4x32xbf16>
      %c0_75 = arith.constant 0 : index
      %89 = arith.index_cast %arg5 : i32 to index
      %c0_76 = arith.constant 0 : index
      %c0_77 = arith.constant 0 : index
      %90 = vector.load %arg4[%c0_75, %89, %c0_76, %c0_77] : memref<1x4x4x32xbf16, #tpu.memory_space<vmem>>, vector<1x1x4x32xbf16>
      %91 = vector.shape_cast %90 : vector<1x1x4x32xbf16> to vector<4x32xbf16>
      %92 = vector.shape_cast %88 : vector<4x32xbf16> to vector<1x1x4x32xbf16>
      tpu.vector_store %arg4[%c0_75, %89, %c0_76, %c0_77], %92 {strides = array<i32>} : memref<1x4x4x32xbf16, #tpu.memory_space<vmem>>, vector<1x1x4x32xbf16>,
    }
    %c4_i32_20 = arith.constant 4 : i32
    return
  }
  func.func @transform_0(%arg0: i32) -> (i32, i32, i32, i32) {
    %c0_i32 = arith.constant 0 : i32
    %c0_i32_0 = arith.constant 0 : i32
    %c0_i32_1 = arith.constant 0 : i32
    %c0_i32_2 = arith.constant 0 : i32
    return %arg0, %c0_i32, %c0_i32_0, %c0_i32_1 : i32, i32, i32, i32
  }
  func.func @transform_1(%arg0: i32) -> (i32, i32, i32) {
    %c0_i32 = arith.constant 0 : i32
    %c0_i32_0 = arith.constant 0 : i32
    %c0_i32_1 = arith.constant 0 : i32
    %c0_i32_2 = arith.constant 0 : i32
    return %c0_i32, %c0_i32_0, %c0_i32_1 : i32, i32, i32
  }
  func.func @transform_2(%arg0: i32) -> (i32, i32) {
    %c0_i32 = arith.constant 0 : i32
    %c0_i32_0 = arith.constant 0 : i32
    %c0_i32_1 = arith.constant 0 : i32
    return %c0_i32, %c0_i32_0 : i32, i32
  }
  func.func @transform_3(%arg0: i32) -> (i32, i32, i32, i32) {
    %c0_i32 = arith.constant 0 : i32
    %c0_i32_0 = arith.constant 0 : i32
    %c0_i32_1 = arith.constant 0 : i32
    %c0_i32_2 = arith.constant 0 : i32
    return %arg0, %c0_i32, %c0_i32_0, %c0_i32_1 : i32, i32, i32, i32
  }
}

module attributes {stable_mosaic.version = 11 : i64} {
  func.func @_gemm_shift_kernel(%arg0: i32, %arg1: memref<8x32xbf16, #tpu.memory_space<vmem>>, %arg2: memref<32x64xbf16, #tpu.memory_space<vmem>>, %arg3: memref<1x64xf32, #tpu.memory_space<vmem>>, %arg4: memref<8x64xbf16, #tpu.memory_space<vmem>>) attributes {dimension_semantics = [#tpu.dimension_semantics<parallel>], iteration_bounds = array<i64: 1>, scalar_prefetch = 0 : i64, scratch_operands = 0 : i64, tpu.core_type = #tpu.core_type<tc>, window_params = [{transform_indices = @transform_0, window_bounds = array<i64: 8, 32>}, {pipeline_mode = #tpu.pipeline_mode<synchronous>, transform_indices = @transform_1, window_bounds = array<i64: 32, 64>}, {pipeline_mode = #tpu.pipeline_mode<synchronous>, transform_indices = @transform_2, window_bounds = array<i64: 1, 64>}, {transform_indices = @transform_3, window_bounds = array<i64: 8, 64>}]} {
    %c0 = arith.constant 0 : index
    %c0_0 = arith.constant 0 : index
    %0 = vector.load %arg1[%c0, %c0_0] : memref<8x32xbf16, #tpu.memory_space<vmem>>, vector<8x32xbf16>
    %c0_1 = arith.constant 0 : index
    %c0_2 = arith.constant 0 : index
    %1 = vector.load %arg2[%c0_1, %c0_2] : memref<32x64xbf16, #tpu.memory_space<vmem>>, vector<32x64xbf16>
    %cst = arith.constant dense<0.000000e+00> : vector<8x64xf32>
    %2 = tpu.matmul %0, %1, %cst {dimension_numbers = #tpu.dot_dimension_numbers<[1], [0], [0], [1], [0, 0, 1, 1], [], []>} : vector<8x32xbf16>, vector<32x64xbf16>, vector<8x64xf32> -> vector<8x64xf32>
    %c0_3 = arith.constant 0 : index
    %c0_4 = arith.constant 0 : index
    %3 = vector.load %arg3[%c0_3, %c0_4] : memref<1x64xf32, #tpu.memory_space<vmem>>, vector<1x64xf32>
    %4 = vector.broadcast %3 : vector<1x64xf32> to vector<8x64xf32>
    %5 = arith.addf %2, %4 : vector<8x64xf32>
    %6 = arith.truncf %5 : vector<8x64xf32> to vector<8x64xbf16>
    %c0_5 = arith.constant 0 : index
    %c0_6 = arith.constant 0 : index
    %7 = vector.load %arg4[%c0_5, %c0_6] : memref<8x64xbf16, #tpu.memory_space<vmem>>, vector<8x64xbf16>
    tpu.vector_store %arg4[%c0_5, %c0_6], %6 {strides = array<i32>} : memref<8x64xbf16, #tpu.memory_space<vmem>>, vector<8x64xbf16>,
    return
  }
  func.func @transform_0(%arg0: i32) -> (i32, i32) {
    %c0_i32 = arith.constant 0 : i32
    %c0_i32_0 = arith.constant 0 : i32
    return %arg0, %c0_i32 : i32, i32
  }
  func.func @transform_1(%arg0: i32) -> (i32, i32) {
    %c0_i32 = arith.constant 0 : i32
    %c0_i32_0 = arith.constant 0 : i32
    %c0_i32_1 = arith.constant 0 : i32
    return %c0_i32, %c0_i32_0 : i32, i32
  }
  func.func @transform_2(%arg0: i32) -> (i32, i32) {
    %c0_i32 = arith.constant 0 : i32
    %c0_i32_0 = arith.constant 0 : i32
    %c0_i32_1 = arith.constant 0 : i32
    return %c0_i32, %c0_i32_0 : i32, i32
  }
  func.func @transform_3(%arg0: i32) -> (i32, i32) {
    %c0_i32 = arith.constant 0 : i32
    %c0_i32_0 = arith.constant 0 : i32
    return %arg0, %c0_i32 : i32, i32
  }
}

module attributes {stable_mosaic.version = 11 : i64} {
  func.func @_conv3x3_kernel(%arg0: i32, %arg1: memref<1x6x3x32xbf16, #tpu.memory_space<vmem>>, %arg2: memref<1x6x3x32xbf16, #tpu.memory_space<vmem>>, %arg3: memref<9x32x64xbf16, #tpu.memory_space<vmem>>, %arg4: memref<1x64xf32, #tpu.memory_space<vmem>>, %arg5: memref<1x2x2x64xbf16, #tpu.memory_space<vmem>>) attributes {dimension_semantics = [#tpu.dimension_semantics<parallel>], iteration_bounds = array<i64: 2>, scalar_prefetch = 0 : i64, scratch_operands = 0 : i64, tpu.core_type = #tpu.core_type<tc>, window_params = [{transform_indices = @transform_0, window_bounds = array<i64: 1, 6, 3, 32>}, {transform_indices = @transform_1, window_bounds = array<i64: 1, 6, 3, 32>}, {pipeline_mode = #tpu.pipeline_mode<synchronous>, transform_indices = @transform_2, window_bounds = array<i64: 9, 32, 64>}, {pipeline_mode = #tpu.pipeline_mode<synchronous>, transform_indices = @transform_3, window_bounds = array<i64: 1, 64>}, {transform_indices = @transform_4, window_bounds = array<i64: 1, 2, 2, 64>}]} {
    %c0 = arith.constant 0 : index
    %c0_0 = arith.constant 0 : index
    %0 = vector.load %arg4[%c0, %c0_0] : memref<1x64xf32, #tpu.memory_space<vmem>>, vector<1x64xf32>
    %c0_1 = arith.constant 0 : index
    %c0_2 = arith.constant 0 : index
    %c0_3 = arith.constant 0 : index
    %1 = vector.load %arg3[%c0_1, %c0_2, %c0_3] : memref<9x32x64xbf16, #tpu.memory_space<vmem>>, vector<1x32x64xbf16>
    %2 = vector.shape_cast %1 : vector<1x32x64xbf16> to vector<32x64xbf16>
    %c1 = arith.constant 1 : index
    %c0_4 = arith.constant 0 : index
    %c0_5 = arith.constant 0 : index
    %3 = vector.load %arg3[%c1, %c0_4, %c0_5] : memref<9x32x64xbf16, #tpu.memory_space<vmem>>, vector<1x32x64xbf16>
    %4 = vector.shape_cast %3 : vector<1x32x64xbf16> to vector<32x64xbf16>
    %c2 = arith.constant 2 : index
    %c0_6 = arith.constant 0 : index
    %c0_7 = arith.constant 0 : index
    %5 = vector.load %arg3[%c2, %c0_6, %c0_7] : memref<9x32x64xbf16, #tpu.memory_space<vmem>>, vector<1x32x64xbf16>
    %6 = vector.shape_cast %5 : vector<1x32x64xbf16> to vector<32x64xbf16>
    %c3 = arith.constant 3 : index
    %c0_8 = arith.constant 0 : index
    %c0_9 = arith.constant 0 : index
    %7 = vector.load %arg3[%c3, %c0_8, %c0_9] : memref<9x32x64xbf16, #tpu.memory_space<vmem>>, vector<1x32x64xbf16>
    %8 = vector.shape_cast %7 : vector<1x32x64xbf16> to vector<32x64xbf16>
    %c4 = arith.constant 4 : index
    %c0_10 = arith.constant 0 : index
    %c0_11 = arith.constant 0 : index
    %9 = vector.load %arg3[%c4, %c0_10, %c0_11] : memref<9x32x64xbf16, #tpu.memory_space<vmem>>, vector<1x32x64xbf16>
    %10 = vector.shape_cast %9 : vector<1x32x64xbf16> to vector<32x64xbf16>
    %c5 = arith.constant 5 : index
    %c0_12 = arith.constant 0 : index
    %c0_13 = arith.constant 0 : index
    %11 = vector.load %arg3[%c5, %c0_12, %c0_13] : memref<9x32x64xbf16, #tpu.memory_space<vmem>>, vector<1x32x64xbf16>
    %12 = vector.shape_cast %11 : vector<1x32x64xbf16> to vector<32x64xbf16>
    %c6 = arith.constant 6 : index
    %c0_14 = arith.constant 0 : index
    %c0_15 = arith.constant 0 : index
    %13 = vector.load %arg3[%c6, %c0_14, %c0_15] : memref<9x32x64xbf16, #tpu.memory_space<vmem>>, vector<1x32x64xbf16>
    %14 = vector.shape_cast %13 : vector<1x32x64xbf16> to vector<32x64xbf16>
    %c7 = arith.constant 7 : index
    %c0_16 = arith.constant 0 : index
    %c0_17 = arith.constant 0 : index
    %15 = vector.load %arg3[%c7, %c0_16, %c0_17] : memref<9x32x64xbf16, #tpu.memory_space<vmem>>, vector<1x32x64xbf16>
    %16 = vector.shape_cast %15 : vector<1x32x64xbf16> to vector<32x64xbf16>
    %c8 = arith.constant 8 : index
    %c0_18 = arith.constant 0 : index
    %c0_19 = arith.constant 0 : index
    %17 = vector.load %arg3[%c8, %c0_18, %c0_19] : memref<9x32x64xbf16, #tpu.memory_space<vmem>>, vector<1x32x64xbf16>
    %18 = vector.shape_cast %17 : vector<1x32x64xbf16> to vector<32x64xbf16>
    %c0_i32 = arith.constant 0 : i32
    %c2_i32 = arith.constant 2 : i32
    %19 = arith.addi %c0_i32, %c2_i32 : i32
    %c1_i32 = arith.constant 1 : i32
    scf.for %arg6 = %c0_i32 to %19 step %c1_i32  : i32 {
      %cst = arith.constant 0.000000e+00 : f32
      %20 = vector.broadcast %cst : f32 to vector<2x64xf32>
      %c2_i32_21 = arith.constant 2 : i32
      %21 = arith.muli %c2_i32_21, %arg6 : i32
      %c0_i32_22 = arith.constant 0 : i32
      %22 = arith.addi %21, %c0_i32_22 : i32
      %c0_23 = arith.constant 0 : index
      %23 = arith.index_cast %22 : i32 to index
      %c0_24 = arith.constant 0 : index
      %c0_25 = arith.constant 0 : index
      %24 = vector.load %arg1[%c0_23, %23, %c0_24, %c0_25] : memref<1x6x3x32xbf16, #tpu.memory_space<vmem>>, vector<1x1x2x32xbf16>
      %25 = vector.shape_cast %24 : vector<1x1x2x32xbf16> to vector<2x32xbf16>
      %cst_26 = arith.constant dense<0.000000e+00> : vector<2x64xf32>
      %26 = tpu.matmul %25, %2, %cst_26 {dimension_numbers = #tpu.dot_dimension_numbers<[1], [0], [0], [1], [0, 0, 1, 1], [], []>} : vector<2x32xbf16>, vector<32x64xbf16>, vector<2x64xf32> -> vector<2x64xf32>
      %27 = arith.addf %20, %26 : vector<2x64xf32>
      %c2_i32_27 = arith.constant 2 : i32
      %28 = arith.muli %c2_i32_27, %arg6 : i32
      %c0_i32_28 = arith.constant 0 : i32
      %29 = arith.addi %28, %c0_i32_28 : i32
      %c0_29 = arith.constant 0 : index
      %30 = arith.index_cast %29 : i32 to index
      %c0_30 = arith.constant 0 : index
      %c0_31 = arith.constant 0 : index
      %31 = vector.load %arg2[%c0_29, %30, %c0_30, %c0_31] : memref<1x6x3x32xbf16, #tpu.memory_space<vmem>>, vector<1x1x2x32xbf16>
      %32 = vector.shape_cast %31 : vector<1x1x2x32xbf16> to vector<2x32xbf16>
      %cst_32 = arith.constant dense<0.000000e+00> : vector<2x64xf32>
      %33 = tpu.matmul %32, %4, %cst_32 {dimension_numbers = #tpu.dot_dimension_numbers<[1], [0], [0], [1], [0, 0, 1, 1], [], []>} : vector<2x32xbf16>, vector<32x64xbf16>, vector<2x64xf32> -> vector<2x64xf32>
      %34 = arith.addf %27, %33 : vector<2x64xf32>
      %c2_i32_33 = arith.constant 2 : i32
      %35 = arith.muli %c2_i32_33, %arg6 : i32
      %c0_i32_34 = arith.constant 0 : i32
      %36 = arith.addi %35, %c0_i32_34 : i32
      %c0_35 = arith.constant 0 : index
      %37 = arith.index_cast %36 : i32 to index
      %c1_36 = arith.constant 1 : index
      %c0_37 = arith.constant 0 : index
      %38 = vector.load %arg1[%c0_35, %37, %c1_36, %c0_37] : memref<1x6x3x32xbf16, #tpu.memory_space<vmem>>, vector<1x1x2x32xbf16>
      %39 = vector.shape_cast %38 : vector<1x1x2x32xbf16> to vector<2x32xbf16>
      %cst_38 = arith.constant dense<0.000000e+00> : vector<2x64xf32>
      %40 = tpu.matmul %39, %6, %cst_38 {dimension_numbers = #tpu.dot_dimension_numbers<[1], [0], [0], [1], [0, 0, 1, 1], [], []>} : vector<2x32xbf16>, vector<32x64xbf16>, vector<2x64xf32> -> vector<2x64xf32>
      %41 = arith.addf %34, %40 : vector<2x64xf32>
      %c2_i32_39 = arith.constant 2 : i32
      %42 = arith.muli %c2_i32_39, %arg6 : i32
      %c1_i32_40 = arith.constant 1 : i32
      %43 = arith.addi %42, %c1_i32_40 : i32
      %c0_41 = arith.constant 0 : index
      %44 = arith.index_cast %43 : i32 to index
      %c0_42 = arith.constant 0 : index
      %c0_43 = arith.constant 0 : index
      %45 = vector.load %arg1[%c0_41, %44, %c0_42, %c0_43] : memref<1x6x3x32xbf16, #tpu.memory_space<vmem>>, vector<1x1x2x32xbf16>
      %46 = vector.shape_cast %45 : vector<1x1x2x32xbf16> to vector<2x32xbf16>
      %cst_44 = arith.constant dense<0.000000e+00> : vector<2x64xf32>
      %47 = tpu.matmul %46, %8, %cst_44 {dimension_numbers = #tpu.dot_dimension_numbers<[1], [0], [0], [1], [0, 0, 1, 1], [], []>} : vector<2x32xbf16>, vector<32x64xbf16>, vector<2x64xf32> -> vector<2x64xf32>
      %48 = arith.addf %41, %47 : vector<2x64xf32>
      %c2_i32_45 = arith.constant 2 : i32
      %49 = arith.muli %c2_i32_45, %arg6 : i32
      %c1_i32_46 = arith.constant 1 : i32
      %50 = arith.addi %49, %c1_i32_46 : i32
      %c0_47 = arith.constant 0 : index
      %51 = arith.index_cast %50 : i32 to index
      %c0_48 = arith.constant 0 : index
      %c0_49 = arith.constant 0 : index
      %52 = vector.load %arg2[%c0_47, %51, %c0_48, %c0_49] : memref<1x6x3x32xbf16, #tpu.memory_space<vmem>>, vector<1x1x2x32xbf16>
      %53 = vector.shape_cast %52 : vector<1x1x2x32xbf16> to vector<2x32xbf16>
      %cst_50 = arith.constant dense<0.000000e+00> : vector<2x64xf32>
      %54 = tpu.matmul %53, %10, %cst_50 {dimension_numbers = #tpu.dot_dimension_numbers<[1], [0], [0], [1], [0, 0, 1, 1], [], []>} : vector<2x32xbf16>, vector<32x64xbf16>, vector<2x64xf32> -> vector<2x64xf32>
      %55 = arith.addf %48, %54 : vector<2x64xf32>
      %c2_i32_51 = arith.constant 2 : i32
      %56 = arith.muli %c2_i32_51, %arg6 : i32
      %c1_i32_52 = arith.constant 1 : i32
      %57 = arith.addi %56, %c1_i32_52 : i32
      %c0_53 = arith.constant 0 : index
      %58 = arith.index_cast %57 : i32 to index
      %c1_54 = arith.constant 1 : index
      %c0_55 = arith.constant 0 : index
      %59 = vector.load %arg1[%c0_53, %58, %c1_54, %c0_55] : memref<1x6x3x32xbf16, #tpu.memory_space<vmem>>, vector<1x1x2x32xbf16>
      %60 = vector.shape_cast %59 : vector<1x1x2x32xbf16> to vector<2x32xbf16>
      %cst_56 = arith.constant dense<0.000000e+00> : vector<2x64xf32>
      %61 = tpu.matmul %60, %12, %cst_56 {dimension_numbers = #tpu.dot_dimension_numbers<[1], [0], [0], [1], [0, 0, 1, 1], [], []>} : vector<2x32xbf16>, vector<32x64xbf16>, vector<2x64xf32> -> vector<2x64xf32>
      %62 = arith.addf %55, %61 : vector<2x64xf32>
      %c2_i32_57 = arith.constant 2 : i32
      %63 = arith.muli %c2_i32_57, %arg6 : i32
      %c2_i32_58 = arith.constant 2 : i32
      %64 = arith.addi %63, %c2_i32_58 : i32
      %c0_59 = arith.constant 0 : index
      %65 = arith.index_cast %64 : i32 to index
      %c0_60 = arith.constant 0 : index
      %c0_61 = arith.constant 0 : index
      %66 = vector.load %arg1[%c0_59, %65, %c0_60, %c0_61] : memref<1x6x3x32xbf16, #tpu.memory_space<vmem>>, vector<1x1x2x32xbf16>
      %67 = vector.shape_cast %66 : vector<1x1x2x32xbf16> to vector<2x32xbf16>
      %cst_62 = arith.constant dense<0.000000e+00> : vector<2x64xf32>
      %68 = tpu.matmul %67, %14, %cst_62 {dimension_numbers = #tpu.dot_dimension_numbers<[1], [0], [0], [1], [0, 0, 1, 1], [], []>} : vector<2x32xbf16>, vector<32x64xbf16>, vector<2x64xf32> -> vector<2x64xf32>
      %69 = arith.addf %62, %68 : vector<2x64xf32>
      %c2_i32_63 = arith.constant 2 : i32
      %70 = arith.muli %c2_i32_63, %arg6 : i32
      %c2_i32_64 = arith.constant 2 : i32
      %71 = arith.addi %70, %c2_i32_64 : i32
      %c0_65 = arith.constant 0 : index
      %72 = arith.index_cast %71 : i32 to index
      %c0_66 = arith.constant 0 : index
      %c0_67 = arith.constant 0 : index
      %73 = vector.load %arg2[%c0_65, %72, %c0_66, %c0_67] : memref<1x6x3x32xbf16, #tpu.memory_space<vmem>>, vector<1x1x2x32xbf16>
      %74 = vector.shape_cast %73 : vector<1x1x2x32xbf16> to vector<2x32xbf16>
      %cst_68 = arith.constant dense<0.000000e+00> : vector<2x64xf32>
      %75 = tpu.matmul %74, %16, %cst_68 {dimension_numbers = #tpu.dot_dimension_numbers<[1], [0], [0], [1], [0, 0, 1, 1], [], []>} : vector<2x32xbf16>, vector<32x64xbf16>, vector<2x64xf32> -> vector<2x64xf32>
      %76 = arith.addf %69, %75 : vector<2x64xf32>
      %c2_i32_69 = arith.constant 2 : i32
      %77 = arith.muli %c2_i32_69, %arg6 : i32
      %c2_i32_70 = arith.constant 2 : i32
      %78 = arith.addi %77, %c2_i32_70 : i32
      %c0_71 = arith.constant 0 : index
      %79 = arith.index_cast %78 : i32 to index
      %c1_72 = arith.constant 1 : index
      %c0_73 = arith.constant 0 : index
      %80 = vector.load %arg1[%c0_71, %79, %c1_72, %c0_73] : memref<1x6x3x32xbf16, #tpu.memory_space<vmem>>, vector<1x1x2x32xbf16>
      %81 = vector.shape_cast %80 : vector<1x1x2x32xbf16> to vector<2x32xbf16>
      %cst_74 = arith.constant dense<0.000000e+00> : vector<2x64xf32>
      %82 = tpu.matmul %81, %18, %cst_74 {dimension_numbers = #tpu.dot_dimension_numbers<[1], [0], [0], [1], [0, 0, 1, 1], [], []>} : vector<2x32xbf16>, vector<32x64xbf16>, vector<2x64xf32> -> vector<2x64xf32>
      %83 = arith.addf %76, %82 : vector<2x64xf32>
      %84 = vector.broadcast %0 : vector<1x64xf32> to vector<2x64xf32>
      %85 = arith.addf %83, %84 : vector<2x64xf32>
      %cst_75 = arith.constant 0.000000e+00 : f32
      %86 = vector.broadcast %cst_75 : f32 to vector<2x64xf32>
      %87 = arith.maximumf %85, %86 : vector<2x64xf32>
      %88 = arith.truncf %87 : vector<2x64xf32> to vector<2x64xbf16>
      %c0_76 = arith.constant 0 : index
      %89 = arith.index_cast %arg6 : i32 to index
      %c0_77 = arith.constant 0 : index
      %c0_78 = arith.constant 0 : index
      %90 = vector.load %arg5[%c0_76, %89, %c0_77, %c0_78] : memref<1x2x2x64xbf16, #tpu.memory_space<vmem>>, vector<1x1x2x64xbf16>
      %91 = vector.shape_cast %90 : vector<1x1x2x64xbf16> to vector<2x64xbf16>
      %92 = vector.shape_cast %88 : vector<2x64xbf16> to vector<1x1x2x64xbf16>
      tpu.vector_store %arg5[%c0_76, %89, %c0_77, %c0_78], %92 {strides = array<i32>} : memref<1x2x2x64xbf16, #tpu.memory_space<vmem>>, vector<1x1x2x64xbf16>,
    }
    %c2_i32_20 = arith.constant 2 : i32
    return
  }
  func.func @transform_0(%arg0: i32) -> (i32, i32, i32, i32) {
    %c0_i32 = arith.constant 0 : i32
    %c0_i32_0 = arith.constant 0 : i32
    %c0_i32_1 = arith.constant 0 : i32
    %c0_i32_2 = arith.constant 0 : i32
    return %arg0, %c0_i32, %c0_i32_0, %c0_i32_1 : i32, i32, i32, i32
  }
  func.func @transform_1(%arg0: i32) -> (i32, i32, i32, i32) {
    %c0_i32 = arith.constant 0 : i32
    %c0_i32_0 = arith.constant 0 : i32
    %c0_i32_1 = arith.constant 0 : i32
    %c0_i32_2 = arith.constant 0 : i32
    return %arg0, %c0_i32, %c0_i32_0, %c0_i32_1 : i32, i32, i32, i32
  }
  func.func @transform_2(%arg0: i32) -> (i32, i32, i32) {
    %c0_i32 = arith.constant 0 : i32
    %c0_i32_0 = arith.constant 0 : i32
    %c0_i32_1 = arith.constant 0 : i32
    %c0_i32_2 = arith.constant 0 : i32
    return %c0_i32, %c0_i32_0, %c0_i32_1 : i32, i32, i32
  }
  func.func @transform_3(%arg0: i32) -> (i32, i32) {
    %c0_i32 = arith.constant 0 : i32
    %c0_i32_0 = arith.constant 0 : i32
    %c0_i32_1 = arith.constant 0 : i32
    return %c0_i32, %c0_i32_0 : i32, i32
  }
  func.func @transform_4(%arg0: i32) -> (i32, i32, i32, i32) {
    %c0_i32 = arith.constant 0 : i32
    %c0_i32_0 = arith.constant 0 : i32
    %c0_i32_1 = arith.constant 0 : i32
    %c0_i32_2 = arith.constant 0 : i32
    return %arg0, %c0_i32, %c0_i32_0, %c0_i32_1 : i32, i32, i32, i32
  }
}

module attributes {stable_mosaic.version = 11 : i64} {
  func.func @_conv3x3_kernel(%arg0: i32, %arg1: memref<1x4x4x64xbf16, #tpu.memory_space<vmem>>, %arg2: memref<9x64x64xbf16, #tpu.memory_space<vmem>>, %arg3: memref<1x64xf32, #tpu.memory_space<vmem>>, %arg4: memref<1x2x2x64xbf16, #tpu.memory_space<vmem>>, %arg5: memref<1x2x2x64xbf16, #tpu.memory_space<vmem>>) attributes {dimension_semantics = [#tpu.dimension_semantics<parallel>], iteration_bounds = array<i64: 2>, scalar_prefetch = 0 : i64, scratch_operands = 0 : i64, tpu.core_type = #tpu.core_type<tc>, window_params = [{transform_indices = @transform_0, window_bounds = array<i64: 1, 4, 4, 64>}, {pipeline_mode = #tpu.pipeline_mode<synchronous>, transform_indices = @transform_1, window_bounds = array<i64: 9, 64, 64>}, {pipeline_mode = #tpu.pipeline_mode<synchronous>, transform_indices = @transform_2, window_bounds = array<i64: 1, 64>}, {transform_indices = @transform_3, window_bounds = array<i64: 1, 2, 2, 64>}, {transform_indices = @transform_4, window_bounds = array<i64: 1, 2, 2, 64>}]} {
    %c0 = arith.constant 0 : index
    %c0_0 = arith.constant 0 : index
    %0 = vector.load %arg3[%c0, %c0_0] : memref<1x64xf32, #tpu.memory_space<vmem>>, vector<1x64xf32>
    %c0_1 = arith.constant 0 : index
    %c0_2 = arith.constant 0 : index
    %c0_3 = arith.constant 0 : index
    %1 = vector.load %arg2[%c0_1, %c0_2, %c0_3] : memref<9x64x64xbf16, #tpu.memory_space<vmem>>, vector<1x64x64xbf16>
    %2 = vector.shape_cast %1 : vector<1x64x64xbf16> to vector<64x64xbf16>
    %c1 = arith.constant 1 : index
    %c0_4 = arith.constant 0 : index
    %c0_5 = arith.constant 0 : index
    %3 = vector.load %arg2[%c1, %c0_4, %c0_5] : memref<9x64x64xbf16, #tpu.memory_space<vmem>>, vector<1x64x64xbf16>
    %4 = vector.shape_cast %3 : vector<1x64x64xbf16> to vector<64x64xbf16>
    %c2 = arith.constant 2 : index
    %c0_6 = arith.constant 0 : index
    %c0_7 = arith.constant 0 : index
    %5 = vector.load %arg2[%c2, %c0_6, %c0_7] : memref<9x64x64xbf16, #tpu.memory_space<vmem>>, vector<1x64x64xbf16>
    %6 = vector.shape_cast %5 : vector<1x64x64xbf16> to vector<64x64xbf16>
    %c3 = arith.constant 3 : index
    %c0_8 = arith.constant 0 : index
    %c0_9 = arith.constant 0 : index
    %7 = vector.load %arg2[%c3, %c0_8, %c0_9] : memref<9x64x64xbf16, #tpu.memory_space<vmem>>, vector<1x64x64xbf16>
    %8 = vector.shape_cast %7 : vector<1x64x64xbf16> to vector<64x64xbf16>
    %c4 = arith.constant 4 : index
    %c0_10 = arith.constant 0 : index
    %c0_11 = arith.constant 0 : index
    %9 = vector.load %arg2[%c4, %c0_10, %c0_11] : memref<9x64x64xbf16, #tpu.memory_space<vmem>>, vector<1x64x64xbf16>
    %10 = vector.shape_cast %9 : vector<1x64x64xbf16> to vector<64x64xbf16>
    %c5 = arith.constant 5 : index
    %c0_12 = arith.constant 0 : index
    %c0_13 = arith.constant 0 : index
    %11 = vector.load %arg2[%c5, %c0_12, %c0_13] : memref<9x64x64xbf16, #tpu.memory_space<vmem>>, vector<1x64x64xbf16>
    %12 = vector.shape_cast %11 : vector<1x64x64xbf16> to vector<64x64xbf16>
    %c6 = arith.constant 6 : index
    %c0_14 = arith.constant 0 : index
    %c0_15 = arith.constant 0 : index
    %13 = vector.load %arg2[%c6, %c0_14, %c0_15] : memref<9x64x64xbf16, #tpu.memory_space<vmem>>, vector<1x64x64xbf16>
    %14 = vector.shape_cast %13 : vector<1x64x64xbf16> to vector<64x64xbf16>
    %c7 = arith.constant 7 : index
    %c0_16 = arith.constant 0 : index
    %c0_17 = arith.constant 0 : index
    %15 = vector.load %arg2[%c7, %c0_16, %c0_17] : memref<9x64x64xbf16, #tpu.memory_space<vmem>>, vector<1x64x64xbf16>
    %16 = vector.shape_cast %15 : vector<1x64x64xbf16> to vector<64x64xbf16>
    %c8 = arith.constant 8 : index
    %c0_18 = arith.constant 0 : index
    %c0_19 = arith.constant 0 : index
    %17 = vector.load %arg2[%c8, %c0_18, %c0_19] : memref<9x64x64xbf16, #tpu.memory_space<vmem>>, vector<1x64x64xbf16>
    %18 = vector.shape_cast %17 : vector<1x64x64xbf16> to vector<64x64xbf16>
    %c0_i32 = arith.constant 0 : i32
    %c2_i32 = arith.constant 2 : i32
    %19 = arith.addi %c0_i32, %c2_i32 : i32
    %c1_i32 = arith.constant 1 : i32
    scf.for %arg6 = %c0_i32 to %19 step %c1_i32  : i32 {
      %cst = arith.constant 0.000000e+00 : f32
      %20 = vector.broadcast %cst : f32 to vector<2x64xf32>
      %c1_i32_21 = arith.constant 1 : i32
      %21 = arith.muli %c1_i32_21, %arg6 : i32
      %c0_i32_22 = arith.constant 0 : i32
      %22 = arith.addi %21, %c0_i32_22 : i32
      %c0_23 = arith.constant 0 : index
      %23 = arith.index_cast %22 : i32 to index
      %c0_24 = arith.constant 0 : index
      %c0_25 = arith.constant 0 : index
      %24 = vector.load %arg1[%c0_23, %23, %c0_24, %c0_25] : memref<1x4x4x64xbf16, #tpu.memory_space<vmem>>, vector<1x1x2x64xbf16>
      %25 = vector.shape_cast %24 : vector<1x1x2x64xbf16> to vector<2x64xbf16>
      %cst_26 = arith.constant dense<0.000000e+00> : vector<2x64xf32>
      %26 = tpu.matmul %25, %2, %cst_26 {dimension_numbers = #tpu.dot_dimension_numbers<[1], [0], [0], [1], [0, 0, 1, 1], [], []>} : vector<2x64xbf16>, vector<64x64xbf16>, vector<2x64xf32> -> vector<2x64xf32>
      %27 = arith.addf %20, %26 : vector<2x64xf32>
      %c1_i32_27 = arith.constant 1 : i32
      %28 = arith.muli %c1_i32_27, %arg6 : i32
      %c0_i32_28 = arith.constant 0 : i32
      %29 = arith.addi %28, %c0_i32_28 : i32
      %c0_29 = arith.constant 0 : index
      %30 = arith.index_cast %29 : i32 to index
      %c1_30 = arith.constant 1 : index
      %c0_31 = arith.constant 0 : index
      %31 = vector.load %arg1[%c0_29, %30, %c1_30, %c0_31] : memref<1x4x4x64xbf16, #tpu.memory_space<vmem>>, vector<1x1x2x64xbf16>
      %32 = vector.shape_cast %31 : vector<1x1x2x64xbf16> to vector<2x64xbf16>
      %cst_32 = arith.constant dense<0.000000e+00> : vector<2x64xf32>
      %33 = tpu.matmul %32, %4, %cst_32 {dimension_numbers = #tpu.dot_dimension_numbers<[1], [0], [0], [1], [0, 0, 1, 1], [], []>} : vector<2x64xbf16>, vector<64x64xbf16>, vector<2x64xf32> -> vector<2x64xf32>
      %34 = arith.addf %27, %33 : vector<2x64xf32>
      %c1_i32_33 = arith.constant 1 : i32
      %35 = arith.muli %c1_i32_33, %arg6 : i32
      %c0_i32_34 = arith.constant 0 : i32
      %36 = arith.addi %35, %c0_i32_34 : i32
      %c0_35 = arith.constant 0 : index
      %37 = arith.index_cast %36 : i32 to index
      %c2_36 = arith.constant 2 : index
      %c0_37 = arith.constant 0 : index
      %38 = vector.load %arg1[%c0_35, %37, %c2_36, %c0_37] : memref<1x4x4x64xbf16, #tpu.memory_space<vmem>>, vector<1x1x2x64xbf16>
      %39 = vector.shape_cast %38 : vector<1x1x2x64xbf16> to vector<2x64xbf16>
      %cst_38 = arith.constant dense<0.000000e+00> : vector<2x64xf32>
      %40 = tpu.matmul %39, %6, %cst_38 {dimension_numbers = #tpu.dot_dimension_numbers<[1], [0], [0], [1], [0, 0, 1, 1], [], []>} : vector<2x64xbf16>, vector<64x64xbf16>, vector<2x64xf32> -> vector<2x64xf32>
      %41 = arith.addf %34, %40 : vector<2x64xf32>
      %c1_i32_39 = arith.constant 1 : i32
      %42 = arith.muli %c1_i32_39, %arg6 : i32
      %c1_i32_40 = arith.constant 1 : i32
      %43 = arith.addi %42, %c1_i32_40 : i32
      %c0_41 = arith.constant 0 : index
      %44 = arith.index_cast %43 : i32 to index
      %c0_42 = arith.constant 0 : index
      %c0_43 = arith.constant 0 : index
      %45 = vector.load %arg1[%c0_41, %44, %c0_42, %c0_43] : memref<1x4x4x64xbf16, #tpu.memory_space<vmem>>, vector<1x1x2x64xbf16>
      %46 = vector.shape_cast %45 : vector<1x1x2x64xbf16> to vector<2x64xbf16>
      %cst_44 = arith.constant dense<0.000000e+00> : vector<2x64xf32>
      %47 = tpu.matmul %46, %8, %cst_44 {dimension_numbers = #tpu.dot_dimension_numbers<[1], [0], [0], [1], [0, 0, 1, 1], [], []>} : vector<2x64xbf16>, vector<64x64xbf16>, vector<2x64xf32> -> vector<2x64xf32>
      %48 = arith.addf %41, %47 : vector<2x64xf32>
      %c1_i32_45 = arith.constant 1 : i32
      %49 = arith.muli %c1_i32_45, %arg6 : i32
      %c1_i32_46 = arith.constant 1 : i32
      %50 = arith.addi %49, %c1_i32_46 : i32
      %c0_47 = arith.constant 0 : index
      %51 = arith.index_cast %50 : i32 to index
      %c1_48 = arith.constant 1 : index
      %c0_49 = arith.constant 0 : index
      %52 = vector.load %arg1[%c0_47, %51, %c1_48, %c0_49] : memref<1x4x4x64xbf16, #tpu.memory_space<vmem>>, vector<1x1x2x64xbf16>
      %53 = vector.shape_cast %52 : vector<1x1x2x64xbf16> to vector<2x64xbf16>
      %cst_50 = arith.constant dense<0.000000e+00> : vector<2x64xf32>
      %54 = tpu.matmul %53, %10, %cst_50 {dimension_numbers = #tpu.dot_dimension_numbers<[1], [0], [0], [1], [0, 0, 1, 1], [], []>} : vector<2x64xbf16>, vector<64x64xbf16>, vector<2x64xf32> -> vector<2x64xf32>
      %55 = arith.addf %48, %54 : vector<2x64xf32>
      %c1_i32_51 = arith.constant 1 : i32
      %56 = arith.muli %c1_i32_51, %arg6 : i32
      %c1_i32_52 = arith.constant 1 : i32
      %57 = arith.addi %56, %c1_i32_52 : i32
      %c0_53 = arith.constant 0 : index
      %58 = arith.index_cast %57 : i32 to index
      %c2_54 = arith.constant 2 : index
      %c0_55 = arith.constant 0 : index
      %59 = vector.load %arg1[%c0_53, %58, %c2_54, %c0_55] : memref<1x4x4x64xbf16, #tpu.memory_space<vmem>>, vector<1x1x2x64xbf16>
      %60 = vector.shape_cast %59 : vector<1x1x2x64xbf16> to vector<2x64xbf16>
      %cst_56 = arith.constant dense<0.000000e+00> : vector<2x64xf32>
      %61 = tpu.matmul %60, %12, %cst_56 {dimension_numbers = #tpu.dot_dimension_numbers<[1], [0], [0], [1], [0, 0, 1, 1], [], []>} : vector<2x64xbf16>, vector<64x64xbf16>, vector<2x64xf32> -> vector<2x64xf32>
      %62 = arith.addf %55, %61 : vector<2x64xf32>
      %c1_i32_57 = arith.constant 1 : i32
      %63 = arith.muli %c1_i32_57, %arg6 : i32
      %c2_i32_58 = arith.constant 2 : i32
      %64 = arith.addi %63, %c2_i32_58 : i32
      %c0_59 = arith.constant 0 : index
      %65 = arith.index_cast %64 : i32 to index
      %c0_60 = arith.constant 0 : index
      %c0_61 = arith.constant 0 : index
      %66 = vector.load %arg1[%c0_59, %65, %c0_60, %c0_61] : memref<1x4x4x64xbf16, #tpu.memory_space<vmem>>, vector<1x1x2x64xbf16>
      %67 = vector.shape_cast %66 : vector<1x1x2x64xbf16> to vector<2x64xbf16>
      %cst_62 = arith.constant dense<0.000000e+00> : vector<2x64xf32>
      %68 = tpu.matmul %67, %14, %cst_62 {dimension_numbers = #tpu.dot_dimension_numbers<[1], [0], [0], [1], [0, 0, 1, 1], [], []>} : vector<2x64xbf16>, vector<64x64xbf16>, vector<2x64xf32> -> vector<2x64xf32>
      %69 = arith.addf %62, %68 : vector<2x64xf32>
      %c1_i32_63 = arith.constant 1 : i32
      %70 = arith.muli %c1_i32_63, %arg6 : i32
      %c2_i32_64 = arith.constant 2 : i32
      %71 = arith.addi %70, %c2_i32_64 : i32
      %c0_65 = arith.constant 0 : index
      %72 = arith.index_cast %71 : i32 to index
      %c1_66 = arith.constant 1 : index
      %c0_67 = arith.constant 0 : index
      %73 = vector.load %arg1[%c0_65, %72, %c1_66, %c0_67] : memref<1x4x4x64xbf16, #tpu.memory_space<vmem>>, vector<1x1x2x64xbf16>
      %74 = vector.shape_cast %73 : vector<1x1x2x64xbf16> to vector<2x64xbf16>
      %cst_68 = arith.constant dense<0.000000e+00> : vector<2x64xf32>
      %75 = tpu.matmul %74, %16, %cst_68 {dimension_numbers = #tpu.dot_dimension_numbers<[1], [0], [0], [1], [0, 0, 1, 1], [], []>} : vector<2x64xbf16>, vector<64x64xbf16>, vector<2x64xf32> -> vector<2x64xf32>
      %76 = arith.addf %69, %75 : vector<2x64xf32>
      %c1_i32_69 = arith.constant 1 : i32
      %77 = arith.muli %c1_i32_69, %arg6 : i32
      %c2_i32_70 = arith.constant 2 : i32
      %78 = arith.addi %77, %c2_i32_70 : i32
      %c0_71 = arith.constant 0 : index
      %79 = arith.index_cast %78 : i32 to index
      %c2_72 = arith.constant 2 : index
      %c0_73 = arith.constant 0 : index
      %80 = vector.load %arg1[%c0_71, %79, %c2_72, %c0_73] : memref<1x4x4x64xbf16, #tpu.memory_space<vmem>>, vector<1x1x2x64xbf16>
      %81 = vector.shape_cast %80 : vector<1x1x2x64xbf16> to vector<2x64xbf16>
      %cst_74 = arith.constant dense<0.000000e+00> : vector<2x64xf32>
      %82 = tpu.matmul %81, %18, %cst_74 {dimension_numbers = #tpu.dot_dimension_numbers<[1], [0], [0], [1], [0, 0, 1, 1], [], []>} : vector<2x64xbf16>, vector<64x64xbf16>, vector<2x64xf32> -> vector<2x64xf32>
      %83 = arith.addf %76, %82 : vector<2x64xf32>
      %84 = vector.broadcast %0 : vector<1x64xf32> to vector<2x64xf32>
      %85 = arith.addf %83, %84 : vector<2x64xf32>
      %c0_75 = arith.constant 0 : index
      %86 = arith.index_cast %arg6 : i32 to index
      %c0_76 = arith.constant 0 : index
      %c0_77 = arith.constant 0 : index
      %87 = vector.load %arg4[%c0_75, %86, %c0_76, %c0_77] : memref<1x2x2x64xbf16, #tpu.memory_space<vmem>>, vector<1x1x2x64xbf16>
      %88 = vector.shape_cast %87 : vector<1x1x2x64xbf16> to vector<2x64xbf16>
      %89 = arith.extf %88 : vector<2x64xbf16> to vector<2x64xf32>
      %90 = arith.addf %85, %89 : vector<2x64xf32>
      %cst_78 = arith.constant 0.000000e+00 : f32
      %91 = vector.broadcast %cst_78 : f32 to vector<2x64xf32>
      %92 = arith.maximumf %90, %91 : vector<2x64xf32>
      %93 = arith.truncf %92 : vector<2x64xf32> to vector<2x64xbf16>
      %c0_79 = arith.constant 0 : index
      %94 = arith.index_cast %arg6 : i32 to index
      %c0_80 = arith.constant 0 : index
      %c0_81 = arith.constant 0 : index
      %95 = vector.load %arg5[%c0_79, %94, %c0_80, %c0_81] : memref<1x2x2x64xbf16, #tpu.memory_space<vmem>>, vector<1x1x2x64xbf16>
      %96 = vector.shape_cast %95 : vector<1x1x2x64xbf16> to vector<2x64xbf16>
      %97 = vector.shape_cast %93 : vector<2x64xbf16> to vector<1x1x2x64xbf16>
      tpu.vector_store %arg5[%c0_79, %94, %c0_80, %c0_81], %97 {strides = array<i32>} : memref<1x2x2x64xbf16, #tpu.memory_space<vmem>>, vector<1x1x2x64xbf16>,
    }
    %c2_i32_20 = arith.constant 2 : i32
    return
  }
  func.func @transform_0(%arg0: i32) -> (i32, i32, i32, i32) {
    %c0_i32 = arith.constant 0 : i32
    %c0_i32_0 = arith.constant 0 : i32
    %c0_i32_1 = arith.constant 0 : i32
    %c0_i32_2 = arith.constant 0 : i32
    return %arg0, %c0_i32, %c0_i32_0, %c0_i32_1 : i32, i32, i32, i32
  }
  func.func @transform_1(%arg0: i32) -> (i32, i32, i32) {
    %c0_i32 = arith.constant 0 : i32
    %c0_i32_0 = arith.constant 0 : i32
    %c0_i32_1 = arith.constant 0 : i32
    %c0_i32_2 = arith.constant 0 : i32
    return %c0_i32, %c0_i32_0, %c0_i32_1 : i32, i32, i32
  }
  func.func @transform_2(%arg0: i32) -> (i32, i32) {
    %c0_i32 = arith.constant 0 : i32
    %c0_i32_0 = arith.constant 0 : i32
    %c0_i32_1 = arith.constant 0 : i32
    return %c0_i32, %c0_i32_0 : i32, i32
  }
  func.func @transform_3(%arg0: i32) -> (i32, i32, i32, i32) {
    %c0_i32 = arith.constant 0 : i32
    %c0_i32_0 = arith.constant 0 : i32
    %c0_i32_1 = arith.constant 0 : i32
    %c0_i32_2 = arith.constant 0 : i32
    return %arg0, %c0_i32, %c0_i32_0, %c0_i32_1 : i32, i32, i32, i32
  }
  func.func @transform_4(%arg0: i32) -> (i32, i32, i32, i32) {
    %c0_i32 = arith.constant 0 : i32
    %c0_i32_0 = arith.constant 0 : i32
    %c0_i32_1 = arith.constant 0 : i32
    %c0_i32_2 = arith.constant 0 : i32
    return %arg0, %c0_i32, %c0_i32_0, %c0_i32_1 : i32, i32, i32, i32
  }
}

module attributes {stable_mosaic.version = 11 : i64} {
  func.func @_conv3x3_kernel(%arg0: i32, %arg1: memref<1x4x4x64xbf16, #tpu.memory_space<vmem>>, %arg2: memref<9x64x64xbf16, #tpu.memory_space<vmem>>, %arg3: memref<1x64xf32, #tpu.memory_space<vmem>>, %arg4: memref<1x2x2x64xbf16, #tpu.memory_space<vmem>>) attributes {dimension_semantics = [#tpu.dimension_semantics<parallel>], iteration_bounds = array<i64: 2>, scalar_prefetch = 0 : i64, scratch_operands = 0 : i64, tpu.core_type = #tpu.core_type<tc>, window_params = [{transform_indices = @transform_0, window_bounds = array<i64: 1, 4, 4, 64>}, {pipeline_mode = #tpu.pipeline_mode<synchronous>, transform_indices = @transform_1, window_bounds = array<i64: 9, 64, 64>}, {pipeline_mode = #tpu.pipeline_mode<synchronous>, transform_indices = @transform_2, window_bounds = array<i64: 1, 64>}, {transform_indices = @transform_3, window_bounds = array<i64: 1, 2, 2, 64>}]} {
    %c0 = arith.constant 0 : index
    %c0_0 = arith.constant 0 : index
    %0 = vector.load %arg3[%c0, %c0_0] : memref<1x64xf32, #tpu.memory_space<vmem>>, vector<1x64xf32>
    %c0_1 = arith.constant 0 : index
    %c0_2 = arith.constant 0 : index
    %c0_3 = arith.constant 0 : index
    %1 = vector.load %arg2[%c0_1, %c0_2, %c0_3] : memref<9x64x64xbf16, #tpu.memory_space<vmem>>, vector<1x64x64xbf16>
    %2 = vector.shape_cast %1 : vector<1x64x64xbf16> to vector<64x64xbf16>
    %c1 = arith.constant 1 : index
    %c0_4 = arith.constant 0 : index
    %c0_5 = arith.constant 0 : index
    %3 = vector.load %arg2[%c1, %c0_4, %c0_5] : memref<9x64x64xbf16, #tpu.memory_space<vmem>>, vector<1x64x64xbf16>
    %4 = vector.shape_cast %3 : vector<1x64x64xbf16> to vector<64x64xbf16>
    %c2 = arith.constant 2 : index
    %c0_6 = arith.constant 0 : index
    %c0_7 = arith.constant 0 : index
    %5 = vector.load %arg2[%c2, %c0_6, %c0_7] : memref<9x64x64xbf16, #tpu.memory_space<vmem>>, vector<1x64x64xbf16>
    %6 = vector.shape_cast %5 : vector<1x64x64xbf16> to vector<64x64xbf16>
    %c3 = arith.constant 3 : index
    %c0_8 = arith.constant 0 : index
    %c0_9 = arith.constant 0 : index
    %7 = vector.load %arg2[%c3, %c0_8, %c0_9] : memref<9x64x64xbf16, #tpu.memory_space<vmem>>, vector<1x64x64xbf16>
    %8 = vector.shape_cast %7 : vector<1x64x64xbf16> to vector<64x64xbf16>
    %c4 = arith.constant 4 : index
    %c0_10 = arith.constant 0 : index
    %c0_11 = arith.constant 0 : index
    %9 = vector.load %arg2[%c4, %c0_10, %c0_11] : memref<9x64x64xbf16, #tpu.memory_space<vmem>>, vector<1x64x64xbf16>
    %10 = vector.shape_cast %9 : vector<1x64x64xbf16> to vector<64x64xbf16>
    %c5 = arith.constant 5 : index
    %c0_12 = arith.constant 0 : index
    %c0_13 = arith.constant 0 : index
    %11 = vector.load %arg2[%c5, %c0_12, %c0_13] : memref<9x64x64xbf16, #tpu.memory_space<vmem>>, vector<1x64x64xbf16>
    %12 = vector.shape_cast %11 : vector<1x64x64xbf16> to vector<64x64xbf16>
    %c6 = arith.constant 6 : index
    %c0_14 = arith.constant 0 : index
    %c0_15 = arith.constant 0 : index
    %13 = vector.load %arg2[%c6, %c0_14, %c0_15] : memref<9x64x64xbf16, #tpu.memory_space<vmem>>, vector<1x64x64xbf16>
    %14 = vector.shape_cast %13 : vector<1x64x64xbf16> to vector<64x64xbf16>
    %c7 = arith.constant 7 : index
    %c0_16 = arith.constant 0 : index
    %c0_17 = arith.constant 0 : index
    %15 = vector.load %arg2[%c7, %c0_16, %c0_17] : memref<9x64x64xbf16, #tpu.memory_space<vmem>>, vector<1x64x64xbf16>
    %16 = vector.shape_cast %15 : vector<1x64x64xbf16> to vector<64x64xbf16>
    %c8 = arith.constant 8 : index
    %c0_18 = arith.constant 0 : index
    %c0_19 = arith.constant 0 : index
    %17 = vector.load %arg2[%c8, %c0_18, %c0_19] : memref<9x64x64xbf16, #tpu.memory_space<vmem>>, vector<1x64x64xbf16>
    %18 = vector.shape_cast %17 : vector<1x64x64xbf16> to vector<64x64xbf16>
    %c0_i32 = arith.constant 0 : i32
    %c2_i32 = arith.constant 2 : i32
    %19 = arith.addi %c0_i32, %c2_i32 : i32
    %c1_i32 = arith.constant 1 : i32
    scf.for %arg5 = %c0_i32 to %19 step %c1_i32  : i32 {
      %cst = arith.constant 0.000000e+00 : f32
      %20 = vector.broadcast %cst : f32 to vector<2x64xf32>
      %c1_i32_21 = arith.constant 1 : i32
      %21 = arith.muli %c1_i32_21, %arg5 : i32
      %c0_i32_22 = arith.constant 0 : i32
      %22 = arith.addi %21, %c0_i32_22 : i32
      %c0_23 = arith.constant 0 : index
      %23 = arith.index_cast %22 : i32 to index
      %c0_24 = arith.constant 0 : index
      %c0_25 = arith.constant 0 : index
      %24 = vector.load %arg1[%c0_23, %23, %c0_24, %c0_25] : memref<1x4x4x64xbf16, #tpu.memory_space<vmem>>, vector<1x1x2x64xbf16>
      %25 = vector.shape_cast %24 : vector<1x1x2x64xbf16> to vector<2x64xbf16>
      %cst_26 = arith.constant dense<0.000000e+00> : vector<2x64xf32>
      %26 = tpu.matmul %25, %2, %cst_26 {dimension_numbers = #tpu.dot_dimension_numbers<[1], [0], [0], [1], [0, 0, 1, 1], [], []>} : vector<2x64xbf16>, vector<64x64xbf16>, vector<2x64xf32> -> vector<2x64xf32>
      %27 = arith.addf %20, %26 : vector<2x64xf32>
      %c1_i32_27 = arith.constant 1 : i32
      %28 = arith.muli %c1_i32_27, %arg5 : i32
      %c0_i32_28 = arith.constant 0 : i32
      %29 = arith.addi %28, %c0_i32_28 : i32
      %c0_29 = arith.constant 0 : index
      %30 = arith.index_cast %29 : i32 to index
      %c1_30 = arith.constant 1 : index
      %c0_31 = arith.constant 0 : index
      %31 = vector.load %arg1[%c0_29, %30, %c1_30, %c0_31] : memref<1x4x4x64xbf16, #tpu.memory_space<vmem>>, vector<1x1x2x64xbf16>
      %32 = vector.shape_cast %31 : vector<1x1x2x64xbf16> to vector<2x64xbf16>
      %cst_32 = arith.constant dense<0.000000e+00> : vector<2x64xf32>
      %33 = tpu.matmul %32, %4, %cst_32 {dimension_numbers = #tpu.dot_dimension_numbers<[1], [0], [0], [1], [0, 0, 1, 1], [], []>} : vector<2x64xbf16>, vector<64x64xbf16>, vector<2x64xf32> -> vector<2x64xf32>
      %34 = arith.addf %27, %33 : vector<2x64xf32>
      %c1_i32_33 = arith.constant 1 : i32
      %35 = arith.muli %c1_i32_33, %arg5 : i32
      %c0_i32_34 = arith.constant 0 : i32
      %36 = arith.addi %35, %c0_i32_34 : i32
      %c0_35 = arith.constant 0 : index
      %37 = arith.index_cast %36 : i32 to index
      %c2_36 = arith.constant 2 : index
      %c0_37 = arith.constant 0 : index
      %38 = vector.load %arg1[%c0_35, %37, %c2_36, %c0_37] : memref<1x4x4x64xbf16, #tpu.memory_space<vmem>>, vector<1x1x2x64xbf16>
      %39 = vector.shape_cast %38 : vector<1x1x2x64xbf16> to vector<2x64xbf16>
      %cst_38 = arith.constant dense<0.000000e+00> : vector<2x64xf32>
      %40 = tpu.matmul %39, %6, %cst_38 {dimension_numbers = #tpu.dot_dimension_numbers<[1], [0], [0], [1], [0, 0, 1, 1], [], []>} : vector<2x64xbf16>, vector<64x64xbf16>, vector<2x64xf32> -> vector<2x64xf32>
      %41 = arith.addf %34, %40 : vector<2x64xf32>
      %c1_i32_39 = arith.constant 1 : i32
      %42 = arith.muli %c1_i32_39, %arg5 : i32
      %c1_i32_40 = arith.constant 1 : i32
      %43 = arith.addi %42, %c1_i32_40 : i32
      %c0_41 = arith.constant 0 : index
      %44 = arith.index_cast %43 : i32 to index
      %c0_42 = arith.constant 0 : index
      %c0_43 = arith.constant 0 : index
      %45 = vector.load %arg1[%c0_41, %44, %c0_42, %c0_43] : memref<1x4x4x64xbf16, #tpu.memory_space<vmem>>, vector<1x1x2x64xbf16>
      %46 = vector.shape_cast %45 : vector<1x1x2x64xbf16> to vector<2x64xbf16>
      %cst_44 = arith.constant dense<0.000000e+00> : vector<2x64xf32>
      %47 = tpu.matmul %46, %8, %cst_44 {dimension_numbers = #tpu.dot_dimension_numbers<[1], [0], [0], [1], [0, 0, 1, 1], [], []>} : vector<2x64xbf16>, vector<64x64xbf16>, vector<2x64xf32> -> vector<2x64xf32>
      %48 = arith.addf %41, %47 : vector<2x64xf32>
      %c1_i32_45 = arith.constant 1 : i32
      %49 = arith.muli %c1_i32_45, %arg5 : i32
      %c1_i32_46 = arith.constant 1 : i32
      %50 = arith.addi %49, %c1_i32_46 : i32
      %c0_47 = arith.constant 0 : index
      %51 = arith.index_cast %50 : i32 to index
      %c1_48 = arith.constant 1 : index
      %c0_49 = arith.constant 0 : index
      %52 = vector.load %arg1[%c0_47, %51, %c1_48, %c0_49] : memref<1x4x4x64xbf16, #tpu.memory_space<vmem>>, vector<1x1x2x64xbf16>
      %53 = vector.shape_cast %52 : vector<1x1x2x64xbf16> to vector<2x64xbf16>
      %cst_50 = arith.constant dense<0.000000e+00> : vector<2x64xf32>
      %54 = tpu.matmul %53, %10, %cst_50 {dimension_numbers = #tpu.dot_dimension_numbers<[1], [0], [0], [1], [0, 0, 1, 1], [], []>} : vector<2x64xbf16>, vector<64x64xbf16>, vector<2x64xf32> -> vector<2x64xf32>
      %55 = arith.addf %48, %54 : vector<2x64xf32>
      %c1_i32_51 = arith.constant 1 : i32
      %56 = arith.muli %c1_i32_51, %arg5 : i32
      %c1_i32_52 = arith.constant 1 : i32
      %57 = arith.addi %56, %c1_i32_52 : i32
      %c0_53 = arith.constant 0 : index
      %58 = arith.index_cast %57 : i32 to index
      %c2_54 = arith.constant 2 : index
      %c0_55 = arith.constant 0 : index
      %59 = vector.load %arg1[%c0_53, %58, %c2_54, %c0_55] : memref<1x4x4x64xbf16, #tpu.memory_space<vmem>>, vector<1x1x2x64xbf16>
      %60 = vector.shape_cast %59 : vector<1x1x2x64xbf16> to vector<2x64xbf16>
      %cst_56 = arith.constant dense<0.000000e+00> : vector<2x64xf32>
      %61 = tpu.matmul %60, %12, %cst_56 {dimension_numbers = #tpu.dot_dimension_numbers<[1], [0], [0], [1], [0, 0, 1, 1], [], []>} : vector<2x64xbf16>, vector<64x64xbf16>, vector<2x64xf32> -> vector<2x64xf32>
      %62 = arith.addf %55, %61 : vector<2x64xf32>
      %c1_i32_57 = arith.constant 1 : i32
      %63 = arith.muli %c1_i32_57, %arg5 : i32
      %c2_i32_58 = arith.constant 2 : i32
      %64 = arith.addi %63, %c2_i32_58 : i32
      %c0_59 = arith.constant 0 : index
      %65 = arith.index_cast %64 : i32 to index
      %c0_60 = arith.constant 0 : index
      %c0_61 = arith.constant 0 : index
      %66 = vector.load %arg1[%c0_59, %65, %c0_60, %c0_61] : memref<1x4x4x64xbf16, #tpu.memory_space<vmem>>, vector<1x1x2x64xbf16>
      %67 = vector.shape_cast %66 : vector<1x1x2x64xbf16> to vector<2x64xbf16>
      %cst_62 = arith.constant dense<0.000000e+00> : vector<2x64xf32>
      %68 = tpu.matmul %67, %14, %cst_62 {dimension_numbers = #tpu.dot_dimension_numbers<[1], [0], [0], [1], [0, 0, 1, 1], [], []>} : vector<2x64xbf16>, vector<64x64xbf16>, vector<2x64xf32> -> vector<2x64xf32>
      %69 = arith.addf %62, %68 : vector<2x64xf32>
      %c1_i32_63 = arith.constant 1 : i32
      %70 = arith.muli %c1_i32_63, %arg5 : i32
      %c2_i32_64 = arith.constant 2 : i32
      %71 = arith.addi %70, %c2_i32_64 : i32
      %c0_65 = arith.constant 0 : index
      %72 = arith.index_cast %71 : i32 to index
      %c1_66 = arith.constant 1 : index
      %c0_67 = arith.constant 0 : index
      %73 = vector.load %arg1[%c0_65, %72, %c1_66, %c0_67] : memref<1x4x4x64xbf16, #tpu.memory_space<vmem>>, vector<1x1x2x64xbf16>
      %74 = vector.shape_cast %73 : vector<1x1x2x64xbf16> to vector<2x64xbf16>
      %cst_68 = arith.constant dense<0.000000e+00> : vector<2x64xf32>
      %75 = tpu.matmul %74, %16, %cst_68 {dimension_numbers = #tpu.dot_dimension_numbers<[1], [0], [0], [1], [0, 0, 1, 1], [], []>} : vector<2x64xbf16>, vector<64x64xbf16>, vector<2x64xf32> -> vector<2x64xf32>
      %76 = arith.addf %69, %75 : vector<2x64xf32>
      %c1_i32_69 = arith.constant 1 : i32
      %77 = arith.muli %c1_i32_69, %arg5 : i32
      %c2_i32_70 = arith.constant 2 : i32
      %78 = arith.addi %77, %c2_i32_70 : i32
      %c0_71 = arith.constant 0 : index
      %79 = arith.index_cast %78 : i32 to index
      %c2_72 = arith.constant 2 : index
      %c0_73 = arith.constant 0 : index
      %80 = vector.load %arg1[%c0_71, %79, %c2_72, %c0_73] : memref<1x4x4x64xbf16, #tpu.memory_space<vmem>>, vector<1x1x2x64xbf16>
      %81 = vector.shape_cast %80 : vector<1x1x2x64xbf16> to vector<2x64xbf16>
      %cst_74 = arith.constant dense<0.000000e+00> : vector<2x64xf32>
      %82 = tpu.matmul %81, %18, %cst_74 {dimension_numbers = #tpu.dot_dimension_numbers<[1], [0], [0], [1], [0, 0, 1, 1], [], []>} : vector<2x64xbf16>, vector<64x64xbf16>, vector<2x64xf32> -> vector<2x64xf32>
      %83 = arith.addf %76, %82 : vector<2x64xf32>
      %84 = vector.broadcast %0 : vector<1x64xf32> to vector<2x64xf32>
      %85 = arith.addf %83, %84 : vector<2x64xf32>
      %cst_75 = arith.constant 0.000000e+00 : f32
      %86 = vector.broadcast %cst_75 : f32 to vector<2x64xf32>
      %87 = arith.maximumf %85, %86 : vector<2x64xf32>
      %88 = arith.truncf %87 : vector<2x64xf32> to vector<2x64xbf16>
      %c0_76 = arith.constant 0 : index
      %89 = arith.index_cast %arg5 : i32 to index
      %c0_77 = arith.constant 0 : index
      %c0_78 = arith.constant 0 : index
      %90 = vector.load %arg4[%c0_76, %89, %c0_77, %c0_78] : memref<1x2x2x64xbf16, #tpu.memory_space<vmem>>, vector<1x1x2x64xbf16>
      %91 = vector.shape_cast %90 : vector<1x1x2x64xbf16> to vector<2x64xbf16>
      %92 = vector.shape_cast %88 : vector<2x64xbf16> to vector<1x1x2x64xbf16>
      tpu.vector_store %arg4[%c0_76, %89, %c0_77, %c0_78], %92 {strides = array<i32>} : memref<1x2x2x64xbf16, #tpu.memory_space<vmem>>, vector<1x1x2x64xbf16>,
    }
    %c2_i32_20 = arith.constant 2 : i32
    return
  }
  func.func @transform_0(%arg0: i32) -> (i32, i32, i32, i32) {
    %c0_i32 = arith.constant 0 : i32
    %c0_i32_0 = arith.constant 0 : i32
    %c0_i32_1 = arith.constant 0 : i32
    %c0_i32_2 = arith.constant 0 : i32
    return %arg0, %c0_i32, %c0_i32_0, %c0_i32_1 : i32, i32, i32, i32
  }
  func.func @transform_1(%arg0: i32) -> (i32, i32, i32) {
    %c0_i32 = arith.constant 0 : i32
    %c0_i32_0 = arith.constant 0 : i32
    %c0_i32_1 = arith.constant 0 : i32
    %c0_i32_2 = arith.constant 0 : i32
    return %c0_i32, %c0_i32_0, %c0_i32_1 : i32, i32, i32
  }
  func.func @transform_2(%arg0: i32) -> (i32, i32) {
    %c0_i32 = arith.constant 0 : i32
    %c0_i32_0 = arith.constant 0 : i32
    %c0_i32_1 = arith.constant 0 : i32
    return %c0_i32, %c0_i32_0 : i32, i32
  }
  func.func @transform_3(%arg0: i32) -> (i32, i32, i32, i32) {
    %c0_i32 = arith.constant 0 : i32
    %c0_i32_0 = arith.constant 0 : i32
    %c0_i32_1 = arith.constant 0 : i32
    %c0_i32_2 = arith.constant 0 : i32
    return %arg0, %c0_i32, %c0_i32_0, %c0_i32_1 : i32, i32, i32, i32
  }
}

module attributes {stable_mosaic.version = 11 : i64} {
  func.func @_gemm_shift_kernel(%arg0: i32, %arg1: memref<8x64xbf16, #tpu.memory_space<vmem>>, %arg2: memref<64x32xbf16, #tpu.memory_space<vmem>>, %arg3: memref<1x32xf32, #tpu.memory_space<vmem>>, %arg4: memref<8x32xf32, #tpu.memory_space<vmem>>) attributes {dimension_semantics = [#tpu.dimension_semantics<parallel>], iteration_bounds = array<i64: 1>, scalar_prefetch = 0 : i64, scratch_operands = 0 : i64, tpu.core_type = #tpu.core_type<tc>, window_params = [{transform_indices = @transform_0, window_bounds = array<i64: 8, 64>}, {pipeline_mode = #tpu.pipeline_mode<synchronous>, transform_indices = @transform_1, window_bounds = array<i64: 64, 32>}, {pipeline_mode = #tpu.pipeline_mode<synchronous>, transform_indices = @transform_2, window_bounds = array<i64: 1, 32>}, {transform_indices = @transform_3, window_bounds = array<i64: 8, 32>}]} {
    %c0 = arith.constant 0 : index
    %c0_0 = arith.constant 0 : index
    %0 = vector.load %arg1[%c0, %c0_0] : memref<8x64xbf16, #tpu.memory_space<vmem>>, vector<8x64xbf16>
    %c0_1 = arith.constant 0 : index
    %c0_2 = arith.constant 0 : index
    %1 = vector.load %arg2[%c0_1, %c0_2] : memref<64x32xbf16, #tpu.memory_space<vmem>>, vector<64x32xbf16>
    %cst = arith.constant dense<0.000000e+00> : vector<8x32xf32>
    %2 = tpu.matmul %0, %1, %cst {dimension_numbers = #tpu.dot_dimension_numbers<[1], [0], [0], [1], [0, 0, 1, 1], [], []>} : vector<8x64xbf16>, vector<64x32xbf16>, vector<8x32xf32> -> vector<8x32xf32>
    %c0_3 = arith.constant 0 : index
    %c0_4 = arith.constant 0 : index
    %3 = vector.load %arg3[%c0_3, %c0_4] : memref<1x32xf32, #tpu.memory_space<vmem>>, vector<1x32xf32>
    %4 = vector.broadcast %3 : vector<1x32xf32> to vector<8x32xf32>
    %5 = arith.addf %2, %4 : vector<8x32xf32>
    %c0_5 = arith.constant 0 : index
    %c0_6 = arith.constant 0 : index
    %6 = vector.load %arg4[%c0_5, %c0_6] : memref<8x32xf32, #tpu.memory_space<vmem>>, vector<8x32xf32>
    tpu.vector_store %arg4[%c0_5, %c0_6], %5 {strides = array<i32>} : memref<8x32xf32, #tpu.memory_space<vmem>>, vector<8x32xf32>,
    return
  }
  func.func @transform_0(%arg0: i32) -> (i32, i32) {
    %c0_i32 = arith.constant 0 : i32
    %c0_i32_0 = arith.constant 0 : i32
    return %arg0, %c0_i32 : i32, i32
  }
  func.func @transform_1(%arg0: i32) -> (i32, i32) {
    %c0_i32 = arith.constant 0 : i32
    %c0_i32_0 = arith.constant 0 : i32
    %c0_i32_1 = arith.constant 0 : i32
    return %c0_i32, %c0_i32_0 : i32, i32
  }
  func.func @transform_2(%arg0: i32) -> (i32, i32) {
    %c0_i32 = arith.constant 0 : i32
    %c0_i32_0 = arith.constant 0 : i32
    %c0_i32_1 = arith.constant 0 : i32
    return %c0_i32, %c0_i32_0 : i32, i32
  }
  func.func @transform_3(%arg0: i32) -> (i32, i32) {
    %c0_i32 = arith.constant 0 : i32
    %c0_i32_0 = arith.constant 0 : i32
    return %arg0, %c0_i32 : i32, i32
  }
}

</mosaic_0001>

<bundles_post_ra>
// kernel: _lambda_.17
= control target key start
LH: loop header
LB: loop body
LE: loop exit
PB: predicated region body
PF: predicated region fallthrough
CT: control target
= control target key end

     0   :  { %s723_s12 = smov 0   ;;  %s847_s0 = inlined_call_operand.vmem [shape: bf16[2,18,18,1], index: 0, kind: input, shape index: {}]   ;;  %s848_s1 = inlined_call_operand.vmem [shape: bf16[9,1,8], index: 1, kind: input, shape index: {}]   ;;  %s849_s2 = inlined_call_operand.vmem [shape: f32[1,8], index: 2, kind: input, shape index: {}]   ;;  %s850_s3 = inlined_call_operand.vmem [shape: bf16[2,16,16,8], index: 3, kind: output, shape index: {}]  }
   0x1 LB: > { %s595_s13 = sadd.s32 4294967295, %s696_s12   ;;  %p599_p0 = scmp.ge.s32.totalorder %s696_s12, 1  ;;  %s696_s12 = sphi %s723_s12, %s13_s12  }
   0x2   : > { %p137_p1 = scmp.lt.s32.totalorder %s696_s12, 3 }
   0x4   : > { %p138_p2 = pnand %p599_p0, %p137_p1 }
   0x5   : > { %p161_p3 = scmp.lt.s32.totalorder (!%p138_p2), %s595_s13, 1  ;;  %s791_s17 = smov (!%p138_p2), 0  }
   0x6   : > { %141 = sbr.rel (%p138_p2) target bundleno = 205 (0xcd), region = 32 }
   0xb   : > { %v734_v0 = vld [vmem:[%s849_s2] sm:$0x1]  ;;  %v744_v2 = vld [vmem:[%s848_s1 + $0x1] sm:$0x1]  ;;  %v749_v3 = vld [vmem:[%s848_s1 + $0x2] sm:$0x1] }
   0xc   : > { %v739_v1 = vld [vmem:[%s848_s1] sm:$0x1]  ;;  %v754_v4 = vld [vmem:[%s848_s1 + $0x3] sm:$0x1]  ;;  %s852_s13 = smov (!%p161_p3, %s595_s13), 1 }
   0xd   : > { %v759_v5 = vld [vmem:[%s848_s1 + $0x4] sm:$0x1]  ;;  %v764_v6 = vld [vmem:[%s848_s1 + $0x5] sm:$0x1]  ;;  %v769_v7 = vld [vmem:[%s848_s1 + $0x6] sm:$0x1] }
   0xe   : > { %v774_v8 = vld [vmem:[%s848_s1 + $0x7] sm:$0x1]  ;;  %v779_v9 = vld [vmem:[%s848_s1 + $0x8] sm:$0x1]  ;;  %s665_s7 = smul.u32 216, %s852_s13  ;;  %s645_s8 = sshll.u32 %s852_s13, 7 }
   0xf   : > { %s784_s11 = scalar_lea.vmem %s850_s3, %s645_s8 }
  0x10   : > { %s789_s16 = scalar_lea.vmem %s847_s0, %s665_s7 }
  0x11 LB: >> { %vm227_vm0 = vcmask 1040384   ;;  %v702_v10 = vmov 0   ;;  %s646_s13 = smul.u32 12, %s700_s17  ;;  %vm223_vm1 = vcmask 7168   ;;  %vm270_vm2 = vcmask 1046528   ;;  %s649_s19 = sshll.u32 %s700_s17, 3  ;;  %s700_s17 = sphi %s791_s17, %s195_s17  }
  0x12   : >> { %v229_v11 = vsel %vm227_vm0, 65535, %v702_v10  ;;  %vm210_vm3 = vsmask.f32 7424  ;;  %s521_s20 = scalar_lea.vmem %s784_s11, %s649_s19  ;;  %vm522_vm4 = vcmask 60416   ;;  %s195_s17 = sadd.s32 1, %s700_s17  }
  0x13   : >> { %v278_v12 = vand.u32 %v749_v3, %v229_v11  ;;  %v231_v13 = vand.u32 %v744_v2, %v229_v11  ;;  %v250_v14 = vand.u32 %v229_v11, %v739_v1  ;;  %v311_v15 = vand.u32 %v754_v4, %v229_v11  ;;  %s806_s18 = scalar_lea.vmem %s789_s16, %s646_s13  ;;  %p192_p4 = scmp.ge.s32.totalorder %s195_s17, 16  }
  0x14   : >> { %v356_v16 = vand.u32 %v759_v5, %v229_v11  ;;  %v418_v17 = vand.u32 %v769_v7, %v229_v11  ;;  %v463_v18 = vand.u32 %v774_v8, %v229_v11  ;;  %v385_v19 = vand.u32 %v764_v6, %v229_v11  ;;  %v658_v20 = vld [vmem:[%s806_s18] sm:$0xf0]  ;;  %v201_v21 = vld [vmem:[%s806_s18 + $0x8] sm:$0x1]  ;;  %v659_v22 = vld [vmem:[%s806_s18] sm:$0xe] }
  0x15   : >> { %287 = vmatpush.bf16.msra.mxu2 %v278_v12  ;;  %240 = vmatpush.bf16.msra.mxu0 %v231_v13  ;;  %v207_v23 = vunpack.c.l.b16 %v201_v21  ;;  %v660_v24 = vor.u32 %v659_v22, %v658_v20  ;;  %v651_v25 = vld [vmem:[%s806_s18] sm:$0xff]   ;;  %v647_v26 = vld [vmem:[%s806_s18 + $0xc] sm:$0xff]  ;;  %v624_v31 = vld [vmem:[%s806_s18 + $0x14] sm:$0x1]  ;;  %v492_v47 = vand.u32 %v779_v9, %v229_v11 }
  0x16   : >> { %259 = vmatpush.bf16.msra.mxu1 %v250_v14  ;;  %320 = vmatpush.bf16.msra.mxu3 %v311_v15  ;;  %v212_v27 = vshrl.u32 %v651_v25, 16  ;;  %v214_v28 = vshll.u32 %v651_v25, 16  ;;  %v622_v29 = vld [vmem:[%s806_s18 + $0xc] sm:$0xff]   ;;  %v661_v32 = vld [vmem:[%s806_s18 + $0x18] sm:$0xff]   ;;  %v637_v35 = vld [vmem:[%s806_s18 + $0x20] sm:$0x1]  ;;  %v337_v43 = vunpack.c.l.b16 %v624_v31 }
  0x17   : >> { %v683_v30 = vld [vmem:[%s806_s18 + $0xc] sm:$0xf0]  ;;  %v209_v33 = vpack.c.b16 %v207_v23, %v207_v23  ;;  %v271_v34 = vrot.slane %v660_v24, 1  ;;  %v684_v36 = vld [vmem:[%s806_s18 + $0xc] sm:$0xe]  ;;  %v444_v38 = vunpack.c.l.b16 %v637_v35  ;;  %v450_v41 = vshll.u32 %v661_v32, 16 }
  0x18   : >> { %v216_v37 = vrot.slane %v214_v28, 1  ;;  %v448_v48 = vshrl.u32 %v661_v32, 16  ;;  %v685_v51 = vor.u32 %v684_v36, %v683_v30  ;;  %v339_v53 = vpack.c.b16 %v337_v43, %v337_v43  ;;  %v648_v12 = vld [vmem:[%s806_s18 + $0x18] sm:$0xff] }
  0x19   : >> { %365 = vmatpush.bf16.msrb.mxu0 %v356_v16  ;;  %427 = vmatpush.bf16.msrb.mxu2 %v418_v17  ;;  %v272_v39 = vrot.slane %v209_v33, 1  ;;  %v219_v40 = vshll.u32 %v209_v33, 16  ;;  %v446_v44 = vpack.c.b16 %v444_v38, %v444_v38  ;;  %v452_v49 = vrot.slane %v450_v41, 1  ;;  %v662_v14 = vld [vmem:[%s806_s18 + $0x18] sm:$0xf0] }
  0x1a   : >> { %472 = vmatpush.bf16.msrb.mxu3 %v463_v18  ;;  %394 = vmatpush.bf16.msrb.mxu1 %v385_v19  ;;  %v217_v42 = vor.u32 %v216_v37, %v212_v27  ;;  %v343_v54 = vshll.u32 %v622_v29, 16  ;;  %v378_v57 = vrot.slane %v685_v51, 1  ;;  %v379_v58 = vrot.slane %v339_v53, 1  ;;  %v663_v15 = vld [vmem:[%s806_s18 + $0x18] sm:$0xe] }
  0x1b   : >> { %613 = vmatmul.msk.bf16.vlgmr.msra.gmra.mxu1 %vm223_vm1, %v651_v25  ;;  %621 = vmatmul.msk.bf16.vlgmr.msra.gmra.mxu3 %vm223_vm1, %v647_v26  ;;  %v273_v45 = vsel %vm270_vm2, %v271_v34, %v272_v39  ;;  %v221_v46 = vrot.slane %v219_v40, 1  ;;  %v455_v50 = vshll.u32 %v446_v44, 16  ;;  %v453_v55 = vor.u32 %v452_v49, %v448_v48 }
  0x1c   : >> { %614 = vmatmul.msk.bf16.vlgmr.msra.gmra.mxu2 %vm223_vm1, %v273_v45  ;;  %v341_v59 = vshrl.u32 %v622_v29, 16  ;;  %v345_v60 = vrot.slane %v343_v54, 1  ;;  %v348_v61 = vshll.u32 %v339_v53, 16  ;;  %v380_v63 = vsel %vm270_vm2, %v378_v57, %v379_v58 }
  0x1d   : >> { %v222_v52 = vsel %vm210_vm3, %v217_v42, %v221_v46  ;;  %v457_v56 = vrot.slane %v455_v50, 1  ;;  %v664_v16 = vor.u32 %v663_v15, %v662_v14  ;;  %v486_v18 = vrot.slane %v446_v44, 1 }
  0x1e   : >> { %612 = vmatmul.msk.bf16.vlgmr.msra.gmra.mxu0 %vm223_vm1, %v222_v52  ;;  %v346_v10 = vor.u32 %v345_v60, %v341_v59  ;;  %v350_v11 = vrot.slane %v348_v61, 1  ;;  %v511_v46 = vperm.slane %v734_v0, 0 }
  0x1f   : >> { %501 = vmatpush.bf16.msra.mxu0 %v492_v47  ;;  %v458_v62 = vsel %vm210_vm3, %v453_v55, %v457_v56  ;;  %v485_v17 = vrot.slane %v664_v16, 1 }
  0x20   : >> { %v351_v13 = vsel %vm210_vm3, %v346_v10, %v350_v11 }
  0x21   : >> { %v487_v19 = vsel %vm270_vm2, %v485_v17, %v486_v18 }
  0x2b   : >> { %638 = vmatmul.msk.bf16.vlgmr.msrb.gmra.mxu3 %vm223_vm1, %v458_v62  ;;  %627 = vmatmul.msk.bf16.vlgmr.msrb.gmra.mxu1 %vm223_vm1, %v380_v63 }
  0x2c   : >> { %634 = vmatmul.msk.bf16.vlgmr.msrb.gmra.mxu2 %vm223_vm1, %v648_v12 }
  0x2e   : >> { %625 = vmatmul.msk.bf16.vlgmr.msrb.gmra.mxu0 %vm223_vm1, %v351_v13 }
  0x3e   : >> { %640 = vmatmul.msk.bf16.vlgmr.msra.gmra.mxu0 %vm223_vm1, %v487_v19 }
  0x98   : >> { %v261_v21 = vpop.f32.mrf.mxu1 }
  0x9b   : >> { %v242_v20 = vpop.f32.mrf.mxu0 }
  0x9c   : >> { %v262_v26 = vadd.f32 %v261_v21, %v242_v20 }
  0x9e   : >> { %v322_v23 = vpop.f32.mrf.mxu3 }
  0x9f   : >> { %v289_v22 = vpop.f32.mrf.mxu2 }
  0xa0   : >> { %v263_v25 = vpop.f32.mrf.mxu1  ;;  %v294_v28 = vadd.f32 %v289_v22, %v262_v26 }
  0xa2   : >> { %v327_v31 = vadd.f32 %v322_v23, %v294_v28 }
  0xa3   : >> { %v244_v24 = vpop.f32.mrf.mxu0 }
  0xa4   : >> { %v264_v33 = vadd.f32 %v263_v25, %v244_v24 }
  0xa6   : >> { %v324_v29 = vpop.f32.mrf.mxu3 }
  0xa7   : >> { %v291_v27 = vpop.f32.mrf.mxu2 }
  0xa8   : >> { %v396_v32 = vpop.f32.mrf.mxu1  ;;  %v295_v35 = vadd.f32 %v291_v27, %v264_v33 }
  0xaa   : >> { %v328_v39 = vadd.f32 %v324_v29, %v295_v35 }
  0xab   : >> { %v367_v30 = vpop.f32.mrf.mxu0 }
  0xac   : >> { %v372_v34 = vadd.f32 %v367_v30, %v327_v31 }
  0xae   : >> { %v401_v37 = vadd.f32 %v396_v32, %v372_v34  ;;  %v474_v40 = vpop.f32.mrf.mxu3 }
  0xaf   : >> { %v429_v36 = vpop.f32.mrf.mxu2 }
  0xb0   : >> { %v434_v41 = vadd.f32 %v429_v36, %v401_v37  ;;  %v398_v43 = vpop.f32.mrf.mxu1 }
  0xb2   : >> { %v479_v44 = vadd.f32 %v474_v40, %v434_v41 }
  0xb3   : >> { %v369_v38 = vpop.f32.mrf.mxu0 }
  0xb4   : >> { %v373_v42 = vadd.f32 %v369_v38, %v328_v39 }
  0xb6   : >> { %v402_v45 = vadd.f32 %v398_v43, %v373_v42  ;;  %v476_v52 = vpop.f32.mrf.mxu3 }
  0xb7   : >> { %v431_v47 = vpop.f32.mrf.mxu2 }
  0xb8   : >> { %v435_v50 = vadd.f32 %v431_v47, %v402_v45 }
  0xba   : >> { %v480_v54 = vadd.f32 %v476_v52, %v435_v50 }
  0xbb   : >> { %v503_v48 = vpop.f32.mrf.mxu0 }
  0xbc   : >> { %v508_v49 = vadd.f32 %v503_v48, %v479_v44 }
  0xbe   : >> { %v513_v51 = vadd.f32 %v511_v46, %v508_v49 }
  0xc0   : >> { %v515_v53 = vmax.f32 %v513_v51, 0.0 }
  0xc2   : >> { %v517_v55 = vpack.c.bf16 %v515_v53, %v515_v53 }
  0xc3   : >> { %v505_v56 = vpop.f32.mrf.mxu0 }
  0xc4   : >> { %523 = vst.msk [vmem:[%s521_s20] sm:$0xf] %vm522_vm4, %v517_v55  ;;  %v509_v57 = vadd.f32 %v505_v56, %v480_v54 }
  0xc6   : >> { %v514_v58 = vadd.f32 %v511_v46, %v509_v57 }
  0xc8   : >> { %v516_v59 = vmax.f32 %v514_v58, 0.0  ;;  %194 = sbr.rel (!%p192_p4) target bundleno = 17 (0x11), region = 81 }
  0xca   : >> { %v518_v60 = vpack.c.bf16 %v516_v59, %v516_v59 }
  0xcc   : >> { %524 = vst.msk [vmem:[%s521_s20 + $0x4] sm:$0xf] %vm522_vm4, %v518_v60 }
  0xcd PF: > { %s13_s12 = sadd.s32 1, %s696_s12  }
  0xce   : > { %p10_p5 = scmp.ge.s32.totalorder %s13_s12, 4  }
  0xd0   :  { %12 = sbr.rel (!%p10_p5) target bundleno = 1 (0x1), region = 92 }

// kernel: _lambda_.19
= control target key start
LH: loop header
LB: loop body
LE: loop exit
PB: predicated region body
PF: predicated region fallthrough
CT: control target
= control target key end

     0   :  { %s402_s12 = smov 0   ;;  %s433_s0 = inlined_call_operand.vmem [shape: bf16[128,8], index: 0, kind: input, shape index: {}]   ;;  %s434_s1 = inlined_call_operand.vmem [shape: bf16[8,16], index: 1, kind: input, shape index: {}]   ;;  %s435_s2 = inlined_call_operand.vmem [shape: f32[1,16], index: 2, kind: input, shape index: {}]   ;;  %s436_s3 = inlined_call_operand.vmem [shape: bf16[128,16], index: 3, kind: output, shape index: {}]  }
   0x1 LB: > { %s327_s13 = sadd.s32 4294967295, %s380_s12   ;;  %p331_p0 = scmp.ge.s32.totalorder %s380_s12, 1  ;;  %s380_s12 = sphi %s402_s12, %s13_s12  }
   0x2   : > { %p138_p1 = scmp.lt.s32.totalorder %s380_s12, 3 }
   0x4   : > { %p139_p2 = pnand %p331_p0, %p138_p1 }
   0x5   : > { %s332_s16 = sshll.u32 (!%p139_p2), %s327_s13, 3 }
   0x6   : > { %142 = sbr.rel (%p139_p2) target bundleno = 163 (0xa3), region = 32  ;;  %p163_p3 = scmp.lt.s32.totalorder (!%p139_p2), %s332_s16, 15 }
   0xb   : > { %v183_v0 = vld [vmem:[%s434_s1] sm:$0xf]  ;;  %vm221_vm0 = vcmask 1043456   ;;  %s438_s16 = smov (!%p163_p3, %s332_s16), 15  ;;  %vm208_vm1 = vcmask 64512   ;;  %vm262_vm2 = vcmask 125952  }
   0xc   : > { %v223_v1 = vsel %vm221_vm0, %v183_v0, 0  ;;  %s333_s17 = sshll.u32 %s438_s16, 2  ;;  %v373_v6 = vld [vmem:[%s435_s2] ss:$0 sm:$0xff] }
   0xd   : > { %232 = vmatpush.bf16.msra.mxu0 %v223_v1  ;;  %362 = vmatpush.bf16.msra.mxu1 %v223_v1  ;;  %s166_s20 = scalar_lea.vmem %s433_s0, %s333_s17  ;;  %s172_s25 = scalar_lea.vmem %s436_s3, %s333_s17 }
   0xe   : > { %363 = vmatpush.bf16.msra.mxu2 %v223_v1  ;;  %364 = vmatpush.bf16.msra.mxu3 %v223_v1  ;;  %v358_v2 = vld [vmem:[%s166_s20] sm:$0xff]  ;;  %v359_v3 = vld [vmem:[%s166_s20 + $0x8] sm:$0xff]  ;;  %v360_v4 = vld [vmem:[%s166_s20 + $0x10] sm:$0xff] }
   0xf   : > { %v361_v5 = vld [vmem:[%s166_s20 + $0x18] sm:$0xff] }
  0x10   : > { %352 = vmatmul.msk.bf16.vlgmr.msra.gmra.mxu0 %vm208_vm1, %v358_v2  ;;  %353 = vmatmul.msk.bf16.vlgmr.msra.gmra.mxu1 %vm208_vm1, %v359_v3 }
  0x11   : > { %354 = vmatmul.msk.bf16.vlgmr.msra.gmra.mxu2 %vm208_vm1, %v360_v4  ;;  %355 = vmatmul.msk.bf16.vlgmr.msra.gmra.mxu3 %vm208_vm1, %v361_v5 }
  0x8d   : > { %v234_v7 = vpop.f32.mrf.mxu0  ;;  %v239_v8 = vpop.f32.mrf.mxu1 }
  0x8e   : > { %v235_v9 = vadd.f32 %v373_v6, %v234_v7  ;;  %v240_v10 = vadd.f32 %v373_v6, %v239_v8 }
  0x90   : > { %v254_v11 = vpack.c.bf16 %v235_v9, %v235_v9  ;;  %v256_v12 = vpack.c.bf16 %v240_v10, %v240_v10 }
  0x92   : > { %263 = vst.msk [vmem:[%s172_s25] sm:$0xf] %vm262_vm2, %v254_v11 }
  0x93   : > { %265 = vst.msk [vmem:[%s172_s25 + $0x8] sm:$0xf] %vm262_vm2, %v256_v12 }
  0x94   : > { %v244_v13 = vpop.f32.mrf.mxu2  ;;  %v249_v14 = vpop.f32.mrf.mxu3 }
  0x95   : > { %v245_v15 = vadd.f32 %v373_v6, %v244_v13  ;;  %v250_v16 = vadd.f32 %v373_v6, %v249_v14  ;;  %v236_v17 = vpop.f32.mrf.mxu0  ;;  %v241_v18 = vpop.f32.mrf.mxu1 }
  0x96   : > { %v237_v19 = vadd.f32 %v373_v6, %v236_v17  ;;  %v242_v20 = vadd.f32 %v373_v6, %v241_v18 }
  0x97   : > { %v258_v21 = vpack.c.bf16 %v245_v15, %v245_v15  ;;  %v260_v22 = vpack.c.bf16 %v250_v16, %v250_v16 }
  0x98   : > { %v255_v23 = vpack.c.bf16 %v237_v19, %v237_v19  ;;  %v257_v24 = vpack.c.bf16 %v242_v20, %v242_v20 }
  0x99   : > { %267 = vst.msk [vmem:[%s172_s25 + $0x10] sm:$0xf] %vm262_vm2, %v258_v21 }
  0x9a   : > { %269 = vst.msk [vmem:[%s172_s25 + $0x18] sm:$0xf] %vm262_vm2, %v260_v22 }
  0x9b   : > { %264 = vst.msk [vmem:[%s172_s25 + $0x4] sm:$0xf] %vm262_vm2, %v255_v23 }
  0x9c   : > { %266 = vst.msk [vmem:[%s172_s25 + $0xc] sm:$0xf] %vm262_vm2, %v257_v24  ;;  %v246_v25 = vpop.f32.mrf.mxu2  ;;  %v251_v26 = vpop.f32.mrf.mxu3 }
  0x9d   : > { %v247_v27 = vadd.f32 %v373_v6, %v246_v25  ;;  %v252_v28 = vadd.f32 %v373_v6, %v251_v26 }
  0x9f   : > { %v259_v29 = vpack.c.bf16 %v247_v27, %v247_v27  ;;  %v261_v30 = vpack.c.bf16 %v252_v28, %v252_v28 }
  0xa1   : > { %268 = vst.msk [vmem:[%s172_s25 + $0x14] sm:$0xf] %vm262_vm2, %v259_v29 }
  0xa2   : > { %270 = vst.msk [vmem:[%s172_s25 + $0x1c] sm:$0xf] %vm262_vm2, %v261_v30 }
  0xa3 PF: > { %s13_s12 = sadd.s32 1, %s380_s12  }
  0xa4   : > { %p10_p4 = scmp.ge.s32.totalorder %s13_s12, 4  }
  0xa6   :  { %12 = sbr.rel (!%p10_p4) target bundleno = 1 (0x1), region = 62 }

// kernel: _lambda_.21
= control target key start
LH: loop header
LB: loop body
LE: loop exit
PB: predicated region body
PF: predicated region fallthrough
CT: control target
= control target key end

     0   :  { %s709_s12 = smov 0   ;;  %s878_s0 = inlined_call_operand.vmem [shape: bf16[2,10,10,16], index: 0, kind: input, shape index: {}]   ;;  %s879_s1 = inlined_call_operand.vmem [shape: bf16[9,16,16], index: 1, kind: input, shape index: {}]   ;;  %s880_s2 = inlined_call_operand.vmem [shape: f32[1,16], index: 2, kind: input, shape index: {}]   ;;  %s881_s3 = inlined_call_operand.vmem [shape: bf16[2,8,8,16], index: 3, kind: output, shape index: {}]  }
   0x1 LB: > { %s561_s13 = sadd.s32 4294967295, %s683_s12   ;;  %p565_p0 = scmp.ge.s32.totalorder %s683_s12, 1  ;;  %s683_s12 = sphi %s709_s12, %s13_s12  }
   0x2   : > { %p137_p1 = scmp.lt.s32.totalorder %s683_s12, 3 }
   0x4   : > { %p138_p2 = pnand %p565_p0, %p137_p1 }
   0x5   : > { %p161_p3 = scmp.lt.s32.totalorder (!%p138_p2), %s561_s13, 1 }
   0x6   : > { %141 = sbr.rel (%p138_p2) target bundleno = 200 (0xc8), region = 32 }
   0xb   : > { %v720_v0 = vld [vmem:[%s880_s2] sm:$0x1]  ;;  %v730_v2 = vld [vmem:[%s879_s1] sm:$0xf0]  ;;  %v735_v3 = vld [vmem:[%s879_s1 + $0x8] sm:$0xf] }
   0xc   : > { %v725_v1 = vld [vmem:[%s879_s1] sm:$0xf]  ;;  %v740_v4 = vld [vmem:[%s879_s1 + $0x8] sm:$0xf0]  ;;  %s883_s13 = smov (!%p161_p3, %s561_s13), 1 }
   0xd   : > { %v745_v5 = vld [vmem:[%s879_s1 + $0x10] sm:$0xf]  ;;  %v750_v6 = vld [vmem:[%s879_s1 + $0x10] sm:$0xf0]  ;;  %v755_v7 = vld [vmem:[%s879_s1 + $0x18] sm:$0xf] }
   0xe   : > { %v760_v8 = vld [vmem:[%s879_s1 + $0x18] sm:$0xf0]  ;;  %v765_v9 = vld [vmem:[%s879_s1 + $0x20] sm:$0xf]  ;;  %s656_s7 = smul.u32 80, %s883_s13  ;;  %s645_s8 = sshll.u32 %s883_s13, 5 }
   0xf   : > { %v770_v10 = vld [vmem:[%s879_s1 + $0x20] sm:$0xf0]  ;;  %v775_v11 = vld [vmem:[%s879_s1 + $0x28] sm:$0xf]  ;;  %s780_s17 = scalar_lea.vmem %s881_s3, %s645_s8  ;;  %v785_v12 = vld [vmem:[%s879_s1 + $0x28] sm:$0xf0] }
  0x10   : > { %v790_v13 = vld [vmem:[%s879_s1 + $0x30] sm:$0xf]  ;;  %v795_v14 = vld [vmem:[%s879_s1 + $0x30] sm:$0xf0]  ;;  %s800_s25 = scalar_lea.vmem %s878_s0, %s656_s7  ;;  %v805_v15 = vld [vmem:[%s879_s1 + $0x38] sm:$0xf] }
  0x11   : > { %v810_v16 = vld [vmem:[%s879_s1 + $0x38] sm:$0xf0]  ;;  %v815_v17 = vld [vmem:[%s879_s1 + $0x40] sm:$0xf]  ;;  %v820_v18 = vld [vmem:[%s879_s1 + $0x40] sm:$0xf0] }
  0x12   : > { %s822_s7 = smov 0  }
  0x13 LB: >> { %v600_v19 = vor.u32 %v750_v6, %v745_v5  ;;  %v607_v20 = vor.u32 %v760_v8, %v755_v7  ;;  %v590_v21 = vor.u32 %v740_v4, %v735_v3  ;;  %v595_v22 = vor.u32 %v730_v2, %v725_v1  ;;  %s655_s8 = sshll.u32 %s687_s7, 3  ;;  %s642_s10 = sshll.u32 %s687_s7, 2  ;;  %s687_s7 = sphi %s822_s7, %s204_s7  }
  0x14   : >> { %v614_v23 = vor.u32 %v770_v10, %v765_v9  ;;  %v627_v24 = vor.u32 %v795_v14, %v790_v13  ;;  %v634_v25 = vor.u32 %v810_v16, %v805_v15  ;;  %v620_v26 = vor.u32 %v785_v12, %v775_v11  ;;  %s845_s9 = scalar_lea.vmem %s800_s25, %s655_s8  ;;  %s488_s11 = scalar_lea.vmem %s780_s17, %s642_s10 }
  0x15   : >> { %288 = vmatpush.bf16.msra.mxu2 %v600_v19  ;;  %316 = vmatpush.bf16.msra.mxu3 %v607_v20  ;;  %vm228_vm0 = vcmask 130048   ;;  %v209_v27 = vld [vmem:[%s845_s9 + $0x4] sm:$0x1]  ;;  %v267_v28 = vld [vmem:[%s845_s9] sm:$0xe]  ;;  %v640_v54 = vor.u32 %v820_v18, %v815_v17  ;;  %vm489_vm1 = vcmask 125952  }
  0x16   : >> { %239 = vmatpush.bf16.msra.mxu0 %v590_v21  ;;  %261 = vmatpush.bf16.msra.mxu1 %v595_v22  ;;  %v603_v29 = vld [vmem:[%s845_s9 + $0x8] sm:$0xf]  ;;  %v213_v30 = vunpack.c.l.b16 %v209_v27  ;;  %v269_v31 = vunpack.c.l.b16 %v267_v28  ;;  %v208_v32 = vld [vmem:[%s845_s9] sm:$0xf]  ;;  %v629_v34 = vld [vmem:[%s845_s9 + $0x10] sm:$0xf] }
  0x17   : >> { %v212_v33 = vunpack.c.l.b16 %v208_v32  ;;  %v630_v35 = vld [vmem:[%s845_s9 + $0x14] sm:$0x1]  ;;  %v420_v37 = vunpack.c.l.b16 %v629_v34  ;;  %v616_v39 = vld [vmem:[%s845_s9 + $0x8] sm:$0xe]  ;;  %v610_v43 = vld [vmem:[%s845_s9 + $0xc] sm:$0x1] }
  0x18   : >> { %608 = vmatmul.msk.bf16.vlgmr.msra.gmra.mxu3 %vm228_vm0, %v603_v29  ;;  %v270_v36 = vpack.c.b16 %v213_v30, %v269_v31  ;;  %v421_v38 = vunpack.c.l.b16 %v630_v35  ;;  %v609_v42 = vld [vmem:[%s845_s9 + $0x8] sm:$0xf]  ;;  %v362_v47 = vunpack.c.l.b16 %v616_v39  ;;  %v328_v51 = vunpack.c.l.b16 %v610_v43  ;;  %v623_v61 = vld [vmem:[%s845_s9 + $0x10] sm:$0xf]  ;;  %s204_s7 = sadd.s32 1, %s687_s7  }
  0x19   : >> { %409 = vmatpush.bf16.msrb.mxu2 %v627_v24  ;;  %596 = vmatmul.msk.bf16.vlgmr.msra.gmra.mxu1 %vm228_vm0, %v208_v32  ;;  %v214_v40 = vpack.c.b16 %v213_v30, %v212_v33  ;;  %v327_v50 = vunpack.c.l.b16 %v609_v42  ;;  %v636_v20 = vld [vmem:[%s845_s9 + $0x10] sm:$0xe]  ;;  %p201_p4 = scmp.ge.s32.totalorder %s204_s7, 8  }
  0x1a   : >> { %353 = vmatpush.bf16.msrb.mxu0 %v614_v23  ;;  %381 = vmatpush.bf16.msrb.mxu1 %v620_v26  ;;  %v271_v41 = vrot.slane %v270_v36, 1  ;;  %v422_v44 = vpack.c.b16 %v421_v38, %v420_v37  ;;  %v363_v56 = vpack.c.b16 %v328_v51, %v362_v47  ;;  %v455_v21 = vunpack.c.l.b16 %v636_v20 }
  0x1b   : >> { %446 = vmatpush.bf16.msrb.mxu3 %v634_v25  ;;  %v216_v45 = vshrl.u32 %v214_v40, 16  ;;  %v218_v46 = vshll.u32 %v214_v40, 16  ;;  %v329_v57 = vpack.c.b16 %v328_v51, %v327_v50  ;;  %v482_v47 = vperm.slane %v720_v0, 0 }
  0x1c   : >> { %601 = vmatmul.msk.bf16.vlgmr.msra.gmra.mxu2 %vm228_vm0, %v271_v41  ;;  %v426_v48 = vshll.u32 %v422_v44, 16  ;;  %v424_v52 = vshrl.u32 %v422_v44, 16  ;;  %v364_v59 = vrot.slane %v363_v56, 1  ;;  %v456_v22 = vpack.c.b16 %v421_v38, %v455_v21 }
  0x1d   : >> { %v220_v49 = vrot.slane %v218_v46, 1  ;;  %v333_v60 = vshll.u32 %v329_v57, 16  ;;  %v331_v62 = vshrl.u32 %v329_v57, 16 }
  0x1e   : >> { %v428_v53 = vrot.slane %v426_v48, 1  ;;  %v457_v23 = vrot.slane %v456_v22, 1 }
  0x1f   : >> { %v221_v55 = vor.u32 %v220_v49, %v216_v45  ;;  %v335_v63 = vrot.slane %v333_v60, 1 }
  0x20   : >> { %v429_v58 = vor.u32 %v428_v53, %v424_v52 }
  0x21   : >> { %591 = vmatmul.msk.bf16.vlgmr.msra.gmra.mxu0 %vm228_vm0, %v221_v55  ;;  %v336_v19 = vor.u32 %v335_v63, %v331_v62 }
  0x22   : >> { %474 = vmatpush.bf16.msra.mxu0 %v640_v54 }
  0x28   : >> { %635 = vmatmul.msk.bf16.vlgmr.msrb.gmra.mxu3 %vm228_vm0, %v429_v58 }
  0x29   : >> { %621 = vmatmul.msk.bf16.vlgmr.msrb.gmra.mxu1 %vm228_vm0, %v364_v59 }
  0x2c   : >> { %628 = vmatmul.msk.bf16.vlgmr.msrb.gmra.mxu2 %vm228_vm0, %v623_v61 }
  0x31   : >> { %615 = vmatmul.msk.bf16.vlgmr.msrb.gmra.mxu0 %vm228_vm0, %v336_v19 }
  0x41   : >> { %641 = vmatmul.msk.bf16.vlgmr.msra.gmra.mxu0 %vm228_vm0, %v457_v23 }
  0x96   : >> { %v263_v24 = vpop.f32.mrf.mxu1 }
  0x9b   : >> { %v318_v25 = vpop.f32.mrf.mxu3 }
  0x9e   : >> { %v265_v26 = vpop.f32.mrf.mxu1  ;;  %v241_v27 = vpop.f32.mrf.mxu0 }
  0x9f   : >> { %v290_v28 = vpop.f32.mrf.mxu2  ;;  %v264_v32 = vadd.f32 %v263_v24, %v241_v27 }
  0xa1   : >> { %v294_v35 = vadd.f32 %v290_v28, %v264_v32 }
  0xa3   : >> { %v320_v29 = vpop.f32.mrf.mxu3  ;;  %v322_v38 = vadd.f32 %v318_v25, %v294_v35 }
  0xa6   : >> { %v383_v30 = vpop.f32.mrf.mxu1  ;;  %v243_v31 = vpop.f32.mrf.mxu0 }
  0xa7   : >> { %v292_v33 = vpop.f32.mrf.mxu2 }
  0xab   : >> { %v448_v34 = vpop.f32.mrf.mxu3 }
  0xae   : >> { %v385_v36 = vpop.f32.mrf.mxu1  ;;  %v355_v37 = vpop.f32.mrf.mxu0 }
  0xaf   : >> { %v411_v39 = vpop.f32.mrf.mxu2  ;;  %v359_v40 = vadd.f32 %v355_v37, %v322_v38 }
  0xb1   : >> { %v387_v42 = vadd.f32 %v383_v30, %v359_v40 }
  0xb3   : >> { %v450_v41 = vpop.f32.mrf.mxu3  ;;  %v415_v45 = vadd.f32 %v411_v39, %v387_v42 }
  0xb5   : >> { %v452_v46 = vadd.f32 %v448_v34, %v415_v45 }
  0xb6   : >> { %v357_v43 = vpop.f32.mrf.mxu0 }
  0xb7   : >> { %v413_v44 = vpop.f32.mrf.mxu2 }
  0xbe   : >> { %v476_v48 = vpop.f32.mrf.mxu0 }
  0xbf   : >> { %v480_v49 = vadd.f32 %v476_v48, %v452_v46 }
  0xc1   : >> { %v484_v50 = vadd.f32 %v482_v47, %v480_v49 }
  0xc3   : >> { %v485_v51 = vmax.f32 %v484_v50, 0.0  ;;  %203 = sbr.rel (!%p201_p4) target bundleno = 19 (0x13), region = 81 }
  0xc5   : >> { %v486_v52 = vpack.c.bf16 %v485_v51, %v485_v51 }
  0xc6   : >> { %v478_v53 = vpop.f32.mrf.mxu0 }
  0xc7   : >> { %490 = vst.msk [vmem:[%s488_s11] sm:$0xf] %vm489_vm1, %v486_v52 }
  0xc8 PF: > { %s13_s12 = sadd.s32 1, %s683_s12  }
  0xc9   : > { %p10_p5 = scmp.ge.s32.totalorder %s13_s12, 4  }
  0xcb   :  { %12 = sbr.rel (!%p10_p5) target bundleno = 1 (0x1), region = 92 }

// kernel: _lambda_.18
= control target key start
LH: loop header
LB: loop body
LE: loop exit
PB: predicated region body
PF: predicated region fallthrough
CT: control target
= control target key end

     0   :  { %s723_s15 = smov 0   ;;  %s856_s0 = inlined_call_operand.vmem [shape: bf16[2,18,9,8], index: 0, kind: input, shape index: {}]   ;;  %s857_s1 = inlined_call_operand.vmem [shape: bf16[2,18,9,8], index: 1, kind: input, shape index: {}]   ;;  %s858_s2 = inlined_call_operand.vmem [shape: bf16[9,8,16], index: 2, kind: input, shape index: {}]   ;;  %s859_s3 = inlined_call_operand.vmem [shape: f32[1,16], index: 3, kind: input, shape index: {}]   ;;  %s860_s4 = inlined_call_operand.vmem [shape: bf16[2,8,8,16], index: 4, kind: output, shape index: {}]  }
   0x1 LB: > { %s593_s16 = sadd.s32 4294967295, %s692_s15   ;;  %p597_p0 = scmp.ge.s32.totalorder %s692_s15, 1  ;;  %s692_s15 = sphi %s723_s15, %s14_s15  }
   0x2   : > { %p172_p1 = scmp.lt.s32.totalorder %s692_s15, 3 }
   0x4   : > { %p173_p2 = pnand %p597_p0, %p172_p1 }
   0x5   : > { %p203_p3 = scmp.lt.s32.totalorder (!%p173_p2), %s593_s16, 1  ;;  %s796_s24 = smov (!%p173_p2), 0  }
   0x6   : > { %176 = sbr.rel (%p173_p2) target bundleno = 191 (0xbf), region = 36 }
   0xb   : > { %v734_v0 = vld [vmem:[%s859_s3] sm:$0x1]  ;;  %v744_v2 = vld [vmem:[%s858_s2 + $0x4] sm:$0xf]  ;;  %v749_v3 = vld [vmem:[%s858_s2 + $0x8] sm:$0xf] }
   0xc   : > { %v739_v1 = vld [vmem:[%s858_s2] sm:$0xf]  ;;  %v754_v4 = vld [vmem:[%s858_s2 + $0xc] sm:$0xf]  ;;  %s862_s16 = smov (!%p203_p3, %s593_s16), 1 }
   0xd   : > { %v759_v5 = vld [vmem:[%s858_s2 + $0x10] sm:$0xf]  ;;  %v764_v6 = vld [vmem:[%s858_s2 + $0x14] sm:$0xf]  ;;  %v769_v7 = vld [vmem:[%s858_s2 + $0x18] sm:$0xf] }
   0xe   : > { %v774_v8 = vld [vmem:[%s858_s2 + $0x1c] sm:$0xf]  ;;  %v779_v9 = vld [vmem:[%s858_s2 + $0x20] sm:$0xf]  ;;  %s665_s11 = smul.u32 144, %s862_s16  ;;  %s654_s12 = sshll.u32 %s862_s16, 5 }
   0xf   : > { %s784_s17 = scalar_lea.vmem %s860_s4, %s654_s12 }
  0x10   : > { %s789_s20 = scalar_lea.vmem %s856_s0, %s665_s11  ;;  %s794_s23 = scalar_lea.vmem %s857_s1, %s665_s11 }
  0x11 LB: >> { %vm255_vm0 = vcmask 1043456   ;;  %s656_s16 = sshll.u32 %s696_s24, 4  ;;  %vm251_vm1 = vcmask 64512   ;;  %s651_s27 = sshll.u32 %s696_s24, 2  ;;  %vm497_vm2 = vcmask 125952   ;;  %s696_s24 = sphi %s796_s24, %s242_s24  }
  0x12   : >> { %v257_v10 = vsel %vm255_vm0, %v744_v2, 0  ;;  %v276_v11 = vsel %vm255_vm0, %v739_v1, 0  ;;  %v334_v12 = vsel %vm255_vm0, %v754_v4, 0  ;;  %v357_v13 = vsel %vm255_vm0, %v759_v5, 0  ;;  %s815_s25 = scalar_lea.vmem %s789_s20, %s656_s16  ;;  %s818_s26 = scalar_lea.vmem %s794_s23, %s656_s16 }
  0x13   : >> { %266 = vmatpush.bf16.msra.mxu0 %v257_v10  ;;  %285 = vmatpush.bf16.msra.mxu1 %v276_v11  ;;  %v309_v14 = vsel %vm255_vm0, %v749_v3, 0  ;;  %v439_v15 = vsel %vm255_vm0, %v774_v8, 0  ;;  %v416_v16 = vsel %vm255_vm0, %v769_v7, 0  ;;  %v391_v17 = vsel %vm255_vm0, %v764_v6, 0  ;;  %v250_v19 = vld [vmem:[%s818_s26] sm:$0xf]  ;;  %s496_s28 = scalar_lea.vmem %s784_s17, %s651_s27 }
  0x14   : >> { %343 = vmatpush.bf16.msra.mxu3 %v334_v12  ;;  %v473_v18 = vsel %vm255_vm0, %v779_v9, 0  ;;  %v247_v20 = vld [vmem:[%s815_s25] sm:$0xf]  ;;  %v623_v21 = vld [vmem:[%s815_s25 + $0x8] sm:$0xf]  ;;  %318 = vmatpush.bf16.msra.mxu2 %v309_v14  ;;  %s242_s24 = sadd.s32 1, %s696_s24  }
  0x15   : >> { %v618_v22 = vld [vmem:[%s815_s25] sm:$0xf]  ;;  %v658_v23 = vld [vmem:[%s815_s25] sm:$0x10]  ;;  %v633_v25 = vld [vmem:[%s815_s25 + $0x8] sm:$0xf] }
  0x16   : >> { %614 = vmatmul.msk.bf16.vlgmr.msra.gmra.mxu0 %vm251_vm1, %v250_v19  ;;  %615 = vmatmul.msk.bf16.vlgmr.msra.gmra.mxu1 %vm251_vm1, %v247_v20  ;;  %v619_v24 = vor.u32 %v658_v23, %v618_v22  ;;  %v661_v26 = vld [vmem:[%s815_s25 + $0x8] sm:$0x10]  ;;  %v627_v36 = vld [vmem:[%s818_s26 + $0x8] sm:$0xf]  ;;  %v648_v37 = vld [vmem:[%s815_s25 + $0x10] sm:$0xf] }
  0x17   : >> { %366 = vmatpush.bf16.msrb.mxu0 %v357_v13  ;;  %624 = vmatmul.msk.bf16.vlgmr.msra.gmra.mxu3 %vm251_vm1, %v623_v21  ;;  %v634_v27 = vor.u32 %v661_v26, %v633_v25  ;;  %v664_v38 = vld [vmem:[%s815_s25 + $0x10] sm:$0x10]  ;;  %v642_v39 = vld [vmem:[%s818_s26 + $0x10] sm:$0xf]  ;;  %p239_p4 = scmp.ge.s32.totalorder %s242_s24, 8  }
  0x18   : >> { %448 = vmatpush.bf16.msrb.mxu3 %v439_v15  ;;  %425 = vmatpush.bf16.msrb.mxu2 %v416_v16  ;;  %v299_v28 = vshrl.u32 %v619_v24, 16  ;;  %v301_v29 = vshll.u32 %v619_v24, 16  ;;  %v649_v40 = vor.u32 %v664_v38, %v648_v37  ;;  %v638_v42 = vld [vmem:[%s815_s25 + $0x10] sm:$0xf]  ;;  %v490_v15 = vperm.slane %v734_v0, 0 }
  0x19   : >> { %400 = vmatpush.bf16.msrb.mxu1 %v391_v17  ;;  %v383_v30 = vshll.u32 %v634_v27, 16  ;;  %v381_v33 = vshrl.u32 %v634_v27, 16 }
  0x1a   : >> { %v303_v31 = vrot.slane %v301_v29, 1  ;;  %v465_v41 = vshll.u32 %v649_v40, 16  ;;  %v463_v43 = vshrl.u32 %v649_v40, 16 }
  0x1b   : >> { %482 = vmatpush.bf16.msra.mxu0 %v473_v18  ;;  %v385_v34 = vrot.slane %v383_v30, 1 }
  0x1c   : >> { %v304_v32 = vor.u32 %v303_v31, %v299_v28  ;;  %v467_v44 = vrot.slane %v465_v41, 1 }
  0x1d   : >> { %v386_v35 = vor.u32 %v385_v34, %v381_v33 }
  0x1e   : >> { %620 = vmatmul.msk.bf16.vlgmr.msra.gmra.mxu2 %vm251_vm1, %v304_v32  ;;  %v468_v45 = vor.u32 %v467_v44, %v463_v43 }
  0x26   : >> { %628 = vmatmul.msk.bf16.vlgmr.msrb.gmra.mxu0 %vm251_vm1, %v627_v36  ;;  %635 = vmatmul.msk.bf16.vlgmr.msrb.gmra.mxu1 %vm251_vm1, %v386_v35 }
  0x27   : >> { %643 = vmatmul.msk.bf16.vlgmr.msrb.gmra.mxu3 %vm251_vm1, %v642_v39 }
  0x2e   : >> { %639 = vmatmul.msk.bf16.vlgmr.msrb.gmra.mxu2 %vm251_vm1, %v638_v42 }
  0x36   : >> { %650 = vmatmul.msk.bf16.vlgmr.msra.gmra.mxu0 %vm251_vm1, %v468_v45 }
  0x93   : >> { %v268_v46 = vpop.f32.mrf.mxu0  ;;  %v287_v47 = vpop.f32.mrf.mxu1 }
  0x94   : >> { %v288_v53 = vadd.f32 %v287_v47, %v268_v46 }
  0x9a   : >> { %v345_v48 = vpop.f32.mrf.mxu3 }
  0x9b   : >> { %v270_v49 = vpop.f32.mrf.mxu0  ;;  %v289_v50 = vpop.f32.mrf.mxu1 }
  0xa1   : >> { %v320_v51 = vpop.f32.mrf.mxu2 }
  0xa2   : >> { %v347_v52 = vpop.f32.mrf.mxu3  ;;  %v324_v56 = vadd.f32 %v320_v51, %v288_v53 }
  0xa3   : >> { %v368_v54 = vpop.f32.mrf.mxu0  ;;  %v402_v55 = vpop.f32.mrf.mxu1 }
  0xa4   : >> { %v349_v57 = vadd.f32 %v345_v48, %v324_v56 }
  0xa6   : >> { %v372_v62 = vadd.f32 %v368_v54, %v349_v57 }
  0xa8   : >> { %v406_v63 = vadd.f32 %v402_v55, %v372_v62 }
  0xa9   : >> { %v322_v58 = vpop.f32.mrf.mxu2 }
  0xaa   : >> { %v450_v59 = vpop.f32.mrf.mxu3 }
  0xab   : >> { %v370_v60 = vpop.f32.mrf.mxu0  ;;  %v404_v61 = vpop.f32.mrf.mxu1 }
  0xb1   : >> { %v427_v10 = vpop.f32.mrf.mxu2 }
  0xb2   : >> { %v452_v11 = vpop.f32.mrf.mxu3  ;;  %v431_v12 = vadd.f32 %v427_v10, %v406_v63 }
  0xb3   : >> { %v484_v13 = vpop.f32.mrf.mxu0 }
  0xb4   : >> { %v454_v14 = vadd.f32 %v450_v59, %v431_v12 }
  0xb6   : >> { %v488_v16 = vadd.f32 %v484_v13, %v454_v14 }
  0xb8   : >> { %v492_v17 = vadd.f32 %v490_v15, %v488_v16 }
  0xb9   : >> { %v429_v18 = vpop.f32.mrf.mxu2 }
  0xba   : >> { %v493_v19 = vmax.f32 %v492_v17, 0.0  ;;  %241 = sbr.rel (!%p239_p4) target bundleno = 17 (0x11), region = 91 }
  0xbb   : >> { %v486_v20 = vpop.f32.mrf.mxu0 }
  0xbc   : >> { %v494_v21 = vpack.c.bf16 %v493_v19, %v493_v19 }
  0xbe   : >> { %498 = vst.msk [vmem:[%s496_s28] sm:$0xf] %vm497_vm2, %v494_v21 }
  0xbf PF: > { %s14_s15 = sadd.s32 1, %s692_s15  }
  0xc0   : > { %p11_p5 = scmp.ge.s32.totalorder %s14_s15, 4  }
  0xc2   :  { %13 = sbr.rel (!%p11_p5) target bundleno = 1 (0x1), region = 102 }

// kernel: _lambda_.20
= control target key start
LH: loop header
LB: loop body
LE: loop exit
PB: predicated region body
PF: predicated region fallthrough
CT: control target
= control target key end

     0   :  { %s784_s15 = smov 0   ;;  %s959_s0 = inlined_call_operand.vmem [shape: bf16[2,10,10,16], index: 0, kind: input, shape index: {}]   ;;  %s960_s1 = inlined_call_operand.vmem [shape: bf16[9,16,16], index: 1, kind: input, shape index: {}]   ;;  %s961_s2 = inlined_call_operand.vmem [shape: f32[1,16], index: 2, kind: input, shape index: {}]   ;;  %s962_s3 = inlined_call_operand.vmem [shape: bf16[2,8,8,16], index: 3, kind: input, shape index: {}]   ;;  %s963_s4 = inlined_call_operand.vmem [shape: bf16[2,8,8,16], index: 4, kind: output, shape index: {}]  }
   0x1 LB: > { %s627_s16 = sadd.s32 4294967295, %s753_s15   ;;  %p631_p0 = scmp.ge.s32.totalorder %s753_s15, 1  ;;  %s753_s15 = sphi %s784_s15, %s14_s15  }
   0x2   : > { %p172_p1 = scmp.lt.s32.totalorder %s753_s15, 3 }
   0x4   : > { %p173_p2 = pnand %p631_p0, %p172_p1 }
   0x5   : > { %p203_p3 = scmp.lt.s32.totalorder (!%p173_p2), %s627_s16, 1 }
   0x6   : > { %176 = sbr.rel (%p173_p2) target bundleno = 202 (0xca), region = 36 }
   0xb   : > { %v795_v0 = vld [vmem:[%s961_s2] sm:$0x1]  ;;  %v805_v2 = vld [vmem:[%s960_s1] sm:$0xf0]  ;;  %v810_v3 = vld [vmem:[%s960_s1 + $0x8] sm:$0xf] }
   0xc   : > { %v800_v1 = vld [vmem:[%s960_s1] sm:$0xf]  ;;  %v815_v4 = vld [vmem:[%s960_s1 + $0x8] sm:$0xf0]  ;;  %s965_s16 = smov (!%p203_p3, %s627_s16), 1 }
   0xd   : > { %v820_v5 = vld [vmem:[%s960_s1 + $0x10] sm:$0xf]  ;;  %v825_v6 = vld [vmem:[%s960_s1 + $0x10] sm:$0xf0]  ;;  %v830_v7 = vld [vmem:[%s960_s1 + $0x18] sm:$0xf] }
   0xe   : > { %v835_v8 = vld [vmem:[%s960_s1 + $0x18] sm:$0xf0]  ;;  %v840_v9 = vld [vmem:[%s960_s1 + $0x20] sm:$0xf]  ;;  %s726_s11 = smul.u32 80, %s965_s16  ;;  %s714_s12 = sshll.u32 %s965_s16, 5 }
   0xf   : > { %v845_v10 = vld [vmem:[%s960_s1 + $0x20] sm:$0xf0]  ;;  %v850_v11 = vld [vmem:[%s960_s1 + $0x28] sm:$0xf]  ;;  %s855_s21 = scalar_lea.vmem %s962_s3, %s714_s12  ;;  %s860_s24 = scalar_lea.vmem %s963_s4, %s714_s12  ;;  %v865_v12 = vld [vmem:[%s960_s1 + $0x28] sm:$0xf0] }
  0x10   : > { %v870_v13 = vld [vmem:[%s960_s1 + $0x30] sm:$0xf]  ;;  %v875_v14 = vld [vmem:[%s960_s1 + $0x30] sm:$0xf0]  ;;  %s880_s6 = scalar_lea.vmem %s959_s0, %s726_s11  ;;  %v885_v15 = vld [vmem:[%s960_s1 + $0x38] sm:$0xf] }
  0x11   : > { %v890_v16 = vld [vmem:[%s960_s1 + $0x38] sm:$0xf0]  ;;  %v895_v17 = vld [vmem:[%s960_s1 + $0x40] sm:$0xf]  ;;  %v900_v18 = vld [vmem:[%s960_s1 + $0x40] sm:$0xf0] }
  0x12   : > { %s902_s11 = smov 0  }
  0x13 LB: >> { %v668_v19 = vor.u32 %v825_v6, %v820_v5  ;;  %v675_v20 = vor.u32 %v835_v8, %v830_v7  ;;  %v658_v21 = vor.u32 %v815_v4, %v810_v3  ;;  %v663_v22 = vor.u32 %v805_v2, %v800_v1  ;;  %s725_s18 = sshll.u32 %s757_s11, 3  ;;  %s710_s20 = sshll.u32 %s757_s11, 2  ;;  %s757_s11 = sphi %s902_s11, %s251_s11  }
  0x14   : >> { %v682_v23 = vor.u32 %v845_v10, %v840_v9  ;;  %v695_v24 = vor.u32 %v875_v14, %v870_v13  ;;  %v702_v25 = vor.u32 %v890_v16, %v885_v15  ;;  %v688_v26 = vor.u32 %v865_v12, %v850_v11  ;;  %s925_s19 = scalar_lea.vmem %s880_s6, %s725_s18  ;;  %s533_s22 = scalar_lea.vmem %s855_s21, %s710_s20 }
  0x15   : >> { %335 = vmatpush.bf16.msra.mxu2 %v668_v19  ;;  %363 = vmatpush.bf16.msra.mxu3 %v675_v20  ;;  %vm275_vm0 = vcmask 130048   ;;  %v256_v27 = vld [vmem:[%s925_s19 + $0x4] sm:$0x1]  ;;  %v314_v28 = vld [vmem:[%s925_s19] sm:$0xe]  ;;  %v708_v54 = vor.u32 %v900_v18, %v895_v17  ;;  %s540_s23 = scalar_lea.vmem %s860_s24, %s710_s20  ;;  %vm541_vm1 = vcmask 125952  }
  0x16   : >> { %286 = vmatpush.bf16.msra.mxu0 %v658_v21  ;;  %308 = vmatpush.bf16.msra.mxu1 %v663_v22  ;;  %v671_v29 = vld [vmem:[%s925_s19 + $0x8] sm:$0xf]  ;;  %v260_v30 = vunpack.c.l.b16 %v256_v27  ;;  %v316_v31 = vunpack.c.l.b16 %v314_v28  ;;  %v255_v32 = vld [vmem:[%s925_s19] sm:$0xf]  ;;  %v697_v34 = vld [vmem:[%s925_s19 + $0x10] sm:$0xf] }
  0x17   : >> { %v259_v33 = vunpack.c.l.b16 %v255_v32  ;;  %v698_v35 = vld [vmem:[%s925_s19 + $0x14] sm:$0x1]  ;;  %v467_v37 = vunpack.c.l.b16 %v697_v34  ;;  %v684_v39 = vld [vmem:[%s925_s19 + $0x8] sm:$0xe]  ;;  %v678_v43 = vld [vmem:[%s925_s19 + $0xc] sm:$0x1] }
  0x18   : >> { %676 = vmatmul.msk.bf16.vlgmr.msra.gmra.mxu3 %vm275_vm0, %v671_v29  ;;  %v317_v36 = vpack.c.b16 %v260_v30, %v316_v31  ;;  %v468_v38 = vunpack.c.l.b16 %v698_v35  ;;  %v677_v42 = vld [vmem:[%s925_s19 + $0x8] sm:$0xf]  ;;  %v409_v47 = vunpack.c.l.b16 %v684_v39  ;;  %v375_v51 = vunpack.c.l.b16 %v678_v43  ;;  %v691_v61 = vld [vmem:[%s925_s19 + $0x10] sm:$0xf]  ;;  %s251_s11 = sadd.s32 1, %s757_s11  }
  0x19   : >> { %456 = vmatpush.bf16.msrb.mxu2 %v695_v24  ;;  %664 = vmatmul.msk.bf16.vlgmr.msra.gmra.mxu1 %vm275_vm0, %v255_v32  ;;  %v261_v40 = vpack.c.b16 %v260_v30, %v259_v33  ;;  %v374_v50 = vunpack.c.l.b16 %v677_v42  ;;  %v704_v20 = vld [vmem:[%s925_s19 + $0x10] sm:$0xe]  ;;  %p248_p4 = scmp.ge.s32.totalorder %s251_s11, 8  }
  0x1a   : >> { %400 = vmatpush.bf16.msrb.mxu0 %v682_v23  ;;  %428 = vmatpush.bf16.msrb.mxu1 %v688_v26  ;;  %v318_v41 = vrot.slane %v317_v36, 1  ;;  %v469_v44 = vpack.c.b16 %v468_v38, %v467_v37  ;;  %v410_v56 = vpack.c.b16 %v375_v51, %v409_v47  ;;  %v502_v21 = vunpack.c.l.b16 %v704_v20 }
  0x1b   : >> { %493 = vmatpush.bf16.msrb.mxu3 %v702_v25  ;;  %v263_v45 = vshrl.u32 %v261_v40, 16  ;;  %v265_v46 = vshll.u32 %v261_v40, 16  ;;  %v376_v57 = vpack.c.b16 %v375_v51, %v374_v50 }
  0x1c   : >> { %669 = vmatmul.msk.bf16.vlgmr.msra.gmra.mxu2 %vm275_vm0, %v318_v41  ;;  %v473_v48 = vshll.u32 %v469_v44, 16  ;;  %v471_v52 = vshrl.u32 %v469_v44, 16  ;;  %v411_v59 = vrot.slane %v410_v56, 1  ;;  %v503_v22 = vpack.c.b16 %v468_v38, %v502_v21 }
  0x1d   : >> { %v267_v49 = vrot.slane %v265_v46, 1  ;;  %v380_v60 = vshll.u32 %v376_v57, 16  ;;  %v378_v62 = vshrl.u32 %v376_v57, 16  ;;  %v534_v46 = vld [vmem:[%s533_s22] sm:$0xf] }
  0x1e   : >> { %v475_v53 = vrot.slane %v473_v48, 1  ;;  %v504_v23 = vrot.slane %v503_v22, 1  ;;  %v529_v48 = vperm.slane %v795_v0, 0  ;;  %v535_v51 = vunpack.c.l.bf16 %v534_v46 }
  0x1f   : >> { %v268_v55 = vor.u32 %v267_v49, %v263_v45  ;;  %v382_v63 = vrot.slane %v380_v60, 1 }
  0x20   : >> { %v476_v58 = vor.u32 %v475_v53, %v471_v52 }
  0x21   : >> { %659 = vmatmul.msk.bf16.vlgmr.msra.gmra.mxu0 %vm275_vm0, %v268_v55  ;;  %v383_v19 = vor.u32 %v382_v63, %v378_v62 }
  0x22   : >> { %521 = vmatpush.bf16.msra.mxu0 %v708_v54 }
  0x28   : >> { %703 = vmatmul.msk.bf16.vlgmr.msrb.gmra.mxu3 %vm275_vm0, %v476_v58 }
  0x29   : >> { %689 = vmatmul.msk.bf16.vlgmr.msrb.gmra.mxu1 %vm275_vm0, %v411_v59 }
  0x2c   : >> { %696 = vmatmul.msk.bf16.vlgmr.msrb.gmra.mxu2 %vm275_vm0, %v691_v61 }
  0x31   : >> { %683 = vmatmul.msk.bf16.vlgmr.msrb.gmra.mxu0 %vm275_vm0, %v383_v19 }
  0x41   : >> { %709 = vmatmul.msk.bf16.vlgmr.msra.gmra.mxu0 %vm275_vm0, %v504_v23 }
  0x96   : >> { %v310_v24 = vpop.f32.mrf.mxu1 }
  0x9b   : >> { %v365_v25 = vpop.f32.mrf.mxu3 }
  0x9e   : >> { %v312_v26 = vpop.f32.mrf.mxu1  ;;  %v288_v27 = vpop.f32.mrf.mxu0 }
  0x9f   : >> { %v337_v28 = vpop.f32.mrf.mxu2  ;;  %v311_v32 = vadd.f32 %v310_v24, %v288_v27 }
  0xa1   : >> { %v341_v35 = vadd.f32 %v337_v28, %v311_v32 }
  0xa3   : >> { %v367_v29 = vpop.f32.mrf.mxu3  ;;  %v369_v38 = vadd.f32 %v365_v25, %v341_v35 }
  0xa6   : >> { %v430_v30 = vpop.f32.mrf.mxu1  ;;  %v290_v31 = vpop.f32.mrf.mxu0 }
  0xa7   : >> { %v339_v33 = vpop.f32.mrf.mxu2 }
  0xab   : >> { %v495_v34 = vpop.f32.mrf.mxu3 }
  0xae   : >> { %v432_v36 = vpop.f32.mrf.mxu1  ;;  %v402_v37 = vpop.f32.mrf.mxu0 }
  0xaf   : >> { %v458_v39 = vpop.f32.mrf.mxu2  ;;  %v406_v40 = vadd.f32 %v402_v37, %v369_v38 }
  0xb1   : >> { %v434_v42 = vadd.f32 %v430_v30, %v406_v40 }
  0xb3   : >> { %v497_v41 = vpop.f32.mrf.mxu3  ;;  %v462_v45 = vadd.f32 %v458_v39, %v434_v42 }
  0xb5   : >> { %v499_v47 = vadd.f32 %v495_v34, %v462_v45 }
  0xb6   : >> { %v404_v43 = vpop.f32.mrf.mxu0 }
  0xb7   : >> { %v460_v44 = vpop.f32.mrf.mxu2 }
  0xbe   : >> { %v523_v49 = vpop.f32.mrf.mxu0 }
  0xbf   : >> { %v527_v50 = vadd.f32 %v523_v49, %v499_v47 }
  0xc1   : >> { %v531_v52 = vadd.f32 %v529_v48, %v527_v50 }
  0xc3   : >> { %v536_v53 = vadd.f32 %v535_v51, %v531_v52 }
  0xc5   : >> { %v537_v54 = vmax.f32 %v536_v53, 0.0  ;;  %250 = sbr.rel (!%p248_p4) target bundleno = 19 (0x13), region = 89 }
  0xc6   : >> { %v525_v55 = vpop.f32.mrf.mxu0 }
  0xc7   : >> { %v538_v56 = vpack.c.bf16 %v537_v54, %v537_v54 }
  0xc9   : >> { %542 = vst.msk [vmem:[%s540_s23] sm:$0xf] %vm541_vm1, %v538_v56 }
  0xca PF: > { %s14_s15 = sadd.s32 1, %s753_s15  }
  0xcb   : > { %p11_p5 = scmp.ge.s32.totalorder %s14_s15, 4  }
  0xcd   :  { %13 = sbr.rel (!%p11_p5) target bundleno = 1 (0x1), region = 100 }

// kernel: _lambda_.24
= control target key start
LH: loop header
LB: loop body
LE: loop exit
PB: predicated region body
PF: predicated region fallthrough
CT: control target
= control target key end

     0   :  { %s332_s12 = smov 0   ;;  %s355_s0 = inlined_call_operand.vmem [shape: bf16[32,16], index: 0, kind: input, shape index: {}]   ;;  %s356_s1 = inlined_call_operand.vmem [shape: bf16[16,32], index: 1, kind: input, shape index: {}]   ;;  %s357_s2 = inlined_call_operand.vmem [shape: f32[1,32], index: 2, kind: input, shape index: {}]   ;;  %s358_s3 = inlined_call_operand.vmem [shape: bf16[32,32], index: 3, kind: output, shape index: {}]  }
   0x1 LB: > { %s273_s13 = sadd.s32 4294967295, %s310_s12   ;;  %p277_p0 = scmp.ge.s32.totalorder %s310_s12, 1  ;;  %s310_s12 = sphi %s332_s12, %s13_s12  }
   0x2   : > { %p138_p1 = scmp.lt.s32.totalorder %s310_s12, 3 }
   0x4   : > { %p139_p2 = pnand %p277_p0, %p138_p1 }
   0x5   : > { %s278_s16 = sshll.u32 (!%p139_p2), %s273_s13, 1 }
   0x6   : > { %142 = sbr.rel (%p139_p2) target bundleno = 154 (0x9a), region = 32  ;;  %p163_p3 = scmp.lt.s32.totalorder (!%p139_p2), %s278_s16, 3 }
   0xb   : > { %v294_v0 = vld [vmem:[%s356_s1] sm:$0xff]  ;;  %s360_s16 = smov (!%p163_p3, %s278_s16), 3  ;;  %vm194_vm0 = vcmask 130048   ;;  %vm214_vm1 = vcmask 257024  }
   0xc   : > { %205 = vmatpush.bf16.msra.mxu0 %v294_v0  ;;  %s279_s17 = sshll.u32 %s360_s16, 2  ;;  %v303_v2 = vld [vmem:[%s357_s2] ss:$0 sm:$0xff] }
   0xd   : > { %s166_s20 = scalar_lea.vmem %s355_s0, %s279_s17  ;;  %s172_s25 = scalar_lea.vmem %s358_s3, %s279_s17 }
   0xe   : > { %v293_v1 = vld [vmem:[%s166_s20] sm:$0xff] }
   0xf   : > { %290 = vmatmul.msk.bf16.vlgmr.msra.gmra.mxu0 %vm194_vm0, %v293_v1 }
  0x8c   : > { %v207_v3 = vpop.f32.mrf.mxu0 }
  0x8d   : > { %v208_v4 = vadd.f32 %v303_v2, %v207_v3 }
  0x8f   : > { %v212_v5 = vpack.c.bf16 %v208_v4, %v208_v4 }
  0x91   : > { %215 = vst.msk [vmem:[%s172_s25] sm:$0xf] %vm214_vm1, %v212_v5 }
  0x94   : > { %v209_v6 = vpop.f32.mrf.mxu0 }
  0x95   : > { %v210_v7 = vadd.f32 %v303_v2, %v209_v6 }
  0x97   : > { %v213_v8 = vpack.c.bf16 %v210_v7, %v210_v7 }
  0x99   : > { %216 = vst.msk [vmem:[%s172_s25 + $0x4] sm:$0xf] %vm214_vm1, %v213_v8 }
  0x9a PF: > { %s13_s12 = sadd.s32 1, %s310_s12  }
  0x9b   : > { %p10_p4 = scmp.ge.s32.totalorder %s13_s12, 4  }
  0x9d   :  { %12 = sbr.rel (!%p10_p4) target bundleno = 1 (0x1), region = 62 }

// kernel: _lambda_.23
= control target key start
LH: loop header
LB: loop body
LE: loop exit
PB: predicated region body
PF: predicated region fallthrough
CT: control target
= control target key end

     0   :  { %s780_s15 = smov 0   ;;  %s955_s0 = inlined_call_operand.vmem [shape: bf16[2,10,5,16], index: 0, kind: input, shape index: {}]   ;;  %s956_s1 = inlined_call_operand.vmem [shape: bf16[2,10,5,16], index: 1, kind: input, shape index: {}]   ;;  %s957_s2 = inlined_call_operand.vmem [shape: bf16[9,16,32], index: 2, kind: input, shape index: {}]   ;;  %s958_s3 = inlined_call_operand.vmem [shape: f32[1,32], index: 3, kind: input, shape index: {}]   ;;  %s959_s4 = inlined_call_operand.vmem [shape: bf16[2,4,4,32], index: 4, kind: output, shape index: {}]  }
   0x1 LB: > { %s616_s16 = sadd.s32 4294967295, %s749_s15   ;;  %p620_p0 = scmp.ge.s32.totalorder %s749_s15, 1  ;;  %s749_s15 = sphi %s780_s15, %s14_s15  }
   0x2   : > { %p172_p1 = scmp.lt.s32.totalorder %s749_s15, 3 }
   0x4   : > { %p173_p2 = pnand %p620_p0, %p172_p1 }
   0x5   : > { %p203_p3 = scmp.lt.s32.totalorder (!%p173_p2), %s616_s16, 1 }
   0x6   : > { %176 = sbr.rel (%p173_p2) target bundleno = 196 (0xc4), region = 36 }
   0xb   : > { %v791_v0 = vld [vmem:[%s958_s3] sm:$0x1]  ;;  %v801_v2 = vld [vmem:[%s957_s2] sm:$0xf0]  ;;  %v806_v3 = vld [vmem:[%s957_s2 + $0x8] sm:$0xf] }
   0xc   : > { %v796_v1 = vld [vmem:[%s957_s2] sm:$0xf]  ;;  %v811_v4 = vld [vmem:[%s957_s2 + $0x8] sm:$0xf0]  ;;  %s961_s16 = smov (!%p203_p3, %s616_s16), 1 }
   0xd   : > { %v816_v5 = vld [vmem:[%s957_s2 + $0x10] sm:$0xf]  ;;  %v821_v6 = vld [vmem:[%s957_s2 + $0x10] sm:$0xf0]  ;;  %v826_v7 = vld [vmem:[%s957_s2 + $0x18] sm:$0xf] }
   0xe   : > { %v831_v8 = vld [vmem:[%s957_s2 + $0x18] sm:$0xf0]  ;;  %v836_v9 = vld [vmem:[%s957_s2 + $0x20] sm:$0xf]  ;;  %s722_s11 = smul.u32 40, %s961_s16  ;;  %s706_s12 = sshll.u32 %s961_s16, 3 }
   0xf   : > { %v841_v10 = vld [vmem:[%s957_s2 + $0x20] sm:$0xf0]  ;;  %v846_v11 = vld [vmem:[%s957_s2 + $0x28] sm:$0xf]  ;;  %s851_s21 = scalar_lea.vmem %s959_s4, %s706_s12  ;;  %v856_v12 = vld [vmem:[%s957_s2 + $0x28] sm:$0xf0] }
  0x10   : > { %v861_v13 = vld [vmem:[%s957_s2 + $0x30] sm:$0xf]  ;;  %v866_v14 = vld [vmem:[%s957_s2 + $0x30] sm:$0xf0]  ;;  %s871_s29 = scalar_lea.vmem %s955_s0, %s722_s11  ;;  %s876_s6 = scalar_lea.vmem %s956_s1, %s722_s11  ;;  %v881_v15 = vld [vmem:[%s957_s2 + $0x38] sm:$0xf] }
  0x11   : > { %v886_v16 = vld [vmem:[%s957_s2 + $0x38] sm:$0xf0]  ;;  %v891_v17 = vld [vmem:[%s957_s2 + $0x40] sm:$0xf]  ;;  %v896_v18 = vld [vmem:[%s957_s2 + $0x40] sm:$0xf0] }
  0x12   : > { %s898_s11 = smov 0  }
  0x13 LB: >> { %v647_v19 = vor.u32 %v811_v4, %v806_v3  ;;  %v652_v20 = vor.u32 %v801_v2, %v796_v1  ;;  %v665_v21 = vor.u32 %v831_v8, %v826_v7  ;;  %v673_v22 = vor.u32 %v841_v10, %v836_v9  ;;  %s716_s18 = sshll.u32 %s753_s11, 3  ;;  %s703_s22 = sshll.u32 %s753_s11, 1  ;;  %s753_s11 = sphi %s898_s11, %s251_s11  }
  0x14   : >> { %v657_v23 = vor.u32 %v821_v6, %v816_v5  ;;  %v695_v24 = vor.u32 %v886_v16, %v881_v15  ;;  %vm265_vm0 = vcmask 130048   ;;  %v687_v25 = vor.u32 %v866_v14, %v861_v13  ;;  %s919_s19 = scalar_lea.vmem %s871_s29, %s716_s18  ;;  %s922_s20 = scalar_lea.vmem %s876_s6, %s716_s18 }
  0x15   : >> { %276 = vmatpush.bf16.msra.mxu0 %v647_v19  ;;  %298 = vmatpush.bf16.msra.mxu1 %v652_v20  ;;  %v679_v26 = vor.u32 %v856_v12, %v846_v11  ;;  %v701_v27 = vor.u32 %v896_v18, %v891_v17  ;;  %v258_v28 = vld [vmem:[%s922_s20] sm:$0x3]  ;;  %v661_v30 = vld [vmem:[%s919_s19 + $0x4] sm:$0x3]  ;;  %v697_v43 = vld [vmem:[%s919_s19 + $0x8] sm:$0x7]  ;;  %s519_s23 = scalar_lea.vmem %s851_s21, %s703_s22 }
  0x16   : >> { %358 = vmatpush.bf16.msra.mxu3 %v665_v21  ;;  %v255_v29 = vld [vmem:[%s919_s19] sm:$0x3]  ;;  %331 = vmatpush.bf16.msra.mxu2 %v657_v23  ;;  %v675_v33 = vld [vmem:[%s919_s19 + $0x4] sm:$0x7]  ;;  %v480_v45 = vunpack.c.l.b16 %v697_v43  ;;  %v691_v48 = vld [vmem:[%s922_s20 + $0x8] sm:$0x3] }
  0x17   : >> { %v304_v31 = vld [vmem:[%s919_s19] sm:$0x7]  ;;  %v393_v34 = vunpack.c.l.b16 %v675_v33  ;;  %v669_v47 = vld [vmem:[%s922_s20 + $0x4] sm:$0x3]  ;;  %v683_v51 = vld [vmem:[%s919_s19 + $0x8] sm:$0x3] }
  0x18   : >> { %648 = vmatmul.msk.bf16.vlgmr.msra.gmra.mxu0 %vm265_vm0, %v258_v28  ;;  %653 = vmatmul.msk.bf16.vlgmr.msra.gmra.mxu1 %vm265_vm0, %v255_v29  ;;  %v306_v32 = vunpack.c.l.b16 %v304_v31  ;;  %v481_v49 = vpack.c.b16 %v480_v45, %v480_v45  ;;  %v513_v33 = vperm.slane %v791_v0, 0  ;;  %vm520_vm1 = vcmask 254976   ;;  %s251_s11 = sadd.s32 1, %s753_s11  }
  0x19   : >> { %384 = vmatpush.bf16.msrb.mxu0 %v673_v22  ;;  %666 = vmatmul.msk.bf16.vlgmr.msra.gmra.mxu3 %vm265_vm0, %v661_v30  ;;  %v394_v36 = vpack.c.b16 %v393_v34, %v393_v34  ;;  %p248_p4 = scmp.ge.s32.totalorder %s251_s11, 4  }
  0x1a   : >> { %471 = vmatpush.bf16.msrb.mxu3 %v695_v24  ;;  %445 = vmatpush.bf16.msrb.mxu2 %v687_v25  ;;  %v307_v35 = vpack.c.b16 %v306_v32, %v306_v32  ;;  %v485_v50 = vshll.u32 %v481_v49, 16  ;;  %v483_v52 = vshrl.u32 %v481_v49, 16 }
  0x1b   : >> { %418 = vmatpush.bf16.msrb.mxu1 %v679_v26  ;;  %v398_v39 = vshll.u32 %v394_v36, 16  ;;  %v396_v41 = vshrl.u32 %v394_v36, 16 }
  0x1c   : >> { %v309_v37 = vshrl.u32 %v307_v35, 16  ;;  %v311_v38 = vshll.u32 %v307_v35, 16  ;;  %v487_v53 = vrot.slane %v485_v50, 1 }
  0x1d   : >> { %505 = vmatpush.bf16.msra.mxu0 %v701_v27  ;;  %v400_v42 = vrot.slane %v398_v39, 1 }
  0x1e   : >> { %v313_v40 = vrot.slane %v311_v38, 1  ;;  %v488_v54 = vor.u32 %v487_v53, %v483_v52 }
  0x1f   : >> { %v401_v46 = vor.u32 %v400_v42, %v396_v41 }
  0x20   : >> { %v314_v44 = vor.u32 %v313_v40, %v309_v37 }
  0x22   : >> { %658 = vmatmul.msk.bf16.vlgmr.msra.gmra.mxu2 %vm265_vm0, %v314_v44 }
  0x28   : >> { %674 = vmatmul.msk.bf16.vlgmr.msrb.gmra.mxu0 %vm265_vm0, %v669_v47  ;;  %680 = vmatmul.msk.bf16.vlgmr.msrb.gmra.mxu1 %vm265_vm0, %v401_v46 }
  0x29   : >> { %696 = vmatmul.msk.bf16.vlgmr.msrb.gmra.mxu3 %vm265_vm0, %v691_v48 }
  0x32   : >> { %688 = vmatmul.msk.bf16.vlgmr.msrb.gmra.mxu2 %vm265_vm0, %v683_v51 }
  0x38   : >> { %702 = vmatmul.msk.bf16.vlgmr.msra.gmra.mxu0 %vm265_vm0, %v488_v54 }
  0x95   : >> { %v278_v55 = vpop.f32.mrf.mxu0  ;;  %v300_v56 = vpop.f32.mrf.mxu1 }
  0x96   : >> { %v301_v19 = vadd.f32 %v300_v56, %v278_v55 }
  0x9c   : >> { %v360_v57 = vpop.f32.mrf.mxu3 }
  0x9d   : >> { %v280_v58 = vpop.f32.mrf.mxu0  ;;  %v302_v59 = vpop.f32.mrf.mxu1 }
  0xa4   : >> { %v362_v60 = vpop.f32.mrf.mxu3 }
  0xa5   : >> { %v386_v61 = vpop.f32.mrf.mxu0  ;;  %v420_v62 = vpop.f32.mrf.mxu1 }
  0xa6   : >> { %v333_v63 = vpop.f32.mrf.mxu2 }
  0xa7   : >> { %v337_v20 = vadd.f32 %v333_v63, %v301_v19 }
  0xa9   : >> { %v364_v22 = vadd.f32 %v360_v57, %v337_v20 }
  0xab   : >> { %v390_v26 = vadd.f32 %v386_v61, %v364_v22 }
  0xac   : >> { %v473_v21 = vpop.f32.mrf.mxu3 }
  0xad   : >> { %v388_v23 = vpop.f32.mrf.mxu0  ;;  %v422_v24 = vpop.f32.mrf.mxu1  ;;  %v424_v28 = vadd.f32 %v420_v62, %v390_v26 }
  0xae   : >> { %v335_v25 = vpop.f32.mrf.mxu2 }
  0xb4   : >> { %v475_v27 = vpop.f32.mrf.mxu3 }
  0xb5   : >> { %v507_v29 = vpop.f32.mrf.mxu0 }
  0xb6   : >> { %v447_v30 = vpop.f32.mrf.mxu2 }
  0xb7   : >> { %v451_v31 = vadd.f32 %v447_v30, %v424_v28 }
  0xb9   : >> { %v477_v32 = vadd.f32 %v473_v21, %v451_v31 }
  0xbb   : >> { %v511_v34 = vadd.f32 %v507_v29, %v477_v32 }
  0xbd   : >> { %v515_v35 = vadd.f32 %v513_v33, %v511_v34  ;;  %v509_v36 = vpop.f32.mrf.mxu0 }
  0xbe   : >> { %v449_v37 = vpop.f32.mrf.mxu2 }
  0xbf   : >> { %v516_v38 = vmax.f32 %v515_v35, 0.0  ;;  %250 = sbr.rel (!%p248_p4) target bundleno = 19 (0x13), region = 91 }
  0xc1   : >> { %v517_v39 = vpack.c.bf16 %v516_v38, %v516_v38 }
  0xc3   : >> { %521 = vst.msk [vmem:[%s519_s23] sm:$0x3] %vm520_vm1, %v517_v39 }
  0xc4 PF: > { %s14_s15 = sadd.s32 1, %s749_s15  }
  0xc5   : > { %p11_p5 = scmp.ge.s32.totalorder %s14_s15, 4  }
  0xc7   :  { %13 = sbr.rel (!%p11_p5) target bundleno = 1 (0x1), region = 102 }

// kernel: _lambda_.25
= control target key start
LH: loop header
LB: loop body
LE: loop exit
PB: predicated region body
PF: predicated region fallthrough
CT: control target
= control target key end

     0   :  { %s902_s15 = smov 0   ;;  %s1183_s0 = inlined_call_operand.vmem [shape: bf16[2,6,6,32], index: 0, kind: input, shape index: {}]   ;;  %s1184_s1 = inlined_call_operand.vmem [shape: bf16[9,32,32], index: 1, kind: input, shape index: {}]   ;;  %s1185_s2 = inlined_call_operand.vmem [shape: f32[1,32], index: 2, kind: input, shape index: {}]   ;;  %s1186_s3 = inlined_call_operand.vmem [shape: bf16[2,4,4,32], index: 3, kind: input, shape index: {}]   ;;  %s1187_s4 = inlined_call_operand.vmem [shape: bf16[2,4,4,32], index: 4, kind: output, shape index: {}]  }
   0x1 LB: > { %s688_s16 = sadd.s32 4294967295, %s871_s15   ;;  %p692_p0 = scmp.ge.s32.totalorder %s871_s15, 1  ;;  %s871_s15 = sphi %s902_s15, %s14_s15  }
   0x2   : > { %p172_p1 = scmp.lt.s32.totalorder %s871_s15, 3 }
   0x4   : > { %p173_p2 = pnand %p692_p0, %p172_p1 }
   0x5   : > { %p203_p3 = scmp.lt.s32.totalorder (!%p173_p2), %s688_s16, 1  ;;  %s1110_s7 = smov (!%p173_p2), 0  }
   0x6   : > { %176 = sbr.rel (%p173_p2) target bundleno = 207 (0xcf), region = 36 }
   0xb   : > { %v913_v0 = vld [vmem:[%s1185_s2] sm:$0x1]  ;;  %v923_v2 = vld [vmem:[%s1184_s1] sm:$0xf0]  ;;  %v928_v3 = vld [vmem:[%s1184_s1 + $0x8] sm:$0xf] }
   0xc   : > { %v918_v1 = vld [vmem:[%s1184_s1] sm:$0xf]  ;;  %v933_v4 = vld [vmem:[%s1184_s1 + $0x8] sm:$0xf0]  ;;  %s1189_s16 = smov (!%p203_p3, %s688_s16), 1 }
   0xd   : > { %v938_v5 = vld [vmem:[%s1184_s1 + $0x10] sm:$0xf]  ;;  %v943_v6 = vld [vmem:[%s1184_s1 + $0x10] sm:$0xf0]  ;;  %v948_v7 = vld [vmem:[%s1184_s1 + $0x18] sm:$0xf] }
   0xe   : > { %v953_v8 = vld [vmem:[%s1184_s1 + $0x18] sm:$0xf0]  ;;  %v958_v9 = vld [vmem:[%s1184_s1 + $0x20] sm:$0xf]  ;;  %s844_s11 = smul.u32 24, %s1189_s16  ;;  %s824_s12 = sshll.u32 %s1189_s16, 3 }
   0xf   : > { %v963_v10 = vld [vmem:[%s1184_s1 + $0x20] sm:$0xf0]  ;;  %v968_v11 = vld [vmem:[%s1184_s1 + $0x28] sm:$0xf]  ;;  %s973_s21 = scalar_lea.vmem %s1186_s3, %s824_s12  ;;  %s978_s24 = scalar_lea.vmem %s1187_s4, %s824_s12  ;;  %v983_v12 = vld [vmem:[%s1184_s1 + $0x28] sm:$0xf0] }
  0x10   : > { %v988_v13 = vld [vmem:[%s1184_s1 + $0x30] sm:$0xf]  ;;  %v993_v14 = vld [vmem:[%s1184_s1 + $0x30] sm:$0xf0]  ;;  %s998_s6 = scalar_lea.vmem %s1183_s0, %s844_s11  ;;  %v1003_v15 = vld [vmem:[%s1184_s1 + $0x38] sm:$0xf] }
  0x11   : > { %v1008_v16 = vld [vmem:[%s1184_s1 + $0x38] sm:$0xf0]  ;;  %v1013_v17 = vld [vmem:[%s1184_s1 + $0x40] sm:$0xf]  ;;  %v1018_v18 = vld [vmem:[%s1184_s1 + $0x40] sm:$0xf0] }
  0x12   : > { %v1023_v19 = vld [vmem:[%s1184_s1 + $0x48] sm:$0xf]  ;;  %v1028_v20 = vld [vmem:[%s1184_s1 + $0x48] sm:$0xf0]  ;;  %v1033_v21 = vld [vmem:[%s1184_s1 + $0x50] sm:$0xf] }
  0x13   : > { %v1038_v22 = vld [vmem:[%s1184_s1 + $0x50] sm:$0xf0]  ;;  %v1043_v23 = vld [vmem:[%s1184_s1 + $0x58] sm:$0xf]  ;;  %v1048_v24 = vld [vmem:[%s1184_s1 + $0x58] sm:$0xf0] }
  0x14   : > { %v1053_v25 = vld [vmem:[%s1184_s1 + $0x60] sm:$0xf]  ;;  %v1058_v26 = vld [vmem:[%s1184_s1 + $0x60] sm:$0xf0]  ;;  %v1063_v27 = vld [vmem:[%s1184_s1 + $0x68] sm:$0xf] }
  0x15   : > { %v1068_v28 = vld [vmem:[%s1184_s1 + $0x68] sm:$0xf0]  ;;  %v1073_v29 = vld [vmem:[%s1184_s1 + $0x70] sm:$0xf]  ;;  %v1078_v30 = vld [vmem:[%s1184_s1 + $0x70] sm:$0xf0] }
  0x16   : > { %v1083_v31 = vld [vmem:[%s1184_s1 + $0x78] sm:$0xf]  ;;  %v1088_v32 = vld [vmem:[%s1184_s1 + $0x78] sm:$0xf0]  ;;  %v1093_v33 = vld [vmem:[%s1184_s1 + $0x80] sm:$0xf] }
  0x17   : > { %v1098_v34 = vld [vmem:[%s1184_s1 + $0x80] sm:$0xf0]  ;;  %v1103_v35 = vld [vmem:[%s1184_s1 + $0x88] sm:$0xf]  ;;  %v1108_v36 = vld [vmem:[%s1184_s1 + $0x88] sm:$0xf0] }
  0x18 LB: >> { %v756_v37 = vor.u32 %v983_v12, %v968_v11  ;;  %v767_v38 = vor.u32 %v1008_v16, %v1003_v15  ;;  %v738_v39 = vor.u32 %v953_v8, %v948_v7  ;;  %v747_v40 = vor.u32 %v933_v4, %v928_v3  ;;  %s730_s8 = sshll.u32 %s875_s7, 2  ;;  %s820_s10 = sshll.u32 %s875_s7, 1  ;;  %s875_s7 = sphi %s1110_s7, %s269_s7  }
  0x19   : >> { %v752_v41 = vor.u32 %v963_v10, %v958_v9  ;;  %v763_v42 = vor.u32 %v993_v14, %v988_v13  ;;  %s1129_s9 = scalar_lea.vmem %s998_s6, %s730_s8  ;;  %v734_v43 = vor.u32 %v943_v6, %v938_v5  ;;  %v743_v44 = vor.u32 %v923_v2, %v918_v1  ;;  %s594_s12 = scalar_lea.vmem %s973_s21, %s820_s10 }
  0x1a   : >> { %367 = vmatpush.bf16.msra.mxu2 %v756_v37  ;;  %400 = vmatpush.bf16.msra.mxu3 %v767_v38  ;;  %v341_v45 = vld [vmem:[%s1129_s9] sm:$0x6]  ;;  %v777_v47 = vor.u32 %v1028_v20, %v1023_v19  ;;  %v798_v48 = vor.u32 %v1068_v28, %v1063_v27  ;;  %v787_v51 = vor.u32 %v1048_v24, %v1043_v23  ;;  %v759_v52 = vld [vmem:[%s1129_s9 + $0x4] sm:$0x3]  ;;  %v800_v54 = vld [vmem:[%s1129_s9 + $0x8] sm:$0x7]  ;;  %s601_s13 = scalar_lea.vmem %s978_s24, %s820_s10 }
  0x1b   : >> { %306 = vmatpush.bf16.msra.mxu0 %v738_v39  ;;  %334 = vmatpush.bf16.msra.mxu1 %v747_v40  ;;  %v273_v46 = vld [vmem:[%s1129_s9] sm:$0x7]  ;;  %v343_v49 = vunpack.c.l.b16 %v341_v45  ;;  %v808_v53 = vor.u32 %v1088_v32, %v1083_v31  ;;  %v517_v58 = vunpack.c.l.b16 %v800_v54  ;;  %vm296_vm0 = vcmask 261120   ;;  %v769_v62 = vld [vmem:[%s1129_s9 + $0x4] sm:$0x7]  ;;  %s269_s7 = sadd.s32 1, %s875_s7  }
  0x1c   : >> { %v275_v50 = vunpack.c.l.b16 %v273_v46  ;;  %v272_v57 = vld [vmem:[%s1129_s9] sm:$0x3]  ;;  %v773_v59 = vor.u32 %v1018_v18, %v1013_v17  ;;  %v794_v60 = vor.u32 %v1058_v26, %v1053_v25  ;;  %v783_v61 = vor.u32 %v1038_v22, %v1033_v21  ;;  %p266_p4 = scmp.ge.s32.totalorder %s269_s7, 4  }
  0x1d   : >> { %v344_v55 = vpack.c.b16 %v343_v49, %v343_v49  ;;  %v518_v39 = vpack.c.b16 %v517_v58, %v517_v58  ;;  %v804_v40 = vor.u32 %v1078_v30, %v1073_v29  ;;  %v814_v49 = vor.u32 %v1098_v34, %v1093_v33  ;;  %v790_v58 = vld [vmem:[%s1129_s9 + $0x8] sm:$0x3] }
  0x1e   : >> { %368 = vmatpush.bf16.msra.mxu2 %v752_v41  ;;  %401 = vmatpush.bf16.msra.mxu3 %v763_v42  ;;  %v276_v56 = vpack.c.b16 %v275_v50, %v275_v50  ;;  %v410_v42 = vunpack.c.l.b16 %v769_v62  ;;  %vm602_vm1 = vcmask 254976  }
  0x1f   : >> { %307 = vmatpush.bf16.msra.mxu0 %v734_v43  ;;  %335 = vmatpush.bf16.msra.mxu1 %v743_v44  ;;  %v345_v63 = vrot.slane %v344_v55, 1  ;;  %v779_v43 = vld [vmem:[%s1129_s9 + $0x4] sm:$0x6]  ;;  %v818_v44 = vor.u32 %v1108_v36, %v1103_v35  ;;  %v522_v46 = vshll.u32 %v518_v39, 16  ;;  %v520_v50 = vshrl.u32 %v518_v39, 16 }
  0x20   : >> { %v278_v37 = vshrl.u32 %v276_v56, 16  ;;  %v280_v38 = vshll.u32 %v276_v56, 16 }
  0x21   : >> { %768 = vmatmul.msk.bf16.vlgmr.msra.gmra.mxu3 %vm296_vm0, %v759_v52  ;;  %757 = vmatmul.msk.bf16.vlgmr.msra.gmra.mxu2 %vm296_vm0, %v345_v63 }
  0x22   : >> { %507 = vmatpush.bf16.msrb.mxu2 %v798_v48  ;;  %748 = vmatmul.msk.bf16.vlgmr.msra.gmra.mxu1 %vm296_vm0, %v272_v57  ;;  %v282_v41 = vrot.slane %v280_v38, 1  ;;  %v411_v48 = vpack.c.b16 %v410_v42, %v410_v42 }
  0x23   : >> { %440 = vmatpush.bf16.msrb.mxu0 %v777_v47  ;;  %474 = vmatpush.bf16.msrb.mxu1 %v787_v51  ;;  %v450_v47 = vunpack.c.l.b16 %v779_v43  ;;  %v524_v51 = vrot.slane %v522_v46, 1 }
  0x24   : >> { %547 = vmatpush.bf16.msrb.mxu3 %v808_v53  ;;  %v283_v45 = vor.u32 %v282_v41, %v278_v37  ;;  %v415_v53 = vshll.u32 %v411_v48, 16  ;;  %v413_v56 = vshrl.u32 %v411_v48, 16 }
  0x25   : >> { %v451_v52 = vpack.c.b16 %v450_v47, %v450_v47  ;;  %v525_v54 = vor.u32 %v524_v51, %v520_v50 }
  0x26   : >> { %508 = vmatpush.bf16.msrb.mxu2 %v794_v60  ;;  %739 = vmatmul.msk.bf16.vlgmr.msra.gmra.mxu0 %vm296_vm0, %v283_v45  ;;  %v417_v57 = vrot.slane %v415_v53, 1  ;;  %v810_v60 = vld [vmem:[%s1129_s9 + $0x8] sm:$0x6] }
  0x27   : >> { %441 = vmatpush.bf16.msrb.mxu0 %v773_v59  ;;  %475 = vmatpush.bf16.msrb.mxu1 %v783_v61  ;;  %v452_v55 = vrot.slane %v451_v52, 1  ;;  %v557_v61 = vunpack.c.l.b16 %v810_v60 }
  0x28   : >> { %548 = vmatpush.bf16.msrb.mxu3 %v804_v40  ;;  %v418_v59 = vor.u32 %v417_v57, %v413_v56 }
  0x29   : >> { %v558_v62 = vpack.c.b16 %v557_v61, %v557_v61  ;;  %v590_v61 = vperm.slane %v913_v0, 0 }
  0x2b   : >> { %581 = vmatpush.bf16.msra.mxu0 %v818_v44  ;;  %v559_v63 = vrot.slane %v558_v62, 1 }
  0x2f   : >> { %582 = vmatpush.bf16.msra.mxu0 %v814_v49 }
  0x31   : >> { %809 = vmatmul.msk.bf16.vlgmr.msrb.gmra.mxu3 %vm296_vm0, %v525_v54  ;;  %799 = vmatmul.msk.bf16.vlgmr.msrb.gmra.mxu2 %vm296_vm0, %v790_v58 }
  0x32   : >> { %788 = vmatmul.msk.bf16.vlgmr.msrb.gmra.mxu1 %vm296_vm0, %v452_v55 }
  0x36   : >> { %778 = vmatmul.msk.bf16.vlgmr.msrb.gmra.mxu0 %vm296_vm0, %v418_v59  ;;  %v595_v59 = vld [vmem:[%s594_s12] sm:$0x3] }
  0x46   : >> { %819 = vmatmul.msk.bf16.vlgmr.msra.gmra.mxu0 %vm296_vm0, %v559_v63 }
  0x9f   : >> { %v337_v37 = vpop.f32.mrf.mxu1 }
  0xa3   : >> { %v309_v38 = vpop.f32.mrf.mxu0 }
  0xa4   : >> { %v403_v39 = vpop.f32.mrf.mxu3  ;;  %v370_v40 = vpop.f32.mrf.mxu2  ;;  %v338_v44 = vadd.f32 %v337_v37, %v309_v38  ;;  %v596_v37 = vunpack.c.l.bf16 %v595_v59 }
  0xa6   : >> { %v374_v47 = vadd.f32 %v370_v40, %v338_v44 }
  0xa7   : >> { %v339_v41 = vpop.f32.mrf.mxu1 }
  0xa8   : >> { %v407_v50 = vadd.f32 %v403_v39, %v374_v47 }
  0xab   : >> { %v311_v42 = vpop.f32.mrf.mxu0 }
  0xac   : >> { %v405_v43 = vpop.f32.mrf.mxu3  ;;  %v372_v45 = vpop.f32.mrf.mxu2 }
  0xaf   : >> { %v477_v46 = vpop.f32.mrf.mxu1 }
  0xb3   : >> { %v443_v48 = vpop.f32.mrf.mxu0 }
  0xb4   : >> { %v550_v49 = vpop.f32.mrf.mxu3  ;;  %v510_v51 = vpop.f32.mrf.mxu2  ;;  %v447_v52 = vadd.f32 %v443_v48, %v407_v50 }
  0xb6   : >> { %v481_v54 = vadd.f32 %v477_v46, %v447_v52 }
  0xb7   : >> { %v479_v53 = vpop.f32.mrf.mxu1 }
  0xb8   : >> { %v514_v58 = vadd.f32 %v510_v51, %v481_v54 }
  0xba   : >> { %v554_v60 = vadd.f32 %v550_v49, %v514_v58 }
  0xbb   : >> { %v445_v55 = vpop.f32.mrf.mxu0 }
  0xbc   : >> { %v552_v56 = vpop.f32.mrf.mxu3  ;;  %v512_v57 = vpop.f32.mrf.mxu2 }
  0xc3   : >> { %v584_v62 = vpop.f32.mrf.mxu0 }
  0xc4   : >> { %v588_v63 = vadd.f32 %v584_v62, %v554_v60 }
  0xc6   : >> { %v592_v38 = vadd.f32 %v590_v61, %v588_v63 }
  0xc8   : >> { %v597_v39 = vadd.f32 %v596_v37, %v592_v38 }
  0xca   : >> { %v598_v40 = vmax.f32 %v597_v39, 0.0  ;;  %268 = sbr.rel (!%p266_p4) target bundleno = 24 (0x18), region = 89 }
  0xcb   : >> { %v586_v41 = vpop.f32.mrf.mxu0 }
  0xcc   : >> { %v599_v42 = vpack.c.bf16 %v598_v40, %v598_v40 }
  0xce   : >> { %603 = vst.msk [vmem:[%s601_s13] sm:$0x3] %vm602_vm1, %v599_v42 }
  0xcf PF: > { %s14_s15 = sadd.s32 1, %s871_s15  }
  0xd0   : > { %p11_p5 = scmp.ge.s32.totalorder %s14_s15, 4  }
  0xd2   :  { %13 = sbr.rel (!%p11_p5) target bundleno = 1 (0x1), region = 100 }

// kernel: _lambda_.29
= control target key start
LH: loop header
LB: loop body
LE: loop exit
PB: predicated region body
PF: predicated region fallthrough
CT: control target
= control target key end

     0   :  { %vm36_vm0 = vcmask 261120   ;;  %vm54_vm1 = vcmask 519168   ;;  %s107_s1 = inlined_call_operand.vmem [shape: bf16[32,64], index: 1, kind: input, shape index: {}]   ;;  %s108_s2 = inlined_call_operand.vmem [shape: f32[1,64], index: 2, kind: input, shape index: {}]   ;;  %s109_s0 = inlined_call_operand.vmem [shape: bf16[8,32], index: 0, kind: input, shape index: {}]   ;;  %s110_s3 = inlined_call_operand.vmem [shape: bf16[8,64], index: 3, kind: output, shape index: {}]  }
   0x1   :  { %v70_v0 = vld [vmem:[%s107_s1 + $0x8] sm:$0xff]  ;;  %v69_v1 = vld [vmem:[%s107_s1] sm:$0xff] }
   0x2   :  { %46 = vmatpush.bf16.msra.mxu0 %v70_v0  ;;  %v15_v2 = vld [vmem:[%s109_s0] sm:$0xf] }
   0x3   :  { %v71_v3 = vld [vmem:[%s108_s2] ss:$0 sm:$0xff] }
   0x6   :  { %47 = vmatpush.bf16.msra.mxu0 %v69_v1 }
   0x9   :  { %68 = vmatmul.msk.bf16.vlgmr.msra.gmra.mxu0 %vm36_vm0, %v15_v2 }
  0x86   :  { %v49_v4 = vpop.f32.mrf.mxu0 }
  0x87   :  { %v50_v5 = vadd.f32 %v71_v3, %v49_v4 }
  0x89   :  { %v53_v6 = vpack.c.bf16 %v50_v5, %v50_v5 }
  0x8b   :  { %55 = vst.msk [vmem:[%s110_s3] sm:$0xf] %vm54_vm1, %v53_v6 }
  0x8e   :  { %v51_v7 = vpop.f32.mrf.mxu0 }

// kernel: _lambda_.26
= control target key start
LH: loop header
LB: loop body
LE: loop exit
PB: predicated region body
PF: predicated region fallthrough
CT: control target
= control target key end

     0   :  { %s827_s12 = smov 0   ;;  %s1102_s0 = inlined_call_operand.vmem [shape: bf16[2,6,6,32], index: 0, kind: input, shape index: {}]   ;;  %s1103_s1 = inlined_call_operand.vmem [shape: bf16[9,32,32], index: 1, kind: input, shape index: {}]   ;;  %s1104_s2 = inlined_call_operand.vmem [shape: f32[1,32], index: 2, kind: input, shape index: {}]   ;;  %s1105_s3 = inlined_call_operand.vmem [shape: bf16[2,4,4,32], index: 3, kind: output, shape index: {}]  }
   0x1 LB: > { %s622_s13 = sadd.s32 4294967295, %s801_s12   ;;  %p626_p0 = scmp.ge.s32.totalorder %s801_s12, 1  ;;  %s801_s12 = sphi %s827_s12, %s13_s12  }
   0x2   : > { %p137_p1 = scmp.lt.s32.totalorder %s801_s12, 3 }
   0x4   : > { %p138_p2 = pnand %p626_p0, %p137_p1 }
   0x5   : > { %p161_p3 = scmp.lt.s32.totalorder (!%p138_p2), %s622_s13, 1  ;;  %s1030_s21 = smov (!%p138_p2), 0  }
   0x6   : > { %141 = sbr.rel (%p138_p2) target bundleno = 205 (0xcd), region = 32 }
   0xb   : > { %v838_v0 = vld [vmem:[%s1104_s2] sm:$0x1]  ;;  %v848_v2 = vld [vmem:[%s1103_s1] sm:$0xf0]  ;;  %v853_v3 = vld [vmem:[%s1103_s1 + $0x8] sm:$0xf] }
   0xc   : > { %v843_v1 = vld [vmem:[%s1103_s1] sm:$0xf]  ;;  %v858_v4 = vld [vmem:[%s1103_s1 + $0x8] sm:$0xf0]  ;;  %s1107_s13 = smov (!%p161_p3, %s622_s13), 1 }
   0xd   : > { %v863_v5 = vld [vmem:[%s1103_s1 + $0x10] sm:$0xf]  ;;  %v868_v6 = vld [vmem:[%s1103_s1 + $0x10] sm:$0xf0]  ;;  %v873_v7 = vld [vmem:[%s1103_s1 + $0x18] sm:$0xf] }
   0xe   : > { %v878_v8 = vld [vmem:[%s1103_s1 + $0x18] sm:$0xf0]  ;;  %v883_v9 = vld [vmem:[%s1103_s1 + $0x20] sm:$0xf]  ;;  %s774_s7 = smul.u32 24, %s1107_s13  ;;  %s755_s8 = sshll.u32 %s1107_s13, 3 }
   0xf   : > { %v888_v10 = vld [vmem:[%s1103_s1 + $0x20] sm:$0xf0]  ;;  %v893_v11 = vld [vmem:[%s1103_s1 + $0x28] sm:$0xf]  ;;  %s898_s17 = scalar_lea.vmem %s1105_s3, %s755_s8  ;;  %v903_v12 = vld [vmem:[%s1103_s1 + $0x28] sm:$0xf0] }
  0x10   : > { %v908_v13 = vld [vmem:[%s1103_s1 + $0x30] sm:$0xf]  ;;  %v913_v14 = vld [vmem:[%s1103_s1 + $0x30] sm:$0xf0]  ;;  %s918_s25 = scalar_lea.vmem %s1102_s0, %s774_s7  ;;  %v923_v15 = vld [vmem:[%s1103_s1 + $0x38] sm:$0xf] }
  0x11   : > { %v928_v16 = vld [vmem:[%s1103_s1 + $0x38] sm:$0xf0]  ;;  %v933_v17 = vld [vmem:[%s1103_s1 + $0x40] sm:$0xf]  ;;  %v938_v18 = vld [vmem:[%s1103_s1 + $0x40] sm:$0xf0] }
  0x12   : > { %v943_v19 = vld [vmem:[%s1103_s1 + $0x48] sm:$0xf]  ;;  %v948_v20 = vld [vmem:[%s1103_s1 + $0x48] sm:$0xf0]  ;;  %v953_v21 = vld [vmem:[%s1103_s1 + $0x50] sm:$0xf] }
  0x13   : > { %v958_v22 = vld [vmem:[%s1103_s1 + $0x50] sm:$0xf0]  ;;  %v963_v23 = vld [vmem:[%s1103_s1 + $0x58] sm:$0xf]  ;;  %v968_v24 = vld [vmem:[%s1103_s1 + $0x58] sm:$0xf0] }
  0x14   : > { %v973_v25 = vld [vmem:[%s1103_s1 + $0x60] sm:$0xf]  ;;  %v978_v26 = vld [vmem:[%s1103_s1 + $0x60] sm:$0xf0]  ;;  %v983_v27 = vld [vmem:[%s1103_s1 + $0x68] sm:$0xf] }
  0x15   : > { %v988_v28 = vld [vmem:[%s1103_s1 + $0x68] sm:$0xf0]  ;;  %v993_v29 = vld [vmem:[%s1103_s1 + $0x70] sm:$0xf]  ;;  %v998_v30 = vld [vmem:[%s1103_s1 + $0x70] sm:$0xf0] }
  0x16   : > { %v1003_v31 = vld [vmem:[%s1103_s1 + $0x78] sm:$0xf]  ;;  %v1008_v32 = vld [vmem:[%s1103_s1 + $0x78] sm:$0xf0]  ;;  %v1013_v33 = vld [vmem:[%s1103_s1 + $0x80] sm:$0xf] }
  0x17   : > { %v1018_v34 = vld [vmem:[%s1103_s1 + $0x80] sm:$0xf0]  ;;  %v1023_v35 = vld [vmem:[%s1103_s1 + $0x88] sm:$0xf]  ;;  %v1028_v36 = vld [vmem:[%s1103_s1 + $0x88] sm:$0xf0] }
  0x18 LB: >> { %v688_v37 = vor.u32 %v903_v12, %v893_v11  ;;  %v699_v38 = vor.u32 %v928_v16, %v923_v15  ;;  %v670_v39 = vor.u32 %v878_v8, %v873_v7  ;;  %v679_v40 = vor.u32 %v858_v4, %v853_v3  ;;  %s662_s22 = sshll.u32 %s805_s21, 2  ;;  %s752_s24 = sshll.u32 %s805_s21, 1  ;;  %s805_s21 = sphi %s1030_s21, %s222_s21  }
  0x19   : >> { %v684_v41 = vor.u32 %v888_v10, %v883_v9  ;;  %v695_v42 = vor.u32 %v913_v14, %v908_v13  ;;  %s1049_s23 = scalar_lea.vmem %s918_s25, %s662_s22  ;;  %v666_v43 = vor.u32 %v868_v6, %v863_v5  ;;  %v675_v44 = vor.u32 %v848_v2, %v843_v1  ;;  %s549_s26 = scalar_lea.vmem %s898_s17, %s752_s24 }
  0x1a   : >> { %320 = vmatpush.bf16.msra.mxu2 %v688_v37  ;;  %353 = vmatpush.bf16.msra.mxu3 %v699_v38  ;;  %v294_v45 = vld [vmem:[%s1049_s23] sm:$0x6]  ;;  %v709_v47 = vor.u32 %v948_v20, %v943_v19  ;;  %v730_v48 = vor.u32 %v988_v28, %v983_v27  ;;  %v719_v51 = vor.u32 %v968_v24, %v963_v23  ;;  %v691_v52 = vld [vmem:[%s1049_s23 + $0x4] sm:$0x3]  ;;  %v732_v54 = vld [vmem:[%s1049_s23 + $0x8] sm:$0x7] }
  0x1b   : >> { %259 = vmatpush.bf16.msra.mxu0 %v670_v39  ;;  %287 = vmatpush.bf16.msra.mxu1 %v679_v40  ;;  %v226_v46 = vld [vmem:[%s1049_s23] sm:$0x7]  ;;  %v296_v49 = vunpack.c.l.b16 %v294_v45  ;;  %v740_v53 = vor.u32 %v1008_v32, %v1003_v31  ;;  %v470_v58 = vunpack.c.l.b16 %v732_v54  ;;  %vm249_vm0 = vcmask 261120   ;;  %v701_v62 = vld [vmem:[%s1049_s23 + $0x4] sm:$0x7]  ;;  %s222_s21 = sadd.s32 1, %s805_s21  }
  0x1c   : >> { %v228_v50 = vunpack.c.l.b16 %v226_v46  ;;  %v225_v57 = vld [vmem:[%s1049_s23] sm:$0x3]  ;;  %v705_v59 = vor.u32 %v938_v18, %v933_v17  ;;  %v726_v60 = vor.u32 %v978_v26, %v973_v25  ;;  %v715_v61 = vor.u32 %v958_v22, %v953_v21  ;;  %p219_p4 = scmp.ge.s32.totalorder %s222_s21, 4  }
  0x1d   : >> { %v297_v55 = vpack.c.b16 %v296_v49, %v296_v49  ;;  %v471_v39 = vpack.c.b16 %v470_v58, %v470_v58  ;;  %v736_v40 = vor.u32 %v998_v30, %v993_v29  ;;  %v746_v49 = vor.u32 %v1018_v34, %v1013_v33  ;;  %v722_v58 = vld [vmem:[%s1049_s23 + $0x8] sm:$0x3] }
  0x1e   : >> { %321 = vmatpush.bf16.msra.mxu2 %v684_v41  ;;  %354 = vmatpush.bf16.msra.mxu3 %v695_v42  ;;  %v229_v56 = vpack.c.b16 %v228_v50, %v228_v50  ;;  %v363_v42 = vunpack.c.l.b16 %v701_v62  ;;  %vm550_vm1 = vcmask 254976  }
  0x1f   : >> { %260 = vmatpush.bf16.msra.mxu0 %v666_v43  ;;  %288 = vmatpush.bf16.msra.mxu1 %v675_v44  ;;  %v298_v63 = vrot.slane %v297_v55, 1  ;;  %v711_v43 = vld [vmem:[%s1049_s23 + $0x4] sm:$0x6]  ;;  %v750_v44 = vor.u32 %v1028_v36, %v1023_v35  ;;  %v475_v46 = vshll.u32 %v471_v39, 16  ;;  %v473_v50 = vshrl.u32 %v471_v39, 16 }
  0x20   : >> { %v231_v37 = vshrl.u32 %v229_v56, 16  ;;  %v233_v38 = vshll.u32 %v229_v56, 16 }
  0x21   : >> { %700 = vmatmul.msk.bf16.vlgmr.msra.gmra.mxu3 %vm249_vm0, %v691_v52  ;;  %689 = vmatmul.msk.bf16.vlgmr.msra.gmra.mxu2 %vm249_vm0, %v298_v63 }
  0x22   : >> { %460 = vmatpush.bf16.msrb.mxu2 %v730_v48  ;;  %680 = vmatmul.msk.bf16.vlgmr.msra.gmra.mxu1 %vm249_vm0, %v225_v57  ;;  %v235_v41 = vrot.slane %v233_v38, 1  ;;  %v364_v48 = vpack.c.b16 %v363_v42, %v363_v42 }
  0x23   : >> { %393 = vmatpush.bf16.msrb.mxu0 %v709_v47  ;;  %427 = vmatpush.bf16.msrb.mxu1 %v719_v51  ;;  %v403_v47 = vunpack.c.l.b16 %v711_v43  ;;  %v477_v51 = vrot.slane %v475_v46, 1 }
  0x24   : >> { %500 = vmatpush.bf16.msrb.mxu3 %v740_v53  ;;  %v236_v45 = vor.u32 %v235_v41, %v231_v37  ;;  %v368_v53 = vshll.u32 %v364_v48, 16  ;;  %v366_v56 = vshrl.u32 %v364_v48, 16 }
  0x25   : >> { %v404_v52 = vpack.c.b16 %v403_v47, %v403_v47  ;;  %v478_v54 = vor.u32 %v477_v51, %v473_v50 }
  0x26   : >> { %461 = vmatpush.bf16.msrb.mxu2 %v726_v60  ;;  %671 = vmatmul.msk.bf16.vlgmr.msra.gmra.mxu0 %vm249_vm0, %v236_v45  ;;  %v370_v57 = vrot.slane %v368_v53, 1  ;;  %v742_v60 = vld [vmem:[%s1049_s23 + $0x8] sm:$0x6] }
  0x27   : >> { %394 = vmatpush.bf16.msrb.mxu0 %v705_v59  ;;  %428 = vmatpush.bf16.msrb.mxu1 %v715_v61  ;;  %v405_v55 = vrot.slane %v404_v52, 1  ;;  %v510_v61 = vunpack.c.l.b16 %v742_v60  ;;  %v543_v60 = vperm.slane %v838_v0, 0 }
  0x28   : >> { %501 = vmatpush.bf16.msrb.mxu3 %v736_v40  ;;  %v371_v59 = vor.u32 %v370_v57, %v366_v56 }
  0x29   : >> { %v511_v62 = vpack.c.b16 %v510_v61, %v510_v61 }
  0x2b   : >> { %534 = vmatpush.bf16.msra.mxu0 %v750_v44  ;;  %v512_v63 = vrot.slane %v511_v62, 1 }
  0x2f   : >> { %535 = vmatpush.bf16.msra.mxu0 %v746_v49 }
  0x31   : >> { %741 = vmatmul.msk.bf16.vlgmr.msrb.gmra.mxu3 %vm249_vm0, %v478_v54  ;;  %731 = vmatmul.msk.bf16.vlgmr.msrb.gmra.mxu2 %vm249_vm0, %v722_v58 }
  0x32   : >> { %720 = vmatmul.msk.bf16.vlgmr.msrb.gmra.mxu1 %vm249_vm0, %v405_v55 }
  0x36   : >> { %710 = vmatmul.msk.bf16.vlgmr.msrb.gmra.mxu0 %vm249_vm0, %v371_v59 }
  0x46   : >> { %751 = vmatmul.msk.bf16.vlgmr.msra.gmra.mxu0 %vm249_vm0, %v512_v63 }
  0x9f   : >> { %v290_v37 = vpop.f32.mrf.mxu1 }
  0xa3   : >> { %v262_v38 = vpop.f32.mrf.mxu0 }
  0xa4   : >> { %v356_v39 = vpop.f32.mrf.mxu3  ;;  %v323_v40 = vpop.f32.mrf.mxu2  ;;  %v291_v44 = vadd.f32 %v290_v37, %v262_v38 }
  0xa6   : >> { %v327_v47 = vadd.f32 %v323_v40, %v291_v44 }
  0xa7   : >> { %v292_v41 = vpop.f32.mrf.mxu1 }
  0xa8   : >> { %v360_v50 = vadd.f32 %v356_v39, %v327_v47 }
  0xab   : >> { %v264_v42 = vpop.f32.mrf.mxu0 }
  0xac   : >> { %v358_v43 = vpop.f32.mrf.mxu3  ;;  %v325_v45 = vpop.f32.mrf.mxu2 }
  0xaf   : >> { %v430_v46 = vpop.f32.mrf.mxu1 }
  0xb3   : >> { %v396_v48 = vpop.f32.mrf.mxu0 }
  0xb4   : >> { %v503_v49 = vpop.f32.mrf.mxu3  ;;  %v463_v51 = vpop.f32.mrf.mxu2  ;;  %v400_v52 = vadd.f32 %v396_v48, %v360_v50 }
  0xb6   : >> { %v434_v54 = vadd.f32 %v430_v46, %v400_v52 }
  0xb7   : >> { %v432_v53 = vpop.f32.mrf.mxu1 }
  0xb8   : >> { %v467_v58 = vadd.f32 %v463_v51, %v434_v54 }
  0xba   : >> { %v507_v59 = vadd.f32 %v503_v49, %v467_v58 }
  0xbb   : >> { %v398_v55 = vpop.f32.mrf.mxu0 }
  0xbc   : >> { %v505_v56 = vpop.f32.mrf.mxu3  ;;  %v465_v57 = vpop.f32.mrf.mxu2 }
  0xc3   : >> { %v537_v61 = vpop.f32.mrf.mxu0 }
  0xc4   : >> { %v541_v62 = vadd.f32 %v537_v61, %v507_v59 }
  0xc6   : >> { %v545_v63 = vadd.f32 %v543_v60, %v541_v62 }
  0xc8   : >> { %v546_v37 = vmax.f32 %v545_v63, 0.0  ;;  %221 = sbr.rel (!%p219_p4) target bundleno = 24 (0x18), region = 81 }
  0xca   : >> { %v547_v38 = vpack.c.bf16 %v546_v37, %v546_v37 }
  0xcb   : >> { %v539_v39 = vpop.f32.mrf.mxu0 }
  0xcc   : >> { %551 = vst.msk [vmem:[%s549_s26] sm:$0x3] %vm550_vm1, %v547_v38 }
  0xcd PF: > { %s13_s12 = sadd.s32 1, %s801_s12  }
  0xce   : > { %p10_p5 = scmp.ge.s32.totalorder %s13_s12, 4  }
  0xd0   :  { %12 = sbr.rel (!%p10_p5) target bundleno = 1 (0x1), region = 92 }

// kernel: _lambda_.28
= control target key start
LH: loop header
LB: loop body
LE: loop exit
PB: predicated region body
PF: predicated region fallthrough
CT: control target
= control target key end

     0   :  { %s901_s15 = smov 0   ;;  %s1184_s0 = inlined_call_operand.vmem [shape: bf16[2,6,3,32], index: 0, kind: input, shape index: {}]   ;;  %s1185_s1 = inlined_call_operand.vmem [shape: bf16[2,6,3,32], index: 1, kind: input, shape index: {}]   ;;  %s1186_s2 = inlined_call_operand.vmem [shape: bf16[9,32,64], index: 2, kind: input, shape index: {}]   ;;  %s1187_s3 = inlined_call_operand.vmem [shape: f32[1,64], index: 3, kind: input, shape index: {}]   ;;  %s1188_s4 = inlined_call_operand.vmem [shape: bf16[2,2,2,64], index: 4, kind: output, shape index: {}]  }
   0x1 LB: > { %s679_s16 = sadd.s32 4294967295, %s870_s15   ;;  %p683_p0 = scmp.ge.s32.totalorder %s870_s15, 1  ;;  %s870_s15 = sphi %s901_s15, %s14_s15  }
   0x2   : > { %p172_p1 = scmp.lt.s32.totalorder %s870_s15, 3 }
   0x4   : > { %p173_p2 = pnand %p683_p0, %p172_p1 }
   0x5   : > { %p202_p3 = scmp.lt.s32.totalorder (!%p173_p2), %s679_s16, 1  ;;  %s1109_s7 = smov (!%p173_p2), 0  }
   0x6   : > { %176 = sbr.rel (%p173_p2) target bundleno = 202 (0xca), region = 36 }
   0xb   : > { %v912_v0 = vld [vmem:[%s1187_s3] sm:$0x1]  ;;  %v922_v2 = vld [vmem:[%s1186_s2] sm:$0xf0]  ;;  %v927_v3 = vld [vmem:[%s1186_s2 + $0x8] sm:$0xf] }
   0xc   : > { %v917_v1 = vld [vmem:[%s1186_s2] sm:$0xf]  ;;  %v932_v4 = vld [vmem:[%s1186_s2 + $0x8] sm:$0xf0]  ;;  %s1190_s16 = smov (!%p202_p3, %s679_s16), 1 }
   0xd   : > { %v937_v5 = vld [vmem:[%s1186_s2 + $0x10] sm:$0xf]  ;;  %v942_v6 = vld [vmem:[%s1186_s2 + $0x10] sm:$0xf0]  ;;  %v947_v7 = vld [vmem:[%s1186_s2 + $0x18] sm:$0xf] }
   0xe   : > { %v952_v8 = vld [vmem:[%s1186_s2 + $0x18] sm:$0xf0]  ;;  %v957_v9 = vld [vmem:[%s1186_s2 + $0x20] sm:$0xf]  ;;  %s843_s11 = smul.u32 12, %s1190_s16  ;;  %s686_s12 = sshll.u32 %s1190_s16, 1 }
   0xf   : > { %v962_v10 = vld [vmem:[%s1186_s2 + $0x20] sm:$0xf0]  ;;  %v967_v11 = vld [vmem:[%s1186_s2 + $0x28] sm:$0xf]  ;;  %s972_s21 = scalar_lea.vmem %s1188_s4, %s686_s12  ;;  %v977_v12 = vld [vmem:[%s1186_s2 + $0x28] sm:$0xf0] }
  0x10   : > { %v982_v13 = vld [vmem:[%s1186_s2 + $0x30] sm:$0xf]  ;;  %v987_v14 = vld [vmem:[%s1186_s2 + $0x30] sm:$0xf0]  ;;  %s992_s29 = scalar_lea.vmem %s1184_s0, %s843_s11  ;;  %s997_s6 = scalar_lea.vmem %s1185_s1, %s843_s11  ;;  %v1002_v15 = vld [vmem:[%s1186_s2 + $0x38] sm:$0xf] }
  0x11   : > { %v1007_v16 = vld [vmem:[%s1186_s2 + $0x38] sm:$0xf0]  ;;  %v1012_v17 = vld [vmem:[%s1186_s2 + $0x40] sm:$0xf]  ;;  %v1017_v18 = vld [vmem:[%s1186_s2 + $0x40] sm:$0xf0] }
  0x12   : > { %v1022_v19 = vld [vmem:[%s1186_s2 + $0x48] sm:$0xf]  ;;  %v1027_v20 = vld [vmem:[%s1186_s2 + $0x48] sm:$0xf0]  ;;  %v1032_v21 = vld [vmem:[%s1186_s2 + $0x50] sm:$0xf] }
  0x13   : > { %v1037_v22 = vld [vmem:[%s1186_s2 + $0x50] sm:$0xf0]  ;;  %v1042_v23 = vld [vmem:[%s1186_s2 + $0x58] sm:$0xf]  ;;  %v1047_v24 = vld [vmem:[%s1186_s2 + $0x58] sm:$0xf0] }
  0x14   : > { %v1052_v25 = vld [vmem:[%s1186_s2 + $0x60] sm:$0xf]  ;;  %v1057_v26 = vld [vmem:[%s1186_s2 + $0x60] sm:$0xf0]  ;;  %v1062_v27 = vld [vmem:[%s1186_s2 + $0x68] sm:$0xf] }
  0x15   : > { %v1067_v28 = vld [vmem:[%s1186_s2 + $0x68] sm:$0xf0]  ;;  %v1072_v29 = vld [vmem:[%s1186_s2 + $0x70] sm:$0xf]  ;;  %v1077_v30 = vld [vmem:[%s1186_s2 + $0x70] sm:$0xf0] }
  0x16   : > { %v1082_v31 = vld [vmem:[%s1186_s2 + $0x78] sm:$0xf]  ;;  %v1087_v32 = vld [vmem:[%s1186_s2 + $0x78] sm:$0xf0]  ;;  %v1092_v33 = vld [vmem:[%s1186_s2 + $0x80] sm:$0xf] }
  0x17   : > { %v1097_v34 = vld [vmem:[%s1186_s2 + $0x80] sm:$0xf0]  ;;  %v1102_v35 = vld [vmem:[%s1186_s2 + $0x88] sm:$0xf]  ;;  %v1107_v36 = vld [vmem:[%s1186_s2 + $0x88] sm:$0xf0] }
  0x18 LB: >> { %v729_v37 = vor.u32 %v952_v8, %v947_v7  ;;  %v738_v38 = vor.u32 %v932_v4, %v927_v3  ;;  %v759_v39 = vor.u32 %v1007_v16, %v1002_v15  ;;  %v747_v40 = vor.u32 %v977_v12, %v967_v11  ;;  %s837_s8 = sshll.u32 %s874_s7, 2  ;;  %s585_s12 = scalar_lea.vmem %s972_s21, %s874_s7  ;;  %s874_s7 = sphi %s1109_s7, %s267_s7  }
  0x19   : >> { %v725_v41 = vor.u32 %v942_v6, %v937_v5  ;;  %v734_v42 = vor.u32 %v922_v2, %v917_v1  ;;  %s1128_s9 = scalar_lea.vmem %s992_s29, %s837_s8  ;;  %s1131_s10 = scalar_lea.vmem %s997_s6, %s837_s8  ;;  %v755_v43 = vor.u32 %v987_v14, %v982_v13  ;;  %v771_v44 = vor.u32 %v1027_v20, %v1022_v19 }
  0x1a   : >> { %297 = vmatpush.bf16.msra.mxu0 %v729_v37  ;;  %325 = vmatpush.bf16.msra.mxu1 %v738_v38  ;;  %v332_v45 = vld [vmem:[%s1128_s9] sm:$0x3]  ;;  %v743_v46 = vor.u32 %v962_v10, %v957_v9  ;;  %v805_v47 = vor.u32 %v1087_v32, %v1082_v31  ;;  %vm287_vm0 = vcmask 261120   ;;  %v793_v50 = vor.u32 %v1067_v28, %v1062_v27  ;;  %v751_v51 = vld [vmem:[%s1128_s9 + $0x2] sm:$0x1]  ;;  %s267_s7 = sadd.s32 1, %s874_s7  }
  0x1b   : >> { %396 = vmatpush.bf16.msra.mxu3 %v759_v39  ;;  %363 = vmatpush.bf16.msra.mxu2 %v747_v40  ;;  %334 = vst [vmem:[#allocation1] ss:$4 sm:$0xff] %v332_v45  ;;  %v274_v48 = vld [vmem:[%s1131_s10] sm:$0x1]  ;;  %v767_v52 = vor.u32 %v1017_v18, %v1012_v17  ;;  %v781_v53 = vor.u32 %v1047_v24, %v1042_v23  ;;  %v773_v56 = vld [vmem:[%s1128_s9 + $0x2] sm:$0x3] }
  0x1c   : >> { %v271_v49 = vld [vmem:[%s1128_s9] sm:$0x1]  ;;  %v801_v54 = vor.u32 %v1077_v30, %v1072_v29  ;;  %v815_v55 = vor.u32 %v1107_v36, %v1102_v35  ;;  %v789_v57 = vor.u32 %v1057_v26, %v1052_v25  ;;  %v777_v58 = vor.u32 %v1037_v22, %v1032_v21  ;;  %v807_v38 = vld [vmem:[%s1128_s9 + $0x4] sm:$0x3]  ;;  %p264_p4 = scmp.ge.s32.totalorder %s267_s7, 2  }
  0x1d   : >> { %v811_v60 = vor.u32 %v1097_v34, %v1092_v33  ;;  %vm586_vm1 = vcmask 516096  }
  0x1e   : >> { %298 = vmatpush.bf16.msra.mxu0 %v725_v41  ;;  %326 = vmatpush.bf16.msra.mxu1 %v734_v42  ;;  %v763_v42 = vld [vmem:[%s1131_s10 + $0x2] sm:$0x1] }
  0x1f   : >> { %397 = vmatpush.bf16.msra.mxu3 %v755_v43  ;;  %364 = vmatpush.bf16.msra.mxu2 %v743_v46  ;;  %v797_v43 = vld [vmem:[%s1131_s10 + $0x4] sm:$0x1] }
  0x21   : >> { %730 = vmatmul.msk.bf16.vlgmr.msra.gmra.mxu0 %vm287_vm0, %v274_v48  ;;  %739 = vmatmul.msk.bf16.vlgmr.msra.gmra.mxu1 %vm287_vm0, %v271_v49  ;;  %v785_v48 = vld [vmem:[%s1128_s9 + $0x4] sm:$0x1] }
  0x22   : >> { %428 = vmatpush.bf16.msrb.mxu0 %v771_v44  ;;  %760 = vmatmul.msk.bf16.vlgmr.msra.gmra.mxu3 %vm287_vm0, %v751_v51  ;;  %v335_v59 = vld.sshfl [vmem:[#allocation1] sm:$0xff pattern:$0x73625140] }
  0x23   : >> { %532 = vmatpush.bf16.msrb.mxu3 %v805_v47  ;;  %500 = vmatpush.bf16.msrb.mxu2 %v793_v50  ;;  %v336_v61 = vshrl.u32 %v335_v59, 16  ;;  %v338_v62 = vshll.u32 %v335_v59, 16  ;;  %438 = vst [vmem:[#allocation1] ss:$4 sm:$0xff] %v773_v56 }
  0x24   : >> { %467 = vmatpush.bf16.msrb.mxu1 %v781_v53 }
  0x25   : >> { %v340_v63 = vrot.slane %v338_v62, 1 }
  0x26   : >> { %429 = vmatpush.bf16.msrb.mxu0 %v767_v52 }
  0x27   : >> { %533 = vmatpush.bf16.msrb.mxu3 %v801_v54  ;;  %501 = vmatpush.bf16.msrb.mxu2 %v789_v57  ;;  %v341_v37 = vor.u32 %v340_v63, %v336_v61 }
  0x28   : >> { %468 = vmatpush.bf16.msrb.mxu1 %v777_v58 }
  0x29   : >> { %748 = vmatmul.msk.bf16.vlgmr.msra.gmra.mxu2 %vm287_vm0, %v341_v37 }
  0x2a   : >> { %571 = vmatpush.bf16.msra.mxu0 %v815_v55  ;;  %v439_v39 = vld.sshfl [vmem:[#allocation1] sm:$0xff pattern:$0x73625140] }
  0x2b   : >> { %v440_v40 = vshrl.u32 %v439_v39, 16  ;;  %v442_v41 = vshll.u32 %v439_v39, 16  ;;  %542 = vst [vmem:[#allocation1] ss:$4 sm:$0xff] %v807_v38 }
  0x2d   : >> { %v444_v44 = vrot.slane %v442_v41, 1 }
  0x2e   : >> { %572 = vmatpush.bf16.msra.mxu0 %v811_v60 }
  0x2f   : >> { %v445_v45 = vor.u32 %v444_v44, %v440_v40 }
  0x31   : >> { %772 = vmatmul.msk.bf16.vlgmr.msrb.gmra.mxu0 %vm287_vm0, %v763_v42  ;;  %782 = vmatmul.msk.bf16.vlgmr.msrb.gmra.mxu1 %vm287_vm0, %v445_v45 }
  0x32   : >> { %806 = vmatmul.msk.bf16.vlgmr.msrb.gmra.mxu3 %vm287_vm0, %v797_v43  ;;  %v543_v46 = vld.sshfl [vmem:[#allocation1] sm:$0xff pattern:$0x73625140] }
  0x33   : >> { %v546_v47 = vshll.u32 %v543_v46, 16  ;;  %v544_v49 = vshrl.u32 %v543_v46, 16 }
  0x35   : >> { %v548_v50 = vrot.slane %v546_v47, 1 }
  0x37   : >> { %v549_v51 = vor.u32 %v548_v50, %v544_v49 }
  0x39   : >> { %794 = vmatmul.msk.bf16.vlgmr.msrb.gmra.mxu2 %vm287_vm0, %v785_v48  ;;  %v580_v48 = vperm.slane %v912_v0, 0 }
  0x41   : >> { %816 = vmatmul.msk.bf16.vlgmr.msra.gmra.mxu0 %vm287_vm0, %v549_v51 }
  0x9e   : >> { %v300_v52 = vpop.f32.mrf.mxu0  ;;  %v328_v53 = vpop.f32.mrf.mxu1 }
  0x9f   : >> { %v329_v60 = vadd.f32 %v328_v53, %v300_v52 }
  0xa5   : >> { %v399_v54 = vpop.f32.mrf.mxu3 }
  0xa6   : >> { %v302_v55 = vpop.f32.mrf.mxu0  ;;  %v330_v56 = vpop.f32.mrf.mxu1 }
  0xac   : >> { %v366_v58 = vpop.f32.mrf.mxu2 }
  0xad   : >> { %v401_v57 = vpop.f32.mrf.mxu3  ;;  %v370_v62 = vadd.f32 %v366_v58, %v329_v60 }
  0xae   : >> { %v431_v59 = vpop.f32.mrf.mxu0  ;;  %v470_v61 = vpop.f32.mrf.mxu1 }
  0xaf   : >> { %v403_v63 = vadd.f32 %v399_v54, %v370_v62 }
  0xb1   : >> { %v435_v41 = vadd.f32 %v431_v59, %v403_v63 }
  0xb3   : >> { %v474_v42 = vadd.f32 %v470_v61, %v435_v41 }
  0xb4   : >> { %v368_v38 = vpop.f32.mrf.mxu2 }
  0xb5   : >> { %v535_v37 = vpop.f32.mrf.mxu3 }
  0xb6   : >> { %v433_v39 = vpop.f32.mrf.mxu0  ;;  %v472_v40 = vpop.f32.mrf.mxu1 }
  0xbc   : >> { %v503_v44 = vpop.f32.mrf.mxu2 }
  0xbd   : >> { %v537_v43 = vpop.f32.mrf.mxu3  ;;  %v507_v46 = vadd.f32 %v503_v44, %v474_v42 }
  0xbe   : >> { %v574_v45 = vpop.f32.mrf.mxu0 }
  0xbf   : >> { %v539_v47 = vadd.f32 %v535_v37, %v507_v46 }
  0xc1   : >> { %v578_v49 = vadd.f32 %v574_v45, %v539_v47 }
  0xc3   : >> { %v582_v50 = vadd.f32 %v580_v48, %v578_v49 }
  0xc4   : >> { %v505_v51 = vpop.f32.mrf.mxu2 }
  0xc5   : >> { %v583_v53 = vmax.f32 %v582_v50, 0.0  ;;  %266 = sbr.rel (!%p264_p4) target bundleno = 24 (0x18), region = 91 }
  0xc6   : >> { %v576_v52 = vpop.f32.mrf.mxu0 }
  0xc7   : >> { %v584_v54 = vpack.c.bf16 %v583_v53, %v583_v53 }
  0xc9   : >> { %587 = vst.msk [vmem:[%s585_s12] sm:$0x1] %vm586_vm1, %v584_v54 }
  0xca PF: > { %s14_s15 = sadd.s32 1, %s870_s15  }
  0xcb   : > { %p11_p5 = scmp.ge.s32.totalorder %s14_s15, 4  }
  0xcd   :  { %13 = sbr.rel (!%p11_p5) target bundleno = 1 (0x1), region = 102 }

// kernel: _lambda_.33
= control target key start
LH: loop header
LB: loop body
LE: loop exit
PB: predicated region body
PF: predicated region fallthrough
CT: control target
= control target key end

     0   :  { %s179_s0 = inlined_call_operand.vmem [shape: bf16[8,64], index: 0, kind: input, shape index: {}]   ;;  %s180_s1 = inlined_call_operand.vmem [shape: bf16[64,32], index: 1, kind: input, shape index: {}]   ;;  %s181_s2 = inlined_call_operand.vmem [shape: f32[1,32], index: 2, kind: input, shape index: {}]   ;;  %s182_s3 = inlined_call_operand.hbm [shape: f32[8,32], index: 3, kind: output, shape index: {}]  }
   0x1   :  { %v108_v0 = vld [vmem:[%s180_s1 + $0x18] sm:$0xff]  ;;  %v107_v1 = vld [vmem:[%s180_s1 + $0x10] sm:$0xff] }
   0x2   :  { %61 = vmatpush.bf16.msra.mxu0 %v108_v0 }
   0x3   :  { %8 = vsyncpa [#allocation3], 0  ;;  %v106_v2 = vld [vmem:[%s180_s1 + $0x8] sm:$0xff]  ;;  %v105_v3 = vld [vmem:[%s180_s1] sm:$0xff]  ;;  %vm53_vm0 = vcmask 523264   ;;  %s137_s24 = smov [#allocation2]  }
   0x4   :  { %v16_v4 = vld [vmem:[%s179_s0] sm:$0xf]  ;;  %s77_s25 = sshll.u32 %s137_s24, 4  ;;  %s79_s28 = sshll.u32 %s182_s3, 4  ;;  %vm70_vm1 = vcmask 261120   ;;  %s78_s25 = int_to_ptr.vmem [resolvable:$true] %s77_s25  ;;  %s80_s28 = int_to_ptr.hbm [resolvable:$true] %s79_s28 }
   0x5   :  { %v110_v5 = vld [vmem:[%s181_s2] ss:$0 sm:$0xff] }
   0x6   :  { %62 = vmatpush.bf16.msra.mxu0 %v107_v1 }
   0xa   :  { %63 = vmatpush.bf16.msra.mxu0 %v106_v2 }
   0xe   :  { %64 = vmatpush.bf16.msra.mxu0 %v105_v3 }
  0x11   :  { %104 = vmatmul.msk.bf16.vlgmr.msra.gmra.mxu0 %vm53_vm0, %v16_v4 }
  0x8e   :  { %v66_v6 = vpop.f32.mrf.mxu0 }
  0x8f   :  { %v67_v7 = vadd.f32 %v110_v5, %v66_v6 }
  0x91   :  { %71 = vst.msk [vmem:[#allocation2] sm:$0xff] %vm70_vm1, %v67_v7 }
  0x92   :  { %82 = dma.vmem_to_hbm [thread:$0]  %s78_s25, 128, %s80_s28, [#allocation3]  }
  0x96   :  { %v68_v8 = vpop.f32.mrf.mxu0 }
  0x97   :  { %135 = dma.done.wait [#allocation3], 128  }
  0x98   :  { %136 = vsyncadd [#allocation3], 4294967168 }
  0x99   :  { %87 = vsyncpa [#allocation3], 1 }

// kernel: _lambda_.30
= control target key start
LH: loop header
LB: loop body
LE: loop exit
PB: predicated region body
PF: predicated region fallthrough
CT: control target
= control target key end

     0   :  { %s1152_s15 = smov 0   ;;  %s1650_s0 = inlined_call_operand.vmem [shape: bf16[2,4,4,64], index: 0, kind: input, shape index: {}]   ;;  %s1651_s1 = inlined_call_operand.vmem [shape: bf16[9,64,64], index: 1, kind: input, shape index: {}]   ;;  %s1652_s2 = inlined_call_operand.vmem [shape: f32[1,64], index: 2, kind: input, shape index: {}]   ;;  %s1653_s3 = inlined_call_operand.vmem [shape: bf16[2,2,2,64], index: 3, kind: input, shape index: {}]   ;;  %s1654_s4 = inlined_call_operand.vmem [shape: bf16[2,2,2,64], index: 4, kind: output, shape index: {}]  }
   0x1 LB: > { %s821_s16 = sadd.s32 4294967295, %s1121_s15   ;;  %p825_p0 = scmp.ge.s32.totalorder %s1121_s15, 1  ;;  %s1121_s15 = sphi %s1152_s15, %s14_s15  }
   0x2   : > { %p171_p1 = scmp.lt.s32.totalorder %s1121_s15, 3 }
   0x4   : > { %p172_p2 = pnand %p825_p0, %p171_p1 }
   0x5   : > { %p200_p3 = scmp.lt.s32.totalorder (!%p172_p2), %s821_s16, 1  ;;  %s1540_s14 = smov (!%p172_p2), 0  }
   0x6   : > { %175 = sbr.rel (%p172_p2) target bundleno = 245 (0xf5), region = 36 }
   0xb   : > { %v1163_v0 = vld [vmem:[%s1652_s2] sm:$0x1]  ;;  %v1173_v2 = vld [vmem:[%s1651_s1] sm:$0xf0]  ;;  %v1178_v3 = vld [vmem:[%s1651_s1 + $0x8] sm:$0xf] }
   0xc   : > { %1655 = vst [vmem:[#allocation2_spill] sm:$0xff] %v1163_v0  ;;  %v1168_v1 = vld [vmem:[%s1651_s1] sm:$0xf]  ;;  %v1183_v4 = vld [vmem:[%s1651_s1 + $0x8] sm:$0xf0]  ;;  %s1720_s16 = smov (!%p200_p3, %s821_s16), 1 }
   0xd   : > { %1656 = vst [vmem:[#allocation3_spill] sm:$0xff] %v1168_v1  ;;  %v1188_v5 = vld [vmem:[%s1651_s1 + $0x10] sm:$0xf]  ;;  %v1193_v6 = vld [vmem:[%s1651_s1 + $0x10] sm:$0xf0]  ;;  %s1058_s11 = sshll.u32 %s1720_s16, 3 }
   0xe   : > { %1657 = vst [vmem:[#allocation4_spill] sm:$0xff] %v1173_v2  ;;  %v1198_v7 = vld [vmem:[%s1651_s1 + $0x18] sm:$0xf]  ;;  %v1203_v8 = vld [vmem:[%s1651_s1 + $0x18] sm:$0xf0]  ;;  %s828_s12 = sshll.u32 %s1720_s16, 1  ;;  %s1223_s21 = scalar_lea.vmem %s1650_s0, %s1058_s11 }
   0xf   : > { %1658 = vst [vmem:[#allocation5_spill] sm:$0xff] %v1178_v3  ;;  %v1208_v9 = vld [vmem:[%s1651_s1 + $0x20] sm:$0xf]  ;;  %v1213_v10 = vld [vmem:[%s1651_s1 + $0x20] sm:$0xf0]  ;;  %s1228_s24 = scalar_lea.vmem %s1653_s3, %s828_s12  ;;  %s1248_s6 = scalar_lea.vmem %s1654_s4, %s828_s12 }
  0x10   : > { %1659 = vst [vmem:[#allocation6_spill] sm:$0xff] %v1183_v4  ;;  %v1218_v11 = vld [vmem:[%s1651_s1 + $0x28] sm:$0xf]  ;;  %v1233_v12 = vld [vmem:[%s1651_s1 + $0x28] sm:$0xf0] }
  0x11   : > { %1660 = vst [vmem:[#allocation7_spill] sm:$0xff] %v1188_v5  ;;  %v1238_v13 = vld [vmem:[%s1651_s1 + $0x30] sm:$0xf]  ;;  %v1243_v14 = vld [vmem:[%s1651_s1 + $0x30] sm:$0xf0] }
  0x12   : > { %1661 = vst [vmem:[#allocation8_spill] sm:$0xff] %v1193_v6  ;;  %v1253_v15 = vld [vmem:[%s1651_s1 + $0x38] sm:$0xf]  ;;  %v1258_v16 = vld [vmem:[%s1651_s1 + $0x38] sm:$0xf0] }
  0x13   : > { %1662 = vst [vmem:[#allocation9_spill] sm:$0xff] %v1198_v7  ;;  %v1263_v17 = vld [vmem:[%s1651_s1 + $0x40] sm:$0xf]  ;;  %v1268_v18 = vld [vmem:[%s1651_s1 + $0x40] sm:$0xf0] }
  0x14   : > { %1663 = vst [vmem:[#allocation10_spill] sm:$0xff] %v1203_v8  ;;  %v1273_v19 = vld [vmem:[%s1651_s1 + $0x48] sm:$0xf]  ;;  %v1278_v20 = vld [vmem:[%s1651_s1 + $0x48] sm:$0xf0] }
  0x15   : > { %1664 = vst [vmem:[#allocation11_spill] sm:$0xff] %v1208_v9  ;;  %v1283_v21 = vld [vmem:[%s1651_s1 + $0x50] sm:$0xf]  ;;  %v1288_v22 = vld [vmem:[%s1651_s1 + $0x50] sm:$0xf0] }
  0x16   : > { %1665 = vst [vmem:[#allocation12_spill] sm:$0xff] %v1213_v10  ;;  %v1293_v23 = vld [vmem:[%s1651_s1 + $0x58] sm:$0xf]  ;;  %v1298_v24 = vld [vmem:[%s1651_s1 + $0x58] sm:$0xf0] }
  0x17   : > { %1666 = vst [vmem:[#allocation13_spill] sm:$0xff] %v1218_v11  ;;  %v1303_v25 = vld [vmem:[%s1651_s1 + $0x60] sm:$0xf]  ;;  %v1308_v26 = vld [vmem:[%s1651_s1 + $0x60] sm:$0xf0] }
  0x18   : > { %1667 = vst [vmem:[#allocation14_spill] sm:$0xff] %v1233_v12  ;;  %v1313_v27 = vld [vmem:[%s1651_s1 + $0x68] sm:$0xf]  ;;  %v1318_v28 = vld [vmem:[%s1651_s1 + $0x68] sm:$0xf0] }
  0x19   : > { %1668 = vst [vmem:[#allocation15_spill] sm:$0xff] %v1238_v13  ;;  %v1323_v29 = vld [vmem:[%s1651_s1 + $0x70] sm:$0xf]  ;;  %v1328_v30 = vld [vmem:[%s1651_s1 + $0x70] sm:$0xf0] }
  0x1a   : > { %1669 = vst [vmem:[#allocation16_spill] sm:$0xff] %v1243_v14  ;;  %v1333_v31 = vld [vmem:[%s1651_s1 + $0x78] sm:$0xf]  ;;  %v1338_v32 = vld [vmem:[%s1651_s1 + $0x78] sm:$0xf0] }
  0x1b   : > { %1670 = vst [vmem:[#allocation17_spill] sm:$0xff] %v1253_v15  ;;  %v1343_v33 = vld [vmem:[%s1651_s1 + $0x80] sm:$0xf]  ;;  %v1348_v34 = vld [vmem:[%s1651_s1 + $0x80] sm:$0xf0] }
  0x1c   : > { %1671 = vst [vmem:[#allocation18_spill] sm:$0xff] %v1258_v16  ;;  %v1353_v35 = vld [vmem:[%s1651_s1 + $0x88] sm:$0xf]  ;;  %v1358_v36 = vld [vmem:[%s1651_s1 + $0x88] sm:$0xf0] }
  0x1d   : > { %v1363_v37 = vld [vmem:[%s1651_s1 + $0x90] sm:$0xf]  ;;  %v1368_v38 = vld [vmem:[%s1651_s1 + $0x90] sm:$0xf0]  ;;  %v1373_v39 = vld [vmem:[%s1651_s1 + $0x98] sm:$0xf] }
  0x1e   : > { %v1378_v40 = vld [vmem:[%s1651_s1 + $0x98] sm:$0xf0]  ;;  %v1383_v41 = vld [vmem:[%s1651_s1 + $0xa0] sm:$0xf]  ;;  %v1388_v42 = vld [vmem:[%s1651_s1 + $0xa0] sm:$0xf0] }
  0x1f   : > { %1672 = vst [vmem:[#allocation19_spill] sm:$0xff] %v1383_v41  ;;  %v1393_v43 = vld [vmem:[%s1651_s1 + $0xa8] sm:$0xf]  ;;  %v1398_v44 = vld [vmem:[%s1651_s1 + $0xa8] sm:$0xf0] }
  0x20   : > { %1673 = vst [vmem:[#allocation20_spill] sm:$0xff] %v1388_v42  ;;  %v1403_v45 = vld [vmem:[%s1651_s1 + $0xb0] sm:$0xf]  ;;  %v1408_v46 = vld [vmem:[%s1651_s1 + $0xb0] sm:$0xf0] }
  0x21   : > { %v1413_v47 = vld [vmem:[%s1651_s1 + $0xb8] sm:$0xf]  ;;  %v1418_v48 = vld [vmem:[%s1651_s1 + $0xb8] sm:$0xf0]  ;;  %v1423_v49 = vld [vmem:[%s1651_s1 + $0xc0] sm:$0xf] }
  0x22   : > { %1674 = vst [vmem:[#allocation21_spill] sm:$0xff] %v1423_v49  ;;  %v1428_v50 = vld [vmem:[%s1651_s1 + $0xc0] sm:$0xf0]  ;;  %v1433_v51 = vld [vmem:[%s1651_s1 + $0xc8] sm:$0xf] }
  0x23   : > { %1675 = vst [vmem:[#allocation22_spill] sm:$0xff] %v1428_v50  ;;  %v1438_v52 = vld [vmem:[%s1651_s1 + $0xc8] sm:$0xf0]  ;;  %v1443_v53 = vld [vmem:[%s1651_s1 + $0xd0] sm:$0xf] }
  0x24   : > { %v1448_v54 = vld [vmem:[%s1651_s1 + $0xd0] sm:$0xf0]  ;;  %v1453_v55 = vld [vmem:[%s1651_s1 + $0xd8] sm:$0xf]  ;;  %v1458_v56 = vld [vmem:[%s1651_s1 + $0xd8] sm:$0xf0] }
  0x25   : > { %v1463_v57 = vld [vmem:[%s1651_s1 + $0xe0] sm:$0xf]  ;;  %v1468_v58 = vld [vmem:[%s1651_s1 + $0xe0] sm:$0xf0]  ;;  %v1473_v59 = vld [vmem:[%s1651_s1 + $0xe8] sm:$0xf] }
  0x26   : > { %1676 = vst [vmem:[#allocation23_spill] sm:$0xff] %v1463_v57  ;;  %v1478_v60 = vld [vmem:[%s1651_s1 + $0xe8] sm:$0xf0]  ;;  %v1483_v61 = vld [vmem:[%s1651_s1 + $0xf0] sm:$0xf] }
  0x27   : > { %1677 = vst [vmem:[#allocation24_spill] sm:$0xff] %v1468_v58  ;;  %v1488_v62 = vld [vmem:[%s1651_s1 + $0xf0] sm:$0xf0]  ;;  %v1493_v63 = vld [vmem:[%s1651_s1 + $0xf8] sm:$0xf] }
  0x28   : > { %v1498_v0 = vld [vmem:[%s1651_s1 + $0xf8] sm:$0xf0]  ;;  %v1503_v58 = vld [vmem:[%s1651_s1 + $0x100] sm:$0xf]  ;;  %v1508_v57 = vld [vmem:[%s1651_s1 + $0x100] sm:$0xf0] }
  0x29   : > { %1678 = vst [vmem:[#allocation25_spill] sm:$0xff] %v1498_v0  ;;  %v1513_v50 = vld [vmem:[%s1651_s1 + $0x108] sm:$0xf]  ;;  %v1518_v49 = vld [vmem:[%s1651_s1 + $0x108] sm:$0xf0] }
  0x2a   : > { %1679 = vst [vmem:[#allocation26_spill] sm:$0xff] %v1503_v58  ;;  %v1523_v42 = vld [vmem:[%s1651_s1 + $0x110] sm:$0xf]  ;;  %v1528_v58 = vld [vmem:[%s1651_s1 + $0x110] sm:$0xf0] }
  0x2b   : > { %1680 = vst [vmem:[#allocation27_spill] sm:$0xff] %v1508_v57  ;;  %v1533_v57 = vld [vmem:[%s1651_s1 + $0x118] sm:$0xf] }
  0x2c   : > { %1681 = vst [vmem:[#allocation28_spill] sm:$0xff] %v1513_v50  ;;  %v1538_v50 = vld [vmem:[%s1651_s1 + $0x118] sm:$0xf0] }
  0x2d   : > { %1682 = vst [vmem:[#allocation29_spill] sm:$0xff] %v1518_v49 }
  0x2e   : > { %1683 = vst [vmem:[#allocation30_spill] sm:$0xff] %v1523_v42 }
  0x2f   : > { %1684 = vst [vmem:[#allocation31_spill] sm:$0xff] %v1528_v58 }
  0x30   : > { %1685 = vst [vmem:[#allocation32_spill] sm:$0xff] %v1533_v57 }
  0x31   : > { %1686 = vst [vmem:[#allocation33_spill] sm:$0xff] %v1538_v50 }
  0x32 LB: >> { %v1687_v15 = vld [vmem:[#allocation17_spill] sm:$0xff]  ;;  %v1688_v16 = vld [vmem:[#allocation18_spill] sm:$0xff]  ;;  %v944_v42 = vor.u32 %v1298_v24, %v1293_v23  ;;  %v963_v50 = vor.u32 %v1338_v32, %v1333_v31  ;;  %v1691_v13 = vld [vmem:[#allocation15_spill] sm:$0xff]  ;;  %s894_s17 = sshll.u32 %s1125_s14, 1  ;;  %vm338_vm0 = vcmask 523264   ;;  %s732_s18 = scalar_lea.vmem %s1228_s24, %s1125_s14  ;;  %vm739_vm1 = vcmask 516096   ;;  %s1125_s14 = sphi %s1540_s14, %s300_s14  }
  0x33   : >> { %v910_v49 = vor.u32 %v1688_v16, %v1687_v15  ;;  %v1689_v7 = vld [vmem:[#allocation9_spill] sm:$0xff]  ;;  %v1690_v8 = vld [vmem:[#allocation10_spill] sm:$0xff]  ;;  %v1692_v14 = vld [vmem:[#allocation16_spill] sm:$0xff]  ;;  %s1563_s12 = scalar_lea.vmem %s1223_s21, %s894_s17  ;;  %s738_s19 = scalar_lea.vmem %s1248_s6, %s1125_s14 }
  0x34   : >> { %v927_v58 = vor.u32 %v1690_v8, %v1689_v7  ;;  %v906_v57 = vor.u32 %v1692_v14, %v1691_v13  ;;  %v1693_v5 = vld [vmem:[#allocation7_spill] sm:$0xff]  ;;  %v1694_v6 = vld [vmem:[#allocation8_spill] sm:$0xff]  ;;  %432 = vmatpush.bf16.msra.mxu2 %v944_v42  ;;  %477 = vmatpush.bf16.msra.mxu3 %v963_v50  ;;  %v940_v7 = vor.u32 %v1288_v22, %v1283_v21  ;;  %v1695_v11 = vld [vmem:[#allocation13_spill] sm:$0xff]  ;;  %s300_s14 = sadd.s32 1, %s1125_s14  }
  0x35   : >> { %346 = vmatpush.bf16.msra.mxu0 %v910_v49  ;;  %v923_v41 = vor.u32 %v1694_v6, %v1693_v5  ;;  %v959_v8 = vor.u32 %v1328_v30, %v1323_v29  ;;  %v304_v49 = vld [vmem:[%s1563_s12] sm:$0x3]  ;;  %v1696_v12 = vld [vmem:[#allocation14_spill] sm:$0xff]  ;;  %v936_v50 = vor.u32 %v1278_v20, %v1273_v19  ;;  %v955_v5 = vor.u32 %v1318_v28, %v1313_v27  ;;  %v1699_v9 = vld [vmem:[#allocation11_spill] sm:$0xff]  ;;  %p297_p4 = scmp.ge.s32.totalorder %s300_s14, 2  }
  0x36   : >> { %386 = vmatpush.bf16.msra.mxu1 %v927_v58  ;;  %306 = vst [vmem:[#allocation1] ss:$4 sm:$0xff] %v304_v49  ;;  %v902_v58 = vor.u32 %v1696_v12, %v1695_v11  ;;  %v1697_v3 = vld [vmem:[#allocation5_spill] sm:$0xff]  ;;  %v1698_v4 = vld [vmem:[#allocation6_spill] sm:$0xff]  ;;  %v1700_v10 = vld [vmem:[#allocation12_spill] sm:$0xff] }
  0x37   : >> { %v919_v42 = vor.u32 %v1698_v4, %v1697_v3  ;;  %v898_v49 = vor.u32 %v1700_v10, %v1699_v9  ;;  %v1701_v1 = vld [vmem:[#allocation3_spill] sm:$0xff]  ;;  %v1702_v2 = vld [vmem:[#allocation4_spill] sm:$0xff]  ;;  %v1703_v0 = vld [vmem:[#allocation25_spill] sm:$0xff]  ;;  %v977_v9 = vor.u32 %v1368_v38, %v1363_v37 }
  0x38   : >> { %433 = vmatpush.bf16.msra.mxu2 %v940_v7  ;;  %478 = vmatpush.bf16.msra.mxu3 %v959_v8  ;;  %v932_v7 = vor.u32 %v1268_v18, %v1263_v17  ;;  %v981_v8 = vor.u32 %v1378_v40, %v1373_v39  ;;  %v1710_v10 = vld [vmem:[#allocation23_spill] sm:$0xff]  ;;  %v1711_v11 = vld [vmem:[#allocation24_spill] sm:$0xff]  ;;  %v733_v14 = vld [vmem:[%s732_s18] sm:$0x1] }
  0x39   : >> { %347 = vmatpush.bf16.msra.mxu0 %v906_v57  ;;  %v395_v57 = vld [vmem:[%s1563_s12] sm:$0x2]  ;;  %v1718_v15 = vld [vmem:[#allocation2_spill] sm:$0xff] }
  0x3a   : >> { %387 = vmatpush.bf16.msra.mxu1 %v923_v41  ;;  %v915_v41 = vor.u32 %v1702_v2, %v1701_v1  ;;  %v1036_v1 = vor.u32 %v1703_v0, %v1493_v63  ;;  %v983_v0 = vld [vmem:[%s1563_s12 + $0x2] sm:$0x2] }
  0x3c   : >> { %434 = vmatpush.bf16.msra.mxu2 %v936_v50  ;;  %479 = vmatpush.bf16.msra.mxu3 %v955_v5  ;;  %v1018_v5 = vor.u32 %v1458_v56, %v1453_v55  ;;  %v303_v50 = vld [vmem:[%s1563_s12] sm:$0x1] }
  0x3d   : >> { %348 = vmatpush.bf16.msra.mxu0 %v902_v58  ;;  %v307_v3 = vld.sshfl [vmem:[#allocation1] sm:$0xff pattern:$0x73625140]  ;;  %v951_v58 = vor.u32 %v1308_v26, %v1303_v25 }
  0x3e   : >> { %388 = vmatpush.bf16.msra.mxu1 %v919_v42  ;;  %v999_v42 = vor.u32 %v1418_v48, %v1413_v47  ;;  %v308_v4 = vshrl.u32 %v307_v3, 16  ;;  %v310_v6 = vshll.u32 %v307_v3, 16  ;;  %397 = vst [vmem:[#allocation1] ss:$4 sm:$0xff] %v395_v57  ;;  %v947_v3 = vld [vmem:[%s1563_s12 + $0x2] sm:$0x1]  ;;  %v995_v57 = vor.u32 %v1408_v46, %v1403_v45 }
  0x40   : >> { %v312_v2 = vrot.slane %v310_v6, 1  ;;  %435 = vmatpush.bf16.msra.mxu2 %v932_v7  ;;  %480 = vmatpush.bf16.msra.mxu3 %v951_v58  ;;  %v965_v6 = vld [vmem:[%s1563_s12 + $0x2] sm:$0x3]  ;;  %v1032_v7 = vor.u32 %v1488_v62, %v1483_v61 }
  0x41   : >> { %349 = vmatpush.bf16.msra.mxu0 %v898_v49 }
  0x42   : >> { %389 = vmatpush.bf16.msra.mxu1 %v915_v41  ;;  %v313_v49 = vor.u32 %v312_v2, %v308_v4  ;;  %v1014_v41 = vor.u32 %v1448_v54, %v1443_v53  ;;  %v973_v2 = vor.u32 %v1358_v36, %v1353_v35  ;;  %v991_v4 = vor.u32 %v1398_v44, %v1393_v43 }
  0x43   : >> { %964 = vmatmul.msk.bf16.vlgmr.msra.gmra.mxu3 %vm338_vm0, %v947_v3 }
  0x44   : >> { %620 = vmatpush.bf16.msrb.mxu2 %v1018_v5  ;;  %671 = vmatpush.bf16.msrb.mxu3 %v1036_v1  ;;  %v1010_v1 = vor.u32 %v1438_v52, %v1433_v51  ;;  %v1704_v5 = vld [vmem:[#allocation19_spill] sm:$0xff] }
  0x45   : >> { %528 = vmatpush.bf16.msrb.mxu0 %v981_v8  ;;  %928 = vmatmul.msk.bf16.vlgmr.msra.gmra.mxu1 %vm338_vm0, %v303_v50  ;;  %v398_v8 = vld.sshfl [vmem:[#allocation1] sm:$0xff pattern:$0x73625140]  ;;  %v1705_v50 = vld [vmem:[#allocation20_spill] sm:$0xff] }
  0x46   : >> { %575 = vmatpush.bf16.msrb.mxu1 %v999_v42  ;;  %911 = vmatmul.msk.bf16.vlgmr.msra.gmra.mxu0 %vm338_vm0, %v313_v49  ;;  %v400_v58 = vrot.slane %v398_v8, 1  ;;  %489 = vst [vmem:[#allocation1] ss:$4 sm:$0xff] %v965_v6  ;;  %v1028_v42 = vor.u32 %v1478_v60, %v1473_v59  ;;  %v987_v3 = vor.u32 %v1705_v50, %v1704_v5  ;;  %v1707_v49 = vld [vmem:[#allocation22_spill] sm:$0xff]  ;;  %v1708_v6 = vld [vmem:[#allocation32_spill] sm:$0xff]  ;;  %v1709_v8 = vld [vmem:[#allocation33_spill] sm:$0xff] }
  0x47   : >> { %v1713_v5 = vld [vmem:[#allocation31_spill] sm:$0xff] }
  0x48   : >> { %621 = vmatpush.bf16.msrb.mxu2 %v1014_v41  ;;  %672 = vmatpush.bf16.msrb.mxu3 %v1032_v7  ;;  %v1054_v7 = vor.u32 %v1709_v8, %v1708_v6  ;;  %v1715_v6 = vld [vmem:[#allocation29_spill] sm:$0xff] }
  0x49   : >> { %529 = vmatpush.bf16.msrb.mxu0 %v977_v9  ;;  %945 = vmatmul.msk.bf16.vlgmr.msra.gmra.mxu2 %vm338_vm0, %v400_v58  ;;  %v969_v9 = vor.u32 %v1348_v34, %v1343_v33 }
  0x4a   : >> { %576 = vmatpush.bf16.msrb.mxu1 %v995_v57  ;;  %v1706_v57 = vld [vmem:[#allocation21_spill] sm:$0xff] }
  0x4b   : >> { %v1006_v41 = vor.u32 %v1707_v49, %v1706_v57  ;;  %v1714_v49 = vld [vmem:[#allocation28_spill] sm:$0xff] }
  0x4c   : >> { %622 = vmatpush.bf16.msrb.mxu2 %v1010_v1  ;;  %673 = vmatpush.bf16.msrb.mxu3 %v1028_v42  ;;  %v1712_v1 = vld [vmem:[#allocation30_spill] sm:$0xff] }
  0x4d   : >> { %530 = vmatpush.bf16.msrb.mxu0 %v973_v2  ;;  %v1024_v2 = vor.u32 %v1711_v11, %v1710_v10  ;;  %v490_v58 = vld.sshfl [vmem:[#allocation1] sm:$0xff pattern:$0x73625140]  ;;  %v1050_v50 = vor.u32 %v1713_v5, %v1712_v1  ;;  %v1046_v10 = vor.u32 %v1715_v6, %v1714_v49 }
  0x4e   : >> { %577 = vmatpush.bf16.msrb.mxu1 %v991_v4  ;;  %v491_v4 = vshrl.u32 %v490_v58, 16  ;;  %v493_v12 = vshll.u32 %v490_v58, 16  ;;  %540 = vst [vmem:[#allocation1] ss:$4 sm:$0xff] %v983_v0  ;;  %v1020_v11 = vld [vmem:[%s1563_s12 + $0x4] sm:$0x3] }
  0x4f   : >> { %v1716_v0 = vld [vmem:[#allocation26_spill] sm:$0xff] }
  0x50   : >> { %623 = vmatpush.bf16.msrb.mxu2 %v1006_v41  ;;  %674 = vmatpush.bf16.msrb.mxu3 %v1024_v2  ;;  %v495_v57 = vrot.slane %v493_v12, 1  ;;  %v1717_v41 = vld [vmem:[#allocation27_spill] sm:$0xff]  ;;  %v1038_v12 = vld [vmem:[%s1563_s12 + $0x4] sm:$0x2] }
  0x51   : >> { %531 = vmatpush.bf16.msrb.mxu0 %v969_v9 }
  0x52   : >> { %578 = vmatpush.bf16.msrb.mxu1 %v987_v3  ;;  %v496_v42 = vor.u32 %v495_v57, %v491_v4  ;;  %v1002_v3 = vld [vmem:[%s1563_s12 + $0x4] sm:$0x1] }
  0x55   : >> { %718 = vmatpush.bf16.msra.mxu0 %v1054_v7  ;;  %v541_v9 = vld.sshfl [vmem:[#allocation1] sm:$0xff pattern:$0x73625140]  ;;  %v1042_v7 = vor.u32 %v1717_v41, %v1716_v0 }
  0x56   : >> { %982 = vmatmul.msk.bf16.vlgmr.msrb.gmra.mxu0 %vm338_vm0, %v496_v42  ;;  %v543_v8 = vrot.slane %v541_v9, 1  ;;  %632 = vst [vmem:[#allocation1] ss:$4 sm:$0xff] %v1020_v11 }
  0x58   : >> { %1000 = vmatmul.msk.bf16.vlgmr.msrb.gmra.mxu1 %vm338_vm0, %v543_v8 }
  0x59   : >> { %719 = vmatpush.bf16.msra.mxu0 %v1050_v50  ;;  %1019 = vmatmul.msk.bf16.vlgmr.msrb.gmra.mxu2 %vm338_vm0, %v1002_v3 }
  0x5d   : >> { %720 = vmatpush.bf16.msra.mxu0 %v1046_v10  ;;  %v633_v2 = vld.sshfl [vmem:[#allocation1] sm:$0xff pattern:$0x73625140] }
  0x5e   : >> { %v634_v58 = vshrl.u32 %v633_v2, 16  ;;  %v636_v4 = vshll.u32 %v633_v2, 16  ;;  %683 = vst [vmem:[#allocation1] ss:$4 sm:$0xff] %v1038_v12 }
  0x60   : >> { %v638_v1 = vrot.slane %v636_v4, 1 }
  0x61   : >> { %721 = vmatpush.bf16.msra.mxu0 %v1042_v7 }
  0x62   : >> { %v639_v5 = vor.u32 %v638_v1, %v634_v58 }
  0x64   : >> { %1037 = vmatmul.msk.bf16.vlgmr.msrb.gmra.mxu3 %vm338_vm0, %v639_v5 }
  0x65   : >> { %v684_v50 = vld.sshfl [vmem:[#allocation1] sm:$0xff pattern:$0x73625140] }
  0x66   : >> { %v686_v57 = vrot.slane %v684_v50, 1 }
  0x68   : >> { %1055 = vmatmul.msk.bf16.vlgmr.msra.gmra.mxu0 %vm338_vm0, %v686_v57 }
  0xc2   : >> { %v391_v42 = vpop.f32.mrf.mxu1 }
  0xc3   : >> { %v351_v49 = vpop.f32.mrf.mxu0 }
  0xc4   : >> { %v392_v7 = vadd.f32 %v391_v42, %v351_v49  ;;  %v734_v42 = vunpack.c.l.bf16 %v733_v14 }
  0xc6   : >> { %v482_v10 = vpop.f32.mrf.mxu3 }
  0xca   : >> { %v393_v6 = vpop.f32.mrf.mxu1 }
  0xcb   : >> { %v353_v11 = vpop.f32.mrf.mxu0 }
  0xcc   : >> { %v437_v9 = vpop.f32.mrf.mxu2 }
  0xcd   : >> { %v441_v58 = vadd.f32 %v437_v9, %v392_v7 }
  0xce   : >> { %v484_v3 = vpop.f32.mrf.mxu3 }
  0xcf   : >> { %v486_v1 = vadd.f32 %v482_v10, %v441_v58 }
  0xd3   : >> { %v533_v8 = vpop.f32.mrf.mxu0 }
  0xd4   : >> { %v439_v0 = vpop.f32.mrf.mxu2  ;;  %v537_v5 = vadd.f32 %v533_v8, %v486_v1 }
  0xd5   : >> { %v580_v41 = vpop.f32.mrf.mxu1  ;;  %v729_v0 = vperm.slane %v1718_v15, 0 }
  0xd6   : >> { %v584_v57 = vadd.f32 %v580_v41, %v537_v5 }
  0xdb   : >> { %v535_v12 = vpop.f32.mrf.mxu0 }
  0xdc   : >> { %v625_v2 = vpop.f32.mrf.mxu2 }
  0xdd   : >> { %v582_v4 = vpop.f32.mrf.mxu1  ;;  %v629_v13 = vadd.f32 %v625_v2, %v584_v57 }
  0xe4   : >> { %v627_v50 = vpop.f32.mrf.mxu2 }
  0xe5   : >> { %v723_v6 = vpop.f32.mrf.mxu0 }
  0xe7   : >> { %v676_v11 = vpop.f32.mrf.mxu3 }
  0xe8   : >> { %v680_v3 = vadd.f32 %v676_v11, %v629_v13 }
  0xea   : >> { %v727_v16 = vadd.f32 %v723_v6, %v680_v3 }
  0xec   : >> { %v731_v49 = vadd.f32 %v729_v0, %v727_v16 }
  0xed   : >> { %v725_v12 = vpop.f32.mrf.mxu0 }
  0xee   : >> { %v735_v9 = vadd.f32 %v734_v42, %v731_v49 }
  0xef   : >> { %v678_v7 = vpop.f32.mrf.mxu3 }
  0xf0   : >> { %v736_v10 = vmax.f32 %v735_v9, 0.0  ;;  %299 = sbr.rel (!%p297_p4) target bundleno = 50 (0x32), region = 89 }
  0xf2   : >> { %v737_v8 = vpack.c.bf16 %v736_v10, %v736_v10 }
  0xf4   : >> { %740 = vst.msk [vmem:[%s738_s19] sm:$0x1] %vm739_vm1, %v737_v8 }
  0xf5 PF: > { %s14_s15 = sadd.s32 1, %s1121_s15  }
  0xf6   : > { %p11_p5 = scmp.ge.s32.totalorder %s14_s15, 4  }
  0xf8   :  { %13 = sbr.rel (!%p11_p5) target bundleno = 1 (0x1), region = 100 }

// kernel: _lambda_.31
= control target key start
LH: loop header
LB: loop body
LE: loop exit
PB: predicated region body
PF: predicated region fallthrough
CT: control target
= control target key end

     0   :  { %s1085_s12 = smov 0   ;;  %s1576_s0 = inlined_call_operand.vmem [shape: bf16[2,4,4,64], index: 0, kind: input, shape index: {}]   ;;  %s1577_s1 = inlined_call_operand.vmem [shape: bf16[9,64,64], index: 1, kind: input, shape index: {}]   ;;  %s1578_s2 = inlined_call_operand.vmem [shape: f32[1,64], index: 2, kind: input, shape index: {}]   ;;  %s1579_s3 = inlined_call_operand.vmem [shape: bf16[2,2,2,64], index: 3, kind: output, shape index: {}]  }
   0x1 LB: > { %s760_s13 = sadd.s32 4294967295, %s1059_s12   ;;  %p764_p0 = scmp.ge.s32.totalorder %s1059_s12, 1  ;;  %s1059_s12 = sphi %s1085_s12, %s13_s12  }
   0x2   : > { %p137_p1 = scmp.lt.s32.totalorder %s1059_s12, 3 }
   0x4   : > { %p138_p2 = pnand %p764_p0, %p137_p1 }
   0x5   : > { %p160_p3 = scmp.lt.s32.totalorder (!%p138_p2), %s760_s13, 1  ;;  %s1468_s22 = smov (!%p138_p2), 0  }
   0x6   : > { %141 = sbr.rel (%p138_p2) target bundleno = 243 (0xf3), region = 32 }
   0xb   : > { %v1096_v0 = vld [vmem:[%s1578_s2] sm:$0x1]  ;;  %v1106_v2 = vld [vmem:[%s1577_s1] sm:$0xf0]  ;;  %v1111_v3 = vld [vmem:[%s1577_s1 + $0x8] sm:$0xf] }
   0xc   : > { %1580 = vst [vmem:[#allocation2_spill] sm:$0xff] %v1096_v0  ;;  %v1101_v1 = vld [vmem:[%s1577_s1] sm:$0xf]  ;;  %v1116_v4 = vld [vmem:[%s1577_s1 + $0x8] sm:$0xf0]  ;;  %s1647_s13 = smov (!%p160_p3, %s760_s13), 1 }
   0xd   : > { %1581 = vst [vmem:[#allocation3_spill] sm:$0xff] %v1101_v1  ;;  %v1121_v5 = vld [vmem:[%s1577_s1 + $0x10] sm:$0xf]  ;;  %v1126_v6 = vld [vmem:[%s1577_s1 + $0x10] sm:$0xf0]  ;;  %s996_s7 = sshll.u32 %s1647_s13, 3 }
   0xe   : > { %1582 = vst [vmem:[#allocation4_spill] sm:$0xff] %v1106_v2  ;;  %v1131_v7 = vld [vmem:[%s1577_s1 + $0x18] sm:$0xf]  ;;  %v1136_v8 = vld [vmem:[%s1577_s1 + $0x18] sm:$0xf0]  ;;  %s767_s8 = sshll.u32 %s1647_s13, 1  ;;  %s1156_s17 = scalar_lea.vmem %s1576_s0, %s996_s7 }
   0xf   : > { %1583 = vst [vmem:[#allocation5_spill] sm:$0xff] %v1111_v3  ;;  %v1141_v9 = vld [vmem:[%s1577_s1 + $0x20] sm:$0xf]  ;;  %v1146_v10 = vld [vmem:[%s1577_s1 + $0x20] sm:$0xf0]  ;;  %s1161_s20 = scalar_lea.vmem %s1579_s3, %s767_s8 }
  0x10   : > { %1584 = vst [vmem:[#allocation6_spill] sm:$0xff] %v1116_v4  ;;  %v1151_v11 = vld [vmem:[%s1577_s1 + $0x28] sm:$0xf]  ;;  %v1166_v12 = vld [vmem:[%s1577_s1 + $0x28] sm:$0xf0] }
  0x11   : > { %1585 = vst [vmem:[#allocation7_spill] sm:$0xff] %v1121_v5  ;;  %v1171_v13 = vld [vmem:[%s1577_s1 + $0x30] sm:$0xf]  ;;  %v1176_v14 = vld [vmem:[%s1577_s1 + $0x30] sm:$0xf0] }
  0x12   : > { %1586 = vst [vmem:[#allocation8_spill] sm:$0xff] %v1126_v6  ;;  %v1181_v15 = vld [vmem:[%s1577_s1 + $0x38] sm:$0xf]  ;;  %v1186_v16 = vld [vmem:[%s1577_s1 + $0x38] sm:$0xf0] }
  0x13   : > { %1587 = vst [vmem:[#allocation9_spill] sm:$0xff] %v1131_v7  ;;  %v1191_v17 = vld [vmem:[%s1577_s1 + $0x40] sm:$0xf]  ;;  %v1196_v18 = vld [vmem:[%s1577_s1 + $0x40] sm:$0xf0] }
  0x14   : > { %1588 = vst [vmem:[#allocation10_spill] sm:$0xff] %v1136_v8  ;;  %v1201_v19 = vld [vmem:[%s1577_s1 + $0x48] sm:$0xf]  ;;  %v1206_v20 = vld [vmem:[%s1577_s1 + $0x48] sm:$0xf0] }
  0x15   : > { %1589 = vst [vmem:[#allocation11_spill] sm:$0xff] %v1141_v9  ;;  %v1211_v21 = vld [vmem:[%s1577_s1 + $0x50] sm:$0xf]  ;;  %v1216_v22 = vld [vmem:[%s1577_s1 + $0x50] sm:$0xf0] }
  0x16   : > { %1590 = vst [vmem:[#allocation12_spill] sm:$0xff] %v1146_v10  ;;  %v1221_v23 = vld [vmem:[%s1577_s1 + $0x58] sm:$0xf]  ;;  %v1226_v24 = vld [vmem:[%s1577_s1 + $0x58] sm:$0xf0] }
  0x17   : > { %1591 = vst [vmem:[#allocation13_spill] sm:$0xff] %v1151_v11  ;;  %v1231_v25 = vld [vmem:[%s1577_s1 + $0x60] sm:$0xf]  ;;  %v1236_v26 = vld [vmem:[%s1577_s1 + $0x60] sm:$0xf0] }
  0x18   : > { %1592 = vst [vmem:[#allocation14_spill] sm:$0xff] %v1166_v12  ;;  %v1241_v27 = vld [vmem:[%s1577_s1 + $0x68] sm:$0xf]  ;;  %v1246_v28 = vld [vmem:[%s1577_s1 + $0x68] sm:$0xf0] }
  0x19   : > { %1593 = vst [vmem:[#allocation15_spill] sm:$0xff] %v1171_v13  ;;  %v1251_v29 = vld [vmem:[%s1577_s1 + $0x70] sm:$0xf]  ;;  %v1256_v30 = vld [vmem:[%s1577_s1 + $0x70] sm:$0xf0] }
  0x1a   : > { %1594 = vst [vmem:[#allocation16_spill] sm:$0xff] %v1176_v14  ;;  %v1261_v31 = vld [vmem:[%s1577_s1 + $0x78] sm:$0xf]  ;;  %v1266_v32 = vld [vmem:[%s1577_s1 + $0x78] sm:$0xf0] }
  0x1b   : > { %1595 = vst [vmem:[#allocation17_spill] sm:$0xff] %v1181_v15  ;;  %v1271_v33 = vld [vmem:[%s1577_s1 + $0x80] sm:$0xf]  ;;  %v1276_v34 = vld [vmem:[%s1577_s1 + $0x80] sm:$0xf0] }
  0x1c   : > { %1596 = vst [vmem:[#allocation18_spill] sm:$0xff] %v1186_v16  ;;  %v1281_v35 = vld [vmem:[%s1577_s1 + $0x88] sm:$0xf]  ;;  %v1286_v36 = vld [vmem:[%s1577_s1 + $0x88] sm:$0xf0] }
  0x1d   : > { %1597 = vst [vmem:[#allocation19_spill] sm:$0xff] %v1191_v17  ;;  %v1291_v37 = vld [vmem:[%s1577_s1 + $0x90] sm:$0xf]  ;;  %v1296_v38 = vld [vmem:[%s1577_s1 + $0x90] sm:$0xf0] }
  0x1e   : > { %v1301_v39 = vld [vmem:[%s1577_s1 + $0x98] sm:$0xf]  ;;  %v1306_v40 = vld [vmem:[%s1577_s1 + $0x98] sm:$0xf0]  ;;  %v1311_v41 = vld [vmem:[%s1577_s1 + $0xa0] sm:$0xf] }
  0x1f   : > { %1598 = vst [vmem:[#allocation20_spill] sm:$0xff] %v1311_v41  ;;  %v1316_v42 = vld [vmem:[%s1577_s1 + $0xa0] sm:$0xf0]  ;;  %v1321_v43 = vld [vmem:[%s1577_s1 + $0xa8] sm:$0xf] }
  0x20   : > { %1599 = vst [vmem:[#allocation21_spill] sm:$0xff] %v1316_v42  ;;  %v1326_v44 = vld [vmem:[%s1577_s1 + $0xa8] sm:$0xf0]  ;;  %v1331_v45 = vld [vmem:[%s1577_s1 + $0xb0] sm:$0xf] }
  0x21   : > { %v1336_v46 = vld [vmem:[%s1577_s1 + $0xb0] sm:$0xf0]  ;;  %v1341_v47 = vld [vmem:[%s1577_s1 + $0xb8] sm:$0xf]  ;;  %v1346_v48 = vld [vmem:[%s1577_s1 + $0xb8] sm:$0xf0] }
  0x22   : > { %v1351_v49 = vld [vmem:[%s1577_s1 + $0xc0] sm:$0xf]  ;;  %v1356_v50 = vld [vmem:[%s1577_s1 + $0xc0] sm:$0xf0]  ;;  %v1361_v51 = vld [vmem:[%s1577_s1 + $0xc8] sm:$0xf] }
  0x23   : > { %1600 = vst [vmem:[#allocation22_spill] sm:$0xff] %v1351_v49  ;;  %v1366_v52 = vld [vmem:[%s1577_s1 + $0xc8] sm:$0xf0]  ;;  %v1371_v53 = vld [vmem:[%s1577_s1 + $0xd0] sm:$0xf] }
  0x24   : > { %1601 = vst [vmem:[#allocation23_spill] sm:$0xff] %v1356_v50  ;;  %v1376_v54 = vld [vmem:[%s1577_s1 + $0xd0] sm:$0xf0]  ;;  %v1381_v55 = vld [vmem:[%s1577_s1 + $0xd8] sm:$0xf] }
  0x25   : > { %v1386_v56 = vld [vmem:[%s1577_s1 + $0xd8] sm:$0xf0]  ;;  %v1391_v57 = vld [vmem:[%s1577_s1 + $0xe0] sm:$0xf]  ;;  %v1396_v58 = vld [vmem:[%s1577_s1 + $0xe0] sm:$0xf0] }
  0x26   : > { %1602 = vst [vmem:[#allocation24_spill] sm:$0xff] %v1391_v57  ;;  %v1401_v59 = vld [vmem:[%s1577_s1 + $0xe8] sm:$0xf]  ;;  %v1406_v60 = vld [vmem:[%s1577_s1 + $0xe8] sm:$0xf0] }
  0x27   : > { %1603 = vst [vmem:[#allocation25_spill] sm:$0xff] %v1396_v58  ;;  %v1411_v61 = vld [vmem:[%s1577_s1 + $0xf0] sm:$0xf]  ;;  %v1416_v62 = vld [vmem:[%s1577_s1 + $0xf0] sm:$0xf0] }
  0x28   : > { %v1421_v63 = vld [vmem:[%s1577_s1 + $0xf8] sm:$0xf]  ;;  %v1426_v0 = vld [vmem:[%s1577_s1 + $0xf8] sm:$0xf0]  ;;  %v1431_v58 = vld [vmem:[%s1577_s1 + $0x100] sm:$0xf] }
  0x29   : > { %1604 = vst [vmem:[#allocation26_spill] sm:$0xff] %v1426_v0  ;;  %v1436_v57 = vld [vmem:[%s1577_s1 + $0x100] sm:$0xf0]  ;;  %v1441_v50 = vld [vmem:[%s1577_s1 + $0x108] sm:$0xf] }
  0x2a   : > { %1605 = vst [vmem:[#allocation27_spill] sm:$0xff] %v1431_v58  ;;  %v1446_v49 = vld [vmem:[%s1577_s1 + $0x108] sm:$0xf0]  ;;  %v1451_v42 = vld [vmem:[%s1577_s1 + $0x110] sm:$0xf] }
  0x2b   : > { %1606 = vst [vmem:[#allocation28_spill] sm:$0xff] %v1436_v57  ;;  %v1456_v58 = vld [vmem:[%s1577_s1 + $0x110] sm:$0xf0]  ;;  %v1461_v57 = vld [vmem:[%s1577_s1 + $0x118] sm:$0xf] }
  0x2c   : > { %1607 = vst [vmem:[#allocation29_spill] sm:$0xff] %v1441_v50  ;;  %v1466_v50 = vld [vmem:[%s1577_s1 + $0x118] sm:$0xf0] }
  0x2d   : > { %1608 = vst [vmem:[#allocation30_spill] sm:$0xff] %v1446_v49 }
  0x2e   : > { %1609 = vst [vmem:[#allocation31_spill] sm:$0xff] %v1451_v42 }
  0x2f   : > { %1610 = vst [vmem:[#allocation32_spill] sm:$0xff] %v1456_v58 }
  0x30   : > { %1611 = vst [vmem:[#allocation33_spill] sm:$0xff] %v1461_v57 }
  0x31   : > { %1612 = vst [vmem:[#allocation34_spill] sm:$0xff] %v1466_v50 }
  0x32 LB: >> { %v1613_v15 = vld [vmem:[#allocation17_spill] sm:$0xff]  ;;  %v1614_v16 = vld [vmem:[#allocation18_spill] sm:$0xff]  ;;  %v882_v42 = vor.u32 %v1226_v24, %v1221_v23  ;;  %v901_v50 = vor.u32 %v1266_v32, %v1261_v31  ;;  %v1617_v13 = vld [vmem:[#allocation15_spill] sm:$0xff]  ;;  %s832_s23 = sshll.u32 %s1063_s22, 1  ;;  %vm294_vm0 = vcmask 523264   ;;  %s690_s25 = scalar_lea.vmem %s1161_s20, %s1063_s22  ;;  %vm691_vm1 = vcmask 516096   ;;  %s1063_s22 = sphi %s1468_s22, %s256_s22  }
  0x33   : >> { %v848_v49 = vor.u32 %v1614_v16, %v1613_v15  ;;  %v1615_v7 = vld [vmem:[#allocation9_spill] sm:$0xff]  ;;  %v1616_v8 = vld [vmem:[#allocation10_spill] sm:$0xff]  ;;  %v1618_v14 = vld [vmem:[#allocation16_spill] sm:$0xff]  ;;  %s1491_s24 = scalar_lea.vmem %s1156_s17, %s832_s23  ;;  %s256_s22 = sadd.s32 1, %s1063_s22  }
  0x34   : >> { %v865_v58 = vor.u32 %v1616_v8, %v1615_v7  ;;  %v844_v57 = vor.u32 %v1618_v14, %v1617_v13  ;;  %v1619_v5 = vld [vmem:[#allocation7_spill] sm:$0xff]  ;;  %v1620_v6 = vld [vmem:[#allocation8_spill] sm:$0xff]  ;;  %388 = vmatpush.bf16.msra.mxu2 %v882_v42  ;;  %433 = vmatpush.bf16.msra.mxu3 %v901_v50  ;;  %v878_v7 = vor.u32 %v1216_v22, %v1211_v21  ;;  %v1621_v11 = vld [vmem:[#allocation13_spill] sm:$0xff]  ;;  %p253_p4 = scmp.ge.s32.totalorder %s256_s22, 2  }
  0x35   : >> { %302 = vmatpush.bf16.msra.mxu0 %v848_v49  ;;  %v861_v41 = vor.u32 %v1620_v6, %v1619_v5  ;;  %v897_v8 = vor.u32 %v1256_v30, %v1251_v29  ;;  %v260_v49 = vld [vmem:[%s1491_s24] sm:$0x3]  ;;  %v1622_v12 = vld [vmem:[#allocation14_spill] sm:$0xff]  ;;  %v874_v50 = vor.u32 %v1206_v20, %v1201_v19  ;;  %v893_v5 = vor.u32 %v1246_v28, %v1241_v27  ;;  %v1625_v9 = vld [vmem:[#allocation11_spill] sm:$0xff] }
  0x36   : >> { %342 = vmatpush.bf16.msra.mxu1 %v865_v58  ;;  %262 = vst [vmem:[#allocation1] ss:$4 sm:$0xff] %v260_v49  ;;  %v840_v58 = vor.u32 %v1622_v12, %v1621_v11  ;;  %v1623_v3 = vld [vmem:[#allocation5_spill] sm:$0xff]  ;;  %v1624_v4 = vld [vmem:[#allocation6_spill] sm:$0xff]  ;;  %v1626_v10 = vld [vmem:[#allocation12_spill] sm:$0xff] }
  0x37   : >> { %v857_v42 = vor.u32 %v1624_v4, %v1623_v3  ;;  %v836_v49 = vor.u32 %v1626_v10, %v1625_v9  ;;  %v1627_v1 = vld [vmem:[#allocation3_spill] sm:$0xff]  ;;  %v1628_v2 = vld [vmem:[#allocation4_spill] sm:$0xff]  ;;  %v1630_v0 = vld [vmem:[#allocation26_spill] sm:$0xff]  ;;  %v915_v9 = vor.u32 %v1296_v38, %v1291_v37 }
  0x38   : >> { %389 = vmatpush.bf16.msra.mxu2 %v878_v7  ;;  %434 = vmatpush.bf16.msra.mxu3 %v897_v8  ;;  %v1629_v17 = vld [vmem:[#allocation19_spill] sm:$0xff]  ;;  %v919_v8 = vor.u32 %v1306_v40, %v1301_v39  ;;  %v1637_v10 = vld [vmem:[#allocation24_spill] sm:$0xff]  ;;  %v1638_v11 = vld [vmem:[#allocation25_spill] sm:$0xff] }
  0x39   : >> { %303 = vmatpush.bf16.msra.mxu0 %v844_v57  ;;  %v351_v57 = vld [vmem:[%s1491_s24] sm:$0x2]  ;;  %v870_v7 = vor.u32 %v1196_v18, %v1629_v17  ;;  %v1645_v15 = vld [vmem:[#allocation2_spill] sm:$0xff] }
  0x3a   : >> { %343 = vmatpush.bf16.msra.mxu1 %v861_v41  ;;  %v853_v41 = vor.u32 %v1628_v2, %v1627_v1  ;;  %v974_v1 = vor.u32 %v1630_v0, %v1421_v63  ;;  %v921_v0 = vld [vmem:[%s1491_s24 + $0x2] sm:$0x2] }
  0x3c   : >> { %390 = vmatpush.bf16.msra.mxu2 %v874_v50  ;;  %435 = vmatpush.bf16.msra.mxu3 %v893_v5  ;;  %v956_v5 = vor.u32 %v1386_v56, %v1381_v55  ;;  %v259_v50 = vld [vmem:[%s1491_s24] sm:$0x1] }
  0x3d   : >> { %304 = vmatpush.bf16.msra.mxu0 %v840_v58  ;;  %v263_v3 = vld.sshfl [vmem:[#allocation1] sm:$0xff pattern:$0x73625140]  ;;  %v889_v58 = vor.u32 %v1236_v26, %v1231_v25 }
  0x3e   : >> { %344 = vmatpush.bf16.msra.mxu1 %v857_v42  ;;  %v937_v42 = vor.u32 %v1346_v48, %v1341_v47  ;;  %v264_v4 = vshrl.u32 %v263_v3, 16  ;;  %v266_v6 = vshll.u32 %v263_v3, 16  ;;  %353 = vst [vmem:[#allocation1] ss:$4 sm:$0xff] %v351_v57  ;;  %v885_v3 = vld [vmem:[%s1491_s24 + $0x2] sm:$0x1]  ;;  %v933_v57 = vor.u32 %v1336_v46, %v1331_v45 }
  0x40   : >> { %v268_v2 = vrot.slane %v266_v6, 1  ;;  %391 = vmatpush.bf16.msra.mxu2 %v870_v7  ;;  %436 = vmatpush.bf16.msra.mxu3 %v889_v58  ;;  %v903_v6 = vld [vmem:[%s1491_s24 + $0x2] sm:$0x3]  ;;  %v970_v7 = vor.u32 %v1416_v62, %v1411_v61 }
  0x41   : >> { %305 = vmatpush.bf16.msra.mxu0 %v836_v49 }
  0x42   : >> { %345 = vmatpush.bf16.msra.mxu1 %v853_v41  ;;  %v269_v49 = vor.u32 %v268_v2, %v264_v4  ;;  %v952_v41 = vor.u32 %v1376_v54, %v1371_v53  ;;  %v911_v2 = vor.u32 %v1286_v36, %v1281_v35  ;;  %v929_v4 = vor.u32 %v1326_v44, %v1321_v43 }
  0x43   : >> { %902 = vmatmul.msk.bf16.vlgmr.msra.gmra.mxu3 %vm294_vm0, %v885_v3 }
  0x44   : >> { %576 = vmatpush.bf16.msrb.mxu2 %v956_v5  ;;  %627 = vmatpush.bf16.msrb.mxu3 %v974_v1  ;;  %v948_v1 = vor.u32 %v1366_v52, %v1361_v51  ;;  %v1631_v5 = vld [vmem:[#allocation20_spill] sm:$0xff] }
  0x45   : >> { %484 = vmatpush.bf16.msrb.mxu0 %v919_v8  ;;  %866 = vmatmul.msk.bf16.vlgmr.msra.gmra.mxu1 %vm294_vm0, %v259_v50  ;;  %v354_v8 = vld.sshfl [vmem:[#allocation1] sm:$0xff pattern:$0x73625140] }
  0x46   : >> { %531 = vmatpush.bf16.msrb.mxu1 %v937_v42  ;;  %849 = vmatmul.msk.bf16.vlgmr.msra.gmra.mxu0 %vm294_vm0, %v269_v49  ;;  %v356_v58 = vrot.slane %v354_v8, 1  ;;  %445 = vst [vmem:[#allocation1] ss:$4 sm:$0xff] %v903_v6  ;;  %v966_v42 = vor.u32 %v1406_v60, %v1401_v59  ;;  %v1632_v50 = vld [vmem:[#allocation21_spill] sm:$0xff]  ;;  %v1634_v49 = vld [vmem:[#allocation23_spill] sm:$0xff]  ;;  %v1636_v8 = vld [vmem:[#allocation34_spill] sm:$0xff] }
  0x47   : >> { %v925_v3 = vor.u32 %v1632_v50, %v1631_v5  ;;  %v1635_v6 = vld [vmem:[#allocation33_spill] sm:$0xff]  ;;  %v1640_v5 = vld [vmem:[#allocation32_spill] sm:$0xff] }
  0x48   : >> { %577 = vmatpush.bf16.msrb.mxu2 %v952_v41  ;;  %628 = vmatpush.bf16.msrb.mxu3 %v970_v7  ;;  %v992_v7 = vor.u32 %v1636_v8, %v1635_v6  ;;  %v1642_v6 = vld [vmem:[#allocation30_spill] sm:$0xff] }
  0x49   : >> { %485 = vmatpush.bf16.msrb.mxu0 %v915_v9  ;;  %883 = vmatmul.msk.bf16.vlgmr.msra.gmra.mxu2 %vm294_vm0, %v356_v58  ;;  %v907_v9 = vor.u32 %v1276_v34, %v1271_v33 }
  0x4a   : >> { %532 = vmatpush.bf16.msrb.mxu1 %v933_v57  ;;  %v1633_v57 = vld [vmem:[#allocation22_spill] sm:$0xff] }
  0x4b   : >> { %v944_v41 = vor.u32 %v1634_v49, %v1633_v57  ;;  %v1641_v49 = vld [vmem:[#allocation29_spill] sm:$0xff] }
  0x4c   : >> { %578 = vmatpush.bf16.msrb.mxu2 %v948_v1  ;;  %629 = vmatpush.bf16.msrb.mxu3 %v966_v42  ;;  %v1639_v1 = vld [vmem:[#allocation31_spill] sm:$0xff] }
  0x4d   : >> { %486 = vmatpush.bf16.msrb.mxu0 %v911_v2  ;;  %v962_v2 = vor.u32 %v1638_v11, %v1637_v10  ;;  %v446_v58 = vld.sshfl [vmem:[#allocation1] sm:$0xff pattern:$0x73625140]  ;;  %v988_v50 = vor.u32 %v1640_v5, %v1639_v1  ;;  %v984_v10 = vor.u32 %v1642_v6, %v1641_v49 }
  0x4e   : >> { %533 = vmatpush.bf16.msrb.mxu1 %v929_v4  ;;  %v447_v4 = vshrl.u32 %v446_v58, 16  ;;  %v449_v12 = vshll.u32 %v446_v58, 16  ;;  %496 = vst [vmem:[#allocation1] ss:$4 sm:$0xff] %v921_v0  ;;  %v958_v11 = vld [vmem:[%s1491_s24 + $0x4] sm:$0x3] }
  0x4f   : >> { %v1643_v0 = vld [vmem:[#allocation27_spill] sm:$0xff] }
  0x50   : >> { %579 = vmatpush.bf16.msrb.mxu2 %v944_v41  ;;  %630 = vmatpush.bf16.msrb.mxu3 %v962_v2  ;;  %v451_v57 = vrot.slane %v449_v12, 1  ;;  %v1644_v41 = vld [vmem:[#allocation28_spill] sm:$0xff]  ;;  %v976_v12 = vld [vmem:[%s1491_s24 + $0x4] sm:$0x2] }
  0x51   : >> { %487 = vmatpush.bf16.msrb.mxu0 %v907_v9 }
  0x52   : >> { %534 = vmatpush.bf16.msrb.mxu1 %v925_v3  ;;  %v452_v42 = vor.u32 %v451_v57, %v447_v4  ;;  %v940_v3 = vld [vmem:[%s1491_s24 + $0x4] sm:$0x1] }
  0x55   : >> { %674 = vmatpush.bf16.msra.mxu0 %v992_v7  ;;  %v497_v9 = vld.sshfl [vmem:[#allocation1] sm:$0xff pattern:$0x73625140]  ;;  %v980_v7 = vor.u32 %v1644_v41, %v1643_v0 }
  0x56   : >> { %920 = vmatmul.msk.bf16.vlgmr.msrb.gmra.mxu0 %vm294_vm0, %v452_v42  ;;  %v499_v8 = vrot.slane %v497_v9, 1  ;;  %588 = vst [vmem:[#allocation1] ss:$4 sm:$0xff] %v958_v11 }
  0x58   : >> { %938 = vmatmul.msk.bf16.vlgmr.msrb.gmra.mxu1 %vm294_vm0, %v499_v8 }
  0x59   : >> { %675 = vmatpush.bf16.msra.mxu0 %v988_v50  ;;  %957 = vmatmul.msk.bf16.vlgmr.msrb.gmra.mxu2 %vm294_vm0, %v940_v3 }
  0x5d   : >> { %676 = vmatpush.bf16.msra.mxu0 %v984_v10  ;;  %v589_v2 = vld.sshfl [vmem:[#allocation1] sm:$0xff pattern:$0x73625140] }
  0x5e   : >> { %v590_v58 = vshrl.u32 %v589_v2, 16  ;;  %v592_v4 = vshll.u32 %v589_v2, 16  ;;  %639 = vst [vmem:[#allocation1] ss:$4 sm:$0xff] %v976_v12 }
  0x60   : >> { %v594_v1 = vrot.slane %v592_v4, 1 }
  0x61   : >> { %677 = vmatpush.bf16.msra.mxu0 %v980_v7 }
  0x62   : >> { %v595_v5 = vor.u32 %v594_v1, %v590_v58 }
  0x64   : >> { %975 = vmatmul.msk.bf16.vlgmr.msrb.gmra.mxu3 %vm294_vm0, %v595_v5 }
  0x65   : >> { %v640_v50 = vld.sshfl [vmem:[#allocation1] sm:$0xff pattern:$0x73625140] }
  0x66   : >> { %v642_v57 = vrot.slane %v640_v50, 1 }
  0x68   : >> { %993 = vmatmul.msk.bf16.vlgmr.msra.gmra.mxu0 %vm294_vm0, %v642_v57 }
  0xc2   : >> { %v347_v42 = vpop.f32.mrf.mxu1 }
  0xc3   : >> { %v307_v49 = vpop.f32.mrf.mxu0 }
  0xc4   : >> { %v348_v7 = vadd.f32 %v347_v42, %v307_v49 }
  0xc6   : >> { %v438_v10 = vpop.f32.mrf.mxu3 }
  0xca   : >> { %v349_v6 = vpop.f32.mrf.mxu1 }
  0xcb   : >> { %v309_v11 = vpop.f32.mrf.mxu0 }
  0xcc   : >> { %v393_v9 = vpop.f32.mrf.mxu2 }
  0xcd   : >> { %v397_v58 = vadd.f32 %v393_v9, %v348_v7 }
  0xce   : >> { %v440_v3 = vpop.f32.mrf.mxu3 }
  0xcf   : >> { %v442_v1 = vadd.f32 %v438_v10, %v397_v58  ;;  %v685_v3 = vperm.slane %v1645_v15, 0 }
  0xd3   : >> { %v489_v8 = vpop.f32.mrf.mxu0 }
  0xd4   : >> { %v395_v0 = vpop.f32.mrf.mxu2  ;;  %v493_v5 = vadd.f32 %v489_v8, %v442_v1 }
  0xd5   : >> { %v536_v41 = vpop.f32.mrf.mxu1 }
  0xd6   : >> { %v540_v57 = vadd.f32 %v536_v41, %v493_v5 }
  0xdb   : >> { %v491_v12 = vpop.f32.mrf.mxu0 }
  0xdc   : >> { %v581_v2 = vpop.f32.mrf.mxu2 }
  0xdd   : >> { %v538_v4 = vpop.f32.mrf.mxu1  ;;  %v585_v6 = vadd.f32 %v581_v2, %v540_v57 }
  0xe4   : >> { %v583_v50 = vpop.f32.mrf.mxu2 }
  0xe5   : >> { %v679_v13 = vpop.f32.mrf.mxu0 }
  0xe7   : >> { %v632_v14 = vpop.f32.mrf.mxu3 }
  0xe8   : >> { %v636_v11 = vadd.f32 %v632_v14, %v585_v6 }
  0xea   : >> { %v683_v16 = vadd.f32 %v679_v13, %v636_v11 }
  0xec   : >> { %v687_v0 = vadd.f32 %v685_v3, %v683_v16 }
  0xed   : >> { %v681_v17 = vpop.f32.mrf.mxu0 }
  0xee   : >> { %v688_v42 = vmax.f32 %v687_v0, 0.0  ;;  %255 = sbr.rel (!%p253_p4) target bundleno = 50 (0x32), region = 81 }
  0xef   : >> { %v634_v49 = vpop.f32.mrf.mxu3 }
  0xf0   : >> { %v689_v12 = vpack.c.bf16 %v688_v42, %v688_v42 }
  0xf2   : >> { %692 = vst.msk [vmem:[%s690_s25] sm:$0x1] %vm691_vm1, %v689_v12 }
  0xf3 PF: > { %s13_s12 = sadd.s32 1, %s1059_s12  }
  0xf4   : > { %p10_p5 = scmp.ge.s32.totalorder %s13_s12, 4  }
  0xf6   :  { %12 = sbr.rel (!%p10_p5) target bundleno = 1 (0x1), region = 92 }

</bundles_post_ra>
